<compile_context>
chip_gen: v6e
topology: v6e:2x2x1
jax: 0.10.0
libtpu: 0.0.40
codegen_flags: <defaults>
</compile_context>

<pallas_src>
import functools

import jax
import jax.numpy as jnp
from jax.experimental import pallas as pl
from jax.experimental.pallas import tpu as pltpu

EPS = 1e-5  # nn.GroupNorm default

_VMEM_LIMIT_CACHE = None


def _vmem_limit_bytes():
    """Generation-aware scoped-VMEM limit (~3/4 of physical per-core VMEM)."""
    global _VMEM_LIMIT_CACHE
    if _VMEM_LIMIT_CACHE is None:
        cap = 64 * 1024 * 1024                      # conservative default (v7x)
        try:
            info = pltpu.get_tpu_info()
            got = int(getattr(info, "vmem_capacity_bytes", cap))
            if got > 0:
                cap = got
        except Exception:
            pass
        _VMEM_LIMIT_CACHE = int(cap * 3 // 4)       # ~96 MiB v5e/v6e, ~48 MiB v7x
    return _VMEM_LIMIT_CACHE


def _round_up(x, m):
    return ((x + m - 1) // m) * m


# ----------------------------- Pallas kernels ------------------------------ #

def _gn_stats_kernel(x_ref, g_ref, b_ref, gm_ref, scale_ref, shift_ref,
                     s1_ref, s2_ref):
    """Row-tiled GroupNorm statistics for one image.

    Accumulates per-channel sum / sum-of-squares across row tiles; on the last
    tile one (2,C)@(C,C) MXU dot (group-matrix, inv_count folded in) turns them
    into per-group mean / E[x^2], then emits per-channel scale/shift:
        scale = gamma * rsqrt(var + eps),  shift = beta - mean * scale.
    """
    r = pl.program_id(1)

    @pl.when(r == 0)
    def _():
        s1_ref[...] = jnp.zeros_like(s1_ref)
        s2_ref[...] = jnp.zeros_like(s2_ref)

    x = x_ref[0].astype(jnp.float32)                          # (thw, C)
    s1_ref[...] += jnp.sum(x, axis=0, keepdims=True)
    s2_ref[...] += jnp.sum(x * x, axis=0, keepdims=True)

    @pl.when(r == pl.num_programs(1) - 1)
    def _():
        s = jnp.concatenate([s1_ref[...], s2_ref[...]], axis=0)      # (2, C)
        m = jnp.dot(s, gm_ref[...], preferred_element_type=jnp.float32)
        mean, ex2 = m[0:1], m[1:2]
        # NOTE: single-pass E[x^2]-mean^2 variance in f32 (fine at these scales).
        inv = jax.lax.rsqrt(ex2 - mean * mean + EPS)
        g = g_ref[...].astype(jnp.float32)
        b = b_ref[...].astype(jnp.float32)
        scale_ref[0] = (g * inv).astype(scale_ref.dtype)
        shift_ref[0] = (b - mean * g * inv).astype(shift_ref.dtype)


def _conv3x3_kernel(xa_ref, xb_ref, sc_ref, sh_ref, w_ref, b_ref, *rest,
                    th, w_out, res_mode):
    """Fused GroupNorm-affine + SiLU + 3x3 SAME conv (+ fused residual) on one
    th-row slab of one image.

    xa_ref: (1, th, Wp, Cin)  main rows of the zero-padded input
    xb_ref: (1, 2,  Wp, Cin)  2-row bottom halo of the same padded input
    sc/sh : (1, 1, Cin)       per-image GN scale / shift
    w_ref : (9, Cin, Cout)    conv weights, tap-major
    b_ref : (1, Cout)
    rest  : optional residual inputs, then (1, th*W, Cout) output, then the
            (th+2, Wp, Cin) VMEM scratch slab.
    """
    o_ref, slab_ref = rest[-2], rest[-1]
    r = pl.program_id(1)
    cin = xa_ref.shape[-1]
    cout = o_ref.shape[-1]
    wp = xa_ref.shape[2]

    sc = sc_ref[...].astype(jnp.float32)                      # (1, 1, Cin)
    sh = sh_ref[...].astype(jnp.float32)

    def gn_silu(raw):
        y = raw.astype(jnp.float32) * sc + sh
        return y * (0.5 * (jnp.tanh(0.5 * y) + 1.0))          # SiLU, stable sigmoid

    # GN + SiLU prologue written straight into the scratch slab (no concat).
    slab_ref[0:th] = gn_silu(xa_ref[0])
    slab_ref[th:th + 2] = gn_silu(xb_ref[0])

    # Re-zero the conv "SAME" padding: GN+SiLU of a zero-pad element is not 0.
    slab_ref[:, 0:1, :] = jnp.zeros((th + 2, 1, cin), jnp.float32)
    slab_ref[:, w_out + 1:, :] = jnp.zeros((th + 2, wp - (w_out + 1), cin),
                                           jnp.float32)

    @pl.when(r == 0)
    def _():  # top zero-pad row
        slab_ref[0:1] = jnp.zeros((1, wp, cin), jnp.float32)

    @pl.when(r == pl.num_programs(1) - 1)
    def _():  # bottom zero-pad row
        slab_ref[th + 1:th + 2] = jnp.zeros((1, wp, cin), jnp.float32)

    # 3x3 conv as 9 accumulating MXU matmuls (no im2col patch materialized).
    acc = jnp.zeros((th * w_out, cout), jnp.float32)
    for dy in range(3):
        for dx in range(3):
            tap = slab_ref[dy:dy + th, dx:dx + w_out, :].reshape(th * w_out, cin)
            acc = acc + jnp.dot(tap, w_ref[dy * 3 + dx],
                                preferred_element_type=jnp.float32)
    acc = acc + b_ref[...].astype(jnp.float32)                # bias in epilogue

    if res_mode == "identity":                                # fused residual add
        acc = acc + rest[0][0].astype(jnp.float32)
    elif res_mode == "proj":                                  # fused 1x1 projection
        res_ref, rw_ref, rb_ref = rest[0], rest[1], rest[2]
        acc = acc + jnp.dot(res_ref[0].astype(jnp.float32), rw_ref[...],
                            preferred_element_type=jnp.float32)
        acc = acc + rb_ref[...].astype(jnp.float32)

    o_ref[0] = acc.astype(o_ref.dtype)


# ------------------------------ host wrappers ------------------------------ #

def _pick_stats_tile(n, hw, c):
    budget = int(_vmem_limit_bytes() * 0.5)
    cand = [t for t in range(hw, 0, -1)
            if hw % t == 0 and (t % 8 == 0 or t == hw)
            and 2 * t * c * 4 + 8 * c * c <= budget]
    if not cand:
        return hw
    for t in cand:                      # prefer >=2 total grid steps (pipelining /
        if n * (hw // t) >= 2:          # v7x dual TensorCore)
            return t
    return cand[0]


def _pick_th(n, h, w, wp, cin, cout, cres):
    """Conv row-slab height against a generation-aware VMEM budget."""
    budget = int(_vmem_limit_bytes() * 0.8)
    f = 4  # f32

    def vmem_bytes(t):
        xa = 2 * t * wp * cin * f                 # main slab, double-buffered
        halo = 2 * 2 * wp * cin * f               # 2-row halo, double-buffered
        out = 2 * t * w * cout * f                # output, double-buffered
        res = 2 * t * w * cres * f                # fused residual input
        wts = 9 * cin * cout * f                  # single-buffered when large
        if wts < (2 << 20):
            wts *= 2
        slab = (t + 2) * wp * cin * f             # scratch slab
        acc = t * w * cout * f                    # f32 accumulator
        tap = t * w * cin * f                     # one live tap load
        misc = (2 * cout + cres * cout + 2 * cin) * f + (2 << 20)
        return xa + halo + out + res + wts + slab + acc + tap + misc

    cand = [t for t in range(h, 0, -1)
            if h % t == 0 and t % 2 == 0 and (t * w) % 8 == 0
            and vmem_bytes(t) <= budget]
    if not cand:
        return h                                   # full-dim block is always legal
    for t in cand:                                 # largest tile giving >=2 steps
        if n * (h // t) >= 2 and (t * w) % 256 == 0:   # and MXU-filling M (v7x/v6e)
            return t
    for t in cand:
        if n * (h // t) >= 2:
            return t
    return cand[0]


def gn_stats(x_flat, gamma, beta, groups=32):
    """x_flat: (N, H*W, C).  Returns per-image GN (scale, shift), each (N, 1, C)."""
    n, hw, c = x_flat.shape
    assert c % groups == 0
    cg = c // groups
    inv_count = 1.0 / float(hw * cg)
    # (C, C) block-diagonal group matrix with 1/count folded in: (sums @ gm)
    # performs the cross-lane group reduce AND the broadcast back in one dot.
    gmat = (jnp.kron(jnp.eye(groups, dtype=jnp.float32),
                     jnp.ones((cg, cg), jnp.float32)) * inv_count)
    thw = _pick_stats_tile(n, hw, c)

    return pl.pallas_call(
        _gn_stats_kernel,
        grid=(n, hw // thw),
        in_specs=[
            pl.BlockSpec((1, thw, c), lambda i, r: (i, r, 0)),
            pl.BlockSpec((1, c), lambda i, r: (0, 0)),
            pl.BlockSpec((1, c), lambda i, r: (0, 0)),
            pl.BlockSpec((c, c), lambda i, r: (0, 0)),
        ],
        out_specs=(pl.BlockSpec((1, 1, c), lambda i, r: (i, 0, 0)),
                   pl.BlockSpec((1, 1, c), lambda i, r: (i, 0, 0))),
        out_shape=(jax.ShapeDtypeStruct((n, 1, c), jnp.float32),
                   jax.ShapeDtypeStruct((n, 1, c), jnp.float32)),
        scratch_shapes=[pltpu.VMEM((1, c), jnp.float32),
                        pltpu.VMEM((1, c), jnp.float32)],
        compiler_params=pltpu.CompilerParams(
            dimension_semantics=("parallel", "arbitrary"),
            vmem_limit_bytes=_vmem_limit_bytes()),
    )(x_flat, gamma.reshape(1, c), beta.reshape(1, c), gmat)


def conv3x3_gn_silu(x_nhwc, scale, shift, w_hwio, b,
                    residual=None, res_w=None, res_b=None):
    """Fused GN-affine+SiLU -> 3x3 SAME conv (-> fused residual add / 1x1 proj).

    x_nhwc: (N, H, W, Cin) raw (pre-GroupNorm) activations.
    scale/shift: (N, 1, Cin) per-image GN affine from gn_stats.
    Returns (N, H*W, Cout) NHWC-flattened.
    """
    n, h, w, cin = x_nhwc.shape
    cout = w_hwio.shape[-1]
    assert h % 2 == 0, "spatial height must be even"
    wp = _round_up(w + 2, 8)                 # sublane-aligned padded width
    cres = 0 if residual is None else residual.shape[-1]
    th = _pick_th(n, h, w, wp, cin, cout, cres)
    # halo index_map below assumes an even th (block height 2)
    assert h % th == 0 and th % 2 == 0

    xp = jnp.pad(x_nhwc, ((0, 0), (1, 1), (1, wp - (w + 1)), (0, 0)))
    w9 = w_hwio.reshape(9, cin, cout)

    # Single-buffer the grid-invariant conv weights once they are big enough to
    # matter for VMEM (halves their footprint vs. default double-buffering).
    w_bytes = int(w9.size) * w9.dtype.itemsize
    w_spec_kwargs = dict(pipeline_mode=pl.Buffered(1)) if w_bytes >= (2 << 20) else {}

    in_specs = [
        pl.BlockSpec((1, th, wp, cin), lambda i, r: (i, r, 0, 0)),
        # 2-row bottom halo: padded rows [(r+1)*th, (r+1)*th + 2) as 2-row blocks.
        pl.BlockSpec((1, 2, wp, cin), lambda i, r: (i, (r + 1) * (th // 2), 0, 0)),
        pl.BlockSpec((1, 1, cin), lambda i, r: (i, 0, 0)),     # GN scale
        pl.BlockSpec((1, 1, cin), lambda i, r: (i, 0, 0)),     # GN shift
        pl.BlockSpec((9, cin, cout), lambda i, r: (0, 0, 0), **w_spec_kwargs),
        pl.BlockSpec((1, cout), lambda i, r: (0, 0)),
    ]
    args = [xp, xp, scale, shift, w9, b.reshape(1, cout)]

    if residual is None:
        res_mode = "none"
    elif res_w is None:
        res_mode = "identity"
        in_specs.append(pl.BlockSpec((1, th * w, cres), lambda i, r: (i, r, 0)))
        args.append(residual)
    else:
        res_mode = "proj"
        in_specs += [
            pl.BlockSpec((1, th * w, cres), lambda i, r: (i, r, 0)),
            pl.BlockSpec((cres, cout), lambda i, r: (0, 0)),
            pl.BlockSpec((1, cout), lambda i, r: (0, 0)),
        ]
        args += [residual, res_w, res_b.reshape(1, cout)]

    return pl.pallas_call(
        functools.partial(_conv3x3_kernel, th=th, w_out=w, res_mode=res_mode),
        grid=(n, h // th),
        in_specs=in_specs,
        out_specs=pl.BlockSpec((1, th * w, cout), lambda i, r: (i, r, 0)),
        out_shape=jax.ShapeDtypeStruct((n, h * w, cout), x_nhwc.dtype),
        scratch_shapes=[pltpu.VMEM((th + 2, wp, cin), jnp.float32)],
        compiler_params=pltpu.CompilerParams(
            dimension_semantics=("parallel", "parallel"),
            vmem_limit_bytes=_vmem_limit_bytes()),
    )(*args)


def vae_residual_block(x_nchw, params, groups=32):
    """x: NCHW float32 -> NCHW float32 (matches the PyTorch module)."""
    n, cin, h, w = x_nchw.shape
    cout = params["conv1_w"].shape[-1]

    # Single layout change in; kernels run NHWC (channels on the 128-lane axis).
    x_nhwc = jnp.transpose(x_nchw, (0, 2, 3, 1))
    x_flat = x_nhwc.reshape(n, h * w, cin)

    # GN1 stats (tiny) -> conv1 with GN1-affine + SiLU fused into its prologue.
    sc1, sh1 = gn_stats(x_flat, params["gn1_gamma"], params["gn1_beta"], groups)
    hid = conv3x3_gn_silu(x_nhwc, sc1, sh1, params["conv1_w"], params["conv1_b"])

    # GN2 stats on conv1 output -> conv2 with fused GN2+SiLU prologue and the
    # residual add / 1x1 projection fused into its epilogue.
    sc2, sh2 = gn_stats(hid, params["gn2_gamma"], params["gn2_beta"], groups)
    out_flat = conv3x3_gn_silu(hid.reshape(n, h, w, cout), sc2, sh2,
                               params["conv2_w"], params["conv2_b"],
                               residual=x_flat,
                               res_w=params.get("res_w"), res_b=params.get("res_b"))

    # Single layout change out.
    return jnp.transpose(out_flat.reshape(n, h, w, cout), (0, 3, 1, 2))


# --------------------------- pure-JAX reference ---------------------------- #

def _ref_block(x, params, groups=32):
    hp = jax.lax.Precision.HIGHEST

    def gn(v, g, b):
        nn_, c, h_, w_ = v.shape
        vg = v.reshape(nn_, groups, c // groups, h_, w_)
        m = vg.mean(axis=(2, 3, 4), keepdims=True)
        var = jnp.square(vg - m).mean(axis=(2, 3, 4), keepdims=True)
        vn = ((vg - m) / jnp.sqrt(var + EPS)).reshape(nn_, c, h_, w_)
        return vn * g.reshape(1, c, 1, 1) + b.reshape(1, c, 1, 1)

    def silu(v):
        return v * jax.nn.sigmoid(v)

    def conv(v, w_hwio, b):
        y = jax.lax.conv_general_dilated(
            v, w_hwio, (1, 1), "SAME",
            dimension_numbers=("NCHW", "HWIO", "NCHW"), precision=hp)
        return y + b.reshape(1, -1, 1, 1)

    hid = conv(silu(gn(x, params["gn1_gamma"], params["gn1_beta"])),
               params["conv1_w"], params["conv1_b"])
    hid = conv(silu(gn(hid, params["gn2_gamma"], params["gn2_beta"])),
               params["conv2_w"], params["conv2_b"])
    cin, cout = x.shape[1], hid.shape[1]
    if cin == cout:
        res = x
    else:
        res = jnp.einsum("nchw,co->nohw", x, params["res_w"], precision=hp) \
            + params["res_b"].reshape(1, -1, 1, 1)
    return hid + res


# ---------------------------------- main ----------------------------------- #

def _make_params(key, cin, cout):
    ks = jax.random.split(key, 10)
    p = {
        "gn1_gamma": 1.0 + 0.1 * jax.random.normal(ks[0], (cin,), jnp.float32),
        "gn1_beta": 0.1 * jax.random.normal(ks[1], (cin,), jnp.float32),
        "conv1_w": 0.05 * jax.random.normal(ks[2], (3, 3, cin, cout), jnp.float32),
        "conv1_b": 0.05 * jax.random.normal(ks[3], (cout,), jnp.float32),
        "gn2_gamma": 1.0 + 0.1 * jax.random.normal(ks[4], (cout,), jnp.float32),
        "gn2_beta": 0.1 * jax.random.normal(ks[5], (cout,), jnp.float32),
        "conv2_w": 0.05 * jax.random.normal(ks[6], (3, 3, cout, cout), jnp.float32),
        "conv2_b": 0.05 * jax.random.normal(ks[7], (cout,), jnp.float32),
    }
    if cin != cout:
        p["res_w"] = 0.05 * jax.random.normal(ks[8], (cin, cout), jnp.float32)
        p["res_b"] = 0.05 * jax.random.normal(ks[9], (cout,), jnp.float32)
    return p


if __name__ == "__main__":
    key = jax.random.PRNGKey(0)
    k1, k2, kx1, kx2 = jax.random.split(key, 4)
    block = jax.jit(vae_residual_block)

    # Config 1: channel change (32 -> 64) -> fused 1x1 residual projection path.
    N, CIN, COUT, H, W = 2, 32, 64, 16, 16   # GroupNorm(32, .) requires C % 32 == 0
    params = _make_params(k1, CIN, COUT)
    x = jax.random.normal(kx1, (N, CIN, H, W), jnp.float32)
    out = jax.block_until_ready(block(x, params))
    ref = jax.block_until_ready(_ref_block(x, params))
    assert out.shape == (N, COUT, H, W)
    assert jnp.allclose(out, ref, atol=2e-2, rtol=2e-2), \
        f"proj path max abs err = {float(jnp.max(jnp.abs(out - ref)))}"

    # Config 2: cin == cout -> fused identity-residual path.
    params2 = _make_params(k2, 64, 64)
    x2 = jax.random.normal(kx2, (1, 64, 8, 8), jnp.float32)
    out2 = jax.block_until_ready(block(x2, params2))
    ref2 = jax.block_until_ready(_ref_block(x2, params2))
    assert jnp.allclose(out2, ref2, atol=2e-2, rtol=2e-2), \
        f"identity path max abs err = {float(jnp.max(jnp.abs(out2 - ref2)))}"

    print("KERNEL_OK")
</pallas_src>

<mosaic_0001>
module attributes {stable_mosaic.version = 11 : i64} {
  func.func @_gn_stats_kernel(%arg0: i32, %arg1: i32, %arg2: memref<1x256x32xf32, #tpu.memory_space<vmem>>, %arg3: memref<1x32xf32, #tpu.memory_space<vmem>>, %arg4: memref<1x32xf32, #tpu.memory_space<vmem>>, %arg5: memref<32x32xf32, #tpu.memory_space<vmem>>, %arg6: memref<1x1x32xf32, #tpu.memory_space<vmem>>, %arg7: memref<1x1x32xf32, #tpu.memory_space<vmem>>, %arg8: memref<1x32xf32, #tpu.memory_space<vmem>>, %arg9: memref<1x32xf32, #tpu.memory_space<vmem>>) attributes {dimension_semantics = [#tpu.dimension_semantics<parallel>, #tpu.dimension_semantics<arbitrary>], iteration_bounds = array<i64: 2, 1>, scalar_prefetch = 0 : i64, scratch_operands = 2 : i64, tpu.core_type = #tpu.core_type<tc>, window_params = [{transform_indices = @transform_0, window_bounds = array<i64: 1, 256, 32>}, {pipeline_mode = #tpu.pipeline_mode<synchronous>, transform_indices = @transform_1, window_bounds = array<i64: 1, 32>}, {pipeline_mode = #tpu.pipeline_mode<synchronous>, transform_indices = @transform_2, window_bounds = array<i64: 1, 32>}, {pipeline_mode = #tpu.pipeline_mode<synchronous>, transform_indices = @transform_3, window_bounds = array<i64: 32, 32>}, {transform_indices = @transform_4, window_bounds = array<i64: 1, 1, 32>}, {transform_indices = @transform_5, window_bounds = array<i64: 1, 1, 32>}]} {
    %c0_i32 = arith.constant 0 : i32
    %0 = arith.cmpi eq, %arg1, %c0_i32 : i32
    %1 = arith.extui %0 : i1 to i32
    %c0_i32_0 = arith.constant 0 : i32
    %2 = arith.cmpi ne, %1, %c0_i32_0 : i32
    scf.if %2 {
      %cst_14 = arith.constant 0.000000e+00 : f32
      %19 = vector.broadcast %cst_14 : f32 to vector<1x32xf32>
      %c0_15 = arith.constant 0 : index
      %c0_16 = arith.constant 0 : index
      %20 = vector.load %arg8[%c0_15, %c0_16] : memref<1x32xf32, #tpu.memory_space<vmem>>, vector<1x32xf32>
      tpu.vector_store %arg8[%c0_15, %c0_16], %19 {strides = array<i32>} : memref<1x32xf32, #tpu.memory_space<vmem>>, vector<1x32xf32>,
      %cst_17 = arith.constant 0.000000e+00 : f32
      %21 = vector.broadcast %cst_17 : f32 to vector<1x32xf32>
      %c0_18 = arith.constant 0 : index
      %c0_19 = arith.constant 0 : index
      %22 = vector.load %arg9[%c0_18, %c0_19] : memref<1x32xf32, #tpu.memory_space<vmem>>, vector<1x32xf32>
      tpu.vector_store %arg9[%c0_18, %c0_19], %21 {strides = array<i32>} : memref<1x32xf32, #tpu.memory_space<vmem>>, vector<1x32xf32>,
    } else {
    }
    %c0 = arith.constant 0 : index
    %c0_1 = arith.constant 0 : index
    %c0_2 = arith.constant 0 : index
    %3 = vector.load %arg2[%c0, %c0_1, %c0_2] : memref<1x256x32xf32, #tpu.memory_space<vmem>>, vector<1x256x32xf32>
    %4 = vector.shape_cast %3 : vector<1x256x32xf32> to vector<256x32xf32>
    %c0_3 = arith.constant 0 : index
    %c0_4 = arith.constant 0 : index
    %5 = vector.load %arg8[%c0_3, %c0_4] : memref<1x32xf32, #tpu.memory_space<vmem>>, vector<1x32xf32>
    %cst = arith.constant dense<0.000000e+00> : vector<32xf32>
    %6 = vector.multi_reduction <add>, %4, %cst [0] : vector<256x32xf32> to vector<32xf32>
    %7 = vector.shape_cast %6 : vector<32xf32> to vector<1x32xf32>
    %8 = arith.addf %5, %7 : vector<1x32xf32>
    %c0_5 = arith.constant 0 : index
    %c0_6 = arith.constant 0 : index
    %9 = vector.load %arg8[%c0_5, %c0_6] : memref<1x32xf32, #tpu.memory_space<vmem>>, vector<1x32xf32>
    tpu.vector_store %arg8[%c0_5, %c0_6], %8 {strides = array<i32>} : memref<1x32xf32, #tpu.memory_space<vmem>>, vector<1x32xf32>,
    %c0_7 = arith.constant 0 : index
    %c0_8 = arith.constant 0 : index
    %10 = vector.load %arg9[%c0_7, %c0_8] : memref<1x32xf32, #tpu.memory_space<vmem>>, vector<1x32xf32>
    %11 = arith.mulf %4, %4 : vector<256x32xf32>
    %cst_9 = arith.constant dense<0.000000e+00> : vector<32xf32>
    %12 = vector.multi_reduction <add>, %11, %cst_9 [0] : vector<256x32xf32> to vector<32xf32>
    %13 = vector.shape_cast %12 : vector<32xf32> to vector<1x32xf32>
    %14 = arith.addf %10, %13 : vector<1x32xf32>
    %c0_10 = arith.constant 0 : index
    %c0_11 = arith.constant 0 : index
    %15 = vector.load %arg9[%c0_10, %c0_11] : memref<1x32xf32, #tpu.memory_space<vmem>>, vector<1x32xf32>
    tpu.vector_store %arg9[%c0_10, %c0_11], %14 {strides = array<i32>} : memref<1x32xf32, #tpu.memory_space<vmem>>, vector<1x32xf32>,
    %c0_i32_12 = arith.constant 0 : i32
    %16 = arith.cmpi eq, %arg1, %c0_i32_12 : i32
    %17 = arith.extui %16 : i1 to i32
    %c0_i32_13 = arith.constant 0 : i32
    %18 = arith.cmpi ne, %17, %c0_i32_13 : i32
    scf.if %18 {
      %c0_14 = arith.constant 0 : index
      %c0_15 = arith.constant 0 : index
      %19 = vector.load %arg8[%c0_14, %c0_15] : memref<1x32xf32, #tpu.memory_space<vmem>>, vector<1x32xf32>
      %c0_16 = arith.constant 0 : index
      %c0_17 = arith.constant 0 : index
      %20 = vector.load %arg9[%c0_16, %c0_17] : memref<1x32xf32, #tpu.memory_space<vmem>>, vector<1x32xf32>
      %21 = tpu.concatenate %19, %20 in 0 : vector<1x32xf32>, vector<1x32xf32> -> vector<2x32xf32>
      %c0_18 = arith.constant 0 : index
      %c0_19 = arith.constant 0 : index
      %22 = vector.load %arg5[%c0_18, %c0_19] : memref<32x32xf32, #tpu.memory_space<vmem>>, vector<32x32xf32>
      %cst_20 = arith.constant dense<0.000000e+00> : vector<2x32xf32>
      %23 = tpu.matmul %21, %22, %cst_20 {dimension_numbers = #tpu.dot_dimension_numbers<[1], [0], [0], [1], [0, 0, 1, 1], [], []>} : vector<2x32xf32>, vector<32x32xf32>, vector<2x32xf32> -> vector<2x32xf32>
      %24 = vector.extract_strided_slice %23 {offsets = [0, 0], sizes = [1, 32], strides = [1, 1]} : vector<2x32xf32> to vector<1x32xf32>
      %25 = vector.extract_strided_slice %23 {offsets = [1, 0], sizes = [1, 32], strides = [1, 1]} : vector<2x32xf32> to vector<1x32xf32>
      %26 = arith.mulf %24, %24 : vector<1x32xf32>
      %27 = arith.subf %25, %26 : vector<1x32xf32>
      %cst_21 = arith.constant 9.99999974E-6 : f32
      %28 = vector.broadcast %cst_21 : f32 to vector<1x32xf32>
      %29 = arith.addf %27, %28 : vector<1x32xf32>
      %30 = math.rsqrt %29 : vector<1x32xf32>
      %c0_22 = arith.constant 0 : index
      %c0_23 = arith.constant 0 : index
      %31 = vector.load %arg3[%c0_22, %c0_23] : memref<1x32xf32, #tpu.memory_space<vmem>>, vector<1x32xf32>
      %c0_24 = arith.constant 0 : index
      %c0_25 = arith.constant 0 : index
      %32 = vector.load %arg4[%c0_24, %c0_25] : memref<1x32xf32, #tpu.memory_space<vmem>>, vector<1x32xf32>
      %33 = arith.mulf %31, %30 : vector<1x32xf32>
      %c0_26 = arith.constant 0 : index
      %c0_27 = arith.constant 0 : index
      %c0_28 = arith.constant 0 : index
      %34 = vector.load %arg6[%c0_26, %c0_27, %c0_28] : memref<1x1x32xf32, #tpu.memory_space<vmem>>, vector<1x1x32xf32>
      %35 = vector.shape_cast %34 : vector<1x1x32xf32> to vector<1x32xf32>
      %36 = vector.shape_cast %33 : vector<1x32xf32> to vector<1x1x32xf32>
      tpu.vector_store %arg6[%c0_26, %c0_27, %c0_28], %36 {strides = array<i32>} : memref<1x1x32xf32, #tpu.memory_space<vmem>>, vector<1x1x32xf32>,
      %37 = arith.mulf %24, %31 : vector<1x32xf32>
      %38 = arith.mulf %37, %30 : vector<1x32xf32>
      %39 = arith.subf %32, %38 : vector<1x32xf32>
      %c0_29 = arith.constant 0 : index
      %c0_30 = arith.constant 0 : index
      %c0_31 = arith.constant 0 : index
      %40 = vector.load %arg7[%c0_29, %c0_30, %c0_31] : memref<1x1x32xf32, #tpu.memory_space<vmem>>, vector<1x1x32xf32>
      %41 = vector.shape_cast %40 : vector<1x1x32xf32> to vector<1x32xf32>
      %42 = vector.shape_cast %39 : vector<1x32xf32> to vector<1x1x32xf32>
      tpu.vector_store %arg7[%c0_29, %c0_30, %c0_31], %42 {strides = array<i32>} : memref<1x1x32xf32, #tpu.memory_space<vmem>>, vector<1x1x32xf32>,
    } else {
    }
    return
  }
  func.func @transform_0(%arg0: i32, %arg1: i32) -> (i32, i32, i32) {
    %c0_i32 = arith.constant 0 : i32
    %c0_i32_0 = arith.constant 0 : i32
    return %arg0, %arg1, %c0_i32 : i32, i32, i32
  }
  func.func @transform_1(%arg0: i32, %arg1: i32) -> (i32, i32) {
    %c0_i32 = arith.constant 0 : i32
    %c0_i32_0 = arith.constant 0 : i32
    %c0_i32_1 = arith.constant 0 : i32
    return %c0_i32, %c0_i32_0 : i32, i32
  }
  func.func @transform_2(%arg0: i32, %arg1: i32) -> (i32, i32) {
    %c0_i32 = arith.constant 0 : i32
    %c0_i32_0 = arith.constant 0 : i32
    %c0_i32_1 = arith.constant 0 : i32
    return %c0_i32, %c0_i32_0 : i32, i32
  }
  func.func @transform_3(%arg0: i32, %arg1: i32) -> (i32, i32) {
    %c0_i32 = arith.constant 0 : i32
    %c0_i32_0 = arith.constant 0 : i32
    %c0_i32_1 = arith.constant 0 : i32
    return %c0_i32, %c0_i32_0 : i32, i32
  }
  func.func @transform_4(%arg0: i32, %arg1: i32) -> (i32, i32, i32) {
    %c0_i32 = arith.constant 0 : i32
    %c0_i32_0 = arith.constant 0 : i32
    %c0_i32_1 = arith.constant 0 : i32
    return %arg0, %c0_i32, %c0_i32_0 : i32, i32, i32
  }
  func.func @transform_5(%arg0: i32, %arg1: i32) -> (i32, i32, i32) {
    %c0_i32 = arith.constant 0 : i32
    %c0_i32_0 = arith.constant 0 : i32
    %c0_i32_1 = arith.constant 0 : i32
    return %arg0, %c0_i32, %c0_i32_0 : i32, i32, i32
  }
}

module attributes {stable_mosaic.version = 11 : i64} {
  func.func @_conv3x3_kernel(%arg0: i32, %arg1: i32, %arg2: memref<1x16x24x32xf32, #tpu.memory_space<vmem>>, %arg3: memref<1x2x24x32xf32, #tpu.memory_space<vmem>>, %arg4: memref<1x1x32xf32, #tpu.memory_space<vmem>>, %arg5: memref<1x1x32xf32, #tpu.memory_space<vmem>>, %arg6: memref<9x32x64xf32, #tpu.memory_space<vmem>>, %arg7: memref<1x64xf32, #tpu.memory_space<vmem>>, %arg8: memref<1x256x64xf32, #tpu.memory_space<vmem>>, %arg9: memref<18x24x32xf32, #tpu.memory_space<vmem>>) attributes {dimension_semantics = [#tpu.dimension_semantics<parallel>, #tpu.dimension_semantics<parallel>], iteration_bounds = array<i64: 2, 1>, scalar_prefetch = 0 : i64, scratch_operands = 1 : i64, tpu.core_type = #tpu.core_type<tc>, window_params = [{transform_indices = @transform_0, window_bounds = array<i64: 1, 16, 24, 32>}, {transform_indices = @transform_1, window_bounds = array<i64: 1, 2, 24, 32>}, {transform_indices = @transform_2, window_bounds = array<i64: 1, 1, 32>}, {transform_indices = @transform_3, window_bounds = array<i64: 1, 1, 32>}, {pipeline_mode = #tpu.pipeline_mode<synchronous>, transform_indices = @transform_4, window_bounds = array<i64: 9, 32, 64>}, {pipeline_mode = #tpu.pipeline_mode<synchronous>, transform_indices = @transform_5, window_bounds = array<i64: 1, 64>}, {transform_indices = @transform_6, window_bounds = array<i64: 1, 256, 64>}]} {
    %c0 = arith.constant 0 : index
    %c0_0 = arith.constant 0 : index
    %c0_1 = arith.constant 0 : index
    %0 = vector.load %arg4[%c0, %c0_0, %c0_1] : memref<1x1x32xf32, #tpu.memory_space<vmem>>, vector<1x1x32xf32>
    %c0_2 = arith.constant 0 : index
    %c0_3 = arith.constant 0 : index
    %c0_4 = arith.constant 0 : index
    %1 = vector.load %arg5[%c0_2, %c0_3, %c0_4] : memref<1x1x32xf32, #tpu.memory_space<vmem>>, vector<1x1x32xf32>
    %c0_5 = arith.constant 0 : index
    %c0_6 = arith.constant 0 : index
    %c0_7 = arith.constant 0 : index
    %c0_8 = arith.constant 0 : index
    %2 = vector.load %arg2[%c0_5, %c0_6, %c0_7, %c0_8] : memref<1x16x24x32xf32, #tpu.memory_space<vmem>>, vector<1x16x24x32xf32>
    %3 = vector.shape_cast %2 : vector<1x16x24x32xf32> to vector<16x24x32xf32>
    %4 = vector.broadcast %0 : vector<1x1x32xf32> to vector<16x24x32xf32>
    %5 = arith.mulf %3, %4 : vector<16x24x32xf32>
    %6 = vector.broadcast %1 : vector<1x1x32xf32> to vector<16x24x32xf32>
    %7 = arith.addf %5, %6 : vector<16x24x32xf32>
    %cst = arith.constant 5.000000e-01 : f32
    %8 = vector.broadcast %cst : f32 to vector<16x24x32xf32>
    %9 = arith.mulf %8, %7 : vector<16x24x32xf32>
    %10 = math.tanh %9 : vector<16x24x32xf32>
    %cst_9 = arith.constant 1.000000e+00 : f32
    %11 = vector.broadcast %cst_9 : f32 to vector<16x24x32xf32>
    %12 = arith.addf %10, %11 : vector<16x24x32xf32>
    %cst_10 = arith.constant 5.000000e-01 : f32
    %13 = vector.broadcast %cst_10 : f32 to vector<16x24x32xf32>
    %14 = arith.mulf %13, %12 : vector<16x24x32xf32>
    %15 = arith.mulf %7, %14 : vector<16x24x32xf32>
    %c0_11 = arith.constant 0 : index
    %c0_12 = arith.constant 0 : index
    %c0_13 = arith.constant 0 : index
    %16 = vector.load %arg9[%c0_11, %c0_12, %c0_13] : memref<18x24x32xf32, #tpu.memory_space<vmem>>, vector<16x24x32xf32>
    tpu.vector_store %arg9[%c0_11, %c0_12, %c0_13], %15 {strides = array<i32>} : memref<18x24x32xf32, #tpu.memory_space<vmem>>, vector<16x24x32xf32>,
    %c0_14 = arith.constant 0 : index
    %c0_15 = arith.constant 0 : index
    %c0_16 = arith.constant 0 : index
    %c0_17 = arith.constant 0 : index
    %17 = vector.load %arg3[%c0_14, %c0_15, %c0_16, %c0_17] : memref<1x2x24x32xf32, #tpu.memory_space<vmem>>, vector<1x2x24x32xf32>
    %18 = vector.shape_cast %17 : vector<1x2x24x32xf32> to vector<2x24x32xf32>
    %19 = vector.broadcast %0 : vector<1x1x32xf32> to vector<2x24x32xf32>
    %20 = arith.mulf %18, %19 : vector<2x24x32xf32>
    %21 = vector.broadcast %1 : vector<1x1x32xf32> to vector<2x24x32xf32>
    %22 = arith.addf %20, %21 : vector<2x24x32xf32>
    %cst_18 = arith.constant 5.000000e-01 : f32
    %23 = vector.broadcast %cst_18 : f32 to vector<2x24x32xf32>
    %24 = arith.mulf %23, %22 : vector<2x24x32xf32>
    %25 = math.tanh %24 : vector<2x24x32xf32>
    %cst_19 = arith.constant 1.000000e+00 : f32
    %26 = vector.broadcast %cst_19 : f32 to vector<2x24x32xf32>
    %27 = arith.addf %25, %26 : vector<2x24x32xf32>
    %cst_20 = arith.constant 5.000000e-01 : f32
    %28 = vector.broadcast %cst_20 : f32 to vector<2x24x32xf32>
    %29 = arith.mulf %28, %27 : vector<2x24x32xf32>
    %30 = arith.mulf %22, %29 : vector<2x24x32xf32>
    %c16 = arith.constant 16 : index
    %c0_21 = arith.constant 0 : index
    %c0_22 = arith.constant 0 : index
    %31 = vector.load %arg9[%c16, %c0_21, %c0_22] : memref<18x24x32xf32, #tpu.memory_space<vmem>>, vector<2x24x32xf32>
    tpu.vector_store %arg9[%c16, %c0_21, %c0_22], %30 {strides = array<i32>} : memref<18x24x32xf32, #tpu.memory_space<vmem>>, vector<2x24x32xf32>,
    %cst_23 = arith.constant 0.000000e+00 : f32
    %32 = vector.broadcast %cst_23 : f32 to vector<18x1x32xf32>
    %c0_24 = arith.constant 0 : index
    %c0_25 = arith.constant 0 : index
    %c0_26 = arith.constant 0 : index
    %33 = vector.load %arg9[%c0_24, %c0_25, %c0_26] : memref<18x24x32xf32, #tpu.memory_space<vmem>>, vector<18x1x32xf32>
    tpu.vector_store %arg9[%c0_24, %c0_25, %c0_26], %32 {strides = array<i32>} : memref<18x24x32xf32, #tpu.memory_space<vmem>>, vector<18x1x32xf32>,
    %cst_27 = arith.constant 0.000000e+00 : f32
    %34 = vector.broadcast %cst_27 : f32 to vector<18x7x32xf32>
    %c0_28 = arith.constant 0 : index
    %c17 = arith.constant 17 : index
    %c0_29 = arith.constant 0 : index
    %35 = vector.load %arg9[%c0_28, %c17, %c0_29] : memref<18x24x32xf32, #tpu.memory_space<vmem>>, vector<18x7x32xf32>
    tpu.vector_store %arg9[%c0_28, %c17, %c0_29], %34 {strides = array<i32>} : memref<18x24x32xf32, #tpu.memory_space<vmem>>, vector<18x7x32xf32>,
    %c0_i32 = arith.constant 0 : i32
    %36 = arith.cmpi eq, %arg1, %c0_i32 : i32
    %37 = arith.extui %36 : i1 to i32
    %c0_i32_30 = arith.constant 0 : i32
    %38 = arith.cmpi ne, %37, %c0_i32_30 : i32
    scf.if %38 {
      %cst_94 = arith.constant 0.000000e+00 : f32
      %103 = vector.broadcast %cst_94 : f32 to vector<1x24x32xf32>
      %c0_95 = arith.constant 0 : index
      %c0_96 = arith.constant 0 : index
      %c0_97 = arith.constant 0 : index
      %104 = vector.load %arg9[%c0_95, %c0_96, %c0_97] : memref<18x24x32xf32, #tpu.memory_space<vmem>>, vector<1x24x32xf32>
      tpu.vector_store %arg9[%c0_95, %c0_96, %c0_97], %103 {strides = array<i32>} : memref<18x24x32xf32, #tpu.memory_space<vmem>>, vector<1x24x32xf32>,
    } else {
    }
    %c0_i32_31 = arith.constant 0 : i32
    %39 = arith.cmpi eq, %arg1, %c0_i32_31 : i32
    %40 = arith.extui %39 : i1 to i32
    %c0_i32_32 = arith.constant 0 : i32
    %41 = arith.cmpi ne, %40, %c0_i32_32 : i32
    scf.if %41 {
      %cst_94 = arith.constant 0.000000e+00 : f32
      %103 = vector.broadcast %cst_94 : f32 to vector<1x24x32xf32>
      %c17_95 = arith.constant 17 : index
      %c0_96 = arith.constant 0 : index
      %c0_97 = arith.constant 0 : index
      %104 = vector.load %arg9[%c17_95, %c0_96, %c0_97] : memref<18x24x32xf32, #tpu.memory_space<vmem>>, vector<1x24x32xf32>
      tpu.vector_store %arg9[%c17_95, %c0_96, %c0_97], %103 {strides = array<i32>} : memref<18x24x32xf32, #tpu.memory_space<vmem>>, vector<1x24x32xf32>,
    } else {
    }
    %cst_33 = arith.constant 0.000000e+00 : f32
    %42 = vector.broadcast %cst_33 : f32 to vector<256x64xf32>
    %c0_34 = arith.constant 0 : index
    %c0_35 = arith.constant 0 : index
    %c0_36 = arith.constant 0 : index
    %43 = vector.load %arg9[%c0_34, %c0_35, %c0_36] : memref<18x24x32xf32, #tpu.memory_space<vmem>>, vector<16x16x32xf32>
    %44 = vector.shape_cast %43 : vector<16x16x32xf32> to vector<256x32xf32>
    %c0_37 = arith.constant 0 : index
    %c0_38 = arith.constant 0 : index
    %c0_39 = arith.constant 0 : index
    %45 = vector.load %arg6[%c0_37, %c0_38, %c0_39] : memref<9x32x64xf32, #tpu.memory_space<vmem>>, vector<1x32x64xf32>
    %46 = vector.shape_cast %45 : vector<1x32x64xf32> to vector<32x64xf32>
    %cst_40 = arith.constant dense<0.000000e+00> : vector<256x64xf32>
    %47 = tpu.matmul %44, %46, %cst_40 {dimension_numbers = #tpu.dot_dimension_numbers<[1], [0], [0], [1], [0, 0, 1, 1], [], []>} : vector<256x32xf32>, vector<32x64xf32>, vector<256x64xf32> -> vector<256x64xf32>
    %48 = arith.addf %42, %47 : vector<256x64xf32>
    %c0_41 = arith.constant 0 : index
    %c1 = arith.constant 1 : index
    %c0_42 = arith.constant 0 : index
    %49 = vector.load %arg9[%c0_41, %c1, %c0_42] : memref<18x24x32xf32, #tpu.memory_space<vmem>>, vector<16x16x32xf32>
    %50 = vector.shape_cast %49 : vector<16x16x32xf32> to vector<256x32xf32>
    %c1_43 = arith.constant 1 : index
    %c0_44 = arith.constant 0 : index
    %c0_45 = arith.constant 0 : index
    %51 = vector.load %arg6[%c1_43, %c0_44, %c0_45] : memref<9x32x64xf32, #tpu.memory_space<vmem>>, vector<1x32x64xf32>
    %52 = vector.shape_cast %51 : vector<1x32x64xf32> to vector<32x64xf32>
    %cst_46 = arith.constant dense<0.000000e+00> : vector<256x64xf32>
    %53 = tpu.matmul %50, %52, %cst_46 {dimension_numbers = #tpu.dot_dimension_numbers<[1], [0], [0], [1], [0, 0, 1, 1], [], []>} : vector<256x32xf32>, vector<32x64xf32>, vector<256x64xf32> -> vector<256x64xf32>
    %54 = arith.addf %48, %53 : vector<256x64xf32>
    %c0_47 = arith.constant 0 : index
    %c2 = arith.constant 2 : index
    %c0_48 = arith.constant 0 : index
    %55 = vector.load %arg9[%c0_47, %c2, %c0_48] : memref<18x24x32xf32, #tpu.memory_space<vmem>>, vector<16x16x32xf32>
    %56 = vector.shape_cast %55 : vector<16x16x32xf32> to vector<256x32xf32>
    %c2_49 = arith.constant 2 : index
    %c0_50 = arith.constant 0 : index
    %c0_51 = arith.constant 0 : index
    %57 = vector.load %arg6[%c2_49, %c0_50, %c0_51] : memref<9x32x64xf32, #tpu.memory_space<vmem>>, vector<1x32x64xf32>
    %58 = vector.shape_cast %57 : vector<1x32x64xf32> to vector<32x64xf32>
    %cst_52 = arith.constant dense<0.000000e+00> : vector<256x64xf32>
    %59 = tpu.matmul %56, %58, %cst_52 {dimension_numbers = #tpu.dot_dimension_numbers<[1], [0], [0], [1], [0, 0, 1, 1], [], []>} : vector<256x32xf32>, vector<32x64xf32>, vector<256x64xf32> -> vector<256x64xf32>
    %60 = arith.addf %54, %59 : vector<256x64xf32>
    %c1_53 = arith.constant 1 : index
    %c0_54 = arith.constant 0 : index
    %c0_55 = arith.constant 0 : index
    %61 = vector.load %arg9[%c1_53, %c0_54, %c0_55] : memref<18x24x32xf32, #tpu.memory_space<vmem>>, vector<16x16x32xf32>
    %62 = vector.shape_cast %61 : vector<16x16x32xf32> to vector<256x32xf32>
    %c3 = arith.constant 3 : index
    %c0_56 = arith.constant 0 : index
    %c0_57 = arith.constant 0 : index
    %63 = vector.load %arg6[%c3, %c0_56, %c0_57] : memref<9x32x64xf32, #tpu.memory_space<vmem>>, vector<1x32x64xf32>
    %64 = vector.shape_cast %63 : vector<1x32x64xf32> to vector<32x64xf32>
    %cst_58 = arith.constant dense<0.000000e+00> : vector<256x64xf32>
    %65 = tpu.matmul %62, %64, %cst_58 {dimension_numbers = #tpu.dot_dimension_numbers<[1], [0], [0], [1], [0, 0, 1, 1], [], []>} : vector<256x32xf32>, vector<32x64xf32>, vector<256x64xf32> -> vector<256x64xf32>
    %66 = arith.addf %60, %65 : vector<256x64xf32>
    %c1_59 = arith.constant 1 : index
    %c1_60 = arith.constant 1 : index
    %c0_61 = arith.constant 0 : index
    %67 = vector.load %arg9[%c1_59, %c1_60, %c0_61] : memref<18x24x32xf32, #tpu.memory_space<vmem>>, vector<16x16x32xf32>
    %68 = vector.shape_cast %67 : vector<16x16x32xf32> to vector<256x32xf32>
    %c4 = arith.constant 4 : index
    %c0_62 = arith.constant 0 : index
    %c0_63 = arith.constant 0 : index
    %69 = vector.load %arg6[%c4, %c0_62, %c0_63] : memref<9x32x64xf32, #tpu.memory_space<vmem>>, vector<1x32x64xf32>
    %70 = vector.shape_cast %69 : vector<1x32x64xf32> to vector<32x64xf32>
    %cst_64 = arith.constant dense<0.000000e+00> : vector<256x64xf32>
    %71 = tpu.matmul %68, %70, %cst_64 {dimension_numbers = #tpu.dot_dimension_numbers<[1], [0], [0], [1], [0, 0, 1, 1], [], []>} : vector<256x32xf32>, vector<32x64xf32>, vector<256x64xf32> -> vector<256x64xf32>
    %72 = arith.addf %66, %71 : vector<256x64xf32>
    %c1_65 = arith.constant 1 : index
    %c2_66 = arith.constant 2 : index
    %c0_67 = arith.constant 0 : index
    %73 = vector.load %arg9[%c1_65, %c2_66, %c0_67] : memref<18x24x32xf32, #tpu.memory_space<vmem>>, vector<16x16x32xf32>
    %74 = vector.shape_cast %73 : vector<16x16x32xf32> to vector<256x32xf32>
    %c5 = arith.constant 5 : index
    %c0_68 = arith.constant 0 : index
    %c0_69 = arith.constant 0 : index
    %75 = vector.load %arg6[%c5, %c0_68, %c0_69] : memref<9x32x64xf32, #tpu.memory_space<vmem>>, vector<1x32x64xf32>
    %76 = vector.shape_cast %75 : vector<1x32x64xf32> to vector<32x64xf32>
    %cst_70 = arith.constant dense<0.000000e+00> : vector<256x64xf32>
    %77 = tpu.matmul %74, %76, %cst_70 {dimension_numbers = #tpu.dot_dimension_numbers<[1], [0], [0], [1], [0, 0, 1, 1], [], []>} : vector<256x32xf32>, vector<32x64xf32>, vector<256x64xf32> -> vector<256x64xf32>
    %78 = arith.addf %72, %77 : vector<256x64xf32>
    %c2_71 = arith.constant 2 : index
    %c0_72 = arith.constant 0 : index
    %c0_73 = arith.constant 0 : index
    %79 = vector.load %arg9[%c2_71, %c0_72, %c0_73] : memref<18x24x32xf32, #tpu.memory_space<vmem>>, vector<16x16x32xf32>
    %80 = vector.shape_cast %79 : vector<16x16x32xf32> to vector<256x32xf32>
    %c6 = arith.constant 6 : index
    %c0_74 = arith.constant 0 : index
    %c0_75 = arith.constant 0 : index
    %81 = vector.load %arg6[%c6, %c0_74, %c0_75] : memref<9x32x64xf32, #tpu.memory_space<vmem>>, vector<1x32x64xf32>
    %82 = vector.shape_cast %81 : vector<1x32x64xf32> to vector<32x64xf32>
    %cst_76 = arith.constant dense<0.000000e+00> : vector<256x64xf32>
    %83 = tpu.matmul %80, %82, %cst_76 {dimension_numbers = #tpu.dot_dimension_numbers<[1], [0], [0], [1], [0, 0, 1, 1], [], []>} : vector<256x32xf32>, vector<32x64xf32>, vector<256x64xf32> -> vector<256x64xf32>
    %84 = arith.addf %78, %83 : vector<256x64xf32>
    %c2_77 = arith.constant 2 : index
    %c1_78 = arith.constant 1 : index
    %c0_79 = arith.constant 0 : index
    %85 = vector.load %arg9[%c2_77, %c1_78, %c0_79] : memref<18x24x32xf32, #tpu.memory_space<vmem>>, vector<16x16x32xf32>
    %86 = vector.shape_cast %85 : vector<16x16x32xf32> to vector<256x32xf32>
    %c7 = arith.constant 7 : index
    %c0_80 = arith.constant 0 : index
    %c0_81 = arith.constant 0 : index
    %87 = vector.load %arg6[%c7, %c0_80, %c0_81] : memref<9x32x64xf32, #tpu.memory_space<vmem>>, vector<1x32x64xf32>
    %88 = vector.shape_cast %87 : vector<1x32x64xf32> to vector<32x64xf32>
    %cst_82 = arith.constant dense<0.000000e+00> : vector<256x64xf32>
    %89 = tpu.matmul %86, %88, %cst_82 {dimension_numbers = #tpu.dot_dimension_numbers<[1], [0], [0], [1], [0, 0, 1, 1], [], []>} : vector<256x32xf32>, vector<32x64xf32>, vector<256x64xf32> -> vector<256x64xf32>
    %90 = arith.addf %84, %89 : vector<256x64xf32>
    %c2_83 = arith.constant 2 : index
    %c2_84 = arith.constant 2 : index
    %c0_85 = arith.constant 0 : index
    %91 = vector.load %arg9[%c2_83, %c2_84, %c0_85] : memref<18x24x32xf32, #tpu.memory_space<vmem>>, vector<16x16x32xf32>
    %92 = vector.shape_cast %91 : vector<16x16x32xf32> to vector<256x32xf32>
    %c8 = arith.constant 8 : index
    %c0_86 = arith.constant 0 : index
    %c0_87 = arith.constant 0 : index
    %93 = vector.load %arg6[%c8, %c0_86, %c0_87] : memref<9x32x64xf32, #tpu.memory_space<vmem>>, vector<1x32x64xf32>
    %94 = vector.shape_cast %93 : vector<1x32x64xf32> to vector<32x64xf32>
    %cst_88 = arith.constant dense<0.000000e+00> : vector<256x64xf32>
    %95 = tpu.matmul %92, %94, %cst_88 {dimension_numbers = #tpu.dot_dimension_numbers<[1], [0], [0], [1], [0, 0, 1, 1], [], []>} : vector<256x32xf32>, vector<32x64xf32>, vector<256x64xf32> -> vector<256x64xf32>
    %96 = arith.addf %90, %95 : vector<256x64xf32>
    %c0_89 = arith.constant 0 : index
    %c0_90 = arith.constant 0 : index
    %97 = vector.load %arg7[%c0_89, %c0_90] : memref<1x64xf32, #tpu.memory_space<vmem>>, vector<1x64xf32>
    %98 = vector.broadcast %97 : vector<1x64xf32> to vector<256x64xf32>
    %99 = arith.addf %96, %98 : vector<256x64xf32>
    %c0_91 = arith.constant 0 : index
    %c0_92 = arith.constant 0 : index
    %c0_93 = arith.constant 0 : index
    %100 = vector.load %arg8[%c0_91, %c0_92, %c0_93] : memref<1x256x64xf32, #tpu.memory_space<vmem>>, vector<1x256x64xf32>
    %101 = vector.shape_cast %100 : vector<1x256x64xf32> to vector<256x64xf32>
    %102 = vector.shape_cast %99 : vector<256x64xf32> to vector<1x256x64xf32>
    tpu.vector_store %arg8[%c0_91, %c0_92, %c0_93], %102 {strides = array<i32>} : memref<1x256x64xf32, #tpu.memory_space<vmem>>, vector<1x256x64xf32>,
    return
  }
  func.func @transform_0(%arg0: i32, %arg1: i32) -> (i32, i32, i32, i32) {
    %c0_i32 = arith.constant 0 : i32
    %c0_i32_0 = arith.constant 0 : i32
    %c0_i32_1 = arith.constant 0 : i32
    return %arg0, %arg1, %c0_i32, %c0_i32_0 : i32, i32, i32, i32
  }
  func.func @transform_1(%arg0: i32, %arg1: i32) -> (i32, i32, i32, i32) {
    %c1_i32 = arith.constant 1 : i32
    %0 = arith.addi %arg1, %c1_i32 : i32
    %c8_i32 = arith.constant 8 : i32
    %1 = arith.muli %0, %c8_i32 : i32
    %c0_i32 = arith.constant 0 : i32
    %c0_i32_0 = arith.constant 0 : i32
    %c0_i32_1 = arith.constant 0 : i32
    return %arg0, %1, %c0_i32, %c0_i32_0 : i32, i32, i32, i32
  }
  func.func @transform_2(%arg0: i32, %arg1: i32) -> (i32, i32, i32) {
    %c0_i32 = arith.constant 0 : i32
    %c0_i32_0 = arith.constant 0 : i32
    %c0_i32_1 = arith.constant 0 : i32
    return %arg0, %c0_i32, %c0_i32_0 : i32, i32, i32
  }
  func.func @transform_3(%arg0: i32, %arg1: i32) -> (i32, i32, i32) {
    %c0_i32 = arith.constant 0 : i32
    %c0_i32_0 = arith.constant 0 : i32
    %c0_i32_1 = arith.constant 0 : i32
    return %arg0, %c0_i32, %c0_i32_0 : i32, i32, i32
  }
  func.func @transform_4(%arg0: i32, %arg1: i32) -> (i32, i32, i32) {
    %c0_i32 = arith.constant 0 : i32
    %c0_i32_0 = arith.constant 0 : i32
    %c0_i32_1 = arith.constant 0 : i32
    %c0_i32_2 = arith.constant 0 : i32
    return %c0_i32, %c0_i32_0, %c0_i32_1 : i32, i32, i32
  }
  func.func @transform_5(%arg0: i32, %arg1: i32) -> (i32, i32) {
    %c0_i32 = arith.constant 0 : i32
    %c0_i32_0 = arith.constant 0 : i32
    %c0_i32_1 = arith.constant 0 : i32
    return %c0_i32, %c0_i32_0 : i32, i32
  }
  func.func @transform_6(%arg0: i32, %arg1: i32) -> (i32, i32, i32) {
    %c0_i32 = arith.constant 0 : i32
    %c0_i32_0 = arith.constant 0 : i32
    return %arg0, %arg1, %c0_i32 : i32, i32, i32
  }
}

module attributes {stable_mosaic.version = 11 : i64} {
  func.func @_gn_stats_kernel(%arg0: i32, %arg1: i32, %arg2: memref<1x256x64xf32, #tpu.memory_space<vmem>>, %arg3: memref<1x64xf32, #tpu.memory_space<vmem>>, %arg4: memref<1x64xf32, #tpu.memory_space<vmem>>, %arg5: memref<64x64xf32, #tpu.memory_space<vmem>>, %arg6: memref<1x1x64xf32, #tpu.memory_space<vmem>>, %arg7: memref<1x1x64xf32, #tpu.memory_space<vmem>>, %arg8: memref<1x64xf32, #tpu.memory_space<vmem>>, %arg9: memref<1x64xf32, #tpu.memory_space<vmem>>) attributes {dimension_semantics = [#tpu.dimension_semantics<parallel>, #tpu.dimension_semantics<arbitrary>], iteration_bounds = array<i64: 2, 1>, scalar_prefetch = 0 : i64, scratch_operands = 2 : i64, tpu.core_type = #tpu.core_type<tc>, window_params = [{transform_indices = @transform_0, window_bounds = array<i64: 1, 256, 64>}, {pipeline_mode = #tpu.pipeline_mode<synchronous>, transform_indices = @transform_1, window_bounds = array<i64: 1, 64>}, {pipeline_mode = #tpu.pipeline_mode<synchronous>, transform_indices = @transform_2, window_bounds = array<i64: 1, 64>}, {pipeline_mode = #tpu.pipeline_mode<synchronous>, transform_indices = @transform_3, window_bounds = array<i64: 64, 64>}, {transform_indices = @transform_4, window_bounds = array<i64: 1, 1, 64>}, {transform_indices = @transform_5, window_bounds = array<i64: 1, 1, 64>}]} {
    %c0_i32 = arith.constant 0 : i32
    %0 = arith.cmpi eq, %arg1, %c0_i32 : i32
    %1 = arith.extui %0 : i1 to i32
    %c0_i32_0 = arith.constant 0 : i32
    %2 = arith.cmpi ne, %1, %c0_i32_0 : i32
    scf.if %2 {
      %cst_14 = arith.constant 0.000000e+00 : f32
      %19 = vector.broadcast %cst_14 : f32 to vector<1x64xf32>
      %c0_15 = arith.constant 0 : index
      %c0_16 = arith.constant 0 : index
      %20 = vector.load %arg8[%c0_15, %c0_16] : memref<1x64xf32, #tpu.memory_space<vmem>>, vector<1x64xf32>
      tpu.vector_store %arg8[%c0_15, %c0_16], %19 {strides = array<i32>} : memref<1x64xf32, #tpu.memory_space<vmem>>, vector<1x64xf32>,
      %cst_17 = arith.constant 0.000000e+00 : f32
      %21 = vector.broadcast %cst_17 : f32 to vector<1x64xf32>
      %c0_18 = arith.constant 0 : index
      %c0_19 = arith.constant 0 : index
      %22 = vector.load %arg9[%c0_18, %c0_19] : memref<1x64xf32, #tpu.memory_space<vmem>>, vector<1x64xf32>
      tpu.vector_store %arg9[%c0_18, %c0_19], %21 {strides = array<i32>} : memref<1x64xf32, #tpu.memory_space<vmem>>, vector<1x64xf32>,
    } else {
    }
    %c0 = arith.constant 0 : index
    %c0_1 = arith.constant 0 : index
    %c0_2 = arith.constant 0 : index
    %3 = vector.load %arg2[%c0, %c0_1, %c0_2] : memref<1x256x64xf32, #tpu.memory_space<vmem>>, vector<1x256x64xf32>
    %4 = vector.shape_cast %3 : vector<1x256x64xf32> to vector<256x64xf32>
    %c0_3 = arith.constant 0 : index
    %c0_4 = arith.constant 0 : index
    %5 = vector.load %arg8[%c0_3, %c0_4] : memref<1x64xf32, #tpu.memory_space<vmem>>, vector<1x64xf32>
    %cst = arith.constant dense<0.000000e+00> : vector<64xf32>
    %6 = vector.multi_reduction <add>, %4, %cst [0] : vector<256x64xf32> to vector<64xf32>
    %7 = vector.shape_cast %6 : vector<64xf32> to vector<1x64xf32>
    %8 = arith.addf %5, %7 : vector<1x64xf32>
    %c0_5 = arith.constant 0 : index
    %c0_6 = arith.constant 0 : index
    %9 = vector.load %arg8[%c0_5, %c0_6] : memref<1x64xf32, #tpu.memory_space<vmem>>, vector<1x64xf32>
    tpu.vector_store %arg8[%c0_5, %c0_6], %8 {strides = array<i32>} : memref<1x64xf32, #tpu.memory_space<vmem>>, vector<1x64xf32>,
    %c0_7 = arith.constant 0 : index
    %c0_8 = arith.constant 0 : index
    %10 = vector.load %arg9[%c0_7, %c0_8] : memref<1x64xf32, #tpu.memory_space<vmem>>, vector<1x64xf32>
    %11 = arith.mulf %4, %4 : vector<256x64xf32>
    %cst_9 = arith.constant dense<0.000000e+00> : vector<64xf32>
    %12 = vector.multi_reduction <add>, %11, %cst_9 [0] : vector<256x64xf32> to vector<64xf32>
    %13 = vector.shape_cast %12 : vector<64xf32> to vector<1x64xf32>
    %14 = arith.addf %10, %13 : vector<1x64xf32>
    %c0_10 = arith.constant 0 : index
    %c0_11 = arith.constant 0 : index
    %15 = vector.load %arg9[%c0_10, %c0_11] : memref<1x64xf32, #tpu.memory_space<vmem>>, vector<1x64xf32>
    tpu.vector_store %arg9[%c0_10, %c0_11], %14 {strides = array<i32>} : memref<1x64xf32, #tpu.memory_space<vmem>>, vector<1x64xf32>,
    %c0_i32_12 = arith.constant 0 : i32
    %16 = arith.cmpi eq, %arg1, %c0_i32_12 : i32
    %17 = arith.extui %16 : i1 to i32
    %c0_i32_13 = arith.constant 0 : i32
    %18 = arith.cmpi ne, %17, %c0_i32_13 : i32
    scf.if %18 {
      %c0_14 = arith.constant 0 : index
      %c0_15 = arith.constant 0 : index
      %19 = vector.load %arg8[%c0_14, %c0_15] : memref<1x64xf32, #tpu.memory_space<vmem>>, vector<1x64xf32>
      %c0_16 = arith.constant 0 : index
      %c0_17 = arith.constant 0 : index
      %20 = vector.load %arg9[%c0_16, %c0_17] : memref<1x64xf32, #tpu.memory_space<vmem>>, vector<1x64xf32>
      %21 = tpu.concatenate %19, %20 in 0 : vector<1x64xf32>, vector<1x64xf32> -> vector<2x64xf32>
      %c0_18 = arith.constant 0 : index
      %c0_19 = arith.constant 0 : index
      %22 = vector.load %arg5[%c0_18, %c0_19] : memref<64x64xf32, #tpu.memory_space<vmem>>, vector<64x64xf32>
      %cst_20 = arith.constant dense<0.000000e+00> : vector<2x64xf32>
      %23 = tpu.matmul %21, %22, %cst_20 {dimension_numbers = #tpu.dot_dimension_numbers<[1], [0], [0], [1], [0, 0, 1, 1], [], []>} : vector<2x64xf32>, vector<64x64xf32>, vector<2x64xf32> -> vector<2x64xf32>
      %24 = vector.extract_strided_slice %23 {offsets = [0, 0], sizes = [1, 64], strides = [1, 1]} : vector<2x64xf32> to vector<1x64xf32>
      %25 = vector.extract_strided_slice %23 {offsets = [1, 0], sizes = [1, 64], strides = [1, 1]} : vector<2x64xf32> to vector<1x64xf32>
      %26 = arith.mulf %24, %24 : vector<1x64xf32>
      %27 = arith.subf %25, %26 : vector<1x64xf32>
      %cst_21 = arith.constant 9.99999974E-6 : f32
      %28 = vector.broadcast %cst_21 : f32 to vector<1x64xf32>
      %29 = arith.addf %27, %28 : vector<1x64xf32>
      %30 = math.rsqrt %29 : vector<1x64xf32>
      %c0_22 = arith.constant 0 : index
      %c0_23 = arith.constant 0 : index
      %31 = vector.load %arg3[%c0_22, %c0_23] : memref<1x64xf32, #tpu.memory_space<vmem>>, vector<1x64xf32>
      %c0_24 = arith.constant 0 : index
      %c0_25 = arith.constant 0 : index
      %32 = vector.load %arg4[%c0_24, %c0_25] : memref<1x64xf32, #tpu.memory_space<vmem>>, vector<1x64xf32>
      %33 = arith.mulf %31, %30 : vector<1x64xf32>
      %c0_26 = arith.constant 0 : index
      %c0_27 = arith.constant 0 : index
      %c0_28 = arith.constant 0 : index
      %34 = vector.load %arg6[%c0_26, %c0_27, %c0_28] : memref<1x1x64xf32, #tpu.memory_space<vmem>>, vector<1x1x64xf32>
      %35 = vector.shape_cast %34 : vector<1x1x64xf32> to vector<1x64xf32>
      %36 = vector.shape_cast %33 : vector<1x64xf32> to vector<1x1x64xf32>
      tpu.vector_store %arg6[%c0_26, %c0_27, %c0_28], %36 {strides = array<i32>} : memref<1x1x64xf32, #tpu.memory_space<vmem>>, vector<1x1x64xf32>,
      %37 = arith.mulf %24, %31 : vector<1x64xf32>
      %38 = arith.mulf %37, %30 : vector<1x64xf32>
      %39 = arith.subf %32, %38 : vector<1x64xf32>
      %c0_29 = arith.constant 0 : index
      %c0_30 = arith.constant 0 : index
      %c0_31 = arith.constant 0 : index
      %40 = vector.load %arg7[%c0_29, %c0_30, %c0_31] : memref<1x1x64xf32, #tpu.memory_space<vmem>>, vector<1x1x64xf32>
      %41 = vector.shape_cast %40 : vector<1x1x64xf32> to vector<1x64xf32>
      %42 = vector.shape_cast %39 : vector<1x64xf32> to vector<1x1x64xf32>
      tpu.vector_store %arg7[%c0_29, %c0_30, %c0_31], %42 {strides = array<i32>} : memref<1x1x64xf32, #tpu.memory_space<vmem>>, vector<1x1x64xf32>,
    } else {
    }
    return
  }
  func.func @transform_0(%arg0: i32, %arg1: i32) -> (i32, i32, i32) {
    %c0_i32 = arith.constant 0 : i32
    %c0_i32_0 = arith.constant 0 : i32
    return %arg0, %arg1, %c0_i32 : i32, i32, i32
  }
  func.func @transform_1(%arg0: i32, %arg1: i32) -> (i32, i32) {
    %c0_i32 = arith.constant 0 : i32
    %c0_i32_0 = arith.constant 0 : i32
    %c0_i32_1 = arith.constant 0 : i32
    return %c0_i32, %c0_i32_0 : i32, i32
  }
  func.func @transform_2(%arg0: i32, %arg1: i32) -> (i32, i32) {
    %c0_i32 = arith.constant 0 : i32
    %c0_i32_0 = arith.constant 0 : i32
    %c0_i32_1 = arith.constant 0 : i32
    return %c0_i32, %c0_i32_0 : i32, i32
  }
  func.func @transform_3(%arg0: i32, %arg1: i32) -> (i32, i32) {
    %c0_i32 = arith.constant 0 : i32
    %c0_i32_0 = arith.constant 0 : i32
    %c0_i32_1 = arith.constant 0 : i32
    return %c0_i32, %c0_i32_0 : i32, i32
  }
  func.func @transform_4(%arg0: i32, %arg1: i32) -> (i32, i32, i32) {
    %c0_i32 = arith.constant 0 : i32
    %c0_i32_0 = arith.constant 0 : i32
    %c0_i32_1 = arith.constant 0 : i32
    return %arg0, %c0_i32, %c0_i32_0 : i32, i32, i32
  }
  func.func @transform_5(%arg0: i32, %arg1: i32) -> (i32, i32, i32) {
    %c0_i32 = arith.constant 0 : i32
    %c0_i32_0 = arith.constant 0 : i32
    %c0_i32_1 = arith.constant 0 : i32
    return %arg0, %c0_i32, %c0_i32_0 : i32, i32, i32
  }
}

module attributes {stable_mosaic.version = 11 : i64} {
  func.func @_conv3x3_kernel(%arg0: i32, %arg1: i32, %arg2: memref<1x16x24x64xf32, #tpu.memory_space<vmem>>, %arg3: memref<1x2x24x64xf32, #tpu.memory_space<vmem>>, %arg4: memref<1x1x64xf32, #tpu.memory_space<vmem>>, %arg5: memref<1x1x64xf32, #tpu.memory_space<vmem>>, %arg6: memref<9x64x64xf32, #tpu.memory_space<vmem>>, %arg7: memref<1x64xf32, #tpu.memory_space<vmem>>, %arg8: memref<1x256x32xf32, #tpu.memory_space<vmem>>, %arg9: memref<32x64xf32, #tpu.memory_space<vmem>>, %arg10: memref<1x64xf32, #tpu.memory_space<vmem>>, %arg11: memref<1x256x64xf32, #tpu.memory_space<vmem>>, %arg12: memref<18x24x64xf32, #tpu.memory_space<vmem>>) attributes {dimension_semantics = [#tpu.dimension_semantics<parallel>, #tpu.dimension_semantics<parallel>], iteration_bounds = array<i64: 2, 1>, scalar_prefetch = 0 : i64, scratch_operands = 1 : i64, tpu.core_type = #tpu.core_type<tc>, window_params = [{transform_indices = @transform_0, window_bounds = array<i64: 1, 16, 24, 64>}, {transform_indices = @transform_1, window_bounds = array<i64: 1, 2, 24, 64>}, {transform_indices = @transform_2, window_bounds = array<i64: 1, 1, 64>}, {transform_indices = @transform_3, window_bounds = array<i64: 1, 1, 64>}, {pipeline_mode = #tpu.pipeline_mode<synchronous>, transform_indices = @transform_4, window_bounds = array<i64: 9, 64, 64>}, {pipeline_mode = #tpu.pipeline_mode<synchronous>, transform_indices = @transform_5, window_bounds = array<i64: 1, 64>}, {transform_indices = @transform_6, window_bounds = array<i64: 1, 256, 32>}, {pipeline_mode = #tpu.pipeline_mode<synchronous>, transform_indices = @transform_7, window_bounds = array<i64: 32, 64>}, {pipeline_mode = #tpu.pipeline_mode<synchronous>, transform_indices = @transform_8, window_bounds = array<i64: 1, 64>}, {transform_indices = @transform_9, window_bounds = array<i64: 1, 256, 64>}]} {
    %c0 = arith.constant 0 : index
    %c0_0 = arith.constant 0 : index
    %c0_1 = arith.constant 0 : index
    %0 = vector.load %arg4[%c0, %c0_0, %c0_1] : memref<1x1x64xf32, #tpu.memory_space<vmem>>, vector<1x1x64xf32>
    %c0_2 = arith.constant 0 : index
    %c0_3 = arith.constant 0 : index
    %c0_4 = arith.constant 0 : index
    %1 = vector.load %arg5[%c0_2, %c0_3, %c0_4] : memref<1x1x64xf32, #tpu.memory_space<vmem>>, vector<1x1x64xf32>
    %c0_5 = arith.constant 0 : index
    %c0_6 = arith.constant 0 : index
    %c0_7 = arith.constant 0 : index
    %c0_8 = arith.constant 0 : index
    %2 = vector.load %arg2[%c0_5, %c0_6, %c0_7, %c0_8] : memref<1x16x24x64xf32, #tpu.memory_space<vmem>>, vector<1x16x24x64xf32>
    %3 = vector.shape_cast %2 : vector<1x16x24x64xf32> to vector<16x24x64xf32>
    %4 = vector.broadcast %0 : vector<1x1x64xf32> to vector<16x24x64xf32>
    %5 = arith.mulf %3, %4 : vector<16x24x64xf32>
    %6 = vector.broadcast %1 : vector<1x1x64xf32> to vector<16x24x64xf32>
    %7 = arith.addf %5, %6 : vector<16x24x64xf32>
    %cst = arith.constant 5.000000e-01 : f32
    %8 = vector.broadcast %cst : f32 to vector<16x24x64xf32>
    %9 = arith.mulf %8, %7 : vector<16x24x64xf32>
    %10 = math.tanh %9 : vector<16x24x64xf32>
    %cst_9 = arith.constant 1.000000e+00 : f32
    %11 = vector.broadcast %cst_9 : f32 to vector<16x24x64xf32>
    %12 = arith.addf %10, %11 : vector<16x24x64xf32>
    %cst_10 = arith.constant 5.000000e-01 : f32
    %13 = vector.broadcast %cst_10 : f32 to vector<16x24x64xf32>
    %14 = arith.mulf %13, %12 : vector<16x24x64xf32>
    %15 = arith.mulf %7, %14 : vector<16x24x64xf32>
    %c0_11 = arith.constant 0 : index
    %c0_12 = arith.constant 0 : index
    %c0_13 = arith.constant 0 : index
    %16 = vector.load %arg12[%c0_11, %c0_12, %c0_13] : memref<18x24x64xf32, #tpu.memory_space<vmem>>, vector<16x24x64xf32>
    tpu.vector_store %arg12[%c0_11, %c0_12, %c0_13], %15 {strides = array<i32>} : memref<18x24x64xf32, #tpu.memory_space<vmem>>, vector<16x24x64xf32>,
    %c0_14 = arith.constant 0 : index
    %c0_15 = arith.constant 0 : index
    %c0_16 = arith.constant 0 : index
    %c0_17 = arith.constant 0 : index
    %17 = vector.load %arg3[%c0_14, %c0_15, %c0_16, %c0_17] : memref<1x2x24x64xf32, #tpu.memory_space<vmem>>, vector<1x2x24x64xf32>
    %18 = vector.shape_cast %17 : vector<1x2x24x64xf32> to vector<2x24x64xf32>
    %19 = vector.broadcast %0 : vector<1x1x64xf32> to vector<2x24x64xf32>
    %20 = arith.mulf %18, %19 : vector<2x24x64xf32>
    %21 = vector.broadcast %1 : vector<1x1x64xf32> to vector<2x24x64xf32>
    %22 = arith.addf %20, %21 : vector<2x24x64xf32>
    %cst_18 = arith.constant 5.000000e-01 : f32
    %23 = vector.broadcast %cst_18 : f32 to vector<2x24x64xf32>
    %24 = arith.mulf %23, %22 : vector<2x24x64xf32>
    %25 = math.tanh %24 : vector<2x24x64xf32>
    %cst_19 = arith.constant 1.000000e+00 : f32
    %26 = vector.broadcast %cst_19 : f32 to vector<2x24x64xf32>
    %27 = arith.addf %25, %26 : vector<2x24x64xf32>
    %cst_20 = arith.constant 5.000000e-01 : f32
    %28 = vector.broadcast %cst_20 : f32 to vector<2x24x64xf32>
    %29 = arith.mulf %28, %27 : vector<2x24x64xf32>
    %30 = arith.mulf %22, %29 : vector<2x24x64xf32>
    %c16 = arith.constant 16 : index
    %c0_21 = arith.constant 0 : index
    %c0_22 = arith.constant 0 : index
    %31 = vector.load %arg12[%c16, %c0_21, %c0_22] : memref<18x24x64xf32, #tpu.memory_space<vmem>>, vector<2x24x64xf32>
    tpu.vector_store %arg12[%c16, %c0_21, %c0_22], %30 {strides = array<i32>} : memref<18x24x64xf32, #tpu.memory_space<vmem>>, vector<2x24x64xf32>,
    %cst_23 = arith.constant 0.000000e+00 : f32
    %32 = vector.broadcast %cst_23 : f32 to vector<18x1x64xf32>
    %c0_24 = arith.constant 0 : index
    %c0_25 = arith.constant 0 : index
    %c0_26 = arith.constant 0 : index
    %33 = vector.load %arg12[%c0_24, %c0_25, %c0_26] : memref<18x24x64xf32, #tpu.memory_space<vmem>>, vector<18x1x64xf32>
    tpu.vector_store %arg12[%c0_24, %c0_25, %c0_26], %32 {strides = array<i32>} : memref<18x24x64xf32, #tpu.memory_space<vmem>>, vector<18x1x64xf32>,
    %cst_27 = arith.constant 0.000000e+00 : f32
    %34 = vector.broadcast %cst_27 : f32 to vector<18x7x64xf32>
    %c0_28 = arith.constant 0 : index
    %c17 = arith.constant 17 : index
    %c0_29 = arith.constant 0 : index
    %35 = vector.load %arg12[%c0_28, %c17, %c0_29] : memref<18x24x64xf32, #tpu.memory_space<vmem>>, vector<18x7x64xf32>
    tpu.vector_store %arg12[%c0_28, %c17, %c0_29], %34 {strides = array<i32>} : memref<18x24x64xf32, #tpu.memory_space<vmem>>, vector<18x7x64xf32>,
    %c0_i32 = arith.constant 0 : i32
    %36 = arith.cmpi eq, %arg1, %c0_i32 : i32
    %37 = arith.extui %36 : i1 to i32
    %c0_i32_30 = arith.constant 0 : i32
    %38 = arith.cmpi ne, %37, %c0_i32_30 : i32
    scf.if %38 {
      %cst_102 = arith.constant 0.000000e+00 : f32
      %111 = vector.broadcast %cst_102 : f32 to vector<1x24x64xf32>
      %c0_103 = arith.constant 0 : index
      %c0_104 = arith.constant 0 : index
      %c0_105 = arith.constant 0 : index
      %112 = vector.load %arg12[%c0_103, %c0_104, %c0_105] : memref<18x24x64xf32, #tpu.memory_space<vmem>>, vector<1x24x64xf32>
      tpu.vector_store %arg12[%c0_103, %c0_104, %c0_105], %111 {strides = array<i32>} : memref<18x24x64xf32, #tpu.memory_space<vmem>>, vector<1x24x64xf32>,
    } else {
    }
    %c0_i32_31 = arith.constant 0 : i32
    %39 = arith.cmpi eq, %arg1, %c0_i32_31 : i32
    %40 = arith.extui %39 : i1 to i32
    %c0_i32_32 = arith.constant 0 : i32
    %41 = arith.cmpi ne, %40, %c0_i32_32 : i32
    scf.if %41 {
      %cst_102 = arith.constant 0.000000e+00 : f32
      %111 = vector.broadcast %cst_102 : f32 to vector<1x24x64xf32>
      %c17_103 = arith.constant 17 : index
      %c0_104 = arith.constant 0 : index
      %c0_105 = arith.constant 0 : index
      %112 = vector.load %arg12[%c17_103, %c0_104, %c0_105] : memref<18x24x64xf32, #tpu.memory_space<vmem>>, vector<1x24x64xf32>
      tpu.vector_store %arg12[%c17_103, %c0_104, %c0_105], %111 {strides = array<i32>} : memref<18x24x64xf32, #tpu.memory_space<vmem>>, vector<1x24x64xf32>,
    } else {
    }
    %cst_33 = arith.constant 0.000000e+00 : f32
    %42 = vector.broadcast %cst_33 : f32 to vector<256x64xf32>
    %c0_34 = arith.constant 0 : index
    %c0_35 = arith.constant 0 : index
    %c0_36 = arith.constant 0 : index
    %43 = vector.load %arg12[%c0_34, %c0_35, %c0_36] : memref<18x24x64xf32, #tpu.memory_space<vmem>>, vector<16x16x64xf32>
    %44 = vector.shape_cast %43 : vector<16x16x64xf32> to vector<256x64xf32>
    %c0_37 = arith.constant 0 : index
    %c0_38 = arith.constant 0 : index
    %c0_39 = arith.constant 0 : index
    %45 = vector.load %arg6[%c0_37, %c0_38, %c0_39] : memref<9x64x64xf32, #tpu.memory_space<vmem>>, vector<1x64x64xf32>
    %46 = vector.shape_cast %45 : vector<1x64x64xf32> to vector<64x64xf32>
    %cst_40 = arith.constant dense<0.000000e+00> : vector<256x64xf32>
    %47 = tpu.matmul %44, %46, %cst_40 {dimension_numbers = #tpu.dot_dimension_numbers<[1], [0], [0], [1], [0, 0, 1, 1], [], []>} : vector<256x64xf32>, vector<64x64xf32>, vector<256x64xf32> -> vector<256x64xf32>
    %48 = arith.addf %42, %47 : vector<256x64xf32>
    %c0_41 = arith.constant 0 : index
    %c1 = arith.constant 1 : index
    %c0_42 = arith.constant 0 : index
    %49 = vector.load %arg12[%c0_41, %c1, %c0_42] : memref<18x24x64xf32, #tpu.memory_space<vmem>>, vector<16x16x64xf32>
    %50 = vector.shape_cast %49 : vector<16x16x64xf32> to vector<256x64xf32>
    %c1_43 = arith.constant 1 : index
    %c0_44 = arith.constant 0 : index
    %c0_45 = arith.constant 0 : index
    %51 = vector.load %arg6[%c1_43, %c0_44, %c0_45] : memref<9x64x64xf32, #tpu.memory_space<vmem>>, vector<1x64x64xf32>
    %52 = vector.shape_cast %51 : vector<1x64x64xf32> to vector<64x64xf32>
    %cst_46 = arith.constant dense<0.000000e+00> : vector<256x64xf32>
    %53 = tpu.matmul %50, %52, %cst_46 {dimension_numbers = #tpu.dot_dimension_numbers<[1], [0], [0], [1], [0, 0, 1, 1], [], []>} : vector<256x64xf32>, vector<64x64xf32>, vector<256x64xf32> -> vector<256x64xf32>
    %54 = arith.addf %48, %53 : vector<256x64xf32>
    %c0_47 = arith.constant 0 : index
    %c2 = arith.constant 2 : index
    %c0_48 = arith.constant 0 : index
    %55 = vector.load %arg12[%c0_47, %c2, %c0_48] : memref<18x24x64xf32, #tpu.memory_space<vmem>>, vector<16x16x64xf32>
    %56 = vector.shape_cast %55 : vector<16x16x64xf32> to vector<256x64xf32>
    %c2_49 = arith.constant 2 : index
    %c0_50 = arith.constant 0 : index
    %c0_51 = arith.constant 0 : index
    %57 = vector.load %arg6[%c2_49, %c0_50, %c0_51] : memref<9x64x64xf32, #tpu.memory_space<vmem>>, vector<1x64x64xf32>
    %58 = vector.shape_cast %57 : vector<1x64x64xf32> to vector<64x64xf32>
    %cst_52 = arith.constant dense<0.000000e+00> : vector<256x64xf32>
    %59 = tpu.matmul %56, %58, %cst_52 {dimension_numbers = #tpu.dot_dimension_numbers<[1], [0], [0], [1], [0, 0, 1, 1], [], []>} : vector<256x64xf32>, vector<64x64xf32>, vector<256x64xf32> -> vector<256x64xf32>
    %60 = arith.addf %54, %59 : vector<256x64xf32>
    %c1_53 = arith.constant 1 : index
    %c0_54 = arith.constant 0 : index
    %c0_55 = arith.constant 0 : index
    %61 = vector.load %arg12[%c1_53, %c0_54, %c0_55] : memref<18x24x64xf32, #tpu.memory_space<vmem>>, vector<16x16x64xf32>
    %62 = vector.shape_cast %61 : vector<16x16x64xf32> to vector<256x64xf32>
    %c3 = arith.constant 3 : index
    %c0_56 = arith.constant 0 : index
    %c0_57 = arith.constant 0 : index
    %63 = vector.load %arg6[%c3, %c0_56, %c0_57] : memref<9x64x64xf32, #tpu.memory_space<vmem>>, vector<1x64x64xf32>
    %64 = vector.shape_cast %63 : vector<1x64x64xf32> to vector<64x64xf32>
    %cst_58 = arith.constant dense<0.000000e+00> : vector<256x64xf32>
    %65 = tpu.matmul %62, %64, %cst_58 {dimension_numbers = #tpu.dot_dimension_numbers<[1], [0], [0], [1], [0, 0, 1, 1], [], []>} : vector<256x64xf32>, vector<64x64xf32>, vector<256x64xf32> -> vector<256x64xf32>
    %66 = arith.addf %60, %65 : vector<256x64xf32>
    %c1_59 = arith.constant 1 : index
    %c1_60 = arith.constant 1 : index
    %c0_61 = arith.constant 0 : index
    %67 = vector.load %arg12[%c1_59, %c1_60, %c0_61] : memref<18x24x64xf32, #tpu.memory_space<vmem>>, vector<16x16x64xf32>
    %68 = vector.shape_cast %67 : vector<16x16x64xf32> to vector<256x64xf32>
    %c4 = arith.constant 4 : index
    %c0_62 = arith.constant 0 : index
    %c0_63 = arith.constant 0 : index
    %69 = vector.load %arg6[%c4, %c0_62, %c0_63] : memref<9x64x64xf32, #tpu.memory_space<vmem>>, vector<1x64x64xf32>
    %70 = vector.shape_cast %69 : vector<1x64x64xf32> to vector<64x64xf32>
    %cst_64 = arith.constant dense<0.000000e+00> : vector<256x64xf32>
    %71 = tpu.matmul %68, %70, %cst_64 {dimension_numbers = #tpu.dot_dimension_numbers<[1], [0], [0], [1], [0, 0, 1, 1], [], []>} : vector<256x64xf32>, vector<64x64xf32>, vector<256x64xf32> -> vector<256x64xf32>
    %72 = arith.addf %66, %71 : vector<256x64xf32>
    %c1_65 = arith.constant 1 : index
    %c2_66 = arith.constant 2 : index
    %c0_67 = arith.constant 0 : index
    %73 = vector.load %arg12[%c1_65, %c2_66, %c0_67] : memref<18x24x64xf32, #tpu.memory_space<vmem>>, vector<16x16x64xf32>
    %74 = vector.shape_cast %73 : vector<16x16x64xf32> to vector<256x64xf32>
    %c5 = arith.constant 5 : index
    %c0_68 = arith.constant 0 : index
    %c0_69 = arith.constant 0 : index
    %75 = vector.load %arg6[%c5, %c0_68, %c0_69] : memref<9x64x64xf32, #tpu.memory_space<vmem>>, vector<1x64x64xf32>
    %76 = vector.shape_cast %75 : vector<1x64x64xf32> to vector<64x64xf32>
    %cst_70 = arith.constant dense<0.000000e+00> : vector<256x64xf32>
    %77 = tpu.matmul %74, %76, %cst_70 {dimension_numbers = #tpu.dot_dimension_numbers<[1], [0], [0], [1], [0, 0, 1, 1], [], []>} : vector<256x64xf32>, vector<64x64xf32>, vector<256x64xf32> -> vector<256x64xf32>
    %78 = arith.addf %72, %77 : vector<256x64xf32>
    %c2_71 = arith.constant 2 : index
    %c0_72 = arith.constant 0 : index
    %c0_73 = arith.constant 0 : index
    %79 = vector.load %arg12[%c2_71, %c0_72, %c0_73] : memref<18x24x64xf32, #tpu.memory_space<vmem>>, vector<16x16x64xf32>
    %80 = vector.shape_cast %79 : vector<16x16x64xf32> to vector<256x64xf32>
    %c6 = arith.constant 6 : index
    %c0_74 = arith.constant 0 : index
    %c0_75 = arith.constant 0 : index
    %81 = vector.load %arg6[%c6, %c0_74, %c0_75] : memref<9x64x64xf32, #tpu.memory_space<vmem>>, vector<1x64x64xf32>
    %82 = vector.shape_cast %81 : vector<1x64x64xf32> to vector<64x64xf32>
    %cst_76 = arith.constant dense<0.000000e+00> : vector<256x64xf32>
    %83 = tpu.matmul %80, %82, %cst_76 {dimension_numbers = #tpu.dot_dimension_numbers<[1], [0], [0], [1], [0, 0, 1, 1], [], []>} : vector<256x64xf32>, vector<64x64xf32>, vector<256x64xf32> -> vector<256x64xf32>
    %84 = arith.addf %78, %83 : vector<256x64xf32>
    %c2_77 = arith.constant 2 : index
    %c1_78 = arith.constant 1 : index
    %c0_79 = arith.constant 0 : index
    %85 = vector.load %arg12[%c2_77, %c1_78, %c0_79] : memref<18x24x64xf32, #tpu.memory_space<vmem>>, vector<16x16x64xf32>
    %86 = vector.shape_cast %85 : vector<16x16x64xf32> to vector<256x64xf32>
    %c7 = arith.constant 7 : index
    %c0_80 = arith.constant 0 : index
    %c0_81 = arith.constant 0 : index
    %87 = vector.load %arg6[%c7, %c0_80, %c0_81] : memref<9x64x64xf32, #tpu.memory_space<vmem>>, vector<1x64x64xf32>
    %88 = vector.shape_cast %87 : vector<1x64x64xf32> to vector<64x64xf32>
    %cst_82 = arith.constant dense<0.000000e+00> : vector<256x64xf32>
    %89 = tpu.matmul %86, %88, %cst_82 {dimension_numbers = #tpu.dot_dimension_numbers<[1], [0], [0], [1], [0, 0, 1, 1], [], []>} : vector<256x64xf32>, vector<64x64xf32>, vector<256x64xf32> -> vector<256x64xf32>
    %90 = arith.addf %84, %89 : vector<256x64xf32>
    %c2_83 = arith.constant 2 : index
    %c2_84 = arith.constant 2 : index
    %c0_85 = arith.constant 0 : index
    %91 = vector.load %arg12[%c2_83, %c2_84, %c0_85] : memref<18x24x64xf32, #tpu.memory_space<vmem>>, vector<16x16x64xf32>
    %92 = vector.shape_cast %91 : vector<16x16x64xf32> to vector<256x64xf32>
    %c8 = arith.constant 8 : index
    %c0_86 = arith.constant 0 : index
    %c0_87 = arith.constant 0 : index
    %93 = vector.load %arg6[%c8, %c0_86, %c0_87] : memref<9x64x64xf32, #tpu.memory_space<vmem>>, vector<1x64x64xf32>
    %94 = vector.shape_cast %93 : vector<1x64x64xf32> to vector<64x64xf32>
    %cst_88 = arith.constant dense<0.000000e+00> : vector<256x64xf32>
    %95 = tpu.matmul %92, %94, %cst_88 {dimension_numbers = #tpu.dot_dimension_numbers<[1], [0], [0], [1], [0, 0, 1, 1], [], []>} : vector<256x64xf32>, vector<64x64xf32>, vector<256x64xf32> -> vector<256x64xf32>
    %96 = arith.addf %90, %95 : vector<256x64xf32>
    %c0_89 = arith.constant 0 : index
    %c0_90 = arith.constant 0 : index
    %97 = vector.load %arg7[%c0_89, %c0_90] : memref<1x64xf32, #tpu.memory_space<vmem>>, vector<1x64xf32>
    %98 = vector.broadcast %97 : vector<1x64xf32> to vector<256x64xf32>
    %99 = arith.addf %96, %98 : vector<256x64xf32>
    %c0_91 = arith.constant 0 : index
    %c0_92 = arith.constant 0 : index
    %c0_93 = arith.constant 0 : index
    %100 = vector.load %arg8[%c0_91, %c0_92, %c0_93] : memref<1x256x32xf32, #tpu.memory_space<vmem>>, vector<1x256x32xf32>
    %101 = vector.shape_cast %100 : vector<1x256x32xf32> to vector<256x32xf32>
    %c0_94 = arith.constant 0 : index
    %c0_95 = arith.constant 0 : index
    %102 = vector.load %arg9[%c0_94, %c0_95] : memref<32x64xf32, #tpu.memory_space<vmem>>, vector<32x64xf32>
    %cst_96 = arith.constant dense<0.000000e+00> : vector<256x64xf32>
    %103 = tpu.matmul %101, %102, %cst_96 {dimension_numbers = #tpu.dot_dimension_numbers<[1], [0], [0], [1], [0, 0, 1, 1], [], []>} : vector<256x32xf32>, vector<32x64xf32>, vector<256x64xf32> -> vector<256x64xf32>
    %104 = arith.addf %99, %103 : vector<256x64xf32>
    %c0_97 = arith.constant 0 : index
    %c0_98 = arith.constant 0 : index
    %105 = vector.load %arg10[%c0_97, %c0_98] : memref<1x64xf32, #tpu.memory_space<vmem>>, vector<1x64xf32>
    %106 = vector.broadcast %105 : vector<1x64xf32> to vector<256x64xf32>
    %107 = arith.addf %104, %106 : vector<256x64xf32>
    %c0_99 = arith.constant 0 : index
    %c0_100 = arith.constant 0 : index
    %c0_101 = arith.constant 0 : index
    %108 = vector.load %arg11[%c0_99, %c0_100, %c0_101] : memref<1x256x64xf32, #tpu.memory_space<vmem>>, vector<1x256x64xf32>
    %109 = vector.shape_cast %108 : vector<1x256x64xf32> to vector<256x64xf32>
    %110 = vector.shape_cast %107 : vector<256x64xf32> to vector<1x256x64xf32>
    tpu.vector_store %arg11[%c0_99, %c0_100, %c0_101], %110 {strides = array<i32>} : memref<1x256x64xf32, #tpu.memory_space<vmem>>, vector<1x256x64xf32>,
    return
  }
  func.func @transform_0(%arg0: i32, %arg1: i32) -> (i32, i32, i32, i32) {
    %c0_i32 = arith.constant 0 : i32
    %c0_i32_0 = arith.constant 0 : i32
    %c0_i32_1 = arith.constant 0 : i32
    return %arg0, %arg1, %c0_i32, %c0_i32_0 : i32, i32, i32, i32
  }
  func.func @transform_1(%arg0: i32, %arg1: i32) -> (i32, i32, i32, i32) {
    %c1_i32 = arith.constant 1 : i32
    %0 = arith.addi %arg1, %c1_i32 : i32
    %c8_i32 = arith.constant 8 : i32
    %1 = arith.muli %0, %c8_i32 : i32
    %c0_i32 = arith.constant 0 : i32
    %c0_i32_0 = arith.constant 0 : i32
    %c0_i32_1 = arith.constant 0 : i32
    return %arg0, %1, %c0_i32, %c0_i32_0 : i32, i32, i32, i32
  }
  func.func @transform_2(%arg0: i32, %arg1: i32) -> (i32, i32, i32) {
    %c0_i32 = arith.constant 0 : i32
    %c0_i32_0 = arith.constant 0 : i32
    %c0_i32_1 = arith.constant 0 : i32
    return %arg0, %c0_i32, %c0_i32_0 : i32, i32, i32
  }
  func.func @transform_3(%arg0: i32, %arg1: i32) -> (i32, i32, i32) {
    %c0_i32 = arith.constant 0 : i32
    %c0_i32_0 = arith.constant 0 : i32
    %c0_i32_1 = arith.constant 0 : i32
    return %arg0, %c0_i32, %c0_i32_0 : i32, i32, i32
  }
  func.func @transform_4(%arg0: i32, %arg1: i32) -> (i32, i32, i32) {
    %c0_i32 = arith.constant 0 : i32
    %c0_i32_0 = arith.constant 0 : i32
    %c0_i32_1 = arith.constant 0 : i32
    %c0_i32_2 = arith.constant 0 : i32
    return %c0_i32, %c0_i32_0, %c0_i32_1 : i32, i32, i32
  }
  func.func @transform_5(%arg0: i32, %arg1: i32) -> (i32, i32) {
    %c0_i32 = arith.constant 0 : i32
    %c0_i32_0 = arith.constant 0 : i32
    %c0_i32_1 = arith.constant 0 : i32
    return %c0_i32, %c0_i32_0 : i32, i32
  }
  func.func @transform_6(%arg0: i32, %arg1: i32) -> (i32, i32, i32) {
    %c0_i32 = arith.constant 0 : i32
    %c0_i32_0 = arith.constant 0 : i32
    return %arg0, %arg1, %c0_i32 : i32, i32, i32
  }
  func.func @transform_7(%arg0: i32, %arg1: i32) -> (i32, i32) {
    %c0_i32 = arith.constant 0 : i32
    %c0_i32_0 = arith.constant 0 : i32
    %c0_i32_1 = arith.constant 0 : i32
    return %c0_i32, %c0_i32_0 : i32, i32
  }
  func.func @transform_8(%arg0: i32, %arg1: i32) -> (i32, i32) {
    %c0_i32 = arith.constant 0 : i32
    %c0_i32_0 = arith.constant 0 : i32
    %c0_i32_1 = arith.constant 0 : i32
    return %c0_i32, %c0_i32_0 : i32, i32
  }
  func.func @transform_9(%arg0: i32, %arg1: i32) -> (i32, i32, i32) {
    %c0_i32 = arith.constant 0 : i32
    %c0_i32_0 = arith.constant 0 : i32
    return %arg0, %arg1, %c0_i32 : i32, i32, i32
  }
}

</mosaic_0001>

<bundles_post_ra>
// kernel: vae_residual_block.4
= control target key start
LH: loop header
LB: loop body
LE: loop exit
PB: predicated region body
PF: predicated region fallthrough
CT: control target
= control target key end

     0   :  { %s1292_s0 = inlined_call_operand.hbm [shape: f32[2,256,32], index: 0, kind: input, shape index: {}]   ;;  %s1293_s1 = inlined_call_operand.hbm [shape: f32[1,32], index: 1, kind: input, shape index: {}]   ;;  %s1294_s2 = inlined_call_operand.hbm [shape: f32[1,32], index: 2, kind: input, shape index: {}]   ;;  %s1295_s3 = inlined_call_operand.vmem [shape: f32[32,32], index: 3, kind: input, shape index: {}]   ;;  %s1296_s4 = inlined_call_operand.vmem [shape: f32[2,1,32], index: 4, kind: output, shape index: {0}]   ;;  %s1297_s5 = inlined_call_operand.vmem [shape: f32[2,1,32], index: 5, kind: output, shape index: {1}]  }
   0x1   :  { %1300 = sst [smem:[#allocation11_spill]] %s1293_s1 }
   0x2   :  { %11 = vsyncpa [#allocation5], 0 }
   0x3   :  { %13 = vsyncpa [#allocation5 + $0x1], 0 }
   0x4   :  { %14 = vsyncpa [#allocation7], 0  ;;  %s1038_s18 = smov 0   ;;  %s1040_s19 = smov 0  }
   0x5   :  { %s1042_s20 = smov 0   ;;  %s1044_s21 = smov 0  }
   0x6   :  { %s1046_s22 = smov 0   ;;  %s1048_s23 = smov 0  }
   0x7 LB: > { %s747_s24 = sadd.s32 4294967295, %s998_s23   ;;  %s41_s25 = sadd.s32 1, %s986_s20  ;;  %s998_s23 = sphi %s1048_s23, %s20_s23   ;;  %s994_s22 = sphi %s1046_s22, %s1312_s22   ;;  %s990_s21 = sphi %s1044_s21, %s1311_s21   ;;  %s986_s20 = sphi %s1042_s20, %s1310_s20   ;;  %s982_s19 = sphi %s1040_s19, %s1309_s19   ;;  %s978_s18 = sphi %s1038_s18, %s1308_s18  }
   0x8   : > { %p48_p0 = scmp.ne.s32.totalorder %s986_s20, %s982_s19  ;;  %p49_p1 = scmp.eq.s32.totalorder %s998_s23, 0 }
   0x9   : > { %p54_p2 = scmp.ne.s32.totalorder %s982_s19, %s978_s18  ;;  %p1072_p3 = scmp.eq.s32.totalorder %s747_s24, 0 }
   0xa   : > { %p50_p4 = por %p49_p1, %p48_p0  ;;  %p749_p5 = scmp.ge.s32.totalorder %s998_s23, 1 }
   0xb   : > { %s1301_s26 = scalar_select %p1072_p3, 1, 0 }
   0xc   : > { %p1079_p6 = por %p1072_p3, %p54_p2  ;;  %p180_p7 = scmp.lt.s32.totalorder %s998_s23, 3 }
   0xd   : > { %s1000_s29 = smov [#allocation6]   ;;  %p804_p10 = scmp.lt.s32.totalorder %s998_s23, 2 }
   0xe   : > { %p1084_p8 = pnand %p749_p5, %p180_p7  ;;  %s193_s30 = sshll.u32 %s1000_s29, 4  ;;  %s194_s30 = int_to_ptr.vmem [resolvable:$true] %s193_s30 }
   0xf   : > { %p1097_p12 = pnand %p804_p10, %p50_p4  ;;  %s1001_s8 = smov [#allocation8]  }
  0x10   : > { %p791_p9 = pneg %p1084_p8  ;;  %s204_s9 = sshll.u32 %s1001_s8, 4  ;;  %s205_s9 = int_to_ptr.vmem [resolvable:$true] %s204_s9 }
  0x11   : > { %s875_s10 = scalar_lea.vmem %s194_s30, 16  ;;  %s882_s11 = scalar_lea.vmem %s194_s30, 32 }
  0x12   : > { %p1093_p11 = pnand %p791_p9, %p1072_p3  ;;  %p876_p0 = scmp.ne.s32.totalorder %s194_s30, %s875_s10 }
  0x13   : > { %p883_p5 = scmp.lt.s32.totalorder %s194_s30, %s194_s30  ;;  %p884_p7 = scmp.lt.s32.totalorder %s882_s11, %s875_s10 }
  0x14   : > { %p866_p13 = pneg %p1093_p11 }
  0x15   : > { %p885_p9 = por %p884_p7, %p883_p5 }
  0x16   : > { %p878_p1 = pnand %p876_p0, %p866_p13 }
  0x18   : > { %p879_p2 = pneg %p878_p1 }
  0x1a   : > { %p886_p3 = pnand %p885_p9, %p879_p2 }
  0x1c   : > { %889 = shalt.err (!%p886_p3)
}
  0x1d   : > { %s1306_s1 = sld [smem:[#allocation11_spill]]  ;;  %s32_s14 = sadd.s32 1, %s994_s22 }
  0x1e   : > { %s901_s15 = scalar_lea.vmem %s205_s9, 16  ;;  %s908_s16 = scalar_lea.vmem %s205_s9, 32 }
  0x1f   : > { %p902_p4 = scmp.ne.s32.totalorder %s205_s9, %s901_s15  ;;  %p909_p1 = scmp.lt.s32.totalorder %s205_s9, %s205_s9 }
  0x20   : > { %p910_p2 = scmp.lt.s32.totalorder %s908_s16, %s901_s15 }
  0x21   : > { %p904_p10 = pnand %p902_p4, %p866_p13 }
  0x22   : > { %p911_p3 = por %p910_p2, %p909_p1 }
  0x23   : > { %794 = dma.hbm_to_vmem [thread:$0]  (!%p1093_p11), %s1306_s1, 16, %s194_s30, [#allocation7]  }
  0x24   : > { %p905_p0 = pneg %p904_p10 }
  0x26   : > { %p912_p5 = pnand %p911_p3, %p905_p0 }
  0x28   : > { %915 = shalt.err (!%p912_p5)
}
  0x29   : > { %797 = dma.hbm_to_vmem [thread:$0]  (!%p1093_p11), %s1294_s2, 16, %s205_s9, [#allocation7]  }
  0x2a   : > { %p34_p13 = scmp.ge.s32.totalorder %s32_s14, 2  ;;  %s218_s24 = sand.u32 1, %s986_s20  }
  0x2b   : > { %s753_s29 = sshll.u32 %s218_s24, 8  ;;  %s764_s30 = sshll.u32 %s994_s22, 12 }
  0x2c   : > { %s1314_s14 = smov (%p34_p13, %s32_s14), 0  ;;  %s230_s11 = scalar_lea.hbm %s1292_s0, %s764_s30 }
  0x2d   : > { %s36_s8 = ssub.s32 %s994_s22, %s1314_s14  ;;  %s222_s12 = scalar_lea.vmem [#allocation4], %s753_s29 }
  0x2e   : > { %p39_p7 = scmp.eq.s32.totalorder %s36_s8, 0  ;;  %s231_s13 = sshll.u32 %s222_s12, 4  ;;  %s232_s13 = int_to_ptr.vmem [resolvable:$true] %s231_s13 }
  0x2f   : > { %s219_s9 = scalar_lea.sflag [#allocation5], %s218_s24  ;;  %p918_p11 = pneg %p1097_p12 }
  0x30   : > { %s1132_s15 = scalar_select %p39_p7, %s986_s20, %s41_s25  }
  0x31   : > { %s929_s16 = scalar_lea.vmem %s232_s13, 4096  ;;  %s1002_s17 = smov [#allocation4]  }
  0x32   : > { %p930_p9 = scmp.ne.s32.totalorder %s232_s13, %s929_s16  ;;  %s934_s18 = sshll.u32 %s1002_s17, 4  ;;  %s935_s18 = int_to_ptr.vmem [resolvable:$false] %s934_s18 }
  0x33   : > { %s936_s1 = scalar_lea.vmem %s935_s18, 8192  ;;  %p937_p0 = scmp.lt.s32.totalorder %s232_s13, %s935_s18 }
  0x34   : > { %p932_p4 = pnand %p930_p9, %p918_p11  ;;  %p938_p1 = scmp.lt.s32.totalorder %s936_s1, %s929_s16 }
  0x36   : > { %p933_p10 = pneg %p932_p4  ;;  %p939_p2 = por %p938_p1, %p937_p0 }
  0x38   : > { %p940_p3 = pnand %p939_p2, %p933_p10 }
  0x3a   : > { %943 = shalt.err (!%p940_p3)
}
  0x3b   : > { %s1003_s29 = smov 128   ;;  %s1004_s25 = smov 8  }
  0x3c   : > { %801 = dma.hbm_to_vmem [thread:$0]  (!%p1097_p12), %s230_s11, 4096, %s232_s13, %s219_s9, %s1003_s29, %s1003_s29, %s1004_s25  }
  0x3d   : > { %243 = sbr.rel (%p1084_p8) target bundleno = 386 (0x182), region = 36  ;;  %s245_s24 = sand.u32 (!%p1084_p8), 1, %s982_s19  }
  0x3e   : > { %s757_s30 = sshll.u32 (!%p1084_p8), %s245_s24, 8  ;;  %s246_s8 = scalar_lea.sflag (!%p1084_p8), [#allocation5], %s245_s24 }
  0x3f   : > { %s1141_s10 = scalar_lea.vmem (!%p1084_p8), [#allocation4], %s757_s30 }
  0x42   : > { %969 = dma.done.wait (%p1079_p6), %s246_s8, 4096  }
  0x43   : > { %971 = vsyncadd (%p1079_p6), %s246_s8, 4294963200  ;;  %p1307_p5 = scmp.ne.s32.totalorder %s1301_s26, 0 }
  0x45   : > { %973 = dma.done.wait (%p1307_p5), [#allocation7], 32  }
  0x46   : > { %975 = vsyncadd (%p1307_p5), [#allocation7], 4294967264  ;;  %vm296_vm0 = vcmask 253952   ;;  %v1005_v0 = vmov 0.0   ;;  %vm1006_vm1 = vmmov 0   ;;  %vm332_vm2 = vcmask 261120  }
  0x47   : > { %297 = vst.msk [vmem:[#allocation2] sm:$0x1] %vm296_vm0, %v1005_v0  ;;  %298 = vst.msk [vmem:[#allocation3] sm:$0x1] %vm296_vm0, %v1005_v0  ;;  %770 = vmatprep.subr.mxu0 %v1005_v0  ;;  %778 = vmatprep.mubr.msk.f32.mxu0 %vm1006_vm1, %v1005_v0  ;;  %v299_v1 = vld [vmem:[%s1141_s10] sm:$0xff]  ;;  %v300_v2 = vld [vmem:[%s1141_s10 + $0x8] sm:$0xff] }
  0x48   : > { %v301_v3 = vld [vmem:[%s1141_s10 + $0x10] sm:$0xff]  ;;  %v333_v4 = vsel %vm332_vm2, %v299_v1, 0.0  ;;  %v334_v5 = vsel %vm332_vm2, %v300_v2, 0.0  ;;  %v302_v7 = vld [vmem:[%s1141_s10 + $0x18] sm:$0xff]  ;;  %v303_v10 = vld [vmem:[%s1141_s10 + $0x20] sm:$0xff]  ;;  %v406_v31 = vmul.f32 %v299_v1, %v299_v1  ;;  %v407_v32 = vmul.f32 %v300_v2, %v300_v2  ;;  %p286_p6 = scmp.lt.s32.totalorder %s990_s21, 1 }
  0x49   : > { %v336_v6 = vsel %vm332_vm2, %v301_v3, 0.0  ;;  %v335_v8 = vadd.f32 %v334_v5, %v333_v4  ;;  %v338_v9 = vsel %vm332_vm2, %v302_v7, 0.0  ;;  %v340_v12 = vsel %vm332_vm2, %v303_v10, 0.0  ;;  %v304_v13 = vld [vmem:[%s1141_s10 + $0x28] sm:$0xff]  ;;  %v305_v16 = vld [vmem:[%s1141_s10 + $0x30] sm:$0xff]  ;;  %v306_v19 = vld [vmem:[%s1141_s10 + $0x38] sm:$0xff] }
  0x4a   : > { %v342_v15 = vsel %vm332_vm2, %v304_v13, 0.0  ;;  %v344_v18 = vsel %vm332_vm2, %v305_v16, 0.0  ;;  %v346_v21 = vsel %vm332_vm2, %v306_v19, 0.0  ;;  %v525_v22 = vld [vmem:[%s1295_s3 + $0x18] sm:$0xff]  ;;  %v307_v23 = vld [vmem:[%s1141_s10 + $0x40] sm:$0xff]  ;;  %v524_v25 = vld [vmem:[%s1295_s3 + $0x10] sm:$0xff]  ;;  %v408_v33 = vmul.f32 %v301_v3, %v301_v3 }
  0x4b   : > { %v337_v11 = vadd.f32 %v336_v6, %v335_v8  ;;  %771 = vmatpush3.msra.mxu0 %v525_v22  ;;  %v348_v26 = vsel %vm332_vm2, %v307_v23, 0.0  ;;  %v523_v27 = vld [vmem:[%s1295_s3 + $0x8] sm:$0xff]  ;;  %v522_v34 = vld [vmem:[%s1295_s3] sm:$0xff]  ;;  %v309_v35 = vld [vmem:[%s1141_s10 + $0x50] sm:$0xff]  ;;  %v409_v39 = vmul.f32 %v302_v7, %v302_v7  ;;  %v410_v42 = vmul.f32 %v303_v10, %v303_v10  ;;  %s1316_s21 = smov (!%p286_p6, %s990_s21), 1 }
  0x4c   : > { %772 = vmatprep.subr.mxu0 %v1005_v0  ;;  %v308_v28 = vld [vmem:[%s1141_s10 + $0x48] sm:$0xff]  ;;  %v310_v37 = vld [vmem:[%s1141_s10 + $0x58] sm:$0xff]  ;;  %v352_v38 = vsel %vm332_vm2, %v309_v35, 0.0  ;;  %v438_v43 = vsel %vm332_vm2, %v406_v31, 0.0  ;;  %v439_v44 = vsel %vm332_vm2, %v407_v32, 0.0  ;;  %v441_v45 = vsel %vm332_vm2, %v408_v33, 0.0  ;;  %s291_s16 = scalar_lea.vmem %s1297_s5, %s1316_s21  ;;  %s288_s29 = scalar_lea.vmem %s1296_s4, %s1316_s21 }
  0x4d   : > { %v339_v14 = vadd.f32 %v338_v9, %v337_v11  ;;  %773 = vmatpush3.msra.mxu0 %v524_v25  ;;  %v350_v30 = vsel %vm332_vm2, %v308_v28, 0.0  ;;  %v354_v41 = vsel %vm332_vm2, %v310_v37, 0.0  ;;  %v311_v46 = vld [vmem:[%s1141_s10 + $0x60] sm:$0xff]  ;;  %v440_v48 = vadd.f32 %v439_v44, %v438_v43  ;;  %v312_v52 = vld [vmem:[%s1141_s10 + $0x68] sm:$0xff]  ;;  %v313_v58 = vld [vmem:[%s1141_s10 + $0x70] sm:$0xff] }
  0x4e   : > { %774 = vmatprep.subr.mxu0 %v1005_v0  ;;  %v356_v49 = vsel %vm332_vm2, %v311_v46, 0.0  ;;  %v411_v50 = vmul.f32 %v304_v13, %v304_v13  ;;  %v443_v51 = vsel %vm332_vm2, %v409_v39, 0.0  ;;  %v358_v55 = vsel %vm332_vm2, %v312_v52, 0.0  ;;  %v315_v6 = vld [vmem:[%s1141_s10 + $0x80] sm:$0xff] }
  0x4f   : > { %v341_v17 = vadd.f32 %v340_v12, %v339_v14  ;;  %775 = vmatpush3.msra.mxu0 %v523_v27  ;;  %v442_v54 = vadd.f32 %v441_v45, %v440_v48  ;;  %v412_v56 = vmul.f32 %v305_v16, %v305_v16  ;;  %v445_v57 = vsel %vm332_vm2, %v410_v42, 0.0  ;;  %v316_v12 = vld [vmem:[%s1141_s10 + $0x88] sm:$0xff]  ;;  %v321_v42 = vld [vmem:[%s1141_s10 + $0xb0] sm:$0xff]  ;;  %v322_v48 = vld [vmem:[%s1141_s10 + $0xb8] sm:$0xff] }
  0x50   : > { %776 = vmatprep.subr.mxu0 %v1005_v0  ;;  %v360_v61 = vsel %vm332_vm2, %v313_v58, 0.0  ;;  %v413_v62 = vmul.f32 %v306_v19, %v306_v19  ;;  %v447_v63 = vsel %vm332_vm2, %v411_v50, 0.0  ;;  %v314_v0 = vld [vmem:[%s1141_s10 + $0x78] sm:$0xff]  ;;  %v414_v4 = vmul.f32 %v307_v23, %v307_v23 }
  0x51   : > { %v343_v20 = vadd.f32 %v342_v15, %v341_v17  ;;  %777 = vmatpush3.msra.mxu0 %v522_v34  ;;  %v444_v60 = vadd.f32 %v443_v51, %v442_v54  ;;  %v362_v3 = vsel %vm332_vm2, %v314_v0, 0.0  ;;  %v449_v5 = vsel %vm332_vm2, %v412_v56, 0.0  ;;  %v323_v54 = vld [vmem:[%s1141_s10 + $0xc0] sm:$0xff] }
  0x52   : > { %v364_v9 = vsel %vm332_vm2, %v315_v6, 0.0  ;;  %v415_v10 = vmul.f32 %v308_v28, %v308_v28  ;;  %v451_v11 = vsel %vm332_vm2, %v413_v62, 0.0  ;;  %v366_v15 = vsel %vm332_vm2, %v316_v12, 0.0 }
  0x53   : > { %v345_v24 = vadd.f32 %v344_v18, %v343_v20  ;;  %v446_v2 = vadd.f32 %v445_v57, %v444_v60  ;;  %v416_v16 = vmul.f32 %v309_v35, %v309_v35  ;;  %v453_v17 = vsel %vm332_vm2, %v414_v4, 0.0  ;;  %v317_v18 = vld [vmem:[%s1141_s10 + $0x90] sm:$0xff]  ;;  %v324_v60 = vld [vmem:[%s1141_s10 + $0xc8] sm:$0xff] }
  0x54   : > { %v417_v22 = vmul.f32 %v310_v37, %v310_v37  ;;  %v455_v23 = vsel %vm332_vm2, %v415_v10, 0.0  ;;  %v418_v28 = vmul.f32 %v311_v46, %v311_v46  ;;  %v419_v34 = vmul.f32 %v312_v52, %v312_v52 }
  0x55   : > { %v347_v29 = vadd.f32 %v346_v21, %v345_v24  ;;  %v448_v8 = vadd.f32 %v447_v63, %v446_v2  ;;  %v368_v21 = vsel %vm332_vm2, %v317_v18, 0.0  ;;  %v318_v24 = vld [vmem:[%s1141_s10 + $0x98] sm:$0xff]  ;;  %v376_v45 = vsel %vm332_vm2, %v321_v42, 0.0  ;;  %v325_v2 = vld [vmem:[%s1141_s10 + $0xd0] sm:$0xff] }
  0x56   : > { %v370_v27 = vsel %vm332_vm2, %v318_v24, 0.0  ;;  %v459_v35 = vsel %vm332_vm2, %v417_v22, 0.0  ;;  %v421_v46 = vmul.f32 %v314_v0, %v314_v0  ;;  %v378_v51 = vsel %vm332_vm2, %v322_v48, 0.0 }
  0x57   : > { %v349_v36 = vadd.f32 %v348_v26, %v347_v29  ;;  %v450_v14 = vadd.f32 %v449_v5, %v448_v8  ;;  %v457_v29 = vsel %vm332_vm2, %v416_v16, 0.0  ;;  %v422_v52 = vmul.f32 %v315_v6, %v315_v6  ;;  %v326_v8 = vld [vmem:[%s1141_s10 + $0xd8] sm:$0xff] }
  0x58   : > { %v380_v57 = vsel %vm332_vm2, %v323_v54, 0.0  ;;  %v382_v63 = vsel %vm332_vm2, %v324_v60, 0.0  ;;  %v424_v0 = vmul.f32 %v317_v18, %v317_v18  ;;  %v384_v5 = vsel %vm332_vm2, %v325_v2, 0.0 }
  0x59   : > { %v351_v40 = vadd.f32 %v350_v30, %v349_v36  ;;  %v452_v20 = vadd.f32 %v451_v11, %v450_v14  ;;  %v319_v30 = vld [vmem:[%s1141_s10 + $0xa0] sm:$0xff]  ;;  %v320_v36 = vld [vmem:[%s1141_s10 + $0xa8] sm:$0xff]  ;;  %v425_v6 = vmul.f32 %v318_v24, %v318_v24  ;;  %v386_v11 = vsel %vm332_vm2, %v326_v8, 0.0 }
  0x5a   : > { %v372_v33 = vsel %vm332_vm2, %v319_v30, 0.0  ;;  %v374_v39 = vsel %vm332_vm2, %v320_v36, 0.0  ;;  %v327_v14 = vld [vmem:[%s1141_s10 + $0xe0] sm:$0xff]  ;;  %v427_v18 = vmul.f32 %v320_v36, %v320_v36  ;;  %v428_v24 = vmul.f32 %v321_v42, %v321_v42 }
  0x5b   : > { %v353_v47 = vadd.f32 %v352_v38, %v351_v40  ;;  %v454_v26 = vadd.f32 %v453_v17, %v452_v20  ;;  %v420_v40 = vmul.f32 %v313_v58, %v313_v58  ;;  %v423_v58 = vmul.f32 %v316_v12, %v316_v12  ;;  %v328_v20 = vld [vmem:[%s1141_s10 + $0xe8] sm:$0xff] }
  0x5c   : > { %v426_v12 = vmul.f32 %v319_v30, %v319_v30  ;;  %v388_v17 = vsel %vm332_vm2, %v327_v14, 0.0  ;;  %v429_v30 = vmul.f32 %v322_v48, %v322_v48  ;;  %v430_v36 = vmul.f32 %v323_v54, %v323_v54 }
  0x5d   : > { %v355_v53 = vadd.f32 %v354_v41, %v353_v47  ;;  %v456_v32 = vadd.f32 %v455_v23, %v454_v26  ;;  %v461_v41 = vsel %vm332_vm2, %v418_v28, 0.0  ;;  %v463_v47 = vsel %vm332_vm2, %v419_v34, 0.0  ;;  %v329_v26 = vld [vmem:[%s1141_s10 + $0xf0] sm:$0xff] }
  0x5e   : > { %v390_v23 = vsel %vm332_vm2, %v328_v20, 0.0  ;;  %v433_v48 = vmul.f32 %v326_v8, %v326_v8  ;;  %vm520_vm3 = vcmask 1040384  }
  0x5f   : > { %v357_v59 = vadd.f32 %v356_v49, %v355_v53  ;;  %v458_v38 = vadd.f32 %v457_v29, %v456_v32  ;;  %v465_v53 = vsel %vm332_vm2, %v420_v40, 0.0  ;;  %v392_v29 = vsel %vm332_vm2, %v329_v26, 0.0  ;;  %v330_v32 = vld [vmem:[%s1141_s10 + $0xf8] sm:$0xff] }
  0x60   : > { %v431_v40 = vmul.f32 %v324_v60, %v324_v60  ;;  %v436_v60 = vmul.f32 %v329_v26, %v329_v26 }
  0x61   : > { %v359_v1 = vadd.f32 %v358_v55, %v357_v59  ;;  %v460_v44 = vadd.f32 %v459_v35, %v458_v38  ;;  %v467_v59 = vsel %vm332_vm2, %v421_v46, 0.0  ;;  %v394_v35 = vsel %vm332_vm2, %v330_v32, 0.0 }
  0x63   : > { %v361_v7 = vadd.f32 %v360_v61, %v359_v1  ;;  %v462_v50 = vadd.f32 %v461_v41, %v460_v44  ;;  %v469_v1 = vsel %vm332_vm2, %v422_v52, 0.0  ;;  %v483_v41 = vsel %vm332_vm2, %v429_v30, 0.0 }
  0x64   : > { %v432_v44 = vmul.f32 %v325_v2, %v325_v2  ;;  %v434_v52 = vmul.f32 %v327_v14, %v327_v14  ;;  %v612_v30 = vlaneseq }
  0x65   : > { %v363_v13 = vadd.f32 %v362_v3, %v361_v7  ;;  %v464_v56 = vadd.f32 %v463_v47, %v462_v50  ;;  %v471_v7 = vsel %vm332_vm2, %v423_v58, 0.0 }
  0x67   : > { %v365_v19 = vadd.f32 %v364_v9, %v363_v13  ;;  %v466_v62 = vadd.f32 %v465_v53, %v464_v56  ;;  %v473_v13 = vsel %vm332_vm2, %v424_v0, 0.0  ;;  %v489_v53 = vsel %vm332_vm2, %v432_v44, 0.0  ;;  %v331_v0 = vld [vmem:[#allocation2] sm:$0x1] }
  0x68   : > { %v435_v56 = vmul.f32 %v328_v20, %v328_v20 }
  0x69   : > { %v367_v25 = vadd.f32 %v366_v15, %v365_v19  ;;  %v468_v4 = vadd.f32 %v467_v59, %v466_v62  ;;  %v475_v19 = vsel %vm332_vm2, %v425_v6, 0.0 }
  0x6a   : > { %v495_v2 = vsel %vm332_vm2, %v435_v56, 0.0 }
  0x6b   : > { %v369_v31 = vadd.f32 %v368_v21, %v367_v25  ;;  %v470_v10 = vadd.f32 %v469_v1, %v468_v4  ;;  %v477_v25 = vsel %vm332_vm2, %v426_v12, 0.0  ;;  %v437_v1 = vmul.f32 %v330_v32, %v330_v32 }
  0x6c   : > { %v613_v32 = vshrl.u32 %v612_v30, 7 }
  0x6d   : > { %v371_v37 = vadd.f32 %v370_v27, %v369_v31  ;;  %v472_v16 = vadd.f32 %v471_v7, %v470_v10  ;;  %v479_v31 = vsel %vm332_vm2, %v427_v18, 0.0  ;;  %v499_v8 = vsel %vm332_vm2, %v437_v1, 0.0 }
  0x6f   : > { %v373_v43 = vadd.f32 %v372_v33, %v371_v37  ;;  %v474_v22 = vadd.f32 %v473_v13, %v472_v16  ;;  %v481_v37 = vsel %vm332_vm2, %v428_v24, 0.0  ;;  %v405_v16 = vld [vmem:[#allocation3] sm:$0x1] }
  0x71   : > { %v375_v49 = vadd.f32 %v374_v39, %v373_v43  ;;  %v476_v28 = vadd.f32 %v475_v19, %v474_v22 }
  0x73   : > { %v377_v55 = vadd.f32 %v376_v45, %v375_v49  ;;  %v478_v34 = vadd.f32 %v477_v25, %v476_v28  ;;  %v485_v45 = vsel %vm332_vm2, %v430_v36, 0.0  ;;  %v487_v49 = vsel %vm332_vm2, %v431_v40, 0.0 }
  0x74   : > { %v1007_v28 = vmov 1966171168  }
  0x75   : > { %v379_v61 = vadd.f32 %v378_v51, %v377_v55  ;;  %v480_v39 = vadd.f32 %v479_v31, %v478_v34  ;;  %v606_v34 = vld [vmem:[#allocation6] sm:$0x1] }
  0x77   : > { %v381_v3 = vadd.f32 %v380_v57, %v379_v61  ;;  %v482_v43 = vadd.f32 %v481_v37, %v480_v39  ;;  %v491_v57 = vsel %vm332_vm2, %v433_v48, 0.0  ;;  %v493_v61 = vsel %vm332_vm2, %v434_v52, 0.0  ;;  %v607_v39 = vld [vmem:[#allocation8] sm:$0x1] }
  0x79   : > { %v383_v9 = vadd.f32 %v382_v63, %v381_v3  ;;  %v484_v47 = vadd.f32 %v483_v41, %v482_v43 }
  0x7b   : > { %v385_v15 = vadd.f32 %v384_v5, %v383_v9  ;;  %v486_v51 = vadd.f32 %v485_v45, %v484_v47  ;;  %v497_v5 = vsel %vm332_vm2, %v436_v60, 0.0 }
  0x7d   : > { %v387_v21 = vadd.f32 %v386_v11, %v385_v15  ;;  %v488_v55 = vadd.f32 %v487_v49, %v486_v51 }
  0x7f   : > { %v389_v27 = vadd.f32 %v388_v17, %v387_v21  ;;  %v490_v59 = vadd.f32 %v489_v53, %v488_v55 }
  0x81   : > { %v391_v33 = vadd.f32 %v390_v23, %v389_v27  ;;  %v492_v63 = vadd.f32 %v491_v57, %v490_v59 }
  0x83   : > { %v393_v38 = vadd.f32 %v392_v29, %v391_v33  ;;  %v494_v4 = vadd.f32 %v493_v61, %v492_v63  ;;  %v610_v29 = vunpack.c.l.s4 %v1007_v28 }
  0x85   : > { %v395_v42 = vadd.f32 %v394_v35, %v393_v38  ;;  %v496_v7 = vadd.f32 %v495_v2, %v494_v4  ;;  %v611_v31 = vunpack.c.0.s8 %v610_v29 }
  0x87   : > { %v396_v46 = vrot.slane %v395_v42, 4  ;;  %v498_v9 = vadd.f32 %v497_v5, %v496_v7  ;;  %v614_v33 = vsub.s32 %v611_v31, %v613_v32 }
  0x89   : > { %v397_v50 = vadd.f32 %v396_v46, %v395_v42  ;;  %v500_v10 = vadd.f32 %v499_v8, %v498_v9 }
  0x8b   : > { %v398_v54 = vrot.slane %v397_v50, 2  ;;  %v501_v11 = vrot.slane %v500_v10, 4 }
  0x8d   : > { %v399_v58 = vadd.f32 %v398_v54, %v397_v50  ;;  %v502_v12 = vadd.f32 %v501_v11, %v500_v10 }
  0x8f   : > { %v400_v62 = vrot.slane %v399_v58, 1  ;;  %v503_v13 = vrot.slane %v502_v12, 2 }
  0x91   : > { %v401_v3 = vadd.f32 %v400_v62, %v399_v58  ;;  %v504_v14 = vadd.f32 %v503_v13, %v502_v12 }
  0x93   : > { %v402_v6 = vadd.f32 %v401_v3, %v331_v0  ;;  %v505_v15 = vrot.slane %v504_v14, 1 }
  0x95   : > { %404 = vst.msk [vmem:[#allocation2] sm:$0x1] %vm296_vm0, %v402_v6  ;;  %v506_v17 = vadd.f32 %v505_v15, %v504_v14 }
  0x97   : > { %v507_v18 = vadd.f32 %v506_v17, %v405_v16 }
  0x99   : > { %508 = vst.msk [vmem:[#allocation3] sm:$0x1] %vm296_vm0, %v507_v18 }
  0x9c   : > { %v512_v19 = vld [vmem:[#allocation2] sm:$0x1] }
  0xa0   : > { %v760_v20 = vld [vmem:[#allocation3] ss:$0 sm:$0xff] }
  0xa1   : > { %v521_v21 = vsel %vm520_vm3, %v512_v19, %v760_v20 }
  0xa2   : > { %779 = vmatmul.mubr.msk.f32.vlgmr.msra.gmra.mxu0 %vm332_vm2, %v521_v21 }
 0x162   : > { %v595_v22 = vpop.f32.mrf.mxu0 }
 0x163   : > { %v599_v23 = vmul.f32 %v595_v22, %v595_v22  ;;  %v627_v37 = vmul.f32 %v606_v34, %v595_v22 }
 0x164   : > { %v780_v24 = vpop.f32.mrf.mxu0 }
 0x165   : > { %v601_v25 = vrot.slane %v599_v23, 7 }
 0x167   : > { %v603_v26 = vsub.f32 %v595_v22, %v601_v25 }
 0x169   : > { %v604_v27 = vadd.f32 1e-05, %v603_v26 }
 0x16b   : > { %862 = vrsqrt.f32 %v604_v27 }
 0x178   : > { %v863_v35 = vpop.eup %862 }
 0x179   : > { %v615_v36 = vrot.slane %v863_v35, %v614_v33  ;;  %v628_v38 = vrot.slane %v863_v35, 1 }
 0x17b   : > { %v616_v40 = vcombine.high %v615_v36, %v615_v36  ;;  %v630_v41 = vmul.f32 %v628_v38, %v627_v37 }
 0x17d   : > { %v623_v42 = vrot.slane %v616_v40, %v614_v33  ;;  %v631_v43 = vsub.f32 %v607_v39, %v630_v41 }
 0x17f   : > { %v625_v44 = vmul.f32 %v623_v42, %v606_v34  ;;  %632 = vst.msk [vmem:[%s291_s16] sm:$0x1] %vm296_vm0, %v631_v43 }
 0x181   : > { %626 = vst.msk [vmem:[%s288_s29] sm:$0x1] %vm296_vm0, %v625_v44 }
 0x182 PF: > { %s20_s23 = sadd.s32 1, %s998_s23   ;;  %s1308_s18 = smov %s982_s19 }
 0x183   : > { %p17_p8 = scmp.ge.s32.totalorder %s20_s23, 4   ;;  %s1309_s19 = smov %s986_s20 }
 0x184   : > { %s1310_s20 = smov %s1132_s15  ;;  %s1311_s21 = smov %s994_s22 }
 0x185   : > { %s1312_s22 = smov %s1314_s14  ;;  %19 = sbr.rel (!%p17_p8) target bundleno = 7 (0x7), region = 104 }
 0x18a   :  { %662 = vsyncpa [#allocation5], 1 }
 0x18b   :  { %664 = vsyncpa [#allocation5 + $0x1], 1 }
 0x18c   :  { %665 = vsyncpa [#allocation7], 1 }

// kernel: vae_residual_block.6
= control target key start
LH: loop header
LB: loop body
LE: loop exit
PB: predicated region body
PF: predicated region fallthrough
CT: control target
= control target key end

     0   :  { %s815_s18 = smov 0   ;;  %s817_s19 = smov 0   ;;  %s991_s0 = inlined_call_operand.vmem [shape: f32[2,256,64], index: 0, kind: input, shape index: {}]   ;;  %s992_s1 = inlined_call_operand.vmem [shape: f32[1,64], index: 1, kind: input, shape index: {}]   ;;  %s993_s2 = inlined_call_operand.vmem [shape: f32[1,64], index: 2, kind: input, shape index: {}]   ;;  %s994_s3 = inlined_call_operand.vmem [shape: f32[64,64], index: 3, kind: input, shape index: {}]   ;;  %s995_s4 = inlined_call_operand.vmem [shape: f32[2,1,64], index: 4, kind: output, shape index: {0}]   ;;  %s996_s5 = inlined_call_operand.vmem [shape: f32[2,1,64], index: 5, kind: output, shape index: {1}]  }
   0x1   :  { %s819_s20 = smov 0  }
   0x2 LB: > { %s28_s21 = sadd.s32 1, %s776_s19  ;;  %p693_p0 = scmp.ge.s32.totalorder %s780_s20, 1  ;;  %s780_s20 = sphi %s819_s20, %s16_s20   ;;  %s776_s19 = sphi %s817_s19, %s998_s19   ;;  %s772_s18 = sphi %s815_s18, %s997_s18  }
   0x3   : > { %p30_p1 = scmp.ge.s32.totalorder %s28_s21, 2  ;;  %p209_p2 = scmp.lt.s32.totalorder %s780_s20, 3 }
   0x5   : > { %s1000_s21 = smov (%p30_p1, %s28_s21), 0  ;;  %p210_p3 = pnand %p693_p0, %p209_p2 }
   0x6   : > { %p243_p4 = scmp.lt.s32.totalorder (!%p210_p3), %s772_s18, 1 }
   0x7   : > { %213 = sbr.rel (%p210_p3) target bundleno = 331 (0x14b), region = 36 }
   0xc   : > { %v495_v0 = vld [vmem:[%s994_s3 + $0x38] sm:$0xff]  ;;  %v782_v1 = vmov 0.0   ;;  %v494_v2 = vld [vmem:[%s994_s3 + $0x30] sm:$0xff]  ;;  %vm783_vm0 = vmmov 0   ;;  %vm262_vm1 = vcmask 516096   ;;  %s1002_s18 = smov (!%p243_p4, %s772_s18), 1 }
   0xd   : > { %710 = vmatprep.subr.mxu0 %v782_v1  ;;  %726 = vmatprep.mubr.msk.f32.mxu0 %vm783_vm0, %v782_v1  ;;  %263 = vst.msk [vmem:[#allocation2] sm:$0x1] %vm262_vm1, %v782_v1  ;;  %264 = vst.msk [vmem:[#allocation3] sm:$0x1] %vm262_vm1, %v782_v1  ;;  %v493_v3 = vld [vmem:[%s994_s3 + $0x28] sm:$0xff]  ;;  %s700_s28 = sshll.u32 %s1002_s18, 8  ;;  %s257_s27 = scalar_lea.vmem %s996_s5, %s1002_s18 }
   0xe   : > { %711 = vmatpush3.msra.mxu0 %v495_v0  ;;  %vm298_vm2 = vcmask 523264   ;;  %v492_v4 = vld [vmem:[%s994_s3 + $0x20] sm:$0xff]  ;;  %s853_s8 = scalar_lea.vmem %s991_s0, %s700_s28  ;;  %v491_v8 = vld [vmem:[%s994_s3 + $0x18] sm:$0xff]  ;;  %v490_v14 = vld [vmem:[%s994_s3 + $0x10] sm:$0xff]  ;;  %vm486_vm3 = vcmask 1040384   ;;  %s254_s30 = scalar_lea.vmem %s995_s4, %s1002_s18 }
   0xf   : > { %712 = vmatprep.subr.mxu0 %v782_v1  ;;  %v265_v5 = vld [vmem:[%s853_s8] sm:$0xff]  ;;  %v266_v6 = vld [vmem:[%s853_s8 + $0x8] sm:$0xff]  ;;  %v267_v7 = vld [vmem:[%s853_s8 + $0x10] sm:$0xff] }
  0x10   : > { %713 = vmatpush3.msra.mxu0 %v494_v2  ;;  %v299_v9 = vsel %vm298_vm2, %v265_v5, 0.0  ;;  %v300_v10 = vsel %vm298_vm2, %v266_v6, 0.0  ;;  %v302_v11 = vsel %vm298_vm2, %v267_v7, 0.0  ;;  %v268_v12 = vld [vmem:[%s853_s8 + $0x18] sm:$0xff]  ;;  %v269_v16 = vld [vmem:[%s853_s8 + $0x20] sm:$0xff]  ;;  %v489_v18 = vld [vmem:[%s994_s3 + $0x8] sm:$0xff]  ;;  %v372_v36 = vmul.f32 %v265_v5, %v265_v5 }
  0x11   : > { %714 = vmatprep.subr.mxu0 %v782_v1  ;;  %v301_v13 = vadd.f32 %v300_v10, %v299_v9  ;;  %v304_v15 = vsel %vm298_vm2, %v268_v12, 0.0  ;;  %v306_v19 = vsel %vm298_vm2, %v269_v16, 0.0  ;;  %v270_v20 = vld [vmem:[%s853_s8 + $0x28] sm:$0xff]  ;;  %v488_v22 = vld [vmem:[%s994_s3] sm:$0xff]  ;;  %v271_v24 = vld [vmem:[%s853_s8 + $0x30] sm:$0xff]  ;;  %v373_v37 = vmul.f32 %v266_v6, %v266_v6 }
  0x12   : > { %715 = vmatpush3.msra.mxu0 %v493_v3  ;;  %v308_v23 = vsel %vm298_vm2, %v270_v20, 0.0  ;;  %v310_v26 = vsel %vm298_vm2, %v271_v24, 0.0  ;;  %v272_v27 = vld [vmem:[%s853_s8 + $0x38] sm:$0xff]  ;;  %v273_v30 = vld [vmem:[%s853_s8 + $0x40] sm:$0xff]  ;;  %v274_v33 = vld [vmem:[%s853_s8 + $0x48] sm:$0xff]  ;;  %v374_v38 = vmul.f32 %v267_v7, %v267_v7  ;;  %v375_v43 = vmul.f32 %v268_v12, %v268_v12 }
  0x13   : > { %716 = vmatprep.subr.mxu0 %v782_v1  ;;  %v303_v17 = vadd.f32 %v302_v11, %v301_v13  ;;  %v312_v29 = vsel %vm298_vm2, %v272_v27, 0.0  ;;  %v314_v32 = vsel %vm298_vm2, %v273_v30, 0.0  ;;  %v316_v35 = vsel %vm298_vm2, %v274_v33, 0.0  ;;  %v275_v39 = vld [vmem:[%s853_s8 + $0x50] sm:$0xff]  ;;  %v276_v41 = vld [vmem:[%s853_s8 + $0x58] sm:$0xff]  ;;  %v277_v50 = vld [vmem:[%s853_s8 + $0x60] sm:$0xff] }
  0x14   : > { %717 = vmatpush3.msra.mxu0 %v492_v4  ;;  %v318_v42 = vsel %vm298_vm2, %v275_v39, 0.0  ;;  %v320_v45 = vsel %vm298_vm2, %v276_v41, 0.0  ;;  %v376_v46 = vmul.f32 %v269_v16, %v269_v16  ;;  %v404_v47 = vsel %vm298_vm2, %v372_v36, 0.0  ;;  %v278_v56 = vld [vmem:[%s853_s8 + $0x68] sm:$0xff]  ;;  %v279_v62 = vld [vmem:[%s853_s8 + $0x70] sm:$0xff]  ;;  %v280_v4 = vld [vmem:[%s853_s8 + $0x78] sm:$0xff] }
  0x15   : > { %718 = vmatprep.subr.mxu0 %v782_v1  ;;  %v305_v21 = vadd.f32 %v304_v15, %v303_v17  ;;  %v405_v48 = vsel %vm298_vm2, %v373_v37, 0.0  ;;  %v407_v49 = vsel %vm298_vm2, %v374_v38, 0.0  ;;  %v322_v53 = vsel %vm298_vm2, %v277_v50, 0.0  ;;  %v281_v10 = vld [vmem:[%s853_s8 + $0x80] sm:$0xff]  ;;  %v282_v16 = vld [vmem:[%s853_s8 + $0x88] sm:$0xff] }
  0x16   : > { %719 = vmatpush3.msra.mxu0 %v491_v8  ;;  %v406_v52 = vadd.f32 %v405_v48, %v404_v47  ;;  %v377_v54 = vmul.f32 %v270_v20, %v270_v20  ;;  %v409_v55 = vsel %vm298_vm2, %v375_v43, 0.0  ;;  %v324_v59 = vsel %vm298_vm2, %v278_v56, 0.0 }
  0x17   : > { %720 = vmatprep.subr.mxu0 %v782_v1  ;;  %v307_v25 = vadd.f32 %v306_v19, %v305_v21  ;;  %v378_v60 = vmul.f32 %v271_v24, %v271_v24  ;;  %v411_v61 = vsel %vm298_vm2, %v376_v46, 0.0  ;;  %v379_v2 = vmul.f32 %v272_v27, %v272_v27  ;;  %v287_v46 = vld [vmem:[%s853_s8 + $0xb0] sm:$0xff] }
  0x18   : > { %721 = vmatpush3.msra.mxu0 %v490_v14  ;;  %v408_v58 = vadd.f32 %v407_v49, %v406_v52  ;;  %v413_v3 = vsel %vm298_vm2, %v377_v54, 0.0  ;;  %v328_v7 = vsel %vm298_vm2, %v280_v4, 0.0  ;;  %v380_v8 = vmul.f32 %v273_v30, %v273_v30  ;;  %v288_v52 = vld [vmem:[%s853_s8 + $0xb8] sm:$0xff] }
  0x19   : > { %722 = vmatprep.subr.mxu0 %v782_v1  ;;  %v309_v28 = vadd.f32 %v308_v23, %v307_v25  ;;  %v415_v9 = vsel %vm298_vm2, %v378_v60, 0.0  ;;  %v330_v13 = vsel %vm298_vm2, %v281_v10, 0.0  ;;  %v381_v14 = vmul.f32 %v274_v33, %v274_v33 }
  0x1a   : > { %723 = vmatpush3.msra.mxu0 %v489_v18  ;;  %v410_v0 = vadd.f32 %v409_v55, %v408_v58  ;;  %v417_v15 = vsel %vm298_vm2, %v379_v2, 0.0  ;;  %v332_v19 = vsel %vm298_vm2, %v282_v16, 0.0  ;;  %v382_v20 = vmul.f32 %v275_v39, %v275_v39  ;;  %v289_v58 = vld [vmem:[%s853_s8 + $0xc0] sm:$0xff] }
  0x1b   : > { %724 = vmatprep.subr.mxu0 %v782_v1  ;;  %v311_v31 = vadd.f32 %v310_v26, %v309_v28  ;;  %v326_v1 = vsel %vm298_vm2, %v279_v62, 0.0  ;;  %v419_v21 = vsel %vm298_vm2, %v380_v8, 0.0  ;;  %v383_v26 = vmul.f32 %v276_v41, %v276_v41  ;;  %v284_v28 = vld [vmem:[%s853_s8 + $0x98] sm:$0xff] }
  0x1c   : > { %725 = vmatpush3.msra.mxu0 %v488_v22  ;;  %v412_v6 = vadd.f32 %v411_v61, %v410_v0  ;;  %v283_v22 = vld [vmem:[%s853_s8 + $0x90] sm:$0xff]  ;;  %v421_v27 = vsel %vm298_vm2, %v381_v14, 0.0  ;;  %v423_v33 = vsel %vm298_vm2, %v382_v20, 0.0  ;;  %v385_v38 = vmul.f32 %v278_v56, %v278_v56  ;;  %v290_v0 = vld [vmem:[%s853_s8 + $0xc8] sm:$0xff] }
  0x1d   : > { %v313_v34 = vadd.f32 %v312_v29, %v311_v31  ;;  %v334_v25 = vsel %vm298_vm2, %v283_v22, 0.0  ;;  %v336_v31 = vsel %vm298_vm2, %v284_v28, 0.0  ;;  %v425_v39 = vsel %vm298_vm2, %v383_v26, 0.0 }
  0x1e   : > { %v414_v12 = vadd.f32 %v413_v3, %v412_v6  ;;  %v342_v49 = vsel %vm298_vm2, %v287_v46, 0.0  ;;  %v344_v55 = vsel %vm298_vm2, %v288_v52, 0.0  ;;  %v388_v56 = vmul.f32 %v281_v10, %v281_v10  ;;  %v291_v6 = vld [vmem:[%s853_s8 + $0xd0] sm:$0xff] }
  0x1f   : > { %v315_v40 = vadd.f32 %v314_v32, %v313_v34  ;;  %v384_v32 = vmul.f32 %v277_v50, %v277_v50  ;;  %v285_v34 = vld [vmem:[%s853_s8 + $0xa0] sm:$0xff]  ;;  %v387_v50 = vmul.f32 %v280_v4, %v280_v4  ;;  %v346_v61 = vsel %vm298_vm2, %v289_v58, 0.0 }
  0x20   : > { %v416_v18 = vadd.f32 %v415_v9, %v414_v12  ;;  %v338_v37 = vsel %vm298_vm2, %v285_v34, 0.0  ;;  %v348_v3 = vsel %vm298_vm2, %v290_v0, 0.0  ;;  %v390_v4 = vmul.f32 %v283_v22, %v283_v22  ;;  %v292_v12 = vld [vmem:[%s853_s8 + $0xd8] sm:$0xff] }
  0x21   : > { %v317_v44 = vadd.f32 %v316_v35, %v315_v40  ;;  %v286_v40 = vld [vmem:[%s853_s8 + $0xa8] sm:$0xff]  ;;  %v350_v9 = vsel %vm298_vm2, %v291_v6, 0.0  ;;  %v391_v10 = vmul.f32 %v284_v28, %v284_v28  ;;  %v394_v28 = vmul.f32 %v287_v46, %v287_v46 }
  0x22   : > { %v418_v24 = vadd.f32 %v417_v15, %v416_v18  ;;  %v340_v43 = vsel %vm298_vm2, %v286_v40, 0.0  ;;  %v352_v15 = vsel %vm298_vm2, %v292_v12, 0.0  ;;  %v293_v18 = vld [vmem:[%s853_s8 + $0xe0] sm:$0xff]  ;;  %v393_v22 = vmul.f32 %v286_v40, %v286_v40 }
  0x23   : > { %v319_v51 = vadd.f32 %v318_v42, %v317_v44  ;;  %v386_v44 = vmul.f32 %v279_v62, %v279_v62  ;;  %v389_v62 = vmul.f32 %v282_v16, %v282_v16  ;;  %v392_v16 = vmul.f32 %v285_v34, %v285_v34 }
  0x24   : > { %v420_v30 = vadd.f32 %v419_v21, %v418_v24  ;;  %v354_v21 = vsel %vm298_vm2, %v293_v18, 0.0  ;;  %v294_v24 = vld [vmem:[%s853_s8 + $0xe8] sm:$0xff]  ;;  %v395_v34 = vmul.f32 %v288_v52, %v288_v52  ;;  %v396_v40 = vmul.f32 %v289_v58, %v289_v58 }
  0x25   : > { %v321_v57 = vadd.f32 %v320_v45, %v319_v51  ;;  %v427_v45 = vsel %vm298_vm2, %v384_v32, 0.0  ;;  %v429_v51 = vsel %vm298_vm2, %v385_v38, 0.0  ;;  %v399_v52 = vmul.f32 %v292_v12, %v292_v12 }
  0x26   : > { %v422_v36 = vadd.f32 %v421_v27, %v420_v30  ;;  %v356_v27 = vsel %vm298_vm2, %v294_v24, 0.0  ;;  %v295_v30 = vld [vmem:[%s853_s8 + $0xf0] sm:$0xff] }
  0x27   : > { %v323_v63 = vadd.f32 %v322_v53, %v321_v57  ;;  %v431_v57 = vsel %vm298_vm2, %v386_v44, 0.0  ;;  %v397_v44 = vmul.f32 %v290_v0, %v290_v0  ;;  %v402_v0 = vmul.f32 %v295_v30, %v295_v30 }
  0x28   : > { %v424_v42 = vadd.f32 %v423_v33, %v422_v36  ;;  %v358_v33 = vsel %vm298_vm2, %v295_v30, 0.0  ;;  %v296_v36 = vld [vmem:[%s853_s8 + $0xf8] sm:$0xff] }
  0x29   : > { %v325_v5 = vadd.f32 %v324_v59, %v323_v63  ;;  %v433_v63 = vsel %vm298_vm2, %v387_v50, 0.0 }
  0x2a   : > { %v426_v48 = vadd.f32 %v425_v39, %v424_v42  ;;  %v360_v39 = vsel %vm298_vm2, %v296_v36, 0.0 }
  0x2b   : > { %v327_v11 = vadd.f32 %v326_v1, %v325_v5  ;;  %v435_v5 = vsel %vm298_vm2, %v388_v56, 0.0  ;;  %v400_v56 = vmul.f32 %v293_v18, %v293_v18 }
  0x2c   : > { %v428_v54 = vadd.f32 %v427_v45, %v426_v48  ;;  %v449_v45 = vsel %vm298_vm2, %v395_v34, 0.0  ;;  %v398_v48 = vmul.f32 %v291_v6, %v291_v6  ;;  %v582_v34 = vlaneseq }
  0x2d   : > { %v329_v17 = vadd.f32 %v328_v7, %v327_v11  ;;  %v437_v11 = vsel %vm298_vm2, %v389_v62, 0.0 }
  0x2e   : > { %v430_v60 = vadd.f32 %v429_v51, %v428_v54 }
  0x2f   : > { %v331_v23 = vadd.f32 %v330_v13, %v329_v17  ;;  %v439_v17 = vsel %vm298_vm2, %v390_v4, 0.0  ;;  %v297_v4 = vld [vmem:[#allocation2] sm:$0x1] }
  0x30   : > { %v432_v2 = vadd.f32 %v431_v57, %v430_v60  ;;  %v455_v57 = vsel %vm298_vm2, %v398_v48, 0.0  ;;  %v401_v60 = vmul.f32 %v294_v24, %v294_v24 }
  0x31   : > { %v333_v29 = vadd.f32 %v332_v19, %v331_v23  ;;  %v441_v23 = vsel %vm298_vm2, %v391_v10, 0.0 }
  0x32   : > { %v434_v8 = vadd.f32 %v433_v63, %v432_v2  ;;  %v461_v6 = vsel %vm298_vm2, %v401_v60, 0.0 }
  0x33   : > { %v335_v35 = vadd.f32 %v334_v25, %v333_v29  ;;  %v443_v29 = vsel %vm298_vm2, %v392_v16, 0.0 }
  0x34   : > { %v436_v14 = vadd.f32 %v435_v5, %v434_v8  ;;  %v403_v5 = vmul.f32 %v296_v36, %v296_v36  ;;  %v583_v36 = vshrl.u32 %v582_v34, 7 }
  0x35   : > { %v337_v41 = vadd.f32 %v336_v31, %v335_v35  ;;  %v445_v35 = vsel %vm298_vm2, %v393_v22, 0.0 }
  0x36   : > { %v438_v20 = vadd.f32 %v437_v11, %v436_v14  ;;  %v465_v12 = vsel %vm298_vm2, %v403_v5, 0.0 }
  0x37   : > { %v339_v47 = vadd.f32 %v338_v37, %v337_v41  ;;  %v447_v41 = vsel %vm298_vm2, %v394_v28, 0.0 }
  0x38   : > { %v440_v26 = vadd.f32 %v439_v17, %v438_v20  ;;  %v371_v20 = vld [vmem:[#allocation3] sm:$0x1] }
  0x39   : > { %v341_v53 = vadd.f32 %v340_v43, %v339_v47 }
  0x3a   : > { %v442_v32 = vadd.f32 %v441_v23, %v440_v26 }
  0x3b   : > { %v343_v59 = vadd.f32 %v342_v49, %v341_v53  ;;  %v451_v49 = vsel %vm298_vm2, %v396_v40, 0.0  ;;  %v453_v53 = vsel %vm298_vm2, %v397_v44, 0.0 }
  0x3c   : > { %v444_v38 = vadd.f32 %v443_v29, %v442_v32  ;;  %v784_v32 = vmov 1966171168  }
  0x3d   : > { %v345_v1 = vadd.f32 %v344_v55, %v343_v59 }
  0x3e   : > { %v446_v43 = vadd.f32 %v445_v35, %v444_v38  ;;  %v576_v38 = vld [vmem:[%s992_s1] sm:$0x1] }
  0x3f   : > { %v347_v7 = vadd.f32 %v346_v61, %v345_v1  ;;  %v457_v61 = vsel %vm298_vm2, %v399_v52, 0.0  ;;  %v459_v1 = vsel %vm298_vm2, %v400_v56, 0.0 }
  0x40   : > { %v448_v47 = vadd.f32 %v447_v41, %v446_v43  ;;  %v577_v43 = vld [vmem:[%s993_s2] sm:$0x1] }
  0x41   : > { %v349_v13 = vadd.f32 %v348_v3, %v347_v7 }
  0x42   : > { %v450_v51 = vadd.f32 %v449_v45, %v448_v47 }
  0x43   : > { %v351_v19 = vadd.f32 %v350_v9, %v349_v13  ;;  %v463_v9 = vsel %vm298_vm2, %v402_v0, 0.0 }
  0x44   : > { %v452_v55 = vadd.f32 %v451_v49, %v450_v51 }
  0x45   : > { %v353_v25 = vadd.f32 %v352_v15, %v351_v19 }
  0x46   : > { %v454_v59 = vadd.f32 %v453_v53, %v452_v55 }
  0x47   : > { %v355_v31 = vadd.f32 %v354_v21, %v353_v25 }
  0x48   : > { %v456_v63 = vadd.f32 %v455_v57, %v454_v59 }
  0x49   : > { %v357_v37 = vadd.f32 %v356_v27, %v355_v31 }
  0x4a   : > { %v458_v3 = vadd.f32 %v457_v61, %v456_v63 }
  0x4b   : > { %v359_v42 = vadd.f32 %v358_v33, %v357_v37  ;;  %v580_v33 = vunpack.c.l.s4 %v784_v32 }
  0x4c   : > { %v460_v8 = vadd.f32 %v459_v1, %v458_v3 }
  0x4d   : > { %v361_v46 = vadd.f32 %v360_v39, %v359_v42  ;;  %v581_v35 = vunpack.c.0.s8 %v580_v33 }
  0x4e   : > { %v462_v11 = vadd.f32 %v461_v6, %v460_v8 }
  0x4f   : > { %v362_v50 = vrot.slane %v361_v46, 4  ;;  %v584_v37 = vsub.s32 %v581_v35, %v583_v36 }
  0x50   : > { %v464_v13 = vadd.f32 %v463_v9, %v462_v11 }
  0x51   : > { %v363_v54 = vadd.f32 %v362_v50, %v361_v46 }
  0x52   : > { %v466_v14 = vadd.f32 %v465_v12, %v464_v13 }
  0x53   : > { %v364_v58 = vrot.slane %v363_v54, 2 }
  0x54   : > { %v467_v15 = vrot.slane %v466_v14, 4 }
  0x55   : > { %v365_v62 = vadd.f32 %v364_v58, %v363_v54 }
  0x56   : > { %v468_v16 = vadd.f32 %v467_v15, %v466_v14 }
  0x57   : > { %v366_v2 = vrot.slane %v365_v62, 1 }
  0x58   : > { %v469_v17 = vrot.slane %v468_v16, 2 }
  0x59   : > { %v367_v7 = vadd.f32 %v366_v2, %v365_v62 }
  0x5a   : > { %v470_v18 = vadd.f32 %v469_v17, %v468_v16 }
  0x5b   : > { %v368_v10 = vadd.f32 %v367_v7, %v297_v4 }
  0x5c   : > { %v471_v19 = vrot.slane %v470_v18, 1 }
  0x5d   : > { %370 = vst.msk [vmem:[#allocation2] sm:$0x1] %vm262_vm1, %v368_v10 }
  0x5e   : > { %v472_v21 = vadd.f32 %v471_v19, %v470_v18 }
  0x60   : > { %v473_v22 = vadd.f32 %v472_v21, %v371_v20 }
  0x62   : > { %474 = vst.msk [vmem:[#allocation3] sm:$0x1] %vm262_vm1, %v473_v22 }
  0x64   : > { %v478_v23 = vld [vmem:[#allocation2] sm:$0x1] }
  0x69   : > { %v696_v24 = vld [vmem:[#allocation3] ss:$0 sm:$0xff] }
  0x6a   : > { %v487_v25 = vsel %vm486_vm3, %v478_v23, %v696_v24 }
  0x6b   : > { %727 = vmatmul.mubr.msk.f32.vlgmr.msra.gmra.mxu0 %vm298_vm2, %v487_v25 }
 0x12b   : > { %v565_v26 = vpop.f32.mrf.mxu0 }
 0x12c   : > { %v569_v27 = vmul.f32 %v565_v26, %v565_v26  ;;  %v597_v41 = vmul.f32 %v576_v38, %v565_v26 }
 0x12d   : > { %v728_v28 = vpop.f32.mrf.mxu0 }
 0x12e   : > { %v571_v29 = vrot.slane %v569_v27, 7 }
 0x130   : > { %v573_v30 = vsub.f32 %v565_v26, %v571_v29 }
 0x132   : > { %v574_v31 = vadd.f32 1e-05, %v573_v30 }
 0x134   : > { %756 = vrsqrt.f32 %v574_v31 }
 0x141   : > { %v757_v39 = vpop.eup %756 }
 0x142   : > { %v585_v40 = vrot.slane %v757_v39, %v584_v37  ;;  %v598_v42 = vrot.slane %v757_v39, 1 }
 0x144   : > { %v586_v44 = vcombine.high %v585_v40, %v585_v40  ;;  %v600_v45 = vmul.f32 %v598_v42, %v597_v41 }
 0x146   : > { %v593_v46 = vrot.slane %v586_v44, %v584_v37  ;;  %v601_v47 = vsub.f32 %v577_v43, %v600_v45 }
 0x148   : > { %v595_v48 = vmul.f32 %v593_v46, %v576_v38  ;;  %602 = vst.msk [vmem:[%s257_s27] sm:$0x1] %vm262_vm1, %v601_v47 }
 0x14a   : > { %596 = vst.msk [vmem:[%s254_s30] sm:$0x1] %vm262_vm1, %v595_v48 }
 0x14b PF: > { %s16_s20 = sadd.s32 1, %s780_s20   ;;  %s997_s18 = smov %s776_s19 }
 0x14c   : > { %p13_p5 = scmp.ge.s32.totalorder %s16_s20, 4   ;;  %s998_s19 = smov %s1000_s21 }
 0x14e   :  { %15 = sbr.rel (!%p13_p5) target bundleno = 2 (0x2), region = 86 }

// kernel: vae_residual_block.5
= control target key start
LH: loop header
LB: loop body
LE: loop exit
PB: predicated region body
PF: predicated region fallthrough
CT: control target
= control target key end

     0   :  { %s5970_s21 = smov 0   ;;  %s5972_s22 = smov 0   ;;  %s7958_s0 = inlined_call_operand.vmem [shape: f32[2,18,24,32], index: 0, kind: input, shape index: {}, may-alias: {0,1}]   ;;  %s7959_s1 = inlined_call_operand.vmem [shape: f32[2,18,24,32], index: 1, kind: input, shape index: {}, may-alias: {0,1}]   ;;  %s7960_s2 = inlined_call_operand.vmem [shape: f32[2,1,32], index: 2, kind: input, shape index: {}]   ;;  %s7961_s3 = inlined_call_operand.vmem [shape: f32[2,1,32], index: 3, kind: input, shape index: {}]   ;;  %s7962_s4 = inlined_call_operand.vmem [shape: f32[9,32,64], index: 4, kind: input, shape index: {}]   ;;  %s7963_s5 = inlined_call_operand.vmem [shape: f32[1,64], index: 5, kind: input, shape index: {}]   ;;  %s7964_s6 = inlined_call_operand.vmem [shape: f32[2,256,64], index: 6, kind: output, shape index: {}]  }
   0x1   :  { %s5974_s23 = smov 0  }
   0x2 LB: > { %s28_s24 = sadd.s32 1, %s5928_s22  ;;  %p4603_p0 = scmp.ge.s32.totalorder %s5932_s23, 1  ;;  %s5932_s23 = sphi %s5974_s23, %s16_s23   ;;  %s5928_s22 = sphi %s5972_s22, %s8114_s22   ;;  %s5924_s21 = sphi %s5970_s21, %s8113_s21  }
   0x3   : > { %p30_p1 = scmp.ge.s32.totalorder %s28_s24, 2  ;;  %p286_p2 = scmp.lt.s32.totalorder %s5932_s23, 3 }
   0x5   : > { %s8116_s24 = smov (%p30_p1, %s28_s24), 0  ;;  %p287_p3 = pnand %p4603_p0, %p286_p2 }
   0x7   : > { %290 = sbr.rel (%p287_p3) target bundleno = 584 (0x248), region = 44 }
   0xc   : > { %v4613_v0 = vld [vmem:[%s7962_s4 + $0x38] sm:$0xff]  ;;  %v4612_v1 = vld [vmem:[%s7962_s4 + $0x30] sm:$0xff]  ;;  %p354_p4 = scmp.lt.s32.totalorder %s5924_s21, 1  ;;  %v4611_v2 = vld [vmem:[%s7962_s4 + $0x28] sm:$0xff]  ;;  %vm798_vm0 = vcmask 261120   ;;  %vm902_vm1 = vcmask 253952  }
   0xd   : > { %5764 = vmatprep.subr.mxu1 %v4613_v0  ;;  %5260 = vmatprep.subr.mxu0 %v4613_v0  ;;  %v4610_v3 = vld [vmem:[%s7962_s4 + $0x20] sm:$0xff]  ;;  %v6031_v6 = vld [vmem:[%s7962_s4 + $0x18] sm:$0xff]  ;;  %vm921_vm2 = vcmask 260096   ;;  %vm4437_vm3 = vcmask 523264  }
   0xe   : > { %5768 = vmatpush3.msra.mxu1 %v4613_v0  ;;  %5261 = vmatpush3.msra.mxu0 %v4613_v0  ;;  %s8118_s21 = smov (!%p354_p4, %s5924_s21), 1  ;;  %v6036_v7 = vld [vmem:[%s7962_s4 + $0x58] sm:$0xff] }
   0xf   : > { %5765 = vmatprep.subr.mxu1 %v4612_v1  ;;  %5262 = vmatprep.subr.mxu0 %v4612_v1  ;;  %s5772_s9 = smul.u32 432, %s8118_s21  ;;  %s6007_s12 = scalar_lea.vmem %s7960_s2, %s8118_s21 }
  0x10   : > { %5769 = vmatpush3.msra.mxu1 %v4612_v1  ;;  %5263 = vmatpush3.msra.mxu0 %v4612_v1  ;;  %s6013_s15 = scalar_lea.vmem %s7961_s3, %s8118_s21  ;;  %v6016_v4 = vld [vmem:[%s6007_s12] ss:$0 sm:$0xff]  ;;  %s4935_s8 = sshll.u32 %s8118_s21, 8 }
  0x11   : > { %5766 = vmatprep.subr.mxu1 %v4611_v2  ;;  %5264 = vmatprep.subr.mxu0 %v4611_v2  ;;  %s6023_s18 = scalar_lea.vmem %s7958_s0, %s5772_s9  ;;  %v6026_v5 = vld [vmem:[%s6013_s15] ss:$0 sm:$0xff]  ;;  %s4934_s27 = sadd.s32 384, %s5772_s9 }
  0x12   : > { %5770 = vmatpush3.msra.mxu1 %v4611_v2  ;;  %5265 = vmatpush3.msra.mxu0 %v4611_v2  ;;  %v426_v8 = vld [vmem:[%s6023_s18 + $0xc0] sm:$0xff]  ;;  %v427_v9 = vld [vmem:[%s6023_s18 + $0xc8] sm:$0xff]  ;;  %v428_v10 = vld [vmem:[%s6023_s18 + $0xd0] sm:$0xff]  ;;  %s6480_s29 = scalar_lea.vmem %s7959_s1, %s4934_s27  ;;  %s7773_s21 = scalar_lea.vmem %s7964_s6, %s4935_s8 }
  0x13   : > { %5767 = vmatprep.subr.mxu1 %v4610_v3  ;;  %5266 = vmatprep.subr.mxu0 %v4610_v3  ;;  %v480_v11 = vmul.f32 %v6016_v4, %v426_v8  ;;  %v481_v12 = vmul.f32 %v6016_v4, %v427_v9  ;;  %v482_v13 = vmul.f32 %v6016_v4, %v428_v10  ;;  %v402_v14 = vld [vmem:[%s6023_s18] sm:$0xff]  ;;  %v403_v15 = vld [vmem:[%s6023_s18 + $0x8] sm:$0xff]  ;;  %v404_v16 = vld [vmem:[%s6023_s18 + $0x10] sm:$0xff] }
  0x14   : > { %5771 = vmatpush3.msra.mxu1 %v4610_v3  ;;  %5267 = vmatpush3.msra.mxu0 %v4610_v3  ;;  %v456_v17 = vmul.f32 %v6016_v4, %v402_v14  ;;  %v457_v18 = vmul.f32 %v6016_v4, %v403_v15  ;;  %v458_v19 = vmul.f32 %v6016_v4, %v404_v16  ;;  %v429_v20 = vld [vmem:[%s6023_s18 + $0xd8] sm:$0xff]  ;;  %v430_v21 = vld [vmem:[%s6023_s18 + $0xe0] sm:$0xff]  ;;  %v431_v30 = vld [vmem:[%s6023_s18 + $0xe8] sm:$0xff] }
  0x15   : > { %5316 = vmatprep.subr.mxu1 %v6031_v6  ;;  %5372 = vmatprep.subr.mxu0 %v6036_v7  ;;  %v6055_v22 = vadd.f32 %v6026_v5, %v480_v11  ;;  %v6058_v23 = vadd.f32 %v6026_v5, %v481_v12  ;;  %v6061_v24 = vadd.f32 %v6026_v5, %v482_v13  ;;  %v405_v31 = vld [vmem:[%s6023_s18 + $0x18] sm:$0xff]  ;;  %v406_v36 = vld [vmem:[%s6023_s18 + $0x20] sm:$0xff]  ;;  %v407_v37 = vld [vmem:[%s6023_s18 + $0x28] sm:$0xff] }
  0x16   : > { %v483_v25 = vmul.f32 %v6016_v4, %v429_v20  ;;  %v6065_v26 = vadd.f32 %v6026_v5, %v456_v17  ;;  %v6068_v27 = vadd.f32 %v6026_v5, %v457_v18  ;;  %v6071_v28 = vadd.f32 %v6026_v5, %v458_v19  ;;  %v432_v42 = vld [vmem:[%s6023_s18 + $0xf0] sm:$0xff]  ;;  %v433_v46 = vld [vmem:[%s6023_s18 + $0xf8] sm:$0xff]  ;;  %v434_v56 = vld [vmem:[%s6023_s18 + $0x100] sm:$0xff] }
  0x17   : > { %v484_v29 = vmul.f32 %v6016_v4, %v430_v21  ;;  %v582_v32 = vmul.f32 0.5, %v6055_v22  ;;  %v583_v33 = vmul.f32 0.5, %v6058_v23  ;;  %v584_v34 = vmul.f32 0.5, %v6061_v24  ;;  %v408_v57 = vld [vmem:[%s6023_s18 + $0x30] sm:$0xff]  ;;  %v409_v61 = vld [vmem:[%s6023_s18 + $0x38] sm:$0xff]  ;;  %v410_v62 = vld [vmem:[%s6023_s18 + $0x40] sm:$0xff] }
  0x18   : > { %v6080_v35 = vadd.f32 %v6026_v5, %v483_v25  ;;  %v558_v38 = vmul.f32 0.5, %v6065_v26  ;;  %v559_v39 = vmul.f32 0.5, %v6068_v27  ;;  %v560_v40 = vmul.f32 0.5, %v6071_v28  ;;  %v435_v2 = vld [vmem:[%s6023_s18 + $0x108] sm:$0xff]  ;;  %v436_v10 = vld [vmem:[%s6023_s18 + $0x110] sm:$0xff]  ;;  %v437_v20 = vld [vmem:[%s6023_s18 + $0x118] sm:$0xff] }
  0x19   : > { %v6088_v41 = vadd.f32 %v6026_v5, %v484_v29  ;;  %5800 = vtanh.f32 %v582_v32  ;;  %v485_v44 = vmul.f32 %v6016_v4, %v431_v30  ;;  %v459_v45 = vmul.f32 %v6016_v4, %v405_v31  ;;  %v411_v21 = vld [vmem:[%s6023_s18 + $0x48] sm:$0xff]  ;;  %v412_v31 = vld [vmem:[%s6023_s18 + $0x50] sm:$0xff]  ;;  %v413_v32 = vld [vmem:[%s6023_s18 + $0x58] sm:$0xff] }
  0x1a   : > { %v585_v43 = vmul.f32 0.5, %v6080_v35  ;;  %5802 = vtanh.f32 %v583_v33  ;;  %v460_v48 = vmul.f32 %v6016_v4, %v406_v36  ;;  %v461_v49 = vmul.f32 %v6016_v4, %v407_v37 }
  0x1b   : > { %v586_v47 = vmul.f32 0.5, %v6088_v41  ;;  %5804 = vtanh.f32 %v584_v34  ;;  %v6099_v50 = vadd.f32 %v6026_v5, %v485_v44  ;;  %v6102_v51 = vadd.f32 %v6026_v5, %v459_v45 }
  0x1c   : > { %v486_v52 = vmul.f32 %v6016_v4, %v432_v42  ;;  %5806 = vtanh.f32 %v558_v38  ;;  %v6106_v53 = vadd.f32 %v6026_v5, %v460_v48  ;;  %v6109_v54 = vadd.f32 %v6026_v5, %v461_v49 }
  0x1d   : > { %v487_v55 = vmul.f32 %v6016_v4, %v433_v46  ;;  %5808 = vtanh.f32 %v559_v39  ;;  %v587_v58 = vmul.f32 0.5, %v6099_v50  ;;  %v561_v59 = vmul.f32 0.5, %v6102_v51 }
  0x1e   : > { %v6117_v60 = vadd.f32 %v6026_v5, %v486_v52  ;;  %5810 = vtanh.f32 %v560_v40  ;;  %v562_v63 = vmul.f32 0.5, %v6106_v53  ;;  %v563_v0 = vmul.f32 0.5, %v6109_v54 }
  0x1f   : > { %v6124_v1 = vadd.f32 %v6026_v5, %v487_v55  ;;  %5812 = vtanh.f32 %v585_v43  ;;  %v488_v8 = vmul.f32 %v6016_v4, %v434_v56  ;;  %v462_v9 = vmul.f32 %v6016_v4, %v408_v57 }
  0x20   : > { %v588_v3 = vmul.f32 0.5, %v6117_v60  ;;  %5814 = vtanh.f32 %v586_v47  ;;  %v463_v12 = vmul.f32 %v6016_v4, %v409_v61  ;;  %v464_v13 = vmul.f32 %v6016_v4, %v410_v62 }
  0x21   : > { %v589_v11 = vmul.f32 0.5, %v6124_v1  ;;  %5816 = vtanh.f32 %v587_v58  ;;  %v6135_v14 = vadd.f32 %v6026_v5, %v488_v8  ;;  %v6138_v15 = vadd.f32 %v6026_v5, %v462_v9 }
  0x22   : > { %v489_v16 = vmul.f32 %v6016_v4, %v435_v2  ;;  %5818 = vtanh.f32 %v561_v59  ;;  %v6142_v17 = vadd.f32 %v6026_v5, %v463_v12  ;;  %v6145_v18 = vadd.f32 %v6026_v5, %v464_v13 }
  0x23   : > { %v490_v19 = vmul.f32 %v6016_v4, %v436_v10  ;;  %5820 = vtanh.f32 %v562_v63  ;;  %v590_v25 = vmul.f32 0.5, %v6135_v14  ;;  %v564_v29 = vmul.f32 0.5, %v6138_v15 }
  0x24   : > { %v6153_v30 = vadd.f32 %v6026_v5, %v489_v16  ;;  %5822 = vtanh.f32 %v563_v0  ;;  %v565_v33 = vmul.f32 0.5, %v6142_v17  ;;  %v566_v34 = vmul.f32 0.5, %v6145_v18 }
  0x25   : > { %v6160_v36 = vadd.f32 %v6026_v5, %v490_v19  ;;  %5824 = vtanh.f32 %v588_v3  ;;  %v491_v38 = vmul.f32 %v6016_v4, %v437_v20  ;;  %v465_v39 = vmul.f32 %v6016_v4, %v411_v21 }
  0x26   : > { %v591_v37 = vmul.f32 0.5, %v6153_v30  ;;  %v5801_v40 = vpop.eup %5800  ;;  %5826 = vtanh.f32 %v589_v11  ;;  %v466_v43 = vmul.f32 %v6016_v4, %v412_v31  ;;  %v467_v44 = vmul.f32 %v6016_v4, %v413_v32 }
  0x27   : > { %v592_v42 = vmul.f32 0.5, %v6160_v36  ;;  %v5803_v45 = vpop.eup %5802  ;;  %v678_v46 = vadd.f32 1.0, %v5801_v40  ;;  %5828 = vtanh.f32 %v590_v25  ;;  %v6169_v47 = vadd.f32 %v6026_v5, %v491_v38 }
  0x28   : > { %v6172_v48 = vadd.f32 %v6026_v5, %v465_v39  ;;  %v5805_v49 = vpop.eup %5804  ;;  %v679_v52 = vadd.f32 1.0, %v5803_v45  ;;  %5830 = vtanh.f32 %v564_v29  ;;  %v6175_v55 = vadd.f32 %v6026_v5, %v466_v43  ;;  %v438_v39 = vld [vmem:[%s6023_s18 + $0x120] sm:$0xff] }
  0x29   : > { %v6178_v56 = vadd.f32 %v6026_v5, %v467_v44  ;;  %v5807_v57 = vpop.eup %5806  ;;  %v726_v58 = vmul.f32 0.5, %v678_v46  ;;  %v680_v59 = vadd.f32 1.0, %v5805_v49  ;;  %5832 = vtanh.f32 %v565_v33 }
  0x2a   : > { %v593_v61 = vmul.f32 0.5, %v6169_v47  ;;  %v5809_v62 = vpop.eup %5808  ;;  %v727_v63 = vmul.f32 0.5, %v679_v52  ;;  %v654_v0 = vadd.f32 1.0, %v5807_v57  ;;  %5834 = vtanh.f32 %v566_v34  ;;  %v439_v52 = vld [vmem:[%s6023_s18 + $0x128] sm:$0xff] }
  0x2b   : > { %v567_v2 = vmul.f32 0.5, %v6172_v48  ;;  %v5811_v3 = vpop.eup %5810  ;;  %v774_v8 = vmul.f32 %v726_v58, %v6055_v22  ;;  %v728_v9 = vmul.f32 0.5, %v680_v59  ;;  %v655_v10 = vadd.f32 1.0, %v5809_v62 }
  0x2c   : > { %5836 = vtanh.f32 %v591_v37  ;;  %v5813_v11 = vpop.eup %5812  ;;  %v775_v12 = vmul.f32 %v727_v63, %v6058_v23  ;;  %v702_v13 = vmul.f32 0.5, %v654_v0  ;;  %v656_v16 = vadd.f32 1.0, %v5811_v3 }
  0x2d   : > { %5838 = vtanh.f32 %v592_v42  ;;  %v5815_v19 = vpop.eup %5814  ;;  %823 = vst.msk [vmem:[#allocation2 + $0xc0] sm:$0xff] %vm798_vm0, %v774_v8  ;;  %v776_v20 = vmul.f32 %v728_v9, %v6061_v24  ;;  %v703_v21 = vmul.f32 0.5, %v655_v10  ;;  %v681_v25 = vadd.f32 1.0, %v5813_v11 }
  0x2e   : > { %5840 = vtanh.f32 %v593_v61  ;;  %v5817_v29 = vpop.eup %5816  ;;  %824 = vst.msk [vmem:[#allocation2 + $0xc8] sm:$0xff] %vm798_vm0, %v775_v12  ;;  %v750_v22 = vmul.f32 %v702_v13, %v6065_v26  ;;  %v7965_v31 = vmov 0.0   ;;  %v704_v23 = vmul.f32 0.5, %v656_v16 }
  0x2f   : > { %911 = vst.msk [vmem:[#allocation2 + $0xc0] sm:$0x1] %vm902_vm1, %v7965_v31  ;;  %v682_v32 = vadd.f32 1.0, %v5815_v19  ;;  %v568_v33 = vmul.f32 0.5, %v6175_v55  ;;  %v5819_v34 = vpop.eup %5818  ;;  %v751_v24 = vmul.f32 %v703_v21, %v6068_v27  ;;  %v729_v37 = vmul.f32 0.5, %v681_v25 }
  0x30   : > { %825 = vst.msk [vmem:[#allocation2 + $0xd0] sm:$0xff] %vm798_vm0, %v776_v20  ;;  %v683_v38 = vadd.f32 1.0, %v5817_v29  ;;  %5842 = vtanh.f32 %v567_v2  ;;  %v5821_v40 = vpop.eup %5820  ;;  %799 = vst.msk [vmem:[#allocation2] sm:$0xff] %vm798_vm0, %v750_v22  ;;  %v752_v26 = vmul.f32 %v704_v23, %v6071_v28  ;;  %v657_v43 = vadd.f32 1.0, %v5819_v34 }
  0x31   : > { %930 = vst.msk [vmem:[#allocation2 + $0xd1] sm:$0x7f] %vm921_vm2, %v7965_v31  ;;  %v730_v42 = vmul.f32 0.5, %v682_v32  ;;  %5844 = vtanh.f32 %v568_v33  ;;  %v5823_v44 = vpop.eup %5822  ;;  %v777_v27 = vmul.f32 %v729_v37, %v6080_v35  ;;  %v658_v46 = vadd.f32 1.0, %v5821_v40  ;;  %v440_v40 = vld [vmem:[%s6023_s18 + $0x130] sm:$0xff] }
  0x32   : > { %800 = vst.msk [vmem:[#allocation2 + $0x8] sm:$0xff] %vm798_vm0, %v751_v24  ;;  %v731_v45 = vmul.f32 0.5, %v683_v38  ;;  %v569_v49 = vmul.f32 0.5, %v6178_v56  ;;  %v5825_v28 = vpop.eup %5824  ;;  %801 = vst.msk [vmem:[#allocation2 + $0x10] sm:$0xff] %vm798_vm0, %v752_v26  ;;  %v705_v58 = vmul.f32 0.5, %v657_v43  ;;  %v659_v59 = vadd.f32 1.0, %v5823_v44 }
  0x33   : > { %903 = vst.msk [vmem:[#allocation2] sm:$0x1] %vm902_vm1, %v7965_v31  ;;  %v778_v57 = vmul.f32 %v730_v42, %v6088_v41  ;;  %v492_v35 = vmul.f32 %v6016_v4, %v438_v39  ;;  %v5827_v61 = vpop.eup %5826  ;;  %v706_v63 = vmul.f32 0.5, %v658_v46  ;;  %v684_v0 = vadd.f32 1.0, %v5825_v28  ;;  %v414_v44 = vld [vmem:[%s6023_s18 + $0x60] sm:$0xff] }
  0x34   : > { %944 = vst.msk [vmem:[#allocation2] sm:$0xff] %vm798_vm0, %v7965_v31  ;;  %945 = vst.msk [vmem:[#allocation2 + $0x8] sm:$0xff] %vm798_vm0, %v7965_v31  ;;  %v779_v62 = vmul.f32 %v731_v45, %v6099_v50  ;;  %5846 = vtanh.f32 %v569_v49  ;;  %v5829_v2 = vpop.eup %5828  ;;  %v753_v41 = vmul.f32 %v705_v58, %v6102_v51  ;;  %v707_v3 = vmul.f32 0.5, %v659_v59  ;;  %v4680_v58 = vld [vmem:[%s7962_s4 + $0x50] sm:$0xff] }
  0x35   : > { %922 = vst.msk [vmem:[#allocation2 + $0x11] sm:$0x7f] %vm921_vm2, %v7965_v31  ;;  %v685_v8 = vadd.f32 1.0, %v5827_v61  ;;  %v493_v9 = vmul.f32 %v6016_v4, %v439_v52  ;;  %v5831_v10 = vpop.eup %5830  ;;  %v1003_v50 = vld [vmem:[#allocation2 + $0xc1] sm:$0xff]  ;;  %v754_v11 = vmul.f32 %v706_v63, %v6106_v53  ;;  %v732_v12 = vmul.f32 0.5, %v684_v0  ;;  %v985_v53 = vld [vmem:[%s7962_s4 + $0x10] sm:$0xff] }
  0x36   : > { %826 = vst.msk [vmem:[#allocation2 + $0xd8] sm:$0xff] %vm798_vm0, %v777_v27  ;;  %946 = vst.msk [vmem:[#allocation2 + $0x10] sm:$0xff] %vm798_vm0, %v7965_v31  ;;  %v686_v13 = vadd.f32 1.0, %v5829_v2  ;;  %v6225_v16 = vadd.f32 %v6026_v5, %v492_v35  ;;  %v5833_v19 = vpop.eup %5832  ;;  %5292 = vmatprep.mubr.msk.f32.mxu1 %vm798_vm0, %v1003_v50  ;;  %v755_v51 = vmul.f32 %v707_v3, %v6109_v54  ;;  %v660_v25 = vadd.f32 1.0, %v5831_v10  ;;  %v415_v27 = vld [vmem:[%s6023_s18 + $0x68] sm:$0xff] }
  0x37   : > { %827 = vst.msk [vmem:[#allocation2 + $0xe0] sm:$0xff] %vm798_vm0, %v778_v57  ;;  %828 = vst.msk [vmem:[#allocation2 + $0xe8] sm:$0xff] %vm798_vm0, %v779_v62  ;;  %v1004_v20 = vld [vmem:[#allocation2 + $0xc9] sm:$0xff]  ;;  %v733_v21 = vmul.f32 0.5, %v685_v8  ;;  %v6236_v29 = vadd.f32 %v6026_v5, %v493_v9  ;;  %v5835_v22 = vpop.eup %5834  ;;  %v780_v54 = vmul.f32 %v732_v12, %v6117_v60  ;;  %v661_v32 = vadd.f32 1.0, %v5833_v19 }
  0x38   : > { %912 = vst.msk [vmem:[#allocation2 + $0xd8] sm:$0x1] %vm902_vm1, %v7965_v31  ;;  %5293 = vmatmul.mubr.msk.f32.vlgmr.msra.gmra.mxu1 %vm798_vm0, %v1004_v20  ;;  %v734_v23 = vmul.f32 0.5, %v686_v13  ;;  %v594_v33 = vmul.f32 0.5, %v6225_v16  ;;  %v708_v37 = vmul.f32 0.5, %v660_v25  ;;  %v662_v38 = vadd.f32 1.0, %v5835_v22 }
  0x39   : > { %931 = vst.msk [vmem:[#allocation2 + $0xe9] sm:$0x7f] %vm921_vm2, %v7965_v31  ;;  %v5837_v34 = vpop.eup %5836  ;;  %5317 = vmatpush3.msra.mxu1 %v6031_v6  ;;  %v781_v24 = vmul.f32 %v733_v21, %v6124_v1  ;;  %v595_v39 = vmul.f32 0.5, %v6236_v29  ;;  %v984_v60 = vld [vmem:[%s7962_s4 + $0x8] sm:$0xff]  ;;  %v709_v1 = vmul.f32 0.5, %v661_v32  ;;  %v494_v61 = vmul.f32 %v6016_v4, %v440_v40  ;;  %v983_v20 = vld [vmem:[%s7962_s4] sm:$0xff] }
  0x3a   : > { %802 = vst.msk [vmem:[#allocation2 + $0x18] sm:$0xff] %vm798_vm0, %v753_v41  ;;  %803 = vst.msk [vmem:[#allocation2 + $0x20] sm:$0xff] %vm798_vm0, %v754_v11  ;;  %v5839_v26 = vpop.eup %5838  ;;  %5318 = vmatprep.subr.mxu1 %v985_v53  ;;  %v782_v6 = vmul.f32 %v734_v23, %v6135_v14  ;;  %v687_v43 = vadd.f32 1.0, %v5837_v34  ;;  %5848 = vtanh.f32 %v594_v33  ;;  %v756_v46 = vmul.f32 %v708_v37, %v6138_v15  ;;  %v416_v41 = vld [vmem:[%s6023_s18 + $0x70] sm:$0xff]  ;;  %v4679_v50 = vld [vmem:[%s7962_s4 + $0x48] sm:$0xff] }
  0x3b   : > { %904 = vst.msk [vmem:[#allocation2 + $0x18] sm:$0x1] %vm902_vm1, %v7965_v31  ;;  %v987_v42 = vld [vmem:[#allocation2 + $0x1] sm:$0xff]  ;;  %v5841_v45 = vpop.eup %5840  ;;  %5319 = vmatpush3.msra.mxu1 %v985_v53  ;;  %v710_v49 = vmul.f32 0.5, %v662_v38  ;;  %v688_v52 = vadd.f32 1.0, %v5839_v26  ;;  %5850 = vtanh.f32 %v595_v39  ;;  %v757_v57 = vmul.f32 %v709_v1, %v6142_v17  ;;  %v441_v11 = vld [vmem:[%s6023_s18 + $0x138] sm:$0xff] }
  0x3c   : > { %804 = vst.msk [vmem:[#allocation2 + $0x28] sm:$0xff] %vm798_vm0, %v755_v51  ;;  %829 = vst.msk [vmem:[#allocation2 + $0xf0] sm:$0xff] %vm798_vm0, %v780_v54  ;;  %5268 = vmatprep.mubr.msk.f32.mxu0 %vm798_vm0, %v987_v42  ;;  %v735_v59 = vmul.f32 0.5, %v687_v43  ;;  %v689_v35 = vadd.f32 1.0, %v5841_v45  ;;  %5320 = vmatprep.subr.mxu1 %v984_v60  ;;  %v468_v0 = vmul.f32 %v6016_v4, %v414_v44  ;;  %v442_v22 = vld [vmem:[%s6023_s18 + $0x140] sm:$0xff]  ;;  %v443_v34 = vld [vmem:[%s6023_s18 + $0x148] sm:$0xff] }
  0x3d   : > { %923 = vst.msk [vmem:[#allocation2 + $0x29] sm:$0x7f] %vm921_vm2, %v7965_v31  ;;  %v988_v14 = vld [vmem:[#allocation2 + $0x9] sm:$0xff]  ;;  %v5843_v15 = vpop.eup %5842  ;;  %v758_v17 = vmul.f32 %v710_v49, %v6145_v18  ;;  %v736_v63 = vmul.f32 0.5, %v688_v52  ;;  %v469_v2 = vmul.f32 %v6016_v4, %v415_v27  ;;  %v6285_v10 = vadd.f32 %v6026_v5, %v494_v61  ;;  %5321 = vmatpush3.msra.mxu1 %v984_v60  ;;  %v6324_v37 = vld [vmem:[%s7962_s4 + $0x78] sm:$0xff]  ;;  %v418_v42 = vld [vmem:[%s6023_s18 + $0x80] sm:$0xff] }
  0x3e   : > { %830 = vst.msk [vmem:[#allocation2 + $0xf8] sm:$0xff] %vm798_vm0, %v781_v24  ;;  %v1005_v28 = vld [vmem:[#allocation2 + $0xd9] sm:$0xff]  ;;  %831 = vst.msk [vmem:[#allocation2 + $0x100] sm:$0xff] %vm798_vm0, %v782_v6  ;;  %5269 = vmatmul.mubr.msk.f32.vlgmr.msra.gmra.mxu0 %vm798_vm0, %v988_v14  ;;  %v1006_v62 = vld [vmem:[#allocation2 + $0xe1] sm:$0xff]  ;;  %v5845_v3 = vpop.eup %5844  ;;  %v783_v8 = vmul.f32 %v735_v59, %v6153_v30  ;;  %v737_v9 = vmul.f32 0.5, %v689_v35  ;;  %v663_v18 = vadd.f32 1.0, %v5843_v15  ;;  %v6294_v30 = vadd.f32 %v6026_v5, %v468_v0 }
  0x3f   : > { %913 = vst.msk [vmem:[#allocation2 + $0xf0] sm:$0x1] %vm902_vm1, %v7965_v31  ;;  %5295 = vmatprep.mubr.msk.f32.mxu1 %vm798_vm0, %v1005_v28  ;;  %5373 = vmatpush3.msra.mxu0 %v6036_v7  ;;  %v784_v12 = vmul.f32 %v736_v63, %v6160_v36  ;;  %v664_v13 = vadd.f32 1.0, %v5845_v3  ;;  %v6297_v19 = vadd.f32 %v6026_v5, %v469_v2  ;;  %v596_v53 = vmul.f32 0.5, %v6285_v10  ;;  %v4678_v24 = vld [vmem:[%s7962_s4 + $0x40] sm:$0xff]  ;;  %v417_v26 = vld [vmem:[%s6023_s18 + $0x78] sm:$0xff] }
  0x40   : > { %932 = vst.msk [vmem:[#allocation2 + $0x101] sm:$0x7f] %vm921_vm2, %v7965_v31  ;;  %5296 = vmatmul.mubr.msk.f32.gmra.mxu1 %vm798_vm0, %v1006_v62  ;;  %5374 = vmatprep.subr.mxu0 %v4680_v58  ;;  %v785_v36 = vmul.f32 %v737_v9, %v6169_v47  ;;  %v711_v21 = vmul.f32 0.5, %v663_v18  ;;  %v470_v25 = vmul.f32 %v6016_v4, %v416_v41  ;;  %v570_v32 = vmul.f32 0.5, %v6294_v30  ;;  %v419_v44 = vld [vmem:[%s6023_s18 + $0x88] sm:$0xff]  ;;  %v6345_v27 = vld [vmem:[%s7962_s4 + $0x98] sm:$0xff] }
  0x41   : > { %805 = vst.msk [vmem:[#allocation2 + $0x30] sm:$0xff] %vm798_vm0, %v756_v46  ;;  %806 = vst.msk [vmem:[#allocation2 + $0x38] sm:$0xff] %vm798_vm0, %v757_v57  ;;  %v989_v7 = vld [vmem:[#allocation2 + $0x19] sm:$0xff]  ;;  %5375 = vmatpush3.msra.mxu0 %v4680_v58  ;;  %v5847_v54 = vpop.eup %5846  ;;  %v712_v23 = vmul.f32 0.5, %v664_v13  ;;  %v571_v47 = vmul.f32 0.5, %v6297_v19  ;;  %v495_v33 = vmul.f32 %v6016_v4, %v441_v11  ;;  %5852 = vtanh.f32 %v596_v53  ;;  %5322 = vmatprep.subr.mxu1 %v983_v20  ;;  %v444_v58 = vld [vmem:[%s6023_s18 + $0x150] sm:$0xff] }
  0x42   : > { %905 = vst.msk [vmem:[#allocation2 + $0x30] sm:$0x1] %vm902_vm1, %v7965_v31  ;;  %5271 = vmatprep.mubr.msk.f32.mxu0 %vm798_vm0, %v989_v7  ;;  %5376 = vmatprep.subr.mxu0 %v4679_v50  ;;  %v759_v39 = vmul.f32 %v711_v21, %v6172_v48  ;;  %v665_v60 = vadd.f32 1.0, %v5847_v54  ;;  %v6329_v40 = vadd.f32 %v6026_v5, %v470_v25  ;;  %5854 = vtanh.f32 %v570_v32  ;;  %v445_v0 = vld [vmem:[%s6023_s18 + $0x158] sm:$0xff] }
  0x43   : > { %807 = vst.msk [vmem:[#allocation2 + $0x40] sm:$0xff] %vm798_vm0, %v758_v17  ;;  %v990_v51 = vld [vmem:[#allocation2 + $0x21] sm:$0xff]  ;;  %832 = vst.msk [vmem:[#allocation2 + $0x108] sm:$0xff] %vm798_vm0, %v783_v8  ;;  %5377 = vmatpush3.msra.mxu0 %v4679_v50  ;;  %v760_v1 = vmul.f32 %v712_v23, %v6175_v55  ;;  %v496_v48 = vmul.f32 %v6016_v4, %v442_v22  ;;  %v6339_v43 = vadd.f32 %v6026_v5, %v495_v33  ;;  %v421_v54 = vld [vmem:[%s6023_s18 + $0x98] sm:$0xff] }
  0x44   : > { %924 = vst.msk [vmem:[#allocation2 + $0x41] sm:$0x7f] %vm921_vm2, %v7965_v31  ;;  %5272 = vmatmul.mubr.msk.f32.gmra.mxu0 %vm798_vm0, %v990_v51  ;;  %5323 = vmatpush3.msra.mxu1 %v983_v20  ;;  %v713_v45 = vmul.f32 0.5, %v665_v60  ;;  %5856 = vtanh.f32 %v571_v47  ;;  %v572_v55 = vmul.f32 0.5, %v6329_v40  ;;  %v497_v46 = vmul.f32 %v6016_v4, %v443_v34  ;;  %v446_v50 = vld [vmem:[%s6023_s18 + $0x160] sm:$0xff]  ;;  %v420_v20 = vld [vmem:[%s6023_s18 + $0x90] sm:$0xff] }
  0x45   : > { %833 = vst.msk [vmem:[#allocation2 + $0x110] sm:$0xff] %vm798_vm0, %v784_v12  ;;  %v1007_v38 = vld [vmem:[#allocation2 + $0xf1] sm:$0xff]  ;;  %834 = vst.msk [vmem:[#allocation2 + $0x118] sm:$0xff] %vm798_vm0, %v785_v36  ;;  %v1008_v6 = vld [vmem:[#allocation2 + $0xf9] sm:$0xff]  ;;  %5378 = vmatprep.subr.mxu0 %v4678_v24  ;;  %v6355_v52 = vadd.f32 %v6026_v5, %v496_v48  ;;  %v597_v14 = vmul.f32 0.5, %v6339_v43  ;;  %v471_v28 = vmul.f32 %v6016_v4, %v417_v26  ;;  %5428 = vmatprep.subr.mxu1 %v6324_v37 }
  0x46   : > { %914 = vst.msk [vmem:[#allocation2 + $0x108] sm:$0x1] %vm902_vm1, %v7965_v31  ;;  %5298 = vmatprep.mubr.msk.f32.mxu1 %vm798_vm0, %v1007_v38  ;;  %v472_v57 = vmul.f32 %v6016_v4, %v418_v42  ;;  %5379 = vmatpush3.msra.mxu0 %v4678_v24  ;;  %v761_v35 = vmul.f32 %v713_v45, %v6178_v56  ;;  %5858 = vtanh.f32 %v572_v55  ;;  %v422_v23 = vld [vmem:[%s6023_s18 + $0xa0] sm:$0xff]  ;;  %v447_v24 = vld [vmem:[%s6023_s18 + $0x168] sm:$0xff]  ;;  %v448_v38 = vld [vmem:[%s6023_s18 + $0x170] sm:$0xff] }
  0x47   : > { %933 = vst.msk [vmem:[#allocation2 + $0x119] sm:$0x7f] %vm921_vm2, %v7965_v31  ;;  %5299 = vmatmul.mubr.msk.f32.gmra.mxu1 %vm798_vm0, %v1008_v6  ;;  %v6365_v61 = vadd.f32 %v6026_v5, %v497_v46  ;;  %v473_v15 = vmul.f32 %v6016_v4, %v419_v44  ;;  %5484 = vmatprep.subr.mxu0 %v6345_v27  ;;  %v5849_v62 = vpop.eup %5848  ;;  %v598_v17 = vmul.f32 0.5, %v6355_v52  ;;  %5860 = vtanh.f32 %v597_v14 }
  0x48   : > { %808 = vst.msk [vmem:[#allocation2 + $0x48] sm:$0xff] %vm798_vm0, %v759_v39  ;;  %v991_v49 = vld [vmem:[#allocation2 + $0x31] sm:$0xff]  ;;  %809 = vst.msk [vmem:[#allocation2 + $0x50] sm:$0xff] %vm798_vm0, %v760_v1  ;;  %v6372_v63 = vadd.f32 %v6026_v5, %v471_v28  ;;  %v6375_v56 = vadd.f32 %v6026_v5, %v472_v57  ;;  %v5851_v2 = vpop.eup %5850  ;;  %v690_v3 = vadd.f32 1.0, %v5849_v62  ;;  %v498_v18 = vmul.f32 %v6016_v4, %v444_v58 }
  0x49   : > { %906 = vst.msk [vmem:[#allocation2 + $0x48] sm:$0x1] %vm902_vm1, %v7965_v31  ;;  %5274 = vmatprep.mubr.msk.f32.mxu0 %vm798_vm0, %v991_v49  ;;  %v599_v8 = vmul.f32 0.5, %v6365_v61  ;;  %v6381_v9 = vadd.f32 %v6026_v5, %v473_v15  ;;  %v691_v7 = vadd.f32 1.0, %v5851_v2  ;;  %5862 = vtanh.f32 %v598_v17 }
  0x4a   : > { %v992_v59 = vld [vmem:[#allocation2 + $0x39] sm:$0xff]  ;;  %810 = vst.msk [vmem:[#allocation2 + $0x58] sm:$0xff] %vm798_vm0, %v761_v35  ;;  %v573_v12 = vmul.f32 0.5, %v6372_v63  ;;  %v574_v13 = vmul.f32 0.5, %v6375_v56  ;;  %v738_v51 = vmul.f32 0.5, %v690_v3  ;;  %v499_v21 = vmul.f32 %v6016_v4, %v445_v0 }
  0x4b   : > { %5275 = vmatmul.mubr.msk.f32.gmra.mxu0 %vm798_vm0, %v992_v59  ;;  %925 = vst.msk [vmem:[#allocation2 + $0x59] sm:$0x7f] %vm921_vm2, %v7965_v31  ;;  %5864 = vtanh.f32 %v599_v8  ;;  %v575_v36 = vmul.f32 0.5, %v6381_v9  ;;  %v739_v53 = vmul.f32 0.5, %v691_v7  ;;  %v6395_v25 = vadd.f32 %v6026_v5, %v498_v18  ;;  %v449_v18 = vld [vmem:[%s6023_s18 + $0x178] sm:$0xff] }
  0x4c   : > { %v1009_v41 = vld [vmem:[#allocation2 + $0x109] sm:$0xff]  ;;  %v1010_v11 = vld [vmem:[#allocation2 + $0x111] sm:$0xff]  ;;  %5866 = vtanh.f32 %v573_v12  ;;  %v500_v22 = vmul.f32 %v6016_v4, %v446_v50  ;;  %v786_v47 = vmul.f32 %v738_v51, %v6225_v16  ;;  %v6404_v33 = vadd.f32 %v6026_v5, %v499_v21 }
  0x4d   : > { %5301 = vmatprep.mubr.msk.f32.mxu1 %vm798_vm0, %v1009_v41  ;;  %5868 = vtanh.f32 %v574_v13  ;;  %v474_v34 = vmul.f32 %v6016_v4, %v420_v20  ;;  %v787_v39 = vmul.f32 %v739_v53, %v6236_v29  ;;  %v600_v60 = vmul.f32 0.5, %v6395_v25  ;;  %v423_v13 = vld [vmem:[%s6023_s18 + $0xa8] sm:$0xff]  ;;  %v424_v21 = vld [vmem:[%s6023_s18 + $0xb0] sm:$0xff] }
  0x4e   : > { %5302 = vmatmul.mubr.msk.f32.gmra.mxu1 %vm798_vm0, %v1010_v11  ;;  %5870 = vtanh.f32 %v575_v36  ;;  %v6414_v26 = vadd.f32 %v6026_v5, %v500_v22  ;;  %835 = vst.msk [vmem:[#allocation2 + $0x120] sm:$0xff] %vm798_vm0, %v786_v47  ;;  %v601_v16 = vmul.f32 0.5, %v6404_v33  ;;  %v475_v42 = vmul.f32 %v6016_v4, %v421_v54  ;;  %v5853_v48 = vpop.eup %5852 }
  0x4f   : > { %v6400_v32 = vld [vmem:[#allocation2 + $0x49] sm:$0xff]  ;;  %v6420_v6 = vadd.f32 %v6026_v5, %v474_v34  ;;  %v476_v1 = vmul.f32 %v6016_v4, %v422_v23  ;;  %836 = vst.msk [vmem:[#allocation2 + $0x128] sm:$0xff] %vm798_vm0, %v787_v39  ;;  %5872 = vtanh.f32 %v600_v60  ;;  %v501_v45 = vmul.f32 %v6016_v4, %v447_v24  ;;  %v5855_v46 = vpop.eup %5854 }
  0x50   : > { %5277 = vmatprep.mubr.msk.f32.mxu0 %vm798_vm0, %v6400_v32  ;;  %915 = vst.msk [vmem:[#allocation2 + $0x120] sm:$0x1] %vm902_vm1, %v7965_v31  ;;  %v602_v29 = vmul.f32 0.5, %v6414_v26  ;;  %v502_v55 = vmul.f32 %v6016_v4, %v448_v38  ;;  %v692_v49 = vadd.f32 1.0, %v5853_v48  ;;  %5874 = vtanh.f32 %v601_v16 }
  0x51   : > { %v6423_v44 = vld [vmem:[#allocation2 + $0x51] sm:$0xff]  ;;  %v6434_v14 = vadd.f32 %v6026_v5, %v475_v42  ;;  %v576_v28 = vmul.f32 0.5, %v6420_v6  ;;  %v5857_v57 = vpop.eup %5856  ;;  %v666_v58 = vadd.f32 1.0, %v5855_v46  ;;  %v6438_v59 = vadd.f32 %v6026_v5, %v476_v1 }
  0x52   : > { %5278 = vmatmul.mubr.msk.f32.gmra.mxu0 %vm798_vm0, %v6423_v44  ;;  %5876 = vtanh.f32 %v602_v29  ;;  %v6441_v35 = vadd.f32 %v6026_v5, %v501_v45  ;;  %v740_v15 = vmul.f32 0.5, %v692_v49  ;;  %v667_v62 = vadd.f32 1.0, %v5857_v57 }
  0x53   : > { %v577_v17 = vmul.f32 0.5, %v6434_v14  ;;  %5878 = vtanh.f32 %v576_v28  ;;  %v5859_v0 = vpop.eup %5858  ;;  %v714_v2 = vmul.f32 0.5, %v666_v58  ;;  %v578_v41 = vmul.f32 0.5, %v6438_v59 }
  0x54   : > { %v6446_v3 = vadd.f32 %v6026_v5, %v502_v55  ;;  %v603_v8 = vmul.f32 0.5, %v6441_v35  ;;  %v5861_v50 = vpop.eup %5860  ;;  %v788_v11 = vmul.f32 %v740_v15, %v6285_v10  ;;  %v715_v7 = vmul.f32 0.5, %v667_v62  ;;  %v425_v15 = vld [vmem:[%s6023_s18 + $0xb8] sm:$0xff] }
  0x55   : > { %v668_v12 = vadd.f32 1.0, %v5859_v0  ;;  %5880 = vtanh.f32 %v577_v17  ;;  %v762_v20 = vmul.f32 %v714_v2, %v6294_v30  ;;  %v693_v51 = vadd.f32 1.0, %v5861_v50 }
  0x56   : > { %5882 = vtanh.f32 %v578_v41  ;;  %v604_v36 = vmul.f32 0.5, %v6446_v3  ;;  %v5863_v53 = vpop.eup %5862  ;;  %v1011_v22 = vld [vmem:[#allocation2 + $0x121] sm:$0xff]  ;;  %837 = vst.msk [vmem:[#allocation2 + $0x130] sm:$0xff] %vm798_vm0, %v788_v11  ;;  %v763_v54 = vmul.f32 %v715_v7, %v6297_v19  ;;  %v503_v10 = vmul.f32 %v6016_v4, %v449_v18 }
  0x57   : > { %v716_v23 = vmul.f32 0.5, %v668_v12  ;;  %5884 = vtanh.f32 %v603_v8  ;;  %5304 = vmatprep.mubr.msk.f32.mxu1 %vm798_vm0, %v1011_v22  ;;  %934 = vst.msk [vmem:[#allocation2 + $0x131] sm:$0x7f] %vm921_vm2, %v7965_v31  ;;  %v694_v30 = vadd.f32 1.0, %v5863_v53  ;;  %v741_v34 = vmul.f32 0.5, %v693_v51  ;;  %v848_v11 = vld [vmem:[%s6480_s29 + $0x8] sm:$0xff] }
  0x58   : > { %v5865_v47 = vpop.eup %5864  ;;  %811 = vst.msk [vmem:[#allocation2 + $0x60] sm:$0xff] %vm798_vm0, %v762_v20  ;;  %5886 = vtanh.f32 %v604_v36  ;;  %v477_v24 = vmul.f32 %v6016_v4, %v423_v13  ;;  %812 = vst.msk [vmem:[#allocation2 + $0x68] sm:$0xff] %vm798_vm0, %v763_v54  ;;  %v6470_v60 = vadd.f32 %v6026_v5, %v503_v10  ;;  %v478_v16 = vmul.f32 %v6016_v4, %v424_v21  ;;  %v6508_v13 = vld [vmem:[%s6007_s12] ss:$0 sm:$0xff] }
  0x59   : > { %v5867_v19 = vpop.eup %5866  ;;  %907 = vst.msk [vmem:[#allocation2 + $0x60] sm:$0x1] %vm902_vm1, %v7965_v31  ;;  %v764_v38 = vmul.f32 %v716_v23, %v6329_v40  ;;  %v695_v39 = vadd.f32 1.0, %v5865_v47  ;;  %v742_v1 = vmul.f32 0.5, %v694_v30  ;;  %v789_v48 = vmul.f32 %v741_v34, %v6339_v43  ;;  %v6525_v10 = vld [vmem:[%s6013_s15] ss:$0 sm:$0xff] }
  0x5a   : > { %v5869_v42 = vpop.eup %5868  ;;  %v669_v29 = vadd.f32 1.0, %v5867_v19  ;;  %v6475_v45 = vadd.f32 %v6026_v5, %v477_v24  ;;  %v605_v4 = vmul.f32 0.5, %v6470_v60  ;;  %v6485_v43 = vadd.f32 %v6026_v5, %v478_v16 }
  0x5b   : > { %v5871_v40 = vpop.eup %5870  ;;  %813 = vst.msk [vmem:[#allocation2 + $0x70] sm:$0xff] %vm798_vm0, %v764_v38  ;;  %v743_v55 = vmul.f32 0.5, %v695_v39  ;;  %v670_v46 = vadd.f32 1.0, %v5869_v42  ;;  %v790_v49 = vmul.f32 %v742_v1, %v6355_v52  ;;  %838 = vst.msk [vmem:[#allocation2 + $0x138] sm:$0xff] %vm798_vm0, %v789_v48  ;;  %v847_v52 = vld [vmem:[%s6480_s29] sm:$0xff]  ;;  %v479_v20 = vmul.f32 %v6508_v13, %v425_v15 }
  0x5c   : > { %926 = vst.msk [vmem:[#allocation2 + $0x71] sm:$0x7f] %vm921_vm2, %v7965_v31  ;;  %v717_v28 = vmul.f32 0.5, %v669_v29  ;;  %v671_v57 = vadd.f32 1.0, %v5871_v40  ;;  %v579_v58 = vmul.f32 0.5, %v6475_v45  ;;  %v5873_v62 = vpop.eup %5872  ;;  %5888 = vtanh.f32 %v605_v4 }
  0x5d   : > { %916 = vst.msk [vmem:[#allocation2 + $0x138] sm:$0x1] %vm902_vm1, %v7965_v31  ;;  %v791_v5 = vmul.f32 %v743_v55, %v6365_v61  ;;  %v718_v17 = vmul.f32 0.5, %v670_v46  ;;  %v580_v0 = vmul.f32 0.5, %v6485_v43  ;;  %v5875_v2 = vpop.eup %5874  ;;  %v6498_v41 = vld [vmem:[#allocation2 + $0x129] sm:$0xff]  ;;  %v696_v50 = vadd.f32 1.0, %v5873_v62 }
  0x5e   : > { %839 = vst.msk [vmem:[#allocation2 + $0x140] sm:$0xff] %vm798_vm0, %v790_v49  ;;  %v765_v8 = vmul.f32 %v717_v28, %v6372_v63  ;;  %v719_v18 = vmul.f32 0.5, %v671_v57  ;;  %5890 = vtanh.f32 %v579_v58  ;;  %5305 = vmatmul.mubr.msk.f32.gmra.mxu1 %vm798_vm0, %v6498_v41  ;;  %v697_v12 = vadd.f32 1.0, %v5875_v2  ;;  %v849_v63 = vld [vmem:[%s6480_s29 + $0x10] sm:$0xff] }
  0x5f   : > { %v5877_v7 = vpop.eup %5876  ;;  %840 = vst.msk [vmem:[#allocation2 + $0x148] sm:$0xff] %vm798_vm0, %v791_v5  ;;  %v766_v61 = vmul.f32 %v718_v17, %v6375_v56  ;;  %5892 = vtanh.f32 %v580_v0  ;;  %v6512_v36 = vld [vmem:[#allocation2 + $0x61] sm:$0xff]  ;;  %v744_v53 = vmul.f32 0.5, %v696_v50  ;;  %v853_v22 = vmul.f32 %v6508_v13, %v847_v52 }
  0x60   : > { %v5879_v51 = vpop.eup %5878  ;;  %935 = vst.msk [vmem:[#allocation2 + $0x149] sm:$0x7f] %vm921_vm2, %v7965_v31  ;;  %v767_v21 = vmul.f32 %v719_v18, %v6381_v9  ;;  %v698_v56 = vadd.f32 1.0, %v5877_v7  ;;  %5280 = vmatprep.mubr.msk.f32.mxu0 %vm798_vm0, %v6512_v36  ;;  %v745_v54 = vmul.f32 0.5, %v697_v12  ;;  %v6528_v47 = vadd.f32 %v6525_v10, %v479_v20 }
  0x61   : > { %814 = vst.msk [vmem:[#allocation2 + $0x78] sm:$0xff] %vm798_vm0, %v765_v8  ;;  %815 = vst.msk [vmem:[#allocation2 + $0x80] sm:$0xff] %vm798_vm0, %v766_v61  ;;  %v672_v23 = vadd.f32 1.0, %v5879_v51  ;;  %v854_v9 = vmul.f32 %v6508_v13, %v848_v11  ;;  %v792_v24 = vmul.f32 %v744_v53, %v6395_v25  ;;  %v6536_v38 = vadd.f32 %v6525_v10, %v853_v22 }
  0x62   : > { %908 = vst.msk [vmem:[#allocation2 + $0x78] sm:$0x1] %vm902_vm1, %v7965_v31  ;;  %v5881_v30 = vpop.eup %5880  ;;  %v6531_v34 = vld [vmem:[#allocation2 + $0x69] sm:$0xff]  ;;  %v746_v19 = vmul.f32 0.5, %v698_v56  ;;  %v855_v39 = vmul.f32 %v6508_v13, %v849_v63  ;;  %v793_v42 = vmul.f32 %v745_v54, %v6404_v33  ;;  %v581_v29 = vmul.f32 0.5, %v6528_v47 }
  0x63   : > { %816 = vst.msk [vmem:[#allocation2 + $0x88] sm:$0xff] %vm798_vm0, %v767_v21  ;;  %v5883_v16 = vpop.eup %5882  ;;  %5281 = vmatmul.mubr.msk.f32.gmra.mxu0 %vm798_vm0, %v6531_v34  ;;  %v673_v1 = vadd.f32 1.0, %v5881_v30  ;;  %v720_v48 = vmul.f32 0.5, %v672_v23  ;;  %841 = vst.msk [vmem:[#allocation2 + $0x150] sm:$0xff] %vm798_vm0, %v792_v24  ;;  %v865_v46 = vmul.f32 0.5, %v6536_v38  ;;  %v6549_v4 = vadd.f32 %v6525_v10, %v854_v9 }
  0x64   : > { %927 = vst.msk [vmem:[#allocation2 + $0x89] sm:$0x7f] %vm921_vm2, %v7965_v31  ;;  %v5885_v25 = vpop.eup %5884  ;;  %v794_v40 = vmul.f32 %v746_v19, %v6414_v26  ;;  %v674_v55 = vadd.f32 1.0, %v5883_v16  ;;  %5894 = vtanh.f32 %v581_v29  ;;  %v6570_v0 = vadd.f32 %v6525_v10, %v855_v39 }
  0x65   : > { %v5887_v49 = vpop.eup %5886  ;;  %v6551_v28 = vld [vmem:[#allocation2 + $0x139] sm:$0xff]  ;;  %842 = vst.msk [vmem:[#allocation2 + $0x158] sm:$0xff] %vm798_vm0, %v793_v42  ;;  %v721_v33 = vmul.f32 0.5, %v673_v1  ;;  %v768_v57 = vmul.f32 %v720_v48, %v6420_v6  ;;  %v699_v58 = vadd.f32 1.0, %v5885_v25  ;;  %5896 = vtanh.f32 %v865_v46 }
  0x66   : > { %917 = vst.msk [vmem:[#allocation2 + $0x150] sm:$0x1] %vm902_vm1, %v7965_v31  ;;  %5307 = vmatprep.mubr.msk.f32.mxu1 %vm798_vm0, %v6551_v28  ;;  %v6559_v26 = vld [vmem:[#allocation2 + $0x141] sm:$0xff]  ;;  %v722_v15 = vmul.f32 0.5, %v674_v55  ;;  %v700_v62 = vadd.f32 1.0, %v5887_v49  ;;  %v866_v5 = vmul.f32 0.5, %v6549_v4 }
  0x67   : > { %843 = vst.msk [vmem:[#allocation2 + $0x160] sm:$0xff] %vm798_vm0, %v794_v40  ;;  %5308 = vmatmul.mubr.msk.f32.gmra.mxu1 %vm798_vm0, %v6559_v26  ;;  %v769_v6 = vmul.f32 %v721_v33, %v6434_v14  ;;  %817 = vst.msk [vmem:[#allocation2 + $0x90] sm:$0xff] %vm798_vm0, %v768_v57  ;;  %v747_v17 = vmul.f32 0.5, %v699_v58  ;;  %v867_v50 = vmul.f32 0.5, %v6570_v0  ;;  %v951_v48 = vld [vmem:[#allocation2] sm:$0xff]  ;;  %v4716_v58 = vld [vmem:[%s7962_s4 + $0x70] sm:$0xff] }
  0x68   : > { %936 = vst.msk [vmem:[#allocation2 + $0x161] sm:$0x7f] %vm921_vm2, %v7965_v31  ;;  %v6572_v52 = vld [vmem:[#allocation2 + $0x79] sm:$0xff]  ;;  %v770_v2 = vmul.f32 %v722_v15, %v6438_v59  ;;  %v748_v8 = vmul.f32 0.5, %v700_v62  ;;  %5898 = vtanh.f32 %v866_v5  ;;  %v1666_v62 = vld [vmem:[#allocation2 + $0x2] sm:$0xff]  ;;  %v6655_v5 = vld [vmem:[#allocation2 + $0x30] sm:$0xff] }
  0x69   : > { %909 = vst.msk [vmem:[#allocation2 + $0x90] sm:$0x1] %vm902_vm1, %v7965_v31  ;;  %5283 = vmatprep.mubr.msk.f32.mxu0 %vm798_vm0, %v6572_v52  ;;  %v795_v14 = vmul.f32 %v747_v17, %v6441_v35  ;;  %v5889_v11 = vpop.eup %5888  ;;  %5900 = vtanh.f32 %v867_v50  ;;  %v4715_v17 = vld [vmem:[%s7962_s4 + $0x68] sm:$0xff]  ;;  %v4714_v50 = vld [vmem:[%s7962_s4 + $0x60] sm:$0xff] }
  0x6a   : > { %v6579_v18 = vld [vmem:[#allocation2 + $0x81] sm:$0xff]  ;;  %818 = vst.msk [vmem:[#allocation2 + $0x98] sm:$0xff] %vm798_vm0, %v769_v6  ;;  %819 = vst.msk [vmem:[#allocation2 + $0xa0] sm:$0xff] %vm798_vm0, %v770_v2  ;;  %v796_v59 = vmul.f32 %v748_v8, %v6446_v3  ;;  %v701_v61 = vadd.f32 1.0, %v5889_v11 }
  0x6b   : > { %5284 = vmatmul.mubr.msk.f32.gmra.mxu0 %vm798_vm0, %v6579_v18  ;;  %v5891_v7 = vpop.eup %5890  ;;  %928 = vst.msk [vmem:[#allocation2 + $0xa1] sm:$0x7f] %vm921_vm2, %v7965_v31  ;;  %v6674_v2 = vld [vmem:[#allocation2 + $0x1a] sm:$0xff]  ;;  %v6676_v8 = vld [vmem:[#allocation2 + $0x48] sm:$0xff] }
  0x6c   : > { %844 = vst.msk [vmem:[#allocation2 + $0x168] sm:$0xff] %vm798_vm0, %v795_v14  ;;  %v5893_v12 = vpop.eup %5892  ;;  %v6591_v35 = vld [vmem:[#allocation2 + $0x151] sm:$0xff]  ;;  %845 = vst.msk [vmem:[#allocation2 + $0x170] sm:$0xff] %vm798_vm0, %v796_v59  ;;  %v675_v20 = vadd.f32 1.0, %v5891_v7  ;;  %v749_v63 = vmul.f32 0.5, %v701_v61  ;;  %v6690_v11 = vld [vmem:[#allocation2 + $0x22] sm:$0xff] }
  0x6d   : > { %918 = vst.msk [vmem:[#allocation2 + $0x168] sm:$0x1] %vm902_vm1, %v7965_v31  ;;  %5310 = vmatprep.mubr.msk.f32.mxu1 %vm798_vm0, %v6591_v35  ;;  %v676_v51 = vadd.f32 1.0, %v5893_v12  ;;  %v4752_v14 = vld [vmem:[%s7962_s4 + $0x90] sm:$0xff]  ;;  %v6698_v61 = vld [vmem:[#allocation2 + $0x60] sm:$0xff]  ;;  %v6710_v12 = vld [vmem:[%s7962_s4 + $0xb8] sm:$0xff] }
  0x6e   : > { %v6598_v3 = vld [vmem:[#allocation2 + $0x159] sm:$0xff]  ;;  %v723_v21 = vmul.f32 0.5, %v675_v20  ;;  %v797_v53 = vmul.f32 %v749_v63, %v6470_v60  ;;  %v6692_v59 = vld [vmem:[#allocation2 + $0x50] sm:$0xff]  ;;  %v6718_v63 = vld [vmem:[#allocation2 + $0x68] sm:$0xff] }
  0x6f   : > { %5311 = vmatmul.mubr.msk.f32.gmra.mxu1 %vm798_vm0, %v6598_v3  ;;  %v724_v56 = vmul.f32 0.5, %v676_v51  ;;  %v6694_v7 = vld [vmem:[#allocation2 + $0x32] sm:$0xff]  ;;  %v6714_v20 = vld [vmem:[#allocation2 + $0x3a] sm:$0xff]  ;;  %v6720_v51 = vld [vmem:[#allocation2 + $0x4a] sm:$0xff] }
  0x70   : > { %v771_v54 = vmul.f32 %v723_v21, %v6475_v45  ;;  %846 = vst.msk [vmem:[#allocation2 + $0x178] sm:$0xff] %vm798_vm0, %v797_v53  ;;  %7988 = vst [vmem:[#allocation3_spill] sm:$0xff] %v6714_v20  ;;  %v6722_v21 = vld [vmem:[#allocation2 + $0x78] sm:$0xff]  ;;  %v4750_v53 = vld [vmem:[%s7962_s4 + $0x80] sm:$0xff] }
  0x71   : > { %v6603_v22 = vld [vmem:[#allocation2 + $0x91] sm:$0xff]  ;;  %v6608_v23 = vld [vmem:[#allocation2 + $0x99] sm:$0xff]  ;;  %v772_v9 = vmul.f32 %v724_v56, %v6485_v43  ;;  %v5895_v30 = vpop.eup %5894  ;;  %937 = vst.msk [vmem:[#allocation2 + $0x179] sm:$0x7f] %vm921_vm2, %v7965_v31  ;;  %7989 = vst [vmem:[#allocation4_spill] sm:$0xff] %v6720_v51 }
  0x72   : > { %5286 = vmatprep.mubr.msk.f32.mxu0 %vm798_vm0, %v6603_v22  ;;  %820 = vst.msk [vmem:[#allocation2 + $0xa8] sm:$0xff] %vm798_vm0, %v771_v54  ;;  %v5897_v60 = vpop.eup %5896  ;;  %v677_v24 = vadd.f32 1.0, %v5895_v30  ;;  %v6734_v56 = vld [vmem:[#allocation2 + $0x52] sm:$0xff]  ;;  %v6738_v54 = vld [vmem:[#allocation2 + $0x80] sm:$0xff] }
  0x73   : > { %5287 = vmatmul.mubr.msk.f32.gmra.mxu0 %vm798_vm0, %v6608_v23  ;;  %v6617_v45 = vld [vmem:[#allocation2 + $0x169] sm:$0xff]  ;;  %821 = vst.msk [vmem:[#allocation2 + $0xb0] sm:$0xff] %vm798_vm0, %v772_v9  ;;  %v877_v43 = vadd.f32 1.0, %v5897_v60  ;;  %7990 = vst [vmem:[#allocation5_spill] sm:$0xff] %v6734_v56  ;;  %v6747_v60 = vld [vmem:[%s7962_s4 + $0xd8] sm:$0xff] }
  0x74   : > { %910 = vst.msk [vmem:[#allocation2 + $0xa8] sm:$0x1] %vm902_vm1, %v7965_v31  ;;  %5313 = vmatprep.mubr.msk.f32.mxu1 %vm798_vm0, %v6617_v45  ;;  %v725_v39 = vmul.f32 0.5, %v677_v24  ;;  %v6740_v9 = vld [vmem:[#allocation2 + $0x62] sm:$0xff]  ;;  %v6742_v30 = vld [vmem:[#allocation2 + $0x90] sm:$0xff] }
  0x75   : > { %v5899_v19 = vpop.eup %5898  ;;  %v883_v16 = vmul.f32 0.5, %v877_v43  ;;  %7991 = vst [vmem:[#allocation6_spill] sm:$0xff] %v6740_v9  ;;  %v6755_v24 = vld [vmem:[#allocation2 + $0x6a] sm:$0xff]  ;;  %v6759_v43 = vld [vmem:[#allocation2 + $0x98] sm:$0xff] }
  0x76   : > { %v878_v42 = vadd.f32 1.0, %v5899_v19  ;;  %v773_v1 = vmul.f32 %v725_v39, %v6528_v47  ;;  %v5901_v29 = vpop.eup %5900  ;;  %v952_v47 = vld [vmem:[#allocation2 + $0x8] sm:$0xff]  ;;  %7992 = vst [vmem:[#allocation7_spill] sm:$0xff] %v6755_v24  ;;  %v6761_v19 = vld [vmem:[#allocation2 + $0x7a] sm:$0xff] }
  0x77   : > { %v6625_v25 = vld [vmem:[#allocation2 + $0x171] sm:$0xff]  ;;  %v889_v40 = vmul.f32 %v883_v16, %v6536_v38  ;;  %v879_v46 = vadd.f32 1.0, %v5901_v29  ;;  %7993 = vst [vmem:[#allocation8_spill] sm:$0xff] %v6761_v19  ;;  %v6772_v16 = vld [vmem:[#allocation2 + $0x82] sm:$0xff]  ;;  %v6788_v29 = vld [vmem:[#allocation2 + $0x9a] sm:$0xff] }
  0x78   : > { %v884_v55 = vmul.f32 0.5, %v878_v42  ;;  %5314 = vmatmul.mubr.msk.f32.gmra.mxu1 %vm798_vm0, %v6625_v25  ;;  %822 = vst.msk [vmem:[#allocation2 + $0xb8] sm:$0xff] %vm798_vm0, %v773_v1  ;;  %v6640_v38 = vld [vmem:[#allocation2 + $0x18] sm:$0xff]  ;;  %7994 = vst [vmem:[#allocation9_spill] sm:$0xff] %v6772_v16 }
  0x79   : > { %929 = vst.msk [vmem:[#allocation2 + $0xb9] sm:$0x7f] %vm921_vm2, %v7965_v31  ;;  %5324 = vmatprep.mubr.msk.f32.mxu1 %vm798_vm0, %v951_v48  ;;  %v885_v57 = vmul.f32 0.5, %v879_v46  ;;  %v6778_v1 = vld [vmem:[#allocation2 + $0x92] sm:$0xff]  ;;  %v6780_v48 = vld [vmem:[#allocation2 + $0xc0] sm:$0xff]  ;;  %7996 = vst [vmem:[#allocation11_spill] sm:$0xff] %v6788_v29 }
  0x7a   : > { %v6631_v49 = vld [vmem:[#allocation2 + $0xa9] sm:$0xff]  ;;  %896 = vst.msk [vmem:[#allocation2 + $0x180] sm:$0xff] %vm798_vm0, %v889_v40  ;;  %v890_v33 = vmul.f32 %v884_v55, %v6549_v4  ;;  %v6653_v4 = vld [vmem:[#allocation2 + $0x20] sm:$0xff]  ;;  %7995 = vst [vmem:[#allocation10_spill] sm:$0xff] %v6778_v1 }
  0x7b   : > { %5289 = vmatprep.mubr.msk.f32.mxu0 %vm798_vm0, %v6631_v49  ;;  %919 = vst.msk [vmem:[#allocation2 + $0x180] sm:$0x1] %vm902_vm1, %v7965_v31  ;;  %v891_v15 = vmul.f32 %v885_v57, %v6570_v0  ;;  %v6672_v0 = vld [vmem:[#allocation2 + $0x38] sm:$0xff]  ;;  %v6763_v39 = vld [vmem:[#allocation2 + $0xa8] sm:$0xff]  ;;  %v6776_v42 = vld [vmem:[#allocation2 + $0xb0] sm:$0xff] }
  0x7c   : > { %897 = vst.msk [vmem:[#allocation2 + $0x188] sm:$0xff] %vm798_vm0, %v890_v33  ;;  %5325 = vmatmul.mubr.msk.f32.vlgmr.msra.gmra.mxu1 %vm798_vm0, %v952_v47  ;;  %v6792_v40 = vld [vmem:[#allocation2 + $0xc8] sm:$0xff]  ;;  %v6796_v46 = vld [vmem:[#allocation2 + $0xd8] sm:$0xff]  ;;  %v851_v57 = vld [vmem:[%s6480_s29 + $0x20] sm:$0xff] }
  0x7d   : > { %5429 = vmatpush3.msra.mxu1 %v6324_v37  ;;  %5327 = vmatprep.mubr.msk.f32.mxu1 %vm798_vm0, %v6640_v38  ;;  %898 = vst.msk [vmem:[#allocation2 + $0x190] sm:$0xff] %vm798_vm0, %v891_v15  ;;  %v1667_v37 = vld [vmem:[#allocation2 + $0xa] sm:$0xff]  ;;  %v850_v47 = vld [vmem:[%s6480_s29 + $0x18] sm:$0xff]  ;;  %v6811_v15 = vld [vmem:[#allocation2 + $0xe0] sm:$0xff] }
  0x7e   : > { %5430 = vmatprep.subr.mxu1 %v4716_v58  ;;  %938 = vst.msk [vmem:[#allocation2 + $0x191] sm:$0x7f] %vm921_vm2, %v7965_v31  ;;  %v6794_v55 = vld [vmem:[#allocation2 + $0xaa] sm:$0xff]  ;;  %v856_v33 = vmul.f32 %v6508_v13, %v850_v47  ;;  %v6830_v47 = vld [vmem:[#allocation2 + $0xf8] sm:$0xff]  ;;  %v6842_v31 = vld [vmem:[#allocation2 + $0xe2] sm:$0xff] }
  0x7f   : > { %v6658_v6 = vld [vmem:[#allocation2 + $0xb1] sm:$0xff]  ;;  %5431 = vmatpush3.msra.mxu1 %v4716_v58  ;;  %7997 = vst [vmem:[#allocation12_spill] sm:$0xff] %v6794_v55  ;;  %8002 = vst [vmem:[#allocation17_spill] sm:$0xff] %v6842_v31 }
  0x80   : > { %5290 = vmatmul.mubr.msk.f32.gmra.mxu0 %vm798_vm0, %v6658_v6  ;;  %5328 = vmatmul.mubr.msk.f32.gmra.mxu1 %vm798_vm0, %v6653_v4  ;;  %v6807_v58 = vld [vmem:[#allocation2 + $0xb2] sm:$0xff] }
  0x81   : > { %5380 = vmatprep.mubr.msk.f32.mxu0 %vm798_vm0, %v1666_v62  ;;  %5330 = vmatprep.mubr.msk.f32.mxu1 %vm798_vm0, %v6655_v5  ;;  %7998 = vst [vmem:[#allocation13_spill] sm:$0xff] %v6807_v58  ;;  %v862_v62 = vadd.f32 %v6525_v10, %v856_v33 }
  0x82   : > { %5432 = vmatprep.subr.mxu1 %v4715_v17 }
  0x83   : > { %5433 = vmatpush3.msra.mxu1 %v4715_v17  ;;  %v857_v17 = vmul.f32 %v6508_v13, %v851_v57  ;;  %v6832_v57 = vld [vmem:[#allocation2 + $0xda] sm:$0xff] }
  0x84   : > { %5381 = vmatmul.mubr.msk.f32.vlgmr.msra.gmra.mxu0 %vm798_vm0, %v1667_v37  ;;  %5331 = vmatmul.mubr.msk.f32.gmra.mxu1 %vm798_vm0, %v6672_v0  ;;  %v6815_v37 = vld [vmem:[#allocation2 + $0xc2] sm:$0xff]  ;;  %8001 = vst [vmem:[#allocation16_spill] sm:$0xff] %v6832_v57 }
  0x85   : > { %5485 = vmatpush3.msra.mxu0 %v6345_v27  ;;  %5383 = vmatprep.mubr.msk.f32.mxu0 %vm798_vm0, %v6674_v2  ;;  %v4751_v27 = vld [vmem:[%s7962_s4 + $0x88] sm:$0xff]  ;;  %7999 = vst [vmem:[#allocation14_spill] sm:$0xff] %v6815_v37 }
  0x86   : > { %5333 = vmatprep.mubr.msk.f32.mxu1 %vm798_vm0, %v6676_v8  ;;  %5486 = vmatprep.subr.mxu0 %v4752_v14 }
  0x87   : > { %5487 = vmatpush3.msra.mxu0 %v4752_v14  ;;  %5434 = vmatprep.subr.mxu1 %v4714_v50  ;;  %v6817_v14 = vld [vmem:[#allocation2 + $0xf0] sm:$0xff] }
  0x88   : > { %5384 = vmatmul.mubr.msk.f32.gmra.mxu0 %vm798_vm0, %v6690_v11  ;;  %5334 = vmatmul.mubr.msk.f32.gmra.mxu1 %vm798_vm0, %v6692_v59 }
  0x89   : > { %5386 = vmatprep.mubr.msk.f32.mxu0 %vm798_vm0, %v6694_v7  ;;  %5336 = vmatprep.mubr.msk.f32.mxu1 %vm798_vm0, %v6698_v61 }
  0x8a   : > { %5488 = vmatprep.subr.mxu0 %v4751_v27  ;;  %5435 = vmatpush3.msra.mxu1 %v4714_v50  ;;  %v868_v50 = vmul.f32 0.5, %v862_v62 }
  0x8b   : > { %5489 = vmatpush3.msra.mxu0 %v4751_v27  ;;  %5540 = vmatprep.subr.mxu1 %v6710_v12  ;;  %v863_v27 = vadd.f32 %v6525_v10, %v857_v17  ;;  %v6834_v17 = vld [vmem:[#allocation2 + $0x108] sm:$0xff] }
  0x8c   : > { %5387 = vmatmul.mubr.msk.f32.gmra.mxu0 %vm798_vm0, %v6714_v20  ;;  %5337 = vmatmul.mubr.msk.f32.gmra.mxu1 %vm798_vm0, %v6718_v63  ;;  %5902 = vtanh.f32 %v868_v50  ;;  %v6846_v50 = vld [vmem:[#allocation2 + $0x110] sm:$0xff] }
  0x8d   : > { %5389 = vmatprep.mubr.msk.f32.mxu0 %vm798_vm0, %v6720_v51  ;;  %5339 = vmatprep.mubr.msk.f32.mxu1 %vm798_vm0, %v6722_v21  ;;  %v869_v33 = vmul.f32 0.5, %v863_v27  ;;  %v6898_v51 = vld [vmem:[#allocation2 + $0x168] sm:$0xff] }
  0x8e   : > { %5490 = vmatprep.subr.mxu0 %v4750_v53 }
  0x8f   : > { %5491 = vmatpush3.msra.mxu0 %v4750_v53  ;;  %v6826_v53 = vld [vmem:[#allocation2 + $0xca] sm:$0xff]  ;;  %5904 = vtanh.f32 %v869_v33  ;;  %v6858_v33 = vld [vmem:[#allocation2 + $0xfa] sm:$0xff] }
  0x90   : > { %5390 = vmatmul.mubr.msk.f32.gmra.mxu0 %vm798_vm0, %v6734_v56  ;;  %5340 = vmatmul.mubr.msk.f32.gmra.mxu1 %vm798_vm0, %v6738_v54  ;;  %8000 = vst [vmem:[#allocation15_spill] sm:$0xff] %v6826_v53  ;;  %8004 = vst [vmem:[#allocation19_spill] sm:$0xff] %v6858_v33 }
  0x91   : > { %5392 = vmatprep.mubr.msk.f32.mxu0 %vm798_vm0, %v6740_v9  ;;  %5342 = vmatprep.mubr.msk.f32.mxu1 %vm798_vm0, %v6742_v30 }
  0x92   : > { %5596 = vmatprep.subr.mxu0 %v6747_v60 }
  0x94   : > { %5393 = vmatmul.mubr.msk.f32.gmra.mxu0 %vm798_vm0, %v6755_v24  ;;  %5343 = vmatmul.mubr.msk.f32.gmra.mxu1 %vm798_vm0, %v6759_v43  ;;  %v6894_v24 = vld [vmem:[#allocation2 + $0x158] sm:$0xff] }
  0x95   : > { %5395 = vmatprep.mubr.msk.f32.mxu0 %vm798_vm0, %v6761_v19  ;;  %5345 = vmatprep.mubr.msk.f32.mxu1 %vm798_vm0, %v6763_v39 }
  0x98   : > { %5396 = vmatmul.mubr.msk.f32.gmra.mxu0 %vm798_vm0, %v6772_v16  ;;  %5346 = vmatmul.mubr.msk.f32.gmra.mxu1 %vm798_vm0, %v6776_v42  ;;  %v6882_v16 = vld [vmem:[#allocation2 + $0x150] sm:$0xff] }
  0x99   : > { %5398 = vmatprep.mubr.msk.f32.mxu0 %vm798_vm0, %v6778_v1  ;;  %5348 = vmatprep.mubr.msk.f32.mxu1 %vm798_vm0, %v6780_v48  ;;  %v6880_v1 = vld [vmem:[#allocation2 + $0x122] sm:$0xff] }
  0x9a   : > { %8007 = vst [vmem:[#allocation22_spill] sm:$0xff] %v6880_v1 }
  0x9c   : > { %5399 = vmatmul.mubr.msk.f32.gmra.mxu0 %vm798_vm0, %v6788_v29  ;;  %5349 = vmatmul.mubr.msk.f32.gmra.mxu1 %vm798_vm0, %v6792_v40  ;;  %v5903_v29 = vpop.eup %5902 }
  0x9d   : > { %5401 = vmatprep.mubr.msk.f32.mxu0 %vm798_vm0, %v6794_v55  ;;  %5351 = vmatprep.mubr.msk.f32.mxu1 %vm798_vm0, %v6796_v46  ;;  %v6866_v55 = vld [vmem:[#allocation2 + $0x138] sm:$0xff]  ;;  %v880_v19 = vadd.f32 1.0, %v5903_v29 }
  0x9e   : > { %v6896_v29 = vld [vmem:[#allocation2 + $0x13a] sm:$0xff] }
  0x9f   : > { %v886_v9 = vmul.f32 0.5, %v880_v19  ;;  %v6910_v19 = vld [vmem:[#allocation2 + $0x170] sm:$0xff] }
  0xa0   : > { %5402 = vmatmul.mubr.msk.f32.gmra.mxu0 %vm798_vm0, %v6807_v58  ;;  %5352 = vmatmul.mubr.msk.f32.gmra.mxu1 %vm798_vm0, %v6811_v15  ;;  %v6850_v58 = vld [vmem:[#allocation2 + $0x120] sm:$0xff] }
  0xa1   : > { %5404 = vmatprep.mubr.msk.f32.mxu0 %vm798_vm0, %v6815_v37  ;;  %5354 = vmatprep.mubr.msk.f32.mxu1 %vm798_vm0, %v6817_v14  ;;  %v6848_v37 = vld [vmem:[#allocation2 + $0xf2] sm:$0xff] }
  0xa2   : > { %8003 = vst [vmem:[#allocation18_spill] sm:$0xff] %v6848_v37 }
  0xa4   : > { %5405 = vmatmul.mubr.msk.f32.gmra.mxu0 %vm798_vm0, %v6826_v53  ;;  %5355 = vmatmul.mubr.msk.f32.gmra.mxu1 %vm798_vm0, %v6830_v47  ;;  %v6864_v53 = vld [vmem:[#allocation2 + $0x10a] sm:$0xff] }
  0xa5   : > { %5407 = vmatprep.mubr.msk.f32.mxu0 %vm798_vm0, %v6832_v57  ;;  %5357 = vmatprep.mubr.msk.f32.mxu1 %vm798_vm0, %v6834_v17  ;;  %v6862_v57 = vld [vmem:[#allocation2 + $0x128] sm:$0xff]  ;;  %8005 = vst [vmem:[#allocation20_spill] sm:$0xff] %v6864_v53 }
  0xa8   : > { %5408 = vmatmul.mubr.msk.f32.gmra.mxu0 %vm798_vm0, %v6842_v31  ;;  %5358 = vmatmul.mubr.msk.f32.gmra.mxu1 %vm798_vm0, %v6846_v50  ;;  %v6878_v31 = vld [vmem:[#allocation2 + $0x140] sm:$0xff] }
  0xa9   : > { %5410 = vmatprep.mubr.msk.f32.mxu0 %vm798_vm0, %v6848_v37  ;;  %5360 = vmatprep.mubr.msk.f32.mxu1 %vm798_vm0, %v6850_v58  ;;  %v6874_v37 = vld [vmem:[#allocation2 + $0x112] sm:$0xff] }
  0xaa   : > { %8006 = vst [vmem:[#allocation21_spill] sm:$0xff] %v6874_v37 }
  0xac   : > { %5411 = vmatmul.mubr.msk.f32.gmra.mxu0 %vm798_vm0, %v6858_v33  ;;  %5361 = vmatmul.mubr.msk.f32.gmra.mxu1 %vm798_vm0, %v6862_v57  ;;  %v5905_v33 = vpop.eup %5904 }
  0xad   : > { %5413 = vmatprep.mubr.msk.f32.mxu0 %vm798_vm0, %v6864_v53  ;;  %5363 = vmatprep.mubr.msk.f32.mxu1 %vm798_vm0, %v6866_v55  ;;  %v6890_v53 = vld [vmem:[#allocation2 + $0x12a] sm:$0xff]  ;;  %v881_v56 = vadd.f32 1.0, %v5905_v33  ;;  %v6943_v33 = vld [vmem:[#allocation2 + $0x172] sm:$0xff] }
  0xae   : > { %8009 = vst [vmem:[#allocation23_spill] sm:$0xff] %v6943_v33 }
  0xaf   : > { %v887_v20 = vmul.f32 0.5, %v881_v56  ;;  %v6913_v56 = vld [vmem:[#allocation2 + $0x152] sm:$0xff] }
  0xb0   : > { %5414 = vmatmul.mubr.msk.f32.gmra.mxu0 %vm798_vm0, %v6874_v37  ;;  %5364 = vmatmul.mubr.msk.f32.gmra.mxu1 %vm798_vm0, %v6878_v31  ;;  %v892_v37 = vmul.f32 %v886_v9, %v862_v62  ;;  %v8008_v62 = vmov 0.0  }
  0xb1   : > { %5416 = vmatprep.mubr.msk.f32.mxu0 %vm798_vm0, %v6880_v1  ;;  %5366 = vmatprep.mubr.msk.f32.mxu1 %vm798_vm0, %v6882_v16  ;;  %v6906_v1 = vld [vmem:[#allocation2 + $0x142] sm:$0xff]  ;;  %v893_v9 = vmul.f32 %v887_v20, %v863_v27  ;;  %v6928_v20 = vld [vmem:[#allocation2 + $0x15a] sm:$0xff]  ;;  %v4788_v27 = vld [vmem:[%s7962_s4 + $0xb0] sm:$0xff] }
  0xb2   : > { %899 = vst.msk [vmem:[#allocation2 + $0x198] sm:$0xff] %vm798_vm0, %v892_v37  ;;  %v6932_v37 = vld [vmem:[#allocation2 + $0x16a] sm:$0xff] }
  0xb3   : > { %920 = vst.msk [vmem:[#allocation2 + $0x198] sm:$0x1] %vm902_vm1, %v8008_v62 }
  0xb4   : > { %5417 = vmatmul.mubr.msk.f32.gmra.mxu0 %vm798_vm0, %v6890_v53  ;;  %5367 = vmatmul.mubr.msk.f32.gmra.mxu1 %vm798_vm0, %v6894_v24  ;;  %948 = vst.msk [vmem:[#allocation2 + $0x198] sm:$0xff] %vm798_vm0, %v8008_v62  ;;  %900 = vst.msk [vmem:[#allocation2 + $0x1a0] sm:$0xff] %vm798_vm0, %v893_v9  ;;  %v4787_v9 = vld [vmem:[%s7962_s4 + $0xa8] sm:$0xff] }
  0xb5   : > { %5419 = vmatprep.mubr.msk.f32.mxu0 %vm798_vm0, %v6896_v29  ;;  %5369 = vmatprep.mubr.msk.f32.mxu1 %vm798_vm0, %v6898_v51  ;;  %949 = vst.msk [vmem:[#allocation2 + $0x1a0] sm:$0xff] %vm798_vm0, %v8008_v62 }
  0xb8   : > { %5420 = vmatmul.mubr.msk.f32.gmra.mxu0 %vm798_vm0, %v6906_v1  ;;  %5370 = vmatmul.mubr.msk.f32.gmra.mxu1 %vm798_vm0, %v6910_v19 }
  0xb9   : > { %5422 = vmatprep.mubr.msk.f32.mxu0 %vm798_vm0, %v6913_v56  ;;  %5436 = vmatprep.mubr.msk.f32.mxu1 %vm798_vm0, %v6640_v38  ;;  %v2447_v38 = vld [vmem:[#allocation2 + $0x19] sm:$0xff] }
  0xbc   : > { %5423 = vmatmul.mubr.msk.f32.gmra.mxu0 %vm798_vm0, %v6928_v20  ;;  %5437 = vmatmul.mubr.msk.f32.vlgmr.msra.gmra.mxu1 %vm798_vm0, %v6653_v4  ;;  %v2448_v4 = vld [vmem:[#allocation2 + $0x21] sm:$0xff] }
  0xbd   : > { %5425 = vmatprep.mubr.msk.f32.mxu0 %vm798_vm0, %v6932_v37  ;;  %5541 = vmatpush3.msra.mxu1 %v6710_v12  ;;  %v6958_v12 = vld [vmem:[#allocation2 + $0x31] sm:$0xff] }
  0xbe   : > { %5439 = vmatprep.mubr.msk.f32.mxu1 %vm798_vm0, %v6655_v5  ;;  %5542 = vmatprep.subr.mxu1 %v4788_v27 }
  0xbf   : > { %5543 = vmatpush3.msra.mxu1 %v4788_v27  ;;  %v4824_v27 = vld [vmem:[%s7962_s4 + $0xd0] sm:$0xff] }
  0xc0   : > { %5426 = vmatmul.mubr.msk.f32.gmra.mxu0 %vm798_vm0, %v6943_v33  ;;  %5440 = vmatmul.mubr.msk.f32.gmra.mxu1 %vm798_vm0, %v6672_v0  ;;  %v6972_v33 = vld [vmem:[#allocation2 + $0x39] sm:$0xff] }
  0xc1   : > { %5492 = vmatprep.mubr.msk.f32.mxu0 %vm798_vm0, %v2447_v38  ;;  %5442 = vmatprep.mubr.msk.f32.mxu1 %vm798_vm0, %v6676_v8  ;;  %v4786_v38 = vld [vmem:[%s7962_s4 + $0xa0] sm:$0xff] }
  0xc2   : > { %5544 = vmatprep.subr.mxu1 %v4787_v9 }
  0xc3   : > { %5545 = vmatpush3.msra.mxu1 %v4787_v9  ;;  %v4823_v9 = vld [vmem:[%s7962_s4 + $0xc8] sm:$0xff] }
  0xc4   : > { %5493 = vmatmul.mubr.msk.f32.vlgmr.msra.gmra.mxu0 %vm798_vm0, %v2448_v4  ;;  %5443 = vmatmul.mubr.msk.f32.gmra.mxu1 %vm798_vm0, %v6692_v59  ;;  %v4822_v4 = vld [vmem:[%s7962_s4 + $0xc0] sm:$0xff] }
  0xc5   : > { %5597 = vmatpush3.msra.mxu0 %v6747_v60  ;;  %5495 = vmatprep.mubr.msk.f32.mxu0 %vm798_vm0, %v6958_v12  ;;  %v6986_v60 = vld [vmem:[%s7962_s4 + $0xf8] sm:$0xff] }
  0xc6   : > { %5445 = vmatprep.mubr.msk.f32.mxu1 %vm798_vm0, %v6698_v61  ;;  %5598 = vmatprep.subr.mxu0 %v4824_v27 }
  0xc7   : > { %5599 = vmatpush3.msra.mxu0 %v4824_v27  ;;  %5546 = vmatprep.subr.mxu1 %v4786_v38  ;;  %v7081_v27 = vld [vmem:[#allocation2 + $0x111] sm:$0xff] }
  0xc8   : > { %5496 = vmatmul.mubr.msk.f32.gmra.mxu0 %vm798_vm0, %v6972_v33  ;;  %5446 = vmatmul.mubr.msk.f32.gmra.mxu1 %vm798_vm0, %v6718_v63 }
  0xc9   : > { %5498 = vmatprep.mubr.msk.f32.mxu0 %vm798_vm0, %v6400_v32  ;;  %5448 = vmatprep.mubr.msk.f32.mxu1 %vm798_vm0, %v6722_v21  ;;  %v7007_v32 = vld [vmem:[%s7962_s4 + $0x118] sm:$0xff] }
  0xca   : > { %5600 = vmatprep.subr.mxu0 %v4823_v9  ;;  %5547 = vmatpush3.msra.mxu1 %v4786_v38  ;;  %v7085_v38 = vld [vmem:[#allocation2 + $0x121] sm:$0xff] }
  0xcb   : > { %5601 = vmatpush3.msra.mxu0 %v4823_v9  ;;  %5652 = vmatprep.subr.mxu1 %v6986_v60 }
  0xcc   : > { %5499 = vmatmul.mubr.msk.f32.gmra.mxu0 %vm798_vm0, %v6423_v44  ;;  %5449 = vmatmul.mubr.msk.f32.gmra.mxu1 %vm798_vm0, %v6738_v54  ;;  %v852_v44 = vld [vmem:[%s6480_s29 + $0x28] sm:$0xff] }
  0xcd   : > { %5501 = vmatprep.mubr.msk.f32.mxu0 %vm798_vm0, %v6512_v36  ;;  %5451 = vmatprep.mubr.msk.f32.mxu1 %vm798_vm0, %v6742_v30  ;;  %v7035_v36 = vld [vmem:[#allocation2 + $0xc1] sm:$0xff] }
  0xce   : > { %5602 = vmatprep.subr.mxu0 %v4822_v4 }
  0xcf   : > { %5603 = vmatpush3.msra.mxu0 %v4822_v4 }
  0xd0   : > { %5502 = vmatmul.mubr.msk.f32.gmra.mxu0 %vm798_vm0, %v6531_v34  ;;  %5452 = vmatmul.mubr.msk.f32.gmra.mxu1 %vm798_vm0, %v6759_v43  ;;  %v858_v34 = vmul.f32 %v6508_v13, %v852_v44  ;;  %v7057_v13 = vld [vmem:[#allocation2 + $0xe1] sm:$0xff] }
  0xd1   : > { %5504 = vmatprep.mubr.msk.f32.mxu0 %vm798_vm0, %v6572_v52  ;;  %5454 = vmatprep.mubr.msk.f32.mxu1 %vm798_vm0, %v6763_v39 }
  0xd2   : > { %5708 = vmatprep.subr.mxu0 %v7007_v32  ;;  %v864_v52 = vadd.f32 %v6525_v10, %v858_v34  ;;  %v7061_v10 = vld [vmem:[#allocation2 + $0xf1] sm:$0xff]  ;;  %v7103_v34 = vld [vmem:[#allocation2 + $0x180] sm:$0xff] }
  0xd4   : > { %5505 = vmatmul.mubr.msk.f32.gmra.mxu0 %vm798_vm0, %v6579_v18  ;;  %5455 = vmatmul.mubr.msk.f32.gmra.mxu1 %vm798_vm0, %v6776_v42  ;;  %v7045_v18 = vld [vmem:[#allocation2 + $0xc9] sm:$0xff] }
  0xd5   : > { %5507 = vmatprep.mubr.msk.f32.mxu0 %vm798_vm0, %v6603_v22  ;;  %5457 = vmatprep.mubr.msk.f32.mxu1 %vm798_vm0, %v6780_v48  ;;  %v7049_v22 = vld [vmem:[#allocation2 + $0xd9] sm:$0xff] }
  0xd8   : > { %5508 = vmatmul.mubr.msk.f32.gmra.mxu0 %vm798_vm0, %v6608_v23  ;;  %5458 = vmatmul.mubr.msk.f32.gmra.mxu1 %vm798_vm0, %v6792_v40  ;;  %v870_v23 = vmul.f32 0.5, %v864_v52 }
  0xd9   : > { %5510 = vmatprep.mubr.msk.f32.mxu0 %vm798_vm0, %v6631_v49  ;;  %5460 = vmatprep.mubr.msk.f32.mxu1 %vm798_vm0, %v6796_v46  ;;  %v7069_v49 = vld [vmem:[#allocation2 + $0xf9] sm:$0xff] }
  0xda   : > { %5906 = vtanh.f32 %v870_v23 }
  0xdc   : > { %5511 = vmatmul.mubr.msk.f32.gmra.mxu0 %vm798_vm0, %v6658_v6  ;;  %5461 = vmatmul.mubr.msk.f32.gmra.mxu1 %vm798_vm0, %v6811_v15  ;;  %v7073_v6 = vld [vmem:[#allocation2 + $0x109] sm:$0xff] }
  0xdd   : > { %5513 = vmatprep.mubr.msk.f32.mxu0 %vm798_vm0, %v7035_v36  ;;  %5463 = vmatprep.mubr.msk.f32.mxu1 %vm798_vm0, %v6817_v14 }
  0xe0   : > { %5514 = vmatmul.mubr.msk.f32.gmra.mxu0 %vm798_vm0, %v7045_v18  ;;  %5464 = vmatmul.mubr.msk.f32.gmra.mxu1 %vm798_vm0, %v6830_v47 }
  0xe1   : > { %5516 = vmatprep.mubr.msk.f32.mxu0 %vm798_vm0, %v7049_v22  ;;  %5466 = vmatprep.mubr.msk.f32.mxu1 %vm798_vm0, %v6834_v17 }
  0xe4   : > { %5517 = vmatmul.mubr.msk.f32.gmra.mxu0 %vm798_vm0, %v7057_v13  ;;  %5467 = vmatmul.mubr.msk.f32.gmra.mxu1 %vm798_vm0, %v6846_v50 }
  0xe5   : > { %5519 = vmatprep.mubr.msk.f32.mxu0 %vm798_vm0, %v7061_v10  ;;  %5469 = vmatprep.mubr.msk.f32.mxu1 %vm798_vm0, %v6850_v58 }
  0xe7   : > { %v5907_v9 = vpop.eup %5906 }
  0xe8   : > { %5520 = vmatmul.mubr.msk.f32.gmra.mxu0 %vm798_vm0, %v7069_v49  ;;  %5470 = vmatmul.mubr.msk.f32.gmra.mxu1 %vm798_vm0, %v6862_v57  ;;  %v882_v4 = vadd.f32 1.0, %v5907_v9 }
  0xe9   : > { %5522 = vmatprep.mubr.msk.f32.mxu0 %vm798_vm0, %v7073_v6  ;;  %5472 = vmatprep.mubr.msk.f32.mxu1 %vm798_vm0, %v6866_v55 }
  0xea   : > { %v888_v44 = vmul.f32 0.5, %v882_v4  ;;  %v8016_v4 = vld [vmem:[#allocation9_spill] sm:$0xff] }
  0xec   : > { %5523 = vmatmul.mubr.msk.f32.gmra.mxu0 %vm798_vm0, %v7081_v27  ;;  %5473 = vmatmul.mubr.msk.f32.gmra.mxu1 %vm798_vm0, %v6878_v31  ;;  %v894_v23 = vmul.f32 %v888_v44, %v864_v52  ;;  %v8014_v52 = vld [vmem:[#allocation7_spill] sm:$0xff] }
  0xed   : > { %5525 = vmatprep.mubr.msk.f32.mxu0 %vm798_vm0, %v7085_v38  ;;  %5475 = vmatprep.mubr.msk.f32.mxu1 %vm798_vm0, %v6882_v16 }
  0xee   : > { %901 = vst.msk [vmem:[#allocation2 + $0x1a8] sm:$0xff] %vm798_vm0, %v894_v23 }
  0xef   : > { %939 = vst.msk [vmem:[#allocation2 + $0x1a9] sm:$0x7f] %vm921_vm2, %v8008_v62 }
  0xf0   : > { %5526 = vmatmul.mubr.msk.f32.gmra.mxu0 %vm798_vm0, %v6498_v41  ;;  %5476 = vmatmul.mubr.msk.f32.gmra.mxu1 %vm798_vm0, %v6894_v24  ;;  %v7114_v41 = vld [vmem:[#allocation2 + $0x188] sm:$0xff]  ;;  %950 = vst.msk [vmem:[#allocation2 + $0x1a8] sm:$0xff] %vm798_vm0, %v8008_v62 }
  0xf1   : > { %5528 = vmatprep.mubr.msk.f32.mxu0 %vm798_vm0, %v6551_v28  ;;  %5478 = vmatprep.mubr.msk.f32.mxu1 %vm798_vm0, %v6898_v51  ;;  %v7128_v28 = vld [vmem:[#allocation2 + $0x181] sm:$0xff] }
  0xf4   : > { %5529 = vmatmul.mubr.msk.f32.gmra.mxu0 %vm798_vm0, %v6559_v26  ;;  %5479 = vmatmul.mubr.msk.f32.gmra.mxu1 %vm798_vm0, %v6910_v19  ;;  %v4860_v26 = vld [vmem:[%s7962_s4 + $0xf0] sm:$0xff] }
  0xf5   : > { %5531 = vmatprep.mubr.msk.f32.mxu0 %vm798_vm0, %v6591_v35  ;;  %5481 = vmatprep.mubr.msk.f32.mxu1 %vm798_vm0, %v7103_v34  ;;  %v7139_v35 = vld [vmem:[#allocation2 + $0x189] sm:$0xff] }
  0xf8   : > { %5532 = vmatmul.mubr.msk.f32.gmra.mxu0 %vm798_vm0, %v6598_v3  ;;  %5482 = vmatmul.mubr.msk.f32.gmra.mxu1 %vm798_vm0, %v7114_v41  ;;  %v4859_v3 = vld [vmem:[%s7962_s4 + $0xe8] sm:$0xff] }
  0xf9   : > { %5534 = vmatprep.mubr.msk.f32.mxu0 %vm798_vm0, %v6617_v45  ;;  %5548 = vmatprep.mubr.msk.f32.mxu1 %vm798_vm0, %v6674_v2  ;;  %v8010_v45 = vld [vmem:[#allocation3_spill] sm:$0xff]  ;;  %v8011_v2 = vld [vmem:[#allocation4_spill] sm:$0xff] }
  0xfc   : > { %5535 = vmatmul.mubr.msk.f32.gmra.mxu0 %vm798_vm0, %v6625_v25  ;;  %5549 = vmatmul.mubr.msk.f32.vlgmr.msra.gmra.mxu1 %vm798_vm0, %v6690_v11  ;;  %v7151_v25 = vpop.f32.mrf.mxu1  ;;  %v4896_v11 = vld [vmem:[%s7962_s4 + $0x110] sm:$0xff] }
  0xfd   : > { %5537 = vmatprep.mubr.msk.f32.mxu0 %vm798_vm0, %v7128_v28  ;;  %5653 = vmatpush3.msra.mxu1 %v6986_v60  ;;  %v8013_v60 = vld [vmem:[#allocation6_spill] sm:$0xff] }
  0xfe   : > { %5551 = vmatprep.mubr.msk.f32.mxu1 %vm798_vm0, %v6694_v7  ;;  %5654 = vmatprep.subr.mxu1 %v4860_v26  ;;  %v8012_v7 = vld [vmem:[#allocation5_spill] sm:$0xff]  ;;  %v7164_v62 = vpop.f32.mrf.mxu1 }
  0xff   : > { %5655 = vmatpush3.msra.mxu1 %v4860_v26  ;;  %v8018_v26 = vld [vmem:[#allocation11_spill] sm:$0xff] }
 0x100   : > { %5538 = vmatmul.mubr.msk.f32.gmra.mxu0 %vm798_vm0, %v7139_v35  ;;  %5552 = vmatmul.mubr.msk.f32.gmra.mxu1 %vm798_vm0, %v8010_v45  ;;  %v7183_v9 = vpop.f32.mrf.mxu1  ;;  %v8019_v45 = vld [vmem:[#allocation12_spill] sm:$0xff] }
 0x101   : > { %5604 = vmatprep.mubr.msk.f32.mxu0 %vm798_vm0, %v6655_v5  ;;  %5554 = vmatprep.mubr.msk.f32.mxu1 %vm798_vm0, %v8011_v2  ;;  %v4858_v5 = vld [vmem:[%s7962_s4 + $0xe0] sm:$0xff] }
 0x102   : > { %5656 = vmatprep.subr.mxu1 %v4859_v3  ;;  %v7198_v23 = vpop.f32.mrf.mxu1 }
 0x103   : > { %5657 = vmatpush3.msra.mxu1 %v4859_v3 }
 0x104   : > { %5605 = vmatmul.mubr.msk.f32.vlgmr.msra.gmra.mxu0 %vm798_vm0, %v6672_v0  ;;  %5555 = vmatmul.mubr.msk.f32.gmra.mxu1 %vm798_vm0, %v8012_v7  ;;  %v4895_v0 = vld [vmem:[%s7962_s4 + $0x108] sm:$0xff] }
 0x105   : > { %5709 = vmatpush3.msra.mxu0 %v7007_v32  ;;  %5607 = vmatprep.mubr.msk.f32.mxu0 %vm798_vm0, %v6676_v8  ;;  %v7181_v32 = vpop.f32.mrf.mxu0  ;;  %v8015_v8 = vld [vmem:[#allocation8_spill] sm:$0xff] }
 0x106   : > { %5557 = vmatprep.mubr.msk.f32.mxu1 %vm798_vm0, %v8013_v60  ;;  %5710 = vmatprep.subr.mxu0 %v4896_v11 }
 0x107   : > { %5711 = vmatpush3.msra.mxu0 %v4896_v11  ;;  %5658 = vmatprep.subr.mxu1 %v4858_v5  ;;  %v7196_v44 = vpop.f32.mrf.mxu0  ;;  %v7210_v3 = vpop.f32.mrf.mxu1  ;;  %v8021_v11 = vld [vmem:[#allocation14_spill] sm:$0xff] }
 0x108   : > { %5608 = vmatmul.mubr.msk.f32.gmra.mxu0 %vm798_vm0, %v6692_v59  ;;  %5558 = vmatmul.mubr.msk.f32.gmra.mxu1 %vm798_vm0, %v8014_v52  ;;  %v4894_v59 = vld [vmem:[%s7962_s4 + $0x100] sm:$0xff] }
 0x109   : > { %5610 = vmatprep.mubr.msk.f32.mxu0 %vm798_vm0, %v6698_v61  ;;  %5560 = vmatprep.mubr.msk.f32.mxu1 %vm798_vm0, %v8015_v8  ;;  %v8017_v61 = vld [vmem:[#allocation10_spill] sm:$0xff]  ;;  %v7222_v2 = vpop.f32.mrf.mxu1  ;;  %v8027_v8 = vld [vmem:[#allocation20_spill] sm:$0xff] }
 0x10a   : > { %5712 = vmatprep.subr.mxu0 %v4895_v0  ;;  %5659 = vmatpush3.msra.mxu1 %v4858_v5  ;;  %v8023_v5 = vld [vmem:[#allocation16_spill] sm:$0xff] }
 0x10b   : > { %5713 = vmatpush3.msra.mxu0 %v4895_v0  ;;  %v8025_v0 = vld [vmem:[#allocation18_spill] sm:$0xff] }
 0x10c   : > { %5611 = vmatmul.mubr.msk.f32.gmra.mxu0 %vm798_vm0, %v6718_v63  ;;  %5561 = vmatmul.mubr.msk.f32.gmra.mxu1 %vm798_vm0, %v8016_v4  ;;  %v7208_v63 = vpop.f32.mrf.mxu0  ;;  %v8029_v4 = vld [vmem:[#allocation22_spill] sm:$0xff] }
 0x10d   : > { %5613 = vmatprep.mubr.msk.f32.mxu0 %vm798_vm0, %v6722_v21  ;;  %5563 = vmatprep.mubr.msk.f32.mxu1 %vm798_vm0, %v8017_v61  ;;  %v8020_v21 = vld [vmem:[#allocation13_spill] sm:$0xff] }
 0x10e   : > { %5714 = vmatprep.subr.mxu0 %v4894_v59  ;;  %v7234_v7 = vpop.f32.mrf.mxu1  ;;  %v3259_v61 = vld [vmem:[#allocation2 + $0x1a0] sm:$0xff] }
 0x10f   : > { %5715 = vmatpush3.msra.mxu0 %v4894_v59 }
 0x110   : > { %5614 = vmatmul.mubr.msk.f32.gmra.mxu0 %vm798_vm0, %v6738_v54  ;;  %5564 = vmatmul.mubr.msk.f32.gmra.mxu1 %vm798_vm0, %v8018_v26  ;;  %v7220_v54 = vpop.f32.mrf.mxu0  ;;  %v7246_v60 = vpop.f32.mrf.mxu1  ;;  %v4008_v26 = vld [vmem:[#allocation2 + $0x32] sm:$0xff] }
 0x111   : > { %5616 = vmatprep.mubr.msk.f32.mxu0 %vm798_vm0, %v6742_v30  ;;  %5566 = vmatprep.mubr.msk.f32.mxu1 %vm798_vm0, %v8019_v45  ;;  %v8022_v30 = vld [vmem:[#allocation15_spill] sm:$0xff] }
 0x114   : > { %5617 = vmatmul.mubr.msk.f32.gmra.mxu0 %vm798_vm0, %v6759_v43  ;;  %5567 = vmatmul.mubr.msk.f32.gmra.mxu1 %vm798_vm0, %v8020_v21  ;;  %v7232_v43 = vpop.f32.mrf.mxu0  ;;  %v3622_v21 = vld [vmem:[#allocation2 + $0x61] sm:$0xff] }
 0x115   : > { %5619 = vmatprep.mubr.msk.f32.mxu0 %vm798_vm0, %v6763_v39  ;;  %5569 = vmatprep.mubr.msk.f32.mxu1 %vm798_vm0, %v8021_v11  ;;  %v8024_v39 = vld [vmem:[#allocation17_spill] sm:$0xff] }
 0x118   : > { %5620 = vmatmul.mubr.msk.f32.gmra.mxu0 %vm798_vm0, %v6776_v42  ;;  %5570 = vmatmul.mubr.msk.f32.gmra.mxu1 %vm798_vm0, %v8022_v30  ;;  %v7244_v42 = vpop.f32.mrf.mxu0 }
 0x119   : > { %5622 = vmatprep.mubr.msk.f32.mxu0 %vm798_vm0, %v6780_v48  ;;  %5572 = vmatprep.mubr.msk.f32.mxu1 %vm798_vm0, %v8023_v5  ;;  %v8026_v48 = vld [vmem:[#allocation19_spill] sm:$0xff] }
 0x11c   : > { %5623 = vmatmul.mubr.msk.f32.gmra.mxu0 %vm798_vm0, %v6792_v40  ;;  %5573 = vmatmul.mubr.msk.f32.gmra.mxu1 %vm798_vm0, %v8024_v39  ;;  %v7256_v40 = vpop.f32.mrf.mxu0  ;;  %v4010_v39 = vld [vmem:[#allocation2 + $0x4a] sm:$0xff] }
 0x11d   : > { %5625 = vmatprep.mubr.msk.f32.mxu0 %vm798_vm0, %v6796_v46  ;;  %5575 = vmatprep.mubr.msk.f32.mxu1 %vm798_vm0, %v8025_v0  ;;  %v8028_v46 = vld [vmem:[#allocation21_spill] sm:$0xff] }
 0x11e   : > { %v7258_v52 = vpop.f32.mrf.mxu1 }
 0x120   : > { %5626 = vmatmul.mubr.msk.f32.gmra.mxu0 %vm798_vm0, %v6811_v15  ;;  %5576 = vmatmul.mubr.msk.f32.gmra.mxu1 %vm798_vm0, %v8026_v48  ;;  %v7268_v15 = vpop.f32.mrf.mxu0  ;;  %v7270_v59 = vpop.f32.mrf.mxu1  ;;  %v3624_v48 = vld [vmem:[#allocation2 + $0x79] sm:$0xff] }
 0x121   : > { %5628 = vmatprep.mubr.msk.f32.mxu0 %vm798_vm0, %v6817_v14  ;;  %5578 = vmatprep.mubr.msk.f32.mxu1 %vm798_vm0, %v8027_v8 }
 0x123   : > { %v7280_v14 = vpop.f32.mrf.mxu0 }
 0x124   : > { %5629 = vmatmul.mubr.msk.f32.gmra.mxu0 %vm798_vm0, %v6830_v47  ;;  %5579 = vmatmul.mubr.msk.f32.gmra.mxu1 %vm798_vm0, %v8028_v46 }
 0x125   : > { %5631 = vmatprep.mubr.msk.f32.mxu0 %vm798_vm0, %v6834_v17  ;;  %5581 = vmatprep.mubr.msk.f32.mxu1 %vm798_vm0, %v8029_v4  ;;  %v7292_v17 = vpop.f32.mrf.mxu0 }
 0x127   : > { %v7282_v47 = vpop.f32.mrf.mxu1 }
 0x128   : > { %5632 = vmatmul.mubr.msk.f32.gmra.mxu0 %vm798_vm0, %v6846_v50  ;;  %5582 = vmatmul.mubr.msk.f32.gmra.mxu1 %vm798_vm0, %v6890_v53 }
 0x129   : > { %5634 = vmatprep.mubr.msk.f32.mxu0 %vm798_vm0, %v6850_v58  ;;  %5584 = vmatprep.mubr.msk.f32.mxu1 %vm798_vm0, %v6896_v29  ;;  %v7294_v50 = vpop.f32.mrf.mxu1 }
 0x12b   : > { %v7304_v58 = vpop.f32.mrf.mxu0 }
 0x12c   : > { %5635 = vmatmul.mubr.msk.f32.gmra.mxu0 %vm798_vm0, %v6862_v57  ;;  %5585 = vmatmul.mubr.msk.f32.gmra.mxu1 %vm798_vm0, %v6906_v1  ;;  %v7312_v1 = vld [vmem:[#allocation2 + $0x182] sm:$0xff] }
 0x12d   : > { %5637 = vmatprep.mubr.msk.f32.mxu0 %vm798_vm0, %v6866_v55  ;;  %5587 = vmatprep.mubr.msk.f32.mxu1 %vm798_vm0, %v6913_v56  ;;  %v7316_v55 = vpop.f32.mrf.mxu0 }
 0x12f   : > { %v7306_v53 = vpop.f32.mrf.mxu1 }
 0x130   : > { %5638 = vmatmul.mubr.msk.f32.gmra.mxu0 %vm798_vm0, %v6878_v31  ;;  %5588 = vmatmul.mubr.msk.f32.gmra.mxu1 %vm798_vm0, %v6928_v20  ;;  %v8030_v31 = vld [vmem:[#allocation23_spill] sm:$0xff] }
 0x131   : > { %5640 = vmatprep.mubr.msk.f32.mxu0 %vm798_vm0, %v6882_v16  ;;  %5590 = vmatprep.mubr.msk.f32.mxu1 %vm798_vm0, %v6932_v37  ;;  %v7320_v57 = vpop.f32.mrf.mxu1  ;;  %v7326_v16 = vld [vmem:[#allocation2 + $0x18a] sm:$0xff] }
 0x132   : > { %v3620_v20 = vld [vmem:[#allocation2 + $0x49] sm:$0xff] }
 0x133   : > { %v7330_v29 = vpop.f32.mrf.mxu0 }
 0x134   : > { %5641 = vmatmul.mubr.msk.f32.gmra.mxu0 %vm798_vm0, %v6894_v24  ;;  %5591 = vmatmul.mubr.msk.f32.gmra.mxu1 %vm798_vm0, %v8030_v31 }
 0x135   : > { %5643 = vmatprep.mubr.msk.f32.mxu0 %vm798_vm0, %v6898_v51  ;;  %5593 = vmatprep.mubr.msk.f32.mxu1 %vm798_vm0, %v7312_v1  ;;  %v3258_v51 = vld [vmem:[#allocation2 + $0x198] sm:$0xff] }
 0x138   : > { %5644 = vmatmul.mubr.msk.f32.gmra.mxu0 %vm798_vm0, %v6910_v19  ;;  %v7332_v24 = vpop.f32.mrf.mxu1  ;;  %5594 = vmatmul.mubr.msk.f32.gmra.mxu1 %vm798_vm0, %v7326_v16  ;;  %v7344_v19 = vpop.f32.mrf.mxu0 }
 0x139   : > { %5646 = vmatprep.mubr.msk.f32.mxu0 %vm798_vm0, %v7103_v34  ;;  %5660 = vmatprep.mubr.msk.f32.mxu1 %vm798_vm0, %v6958_v12  ;;  %v3621_v12 = vld [vmem:[#allocation2 + $0x51] sm:$0xff] }
 0x13a   : > { %v7340_v56 = vpop.f32.mrf.mxu1 }
 0x13c   : > { %5647 = vmatmul.mubr.msk.f32.gmra.mxu0 %vm798_vm0, %v7114_v41  ;;  %v5326_v37 = vpop.f32.mrf.mxu1  ;;  %5661 = vmatmul.mubr.msk.f32.vlgmr.msra.gmra.mxu1 %vm798_vm0, %v6972_v33  ;;  %v4009_v33 = vld [vmem:[#allocation2 + $0x3a] sm:$0xff] }
 0x13d   : > { %5649 = vmatprep.mubr.msk.f32.mxu0 %vm798_vm0, %v3258_v51  ;;  %v1513_v34 = vadd.f32 %v5326_v37, %v7181_v32  ;;  %5663 = vmatprep.mubr.msk.f32.mxu1 %vm798_vm0, %v3620_v20  ;;  %v3623_v32 = vld [vmem:[#allocation2 + $0x69] sm:$0xff]  ;;  %v3625_v20 = vld [vmem:[#allocation2 + $0x81] sm:$0xff] }
 0x13e   : > { %v1507_v45 = vpop.f32.mrf.mxu1 }
 0x13f   : > { %v1508_v8 = vadd.f32 %v1507_v45, %v7196_v44  ;;  %v3626_v44 = vld [vmem:[#allocation2 + $0x91] sm:$0xff] }
 0x140   : > { %v7351_v11 = vpop.f32.mrf.mxu0  ;;  %5650 = vmatmul.mubr.msk.f32.gmra.mxu0 %vm798_vm0, %v3259_v61  ;;  %v5329_v41 = vpop.f32.mrf.mxu1  ;;  %5664 = vmatmul.mubr.msk.f32.gmra.mxu1 %vm798_vm0, %v3621_v12  ;;  %v4012_v61 = vld [vmem:[#allocation2 + $0x62] sm:$0xff] }
 0x141   : > { %5716 = vmatprep.mubr.msk.f32.mxu0 %vm798_vm0, %v4008_v26  ;;  %v1523_v30 = vadd.f32 %v5329_v41, %v7208_v63  ;;  %5666 = vmatprep.mubr.msk.f32.mxu1 %vm798_vm0, %v3622_v21  ;;  %v4011_v63 = vld [vmem:[#allocation2 + $0x52] sm:$0xff] }
 0x142   : > { %v7358_v5 = vpop.f32.mrf.mxu0  ;;  %v1517_v0 = vpop.f32.mrf.mxu1 }
 0x143   : > { %v1518_v45 = vadd.f32 %v1517_v0, %v7220_v54  ;;  %v4014_v54 = vld [vmem:[#allocation2 + $0x7a] sm:$0xff] }
 0x144   : > { %v5382_v46 = vpop.f32.mrf.mxu0  ;;  %5717 = vmatmul.mubr.msk.f32.vlgmr.msra.gmra.mxu0 %vm798_vm0, %v4009_v33  ;;  %v5332_v4 = vpop.f32.mrf.mxu1  ;;  %5667 = vmatmul.mubr.msk.f32.gmra.mxu1 %vm798_vm0, %v3623_v32  ;;  %v4013_v33 = vld [vmem:[#allocation2 + $0x6a] sm:$0xff] }
 0x145   : > { %v7363_v31 = vadd.f32 %v5382_v46, %v1513_v34  ;;  %5719 = vmatprep.mubr.msk.f32.mxu0 %vm798_vm0, %v4010_v39  ;;  %v1533_v51 = vadd.f32 %v5332_v4, %v7232_v43  ;;  %5669 = vmatprep.mubr.msk.f32.mxu1 %vm798_vm0, %v3624_v48  ;;  %v3627_v39 = vld [vmem:[#allocation2 + $0x99] sm:$0xff] }
 0x146   : > { %v1865_v37 = vpop.f32.mrf.mxu0  ;;  %v1527_v12 = vpop.f32.mrf.mxu1 }
 0x147   : > { %v7368_v26 = vadd.f32 %v1865_v37, %v1508_v8  ;;  %v1528_v21 = vadd.f32 %v1527_v12, %v7244_v42  ;;  %v3628_v42 = vld [vmem:[#allocation2 + $0xa9] sm:$0xff]  ;;  %v3629_v37 = vld [vmem:[#allocation2 + $0xb1] sm:$0xff] }
 0x148   : > { %v5385_v34 = vpop.f32.mrf.mxu0  ;;  %5720 = vmatmul.mubr.msk.f32.gmra.mxu0 %vm798_vm0, %v4011_v63  ;;  %v5335_v41 = vpop.f32.mrf.mxu1  ;;  %5670 = vmatmul.mubr.msk.f32.gmra.mxu1 %vm798_vm0, %v3625_v20  ;;  %v4016_v12 = vld [vmem:[#allocation2 + $0x92] sm:$0xff] }
 0x149   : > { %v7374_v43 = vadd.f32 %v5385_v34, %v1523_v30  ;;  %5722 = vmatprep.mubr.msk.f32.mxu0 %vm798_vm0, %v4012_v61  ;;  %v1543_v32 = vadd.f32 %v5335_v41, %v7256_v40  ;;  %5672 = vmatprep.mubr.msk.f32.mxu1 %vm798_vm0, %v3626_v44  ;;  %v4015_v40 = vld [vmem:[#allocation2 + $0x82] sm:$0xff] }
 0x14a   : > { %v1875_v48 = vpop.f32.mrf.mxu0  ;;  %v1537_v0 = vpop.f32.mrf.mxu1 }
 0x14b   : > { %v7379_v8 = vadd.f32 %v1875_v48, %v1518_v45  ;;  %v1538_v46 = vadd.f32 %v1537_v0, %v7268_v15 }
 0x14c   : > { %v5388_v4 = vpop.f32.mrf.mxu0  ;;  %5723 = vmatmul.mubr.msk.f32.gmra.mxu0 %vm798_vm0, %v4013_v33  ;;  %v5338_v30 = vpop.f32.mrf.mxu1  ;;  %5673 = vmatmul.mubr.msk.f32.gmra.mxu1 %vm798_vm0, %v3627_v39  ;;  %v4018_v39 = vld [vmem:[#allocation2 + $0xaa] sm:$0xff] }
 0x14d   : > { %v7384_v63 = vadd.f32 %v5388_v4, %v1533_v51  ;;  %5725 = vmatprep.mubr.msk.f32.mxu0 %vm798_vm0, %v4014_v54  ;;  %v1553_v20 = vadd.f32 %v5338_v30, %v7280_v14  ;;  %5675 = vmatprep.mubr.msk.f32.mxu1 %vm798_vm0, %v3628_v42  ;;  %v4017_v14 = vld [vmem:[#allocation2 + $0x9a] sm:$0xff]  ;;  %v4020_v4 = vld [vmem:[#allocation2 + $0xc2] sm:$0xff] }
 0x14e   : > { %v1885_v61 = vpop.f32.mrf.mxu0  ;;  %v1547_v44 = vpop.f32.mrf.mxu1 }
 0x14f   : > { %v7389_v15 = vadd.f32 %v1885_v61, %v1528_v21  ;;  %v1548_v45 = vadd.f32 %v1547_v44, %v7292_v17 }
 0x150   : > { %v5391_v34 = vpop.f32.mrf.mxu0  ;;  %5726 = vmatmul.mubr.msk.f32.gmra.mxu0 %vm798_vm0, %v4015_v40  ;;  %v5341_v51 = vpop.f32.mrf.mxu1  ;;  %5676 = vmatmul.mubr.msk.f32.gmra.mxu1 %vm798_vm0, %v3629_v37 }
 0x151   : > { %v7394_v41 = vadd.f32 %v5391_v34, %v1543_v32  ;;  %5728 = vmatprep.mubr.msk.f32.mxu0 %vm798_vm0, %v4016_v12  ;;  %v1563_v33 = vadd.f32 %v5341_v51, %v7304_v58  ;;  %5678 = vmatprep.mubr.msk.f32.mxu1 %vm798_vm0, %v7035_v36  ;;  %v4019_v58 = vld [vmem:[#allocation2 + $0xb2] sm:$0xff]  ;;  %v4022_v12 = vld [vmem:[#allocation2 + $0xda] sm:$0xff] }
 0x152   : > { %v1895_v21 = vpop.f32.mrf.mxu0  ;;  %v1557_v48 = vpop.f32.mrf.mxu1 }
 0x153   : > { %v7400_v17 = vadd.f32 %v1895_v21, %v1538_v46  ;;  %v1558_v54 = vadd.f32 %v1557_v48, %v7316_v55 }
 0x154   : > { %v5394_v0 = vpop.f32.mrf.mxu0  ;;  %5729 = vmatmul.mubr.msk.f32.gmra.mxu0 %vm798_vm0, %v4017_v14  ;;  %v5344_v32 = vpop.f32.mrf.mxu1  ;;  %5679 = vmatmul.mubr.msk.f32.gmra.mxu1 %vm798_vm0, %v7045_v18  ;;  %v4024_v14 = vld [vmem:[#allocation2 + $0xf2] sm:$0xff] }
 0x155   : > { %v7406_v42 = vadd.f32 %v5394_v0, %v1553_v20  ;;  %5731 = vmatprep.mubr.msk.f32.mxu0 %vm798_vm0, %v4018_v39  ;;  %v1573_v36 = vadd.f32 %v5344_v32, %v7330_v29  ;;  %5681 = vmatprep.mubr.msk.f32.mxu1 %vm798_vm0, %v7049_v22  ;;  %v4021_v29 = vld [vmem:[#allocation2 + $0xca] sm:$0xff] }
 0x156   : > { %v1905_v46 = vpop.f32.mrf.mxu0  ;;  %v1567_v55 = vpop.f32.mrf.mxu1  ;;  %v4026_v32 = vld [vmem:[#allocation2 + $0x10a] sm:$0xff] }
 0x157   : > { %v7412_v30 = vadd.f32 %v1905_v46, %v1548_v45  ;;  %v1568_v40 = vadd.f32 %v1567_v55, %v7344_v19 }
 0x158   : > { %v5397_v37 = vpop.f32.mrf.mxu0  ;;  %5732 = vmatmul.mubr.msk.f32.gmra.mxu0 %vm798_vm0, %v4019_v58  ;;  %v5347_v18 = vpop.f32.mrf.mxu1  ;;  %5682 = vmatmul.mubr.msk.f32.gmra.mxu1 %vm798_vm0, %v7057_v13 }
 0x159   : > { %v7418_v20 = vadd.f32 %v5397_v37, %v1563_v33  ;;  %5734 = vmatprep.mubr.msk.f32.mxu0 %vm798_vm0, %v4020_v4  ;;  %v1583_v22 = vadd.f32 %v5347_v18, %v7351_v11  ;;  %5684 = vmatprep.mubr.msk.f32.mxu1 %vm798_vm0, %v7061_v10  ;;  %v4023_v11 = vld [vmem:[#allocation2 + $0xe2] sm:$0xff] }
 0x15a   : > { %v1915_v61 = vpop.f32.mrf.mxu0  ;;  %v1577_v19 = vpop.f32.mrf.mxu1  ;;  %v3641_v37 = vld [vmem:[#allocation2 + $0x141] sm:$0xff] }
 0x15b   : > { %v7424_v44 = vadd.f32 %v1915_v61, %v1558_v54  ;;  %v1578_v45 = vadd.f32 %v1577_v19, %v7358_v5  ;;  %v4025_v54 = vld [vmem:[#allocation2 + $0xfa] sm:$0xff] }
 0x15c   : > { %v5400_v34 = vpop.f32.mrf.mxu0  ;;  %5735 = vmatmul.mubr.msk.f32.gmra.mxu0 %vm798_vm0, %v4021_v29  ;;  %v5350_v13 = vpop.f32.mrf.mxu1  ;;  %5685 = vmatmul.mubr.msk.f32.gmra.mxu1 %vm798_vm0, %v7069_v49  ;;  %v4028_v29 = vld [vmem:[#allocation2 + $0x122] sm:$0xff] }
 0x15d   : > { %v7430_v51 = vadd.f32 %v5400_v34, %v1573_v36  ;;  %5737 = vmatprep.mubr.msk.f32.mxu0 %vm798_vm0, %v4022_v12  ;;  %5687 = vmatprep.mubr.msk.f32.mxu1 %vm798_vm0, %v7073_v6  ;;  %v1593_v48 = vadd.f32 %v5350_v13, %v7151_v25  ;;  %v3639_v6 = vld [vmem:[#allocation2 + $0x129] sm:$0xff]  ;;  %v3640_v36 = vld [vmem:[#allocation2 + $0x139] sm:$0xff] }
 0x15e   : > { %v1925_v10 = vpop.f32.mrf.mxu0  ;;  %v1587_v33 = vpop.f32.mrf.mxu1  ;;  %v4029_v13 = vld [vmem:[#allocation2 + $0x12a] sm:$0xff] }
 0x15f   : > { %v7435_v21 = vadd.f32 %v1925_v10, %v1568_v40  ;;  %v1588_v4 = vadd.f32 %v1587_v33, %v7164_v62  ;;  %v3642_v62 = vld [vmem:[#allocation2 + $0x151] sm:$0xff] }
 0x160   : > { %v5403_v5 = vpop.f32.mrf.mxu0  ;;  %5738 = vmatmul.mubr.msk.f32.gmra.mxu0 %vm798_vm0, %v4023_v11  ;;  %v5353_v39 = vpop.f32.mrf.mxu1  ;;  %5688 = vmatmul.mubr.msk.f32.gmra.mxu1 %vm798_vm0, %v7081_v27  ;;  %v3643_v11 = vld [vmem:[#allocation2 + $0x159] sm:$0xff] }
 0x161   : > { %v7440_v49 = vadd.f32 %v5403_v5, %v1583_v22  ;;  %5740 = vmatprep.mubr.msk.f32.mxu0 %vm798_vm0, %v4024_v14  ;;  %5690 = vmatprep.mubr.msk.f32.mxu1 %vm798_vm0, %v7085_v38  ;;  %v1603_v40 = vadd.f32 %v5353_v39, %v7183_v9  ;;  %v4027_v38 = vld [vmem:[#allocation2 + $0x112] sm:$0xff]  ;;  %v4030_v14 = vld [vmem:[#allocation2 + $0x13a] sm:$0xff] }
 0x162   : > { %v1935_v0 = vpop.f32.mrf.mxu0  ;;  %v1597_v58 = vpop.f32.mrf.mxu1 }
 0x163   : > { %v7446_v46 = vadd.f32 %v1935_v0, %v1578_v45  ;;  %v1598_v12 = vadd.f32 %v1597_v58, %v7198_v23  ;;  %v3644_v23 = vld [vmem:[#allocation2 + $0x169] sm:$0xff] }
 0x164   : > { %v5406_v27 = vpop.f32.mrf.mxu0  ;;  %5741 = vmatmul.mubr.msk.f32.gmra.mxu0 %vm798_vm0, %v4025_v54  ;;  %v5356_v55 = vpop.f32.mrf.mxu1  ;;  %5691 = vmatmul.mubr.msk.f32.gmra.mxu1 %vm798_vm0, %v3639_v6  ;;  %v4031_v0 = vld [vmem:[#allocation2 + $0x142] sm:$0xff] }
 0x165   : > { %v7451_v25 = vadd.f32 %v5406_v27, %v1593_v48  ;;  %5743 = vmatprep.mubr.msk.f32.mxu0 %vm798_vm0, %v4026_v32  ;;  %5693 = vmatprep.mubr.msk.f32.mxu1 %vm798_vm0, %v3640_v36  ;;  %v1613_v34 = vadd.f32 %v5356_v55, %v7210_v3  ;;  %v3645_v32 = vld [vmem:[#allocation2 + $0x171] sm:$0xff] }
 0x166   : > { %v1945_v18 = vpop.f32.mrf.mxu0  ;;  %v1607_v22 = vpop.f32.mrf.mxu1  ;;  %v4032_v36 = vld [vmem:[#allocation2 + $0x152] sm:$0xff] }
 0x167   : > { %v7456_v61 = vadd.f32 %v1945_v18, %v1588_v4  ;;  %v1608_v39 = vadd.f32 %v1607_v22, %v7222_v2 }
 0x168   : > { %v5409_v19 = vpop.f32.mrf.mxu0  ;;  %5744 = vmatmul.mubr.msk.f32.gmra.mxu0 %vm798_vm0, %v4027_v38  ;;  %v5359_v45 = vpop.f32.mrf.mxu1  ;;  %5694 = vmatmul.mubr.msk.f32.gmra.mxu1 %vm798_vm0, %v3641_v37  ;;  %v4033_v37 = vld [vmem:[#allocation2 + $0x15a] sm:$0xff] }
 0x169   : > { %v7461_v9 = vadd.f32 %v5409_v19, %v1603_v40  ;;  %5746 = vmatprep.mubr.msk.f32.mxu0 %vm798_vm0, %v4028_v29  ;;  %5696 = vmatprep.mubr.msk.f32.mxu1 %vm798_vm0, %v3642_v62  ;;  %v1623_v6 = vadd.f32 %v5359_v45, %v7234_v7  ;;  %v4034_v29 = vld [vmem:[#allocation2 + $0x16a] sm:$0xff] }
 0x16a   : > { %v1955_v10 = vpop.f32.mrf.mxu0  ;;  %v1617_v33 = vpop.f32.mrf.mxu1 }
 0x16b   : > { %v7466_v5 = vadd.f32 %v1955_v10, %v1598_v12  ;;  %v1618_v27 = vadd.f32 %v1617_v33, %v7246_v60  ;;  %v3648_v60 = vld [vmem:[#allocation2 + $0x199] sm:$0xff] }
 0x16c   : > { %v5412_v48 = vpop.f32.mrf.mxu0  ;;  %5747 = vmatmul.mubr.msk.f32.gmra.mxu0 %vm798_vm0, %v4029_v13  ;;  %v5362_v54 = vpop.f32.mrf.mxu1  ;;  %5697 = vmatmul.mubr.msk.f32.gmra.mxu1 %vm798_vm0, %v3643_v11  ;;  %v3649_v13 = vld [vmem:[#allocation2 + $0x1a1] sm:$0xff] }
 0x16d   : > { %v7471_v3 = vadd.f32 %v5412_v48, %v1613_v34  ;;  %5749 = vmatprep.mubr.msk.f32.mxu0 %vm798_vm0, %v4030_v14  ;;  %5699 = vmatprep.mubr.msk.f32.mxu1 %vm798_vm0, %v3644_v23  ;;  %v1633_v38 = vadd.f32 %v5362_v54, %v7258_v52 }
 0x16e   : > { %v1965_v58 = vpop.f32.mrf.mxu0  ;;  %v1627_v4 = vpop.f32.mrf.mxu1 }
 0x16f   : > { %v7476_v2 = vadd.f32 %v1965_v58, %v1608_v39  ;;  %v1628_v12 = vadd.f32 %v1627_v4, %v7270_v59 }
 0x170   : > { %v5415_v55 = vpop.f32.mrf.mxu0  ;;  %5750 = vmatmul.mubr.msk.f32.gmra.mxu0 %vm798_vm0, %v4031_v0  ;;  %v5365_v40 = vpop.f32.mrf.mxu1  ;;  %5700 = vmatmul.mubr.msk.f32.gmra.mxu1 %vm798_vm0, %v3645_v32 }
 0x171   : > { %v7481_v7 = vadd.f32 %v5415_v55, %v1623_v6  ;;  %5752 = vmatprep.mubr.msk.f32.mxu0 %vm798_vm0, %v4032_v36  ;;  %5702 = vmatprep.mubr.msk.f32.mxu1 %vm798_vm0, %v7128_v28  ;;  %v1643_v34 = vadd.f32 %v5365_v40, %v7282_v47  ;;  %v4035_v28 = vld [vmem:[#allocation2 + $0x172] sm:$0xff]  ;;  %v4038_v6 = vld [vmem:[#allocation2 + $0x19a] sm:$0xff] }
 0x172   : > { %v1975_v18 = vpop.f32.mrf.mxu0  ;;  %v1637_v22 = vpop.f32.mrf.mxu1 }
 0x173   : > { %v7487_v62 = vadd.f32 %v1975_v18, %v1618_v27  ;;  %v1638_v14 = vadd.f32 %v1637_v22, %v7294_v50 }
 0x174   : > { %v5418_v19 = vpop.f32.mrf.mxu0  ;;  %5753 = vmatmul.mubr.msk.f32.gmra.mxu0 %vm798_vm0, %v4033_v37  ;;  %v5368_v45 = vpop.f32.mrf.mxu1  ;;  %5703 = vmatmul.mubr.msk.f32.gmra.mxu1 %vm798_vm0, %v7139_v35 }
 0x175   : > { %v7493_v52 = vadd.f32 %v5418_v19, %v1633_v38  ;;  %5755 = vmatprep.mubr.msk.f32.mxu0 %vm798_vm0, %v4034_v29  ;;  %5705 = vmatprep.mubr.msk.f32.mxu1 %vm798_vm0, %v3648_v60  ;;  %v1653_v39 = vadd.f32 %v5368_v45, %v7306_v53  ;;  %v4039_v53 = vld [vmem:[#allocation2 + $0x1a2] sm:$0xff] }
 0x176   : > { %v1985_v11 = vpop.f32.mrf.mxu0  ;;  %v1647_v10 = vpop.f32.mrf.mxu1 }
 0x177   : > { %v7498_v59 = vadd.f32 %v1985_v11, %v1628_v12  ;;  %v1648_v33 = vadd.f32 %v1647_v10, %v7320_v57 }
 0x178   : > { %v5421_v23 = vpop.f32.mrf.mxu0  ;;  %5756 = vmatmul.mubr.msk.f32.gmra.mxu0 %vm798_vm0, %v4035_v28  ;;  %v5371_v35 = vpop.f32.mrf.mxu1  ;;  %5706 = vmatmul.mubr.msk.f32.gmra.mxu1 %vm798_vm0, %v3649_v13 }
 0x179   : > { %v7504_v47 = vadd.f32 %v5421_v23, %v1643_v34  ;;  %5758 = vmatprep.mubr.msk.f32.mxu0 %vm798_vm0, %v7312_v1  ;;  %v1663_v48 = vadd.f32 %v5371_v35, %v7332_v24 }
 0x17a   : > { %v1995_v54 = vpop.f32.mrf.mxu0  ;;  %v1657_v50 = vpop.f32.mrf.mxu1 }
 0x17b   : > { %v7510_v0 = vadd.f32 %v1995_v54, %v1638_v14  ;;  %v1658_v57 = vadd.f32 %v1657_v50, %v7340_v56 }
 0x17c   : > { %v5424_v32 = vpop.f32.mrf.mxu0  ;;  %5759 = vmatmul.mubr.msk.f32.gmra.mxu0 %vm798_vm0, %v7326_v16  ;;  %v5438_v58 = vpop.f32.mrf.mxu1 }
 0x17d   : > { %v7515_v36 = vadd.f32 %v5424_v32, %v1653_v39  ;;  %5761 = vmatprep.mubr.msk.f32.mxu0 %vm798_vm0, %v4038_v6  ;;  %v2416_v1 = vadd.f32 %v5438_v58, %v7363_v31 }
 0x17e   : > { %v2005_v24 = vpop.f32.mrf.mxu0  ;;  %v2256_v4 = vpop.f32.mrf.mxu1 }
 0x17f   : > { %v7519_v27 = vadd.f32 %v2005_v24, %v1648_v33  ;;  %v2415_v55 = vadd.f32 %v2256_v4, %v7368_v26 }
 0x180   : > { %v5427_v40 = vpop.f32.mrf.mxu0  ;;  %5762 = vmatmul.mubr.msk.f32.gmra.mxu0 %vm798_vm0, %v4039_v53  ;;  %v5441_v56 = vpop.f32.mrf.mxu1 }
 0x181   : > { %v7523_v38 = vadd.f32 %v5427_v40, %v1663_v48  ;;  %v2418_v16 = vadd.f32 %v5441_v56, %v7374_v43 }
 0x182   : > { %v2015_v37 = vpop.f32.mrf.mxu0  ;;  %v2266_v18 = vpop.f32.mrf.mxu1 }
 0x183   : > { %v7526_v29 = vadd.f32 %v2015_v37, %v1658_v57  ;;  %v2417_v31 = vadd.f32 %v2266_v18, %v7379_v8 }
 0x184   : > { %v5494_v22 = vpop.f32.mrf.mxu0  ;;  %v5444_v60 = vpop.f32.mrf.mxu1 }
 0x185   : > { %v7529_v12 = vadd.f32 %v5494_v22, %v2416_v1  ;;  %v2420_v26 = vadd.f32 %v5444_v60, %v7384_v63 }
 0x186   : > { %v2646_v19 = vpop.f32.mrf.mxu0  ;;  %v2276_v45 = vpop.f32.mrf.mxu1 }
 0x187   : > { %v7532_v34 = vadd.f32 %v2646_v19, %v2415_v55  ;;  %v2419_v28 = vadd.f32 %v2276_v45, %v7389_v15 }
 0x188   : > { %v5497_v13 = vpop.f32.mrf.mxu0  ;;  %v5447_v43 = vpop.f32.mrf.mxu1 }
 0x189   : > { %v7535_v11 = vadd.f32 %v5497_v13, %v2418_v16  ;;  %v2422_v10 = vadd.f32 %v5447_v43, %v7394_v41 }
 0x18a   : > { %v2656_v14 = vpop.f32.mrf.mxu0  ;;  %v2286_v8 = vpop.f32.mrf.mxu1 }
 0x18b   : > { %v7538_v33 = vadd.f32 %v2656_v14, %v2417_v31  ;;  %v2421_v23 = vadd.f32 %v2286_v8, %v7400_v17 }
 0x18c   : > { %v5500_v35 = vpop.f32.mrf.mxu0  ;;  %v5450_v63 = vpop.f32.mrf.mxu1 }
 0x18d   : > { %v7541_v39 = vadd.f32 %v5500_v35, %v2420_v26  ;;  %v2424_v48 = vadd.f32 %v5450_v63, %v7406_v42 }
 0x18e   : > { %v2666_v54 = vpop.f32.mrf.mxu0  ;;  %v2296_v15 = vpop.f32.mrf.mxu1 }
 0x18f   : > { %v7544_v6 = vadd.f32 %v2666_v54, %v2419_v28  ;;  %v2423_v50 = vadd.f32 %v2296_v15, %v7412_v30 }
 0x190   : > { %v5503_v57 = vpop.f32.mrf.mxu0  ;;  %v5453_v41 = vpop.f32.mrf.mxu1 }
 0x191   : > { %v7547_v32 = vadd.f32 %v5503_v57, %v2422_v10  ;;  %v2426_v58 = vadd.f32 %v5453_v41, %v7418_v20 }
 0x192   : > { %v2676_v53 = vpop.f32.mrf.mxu0  ;;  %v2306_v17 = vpop.f32.mrf.mxu1 }
 0x193   : > { %v7550_v1 = vadd.f32 %v2676_v53, %v2421_v23  ;;  %v2425_v24 = vadd.f32 %v2306_v17, %v7424_v44 }
 0x194   : > { %v5506_v4 = vpop.f32.mrf.mxu0  ;;  %v5456_v42 = vpop.f32.mrf.mxu1 }
 0x195   : > { %v7553_v55 = vadd.f32 %v5506_v4, %v2424_v48  ;;  %v2428_v40 = vadd.f32 %v5456_v42, %v7430_v51 }
 0x196   : > { %v2686_v56 = vpop.f32.mrf.mxu0  ;;  %v2316_v30 = vpop.f32.mrf.mxu1 }
 0x197   : > { %v7556_v16 = vadd.f32 %v2686_v56, %v2423_v50  ;;  %v2427_v37 = vadd.f32 %v2316_v30, %v7435_v21 }
 0x198   : > { %v5509_v18 = vpop.f32.mrf.mxu0  ;;  %v5459_v20 = vpop.f32.mrf.mxu1 }
 0x199   : > { %v7559_v31 = vadd.f32 %v5509_v18, %v2426_v58  ;;  %v2430_v22 = vadd.f32 %v5459_v20, %v7440_v49 }
 0x19a   : > { %v2696_v60 = vpop.f32.mrf.mxu0  ;;  %v2326_v44 = vpop.f32.mrf.mxu1 }
 0x19b   : > { %v7562_v26 = vadd.f32 %v2696_v60, %v2425_v24  ;;  %v2429_v19 = vadd.f32 %v2326_v44, %v7446_v46 }
 0x19c   : > { %v5512_v45 = vpop.f32.mrf.mxu0  ;;  %v5462_v51 = vpop.f32.mrf.mxu1 }
 0x19d   : > { %v7565_v28 = vadd.f32 %v5512_v45, %v2428_v40  ;;  %v2432_v13 = vadd.f32 %v5462_v51, %v7451_v25 }
 0x19e   : > { %v2706_v43 = vpop.f32.mrf.mxu0  ;;  %v2336_v21 = vpop.f32.mrf.mxu1 }
 0x19f   : > { %v7568_v10 = vadd.f32 %v2706_v43, %v2427_v37  ;;  %v2431_v14 = vadd.f32 %v2336_v21, %v7456_v61 }
 0x1a0   : > { %v5515_v8 = vpop.f32.mrf.mxu0  ;;  %v5465_v49 = vpop.f32.mrf.mxu1 }
 0x1a1   : > { %v7571_v23 = vadd.f32 %v5515_v8, %v2430_v22  ;;  %v2434_v35 = vadd.f32 %v5465_v49, %v7461_v9 }
 0x1a2   : > { %v2716_v63 = vpop.f32.mrf.mxu0  ;;  %v2346_v46 = vpop.f32.mrf.mxu1 }
 0x1a3   : > { %v7574_v48 = vadd.f32 %v2716_v63, %v2429_v19  ;;  %v2433_v54 = vadd.f32 %v2346_v46, %v7466_v5 }
 0x1a4   : > { %v5518_v15 = vpop.f32.mrf.mxu0  ;;  %v5468_v25 = vpop.f32.mrf.mxu1 }
 0x1a5   : > { %v7577_v50 = vadd.f32 %v5518_v15, %v2432_v13  ;;  %v2436_v57 = vadd.f32 %v5468_v25, %v7471_v3 }
 0x1a6   : > { %v2726_v41 = vpop.f32.mrf.mxu0  ;;  %v2356_v61 = vpop.f32.mrf.mxu1 }
 0x1a7   : > { %v7580_v58 = vadd.f32 %v2726_v41, %v2431_v14  ;;  %v2435_v53 = vadd.f32 %v2356_v61, %v7476_v2 }
 0x1a8   : > { %v5521_v17 = vpop.f32.mrf.mxu0  ;;  %v5471_v9 = vpop.f32.mrf.mxu1 }
 0x1a9   : > { %v7583_v24 = vadd.f32 %v5521_v17, %v2434_v35  ;;  %v2438_v4 = vadd.f32 %v5471_v9, %v7481_v7 }
 0x1aa   : > { %v2736_v42 = vpop.f32.mrf.mxu0  ;;  %v2366_v5 = vpop.f32.mrf.mxu1 }
 0x1ab   : > { %8031 = vst [vmem:[#allocation3_spill] sm:$0xff] %v7583_v24  ;;  %v7586_v40 = vadd.f32 %v2736_v42, %v2433_v54  ;;  %v2437_v56 = vadd.f32 %v2366_v5, %v7487_v62 }
 0x1ac   : > { %v5524_v30 = vpop.f32.mrf.mxu0  ;;  %v5474_v3 = vpop.f32.mrf.mxu1 }
 0x1ad   : > { %8032 = vst [vmem:[#allocation4_spill] sm:$0xff] %v7586_v40  ;;  %v7589_v37 = vadd.f32 %v5524_v30, %v2436_v57  ;;  %v2440_v18 = vadd.f32 %v5474_v3, %v7493_v52 }
 0x1ae   : > { %v2746_v20 = vpop.f32.mrf.mxu0  ;;  %v2376_v2 = vpop.f32.mrf.mxu1 }
 0x1af   : > { %8033 = vst [vmem:[#allocation5_spill] sm:$0xff] %v7589_v37  ;;  %v7592_v22 = vadd.f32 %v2746_v20, %v2435_v53  ;;  %v2439_v60 = vadd.f32 %v2376_v2, %v7498_v59 }
 0x1b0   : > { %v5527_v44 = vpop.f32.mrf.mxu0  ;;  %v5477_v7 = vpop.f32.mrf.mxu1 }
 0x1b1   : > { %8034 = vst [vmem:[#allocation6_spill] sm:$0xff] %v7592_v22  ;;  %v7595_v19 = vadd.f32 %v5527_v44, %v2438_v4  ;;  %v2442_v45 = vadd.f32 %v5477_v7, %v7504_v47 }
 0x1b2   : > { %v2756_v51 = vpop.f32.mrf.mxu0  ;;  %v2386_v62 = vpop.f32.mrf.mxu1 }
 0x1b3   : > { %8035 = vst [vmem:[#allocation7_spill] sm:$0xff] %v7595_v19  ;;  %v7598_v13 = vadd.f32 %v2756_v51, %v2437_v56  ;;  %v2441_v43 = vadd.f32 %v2386_v62, %v7510_v0 }
 0x1b4   : > { %v5530_v21 = vpop.f32.mrf.mxu0  ;;  %v5480_v52 = vpop.f32.mrf.mxu1 }
 0x1b5   : > { %8036 = vst [vmem:[#allocation8_spill] sm:$0xff] %v7598_v13  ;;  %v7601_v14 = vadd.f32 %v5530_v21, %v2440_v18  ;;  %v2444_v8 = vadd.f32 %v5480_v52, %v7515_v36 }
 0x1b6   : > { %v2766_v49 = vpop.f32.mrf.mxu0  ;;  %v2396_v59 = vpop.f32.mrf.mxu1 }
 0x1b7   : > { %8037 = vst [vmem:[#allocation9_spill] sm:$0xff] %v7601_v14  ;;  %v7604_v35 = vadd.f32 %v2766_v49, %v2439_v60  ;;  %v2443_v63 = vadd.f32 %v2396_v59, %v7519_v27 }
 0x1b8   : > { %v5533_v46 = vpop.f32.mrf.mxu0  ;;  %v5483_v47 = vpop.f32.mrf.mxu1 }
 0x1b9   : > { %8038 = vst [vmem:[#allocation10_spill] sm:$0xff] %v7604_v35  ;;  %v7607_v54 = vadd.f32 %v5533_v46, %v2442_v45  ;;  %v2446_v15 = vadd.f32 %v5483_v47, %v7523_v38 }
 0x1ba   : > { %v2776_v25 = vpop.f32.mrf.mxu0  ;;  %v2406_v0 = vpop.f32.mrf.mxu1 }
 0x1bb   : > { %8039 = vst [vmem:[#allocation11_spill] sm:$0xff] %v7607_v54  ;;  %v7610_v57 = vadd.f32 %v2776_v25, %v2441_v43  ;;  %v2445_v41 = vadd.f32 %v2406_v0, %v7526_v29 }
 0x1bc   : > { %v5536_v61 = vpop.f32.mrf.mxu0  ;;  %v7613_v36 = vpop.f32.mrf.mxu1 }
 0x1bd   : > { %8040 = vst [vmem:[#allocation12_spill] sm:$0xff] %v7610_v57  ;;  %v7615_v53 = vadd.f32 %v5536_v61, %v2444_v8 }
 0x1be   : > { %v2786_v17 = vpop.f32.mrf.mxu0  ;;  %v7617_v9 = vpop.f32.mrf.mxu1 }
 0x1bf   : > { %8041 = vst [vmem:[#allocation13_spill] sm:$0xff] %v7615_v53  ;;  %v7619_v27 = vadd.f32 %v2786_v17, %v2443_v63 }
 0x1c0   : > { %v5539_v4 = vpop.f32.mrf.mxu0  ;;  %v7621_v42 = vpop.f32.mrf.mxu1 }
 0x1c1   : > { %8042 = vst [vmem:[#allocation14_spill] sm:$0xff] %v7619_v27  ;;  %v7623_v38 = vadd.f32 %v5539_v4, %v2446_v15 }
 0x1c2   : > { %v2796_v5 = vpop.f32.mrf.mxu0  ;;  %v7625_v56 = vpop.f32.mrf.mxu1 }
 0x1c3   : > { %8043 = vst [vmem:[#allocation15_spill] sm:$0xff] %v7623_v38  ;;  %v7627_v30 = vadd.f32 %v2796_v5, %v2445_v41 }
 0x1c4   : > { %v5606_v29 = vpop.f32.mrf.mxu0  ;;  %v7629_v3 = vpop.f32.mrf.mxu1 }
 0x1c5   : > { %8044 = vst [vmem:[#allocation16_spill] sm:$0xff] %v7627_v30 }
 0x1c6   : > { %v7631_v18 = vpop.f32.mrf.mxu0  ;;  %v7633_v20 = vpop.f32.mrf.mxu1 }
 0x1c8   : > { %v7635_v2 = vpop.f32.mrf.mxu0  ;;  %v7637_v60 = vpop.f32.mrf.mxu1 }
 0x1ca   : > { %v7639_v44 = vpop.f32.mrf.mxu0  ;;  %v7641_v7 = vpop.f32.mrf.mxu1 }
 0x1cc   : > { %v7643_v45 = vpop.f32.mrf.mxu0  ;;  %v7645_v51 = vpop.f32.mrf.mxu1 }
 0x1ce   : > { %v7647_v62 = vpop.f32.mrf.mxu0  ;;  %v7649_v43 = vpop.f32.mrf.mxu1 }
 0x1d0   : > { %v7651_v21 = vpop.f32.mrf.mxu0  ;;  %v7653_v52 = vpop.f32.mrf.mxu1 }
 0x1d2   : > { %v7655_v8 = vpop.f32.mrf.mxu0  ;;  %v7657_v49 = vpop.f32.mrf.mxu1 }
 0x1d4   : > { %v7659_v59 = vpop.f32.mrf.mxu0  ;;  %v7661_v63 = vpop.f32.mrf.mxu1 }
 0x1d6   : > { %v7663_v46 = vpop.f32.mrf.mxu0  ;;  %v7665_v47 = vpop.f32.mrf.mxu1 }
 0x1d8   : > { %v7667_v15 = vpop.f32.mrf.mxu0  ;;  %v7669_v25 = vpop.f32.mrf.mxu1 }
 0x1da   : > { %v7671_v0 = vpop.f32.mrf.mxu0  ;;  %v7673_v41 = vpop.f32.mrf.mxu1 }
 0x1dc   : > { %v7675_v61 = vpop.f32.mrf.mxu0  ;;  %v7677_v17 = vpop.f32.mrf.mxu1 }
 0x1de   : > { %v7679_v4 = vpop.f32.mrf.mxu0  ;;  %v7681_v5 = vpop.f32.mrf.mxu1 }
 0x1e0   : > { %v7683_v30 = vpop.f32.mrf.mxu0  ;;  %v7685_v38 = vpop.f32.mrf.mxu1 }
 0x1e1   : > { %8045 = vst [vmem:[#allocation17_spill] sm:$0xff] %v7685_v38 }
 0x1e2   : > { %v7687_v27 = vpop.f32.mrf.mxu0  ;;  %v7689_v53 = vpop.f32.mrf.mxu1 }
 0x1e3   : > { %8046 = vst [vmem:[#allocation18_spill] sm:$0xff] %v7689_v53 }
 0x1e4   : > { %v7691_v57 = vpop.f32.mrf.mxu0  ;;  %v7693_v54 = vpop.f32.mrf.mxu1 }
 0x1e5   : > { %8047 = vst [vmem:[#allocation19_spill] sm:$0xff] %v7691_v57  ;;  %8048 = vst [vmem:[#allocation20_spill] sm:$0xff] %v7693_v54 }
 0x1e6   : > { %v7695_v35 = vpop.f32.mrf.mxu0  ;;  %v7697_v14 = vpop.f32.mrf.mxu1 }
 0x1e7   : > { %8049 = vst [vmem:[#allocation21_spill] sm:$0xff] %v7695_v35  ;;  %8050 = vst [vmem:[#allocation22_spill] sm:$0xff] %v7697_v14 }
 0x1e8   : > { %v7699_v13 = vpop.f32.mrf.mxu0  ;;  %v7701_v19 = vpop.f32.mrf.mxu1 }
 0x1e9   : > { %8051 = vst [vmem:[#allocation23_spill] sm:$0xff] %v7699_v13  ;;  %8052 = vst [vmem:[#allocation24_spill] sm:$0xff] %v7701_v19 }
 0x1ea   : > { %v7703_v22 = vpop.f32.mrf.mxu0  ;;  %v7705_v37 = vpop.f32.mrf.mxu1 }
 0x1eb   : > { %8053 = vst [vmem:[#allocation25_spill] sm:$0xff] %v7703_v22  ;;  %8054 = vst [vmem:[#allocation26_spill] sm:$0xff] %v7705_v37 }
 0x1ec   : > { %v7707_v40 = vpop.f32.mrf.mxu0  ;;  %v7709_v38 = vpop.f32.mrf.mxu1 }
 0x1ed   : > { %8055 = vst [vmem:[#allocation27_spill] sm:$0xff] %v7707_v40  ;;  %8056 = vst [vmem:[#allocation28_spill] sm:$0xff] %v7709_v38 }
 0x1ee   : > { %v7711_v53 = vpop.f32.mrf.mxu0  ;;  %v7713_v57 = vpop.f32.mrf.mxu1 }
 0x1ef   : > { %8057 = vst [vmem:[#allocation29_spill] sm:$0xff] %v7711_v53  ;;  %8058 = vst [vmem:[#allocation30_spill] sm:$0xff] %v7713_v57 }
 0x1f0   : > { %v7715_v54 = vpop.f32.mrf.mxu0  ;;  %v7717_v35 = vpop.f32.mrf.mxu1 }
 0x1f1   : > { %8059 = vst [vmem:[#allocation31_spill] sm:$0xff] %v7715_v54  ;;  %8060 = vst [vmem:[#allocation32_spill] sm:$0xff] %v7717_v35  ;;  %v3196_v35 = vadd.f32 %v7613_v36, %v7529_v12  ;;  %v3197_v12 = vadd.f32 %v7625_v56, %v7538_v33 }
 0x1f2   : > { %v7719_v14 = vpop.f32.mrf.mxu0  ;;  %v7721_v13 = vpop.f32.mrf.mxu1 }
 0x1f3   : > { %8061 = vst [vmem:[#allocation33_spill] sm:$0xff] %v7719_v14  ;;  %8062 = vst [vmem:[#allocation34_spill] sm:$0xff] %v7721_v13  ;;  %v3588_v33 = vadd.f32 %v7639_v44, %v3197_v12 }
 0x1f4   : > { %v7723_v19 = vpop.f32.mrf.mxu0  ;;  %v7725_v22 = vpop.f32.mrf.mxu1 }
 0x1f5   : > { %8063 = vst [vmem:[#allocation35_spill] sm:$0xff] %v7723_v19  ;;  %8064 = vst [vmem:[#allocation36_spill] sm:$0xff] %v7725_v22  ;;  %v3195_v22 = vadd.f32 %v7617_v9, %v7532_v34 }
 0x1f6   : > { %v7727_v37 = vpop.f32.mrf.mxu0  ;;  %v7729_v40 = vpop.f32.mrf.mxu1 }
 0x1f7   : > { %8065 = vst [vmem:[#allocation37_spill] sm:$0xff] %v7727_v37  ;;  %8066 = vst [vmem:[#allocation38_spill] sm:$0xff] %v7729_v40  ;;  %v3586_v14 = vadd.f32 %v7631_v18, %v3195_v22 }
 0x1f8   : > { %v7731_v38 = vpop.f32.mrf.mxu0  ;;  %v7733_v53 = vpop.f32.mrf.mxu1 }
 0x1f9   : > { %8067 = vst [vmem:[#allocation39_spill] sm:$0xff] %v7731_v38  ;;  %8068 = vst [vmem:[#allocation40_spill] sm:$0xff] %v7733_v53  ;;  %v3587_v38 = vadd.f32 %v5606_v29, %v3196_v35  ;;  %v3198_v53 = vadd.f32 %v7621_v42, %v7535_v11  ;;  %v3200_v35 = vadd.f32 %v7629_v3, %v7541_v39  ;;  %v7763_v42 = vld [vmem:[%s7963_s5] ss:$0 sm:$0xff] }
 0x1fa   : > { %v7735_v57 = vpop.f32.mrf.mxu0  ;;  %v7737_v54 = vpop.f32.mrf.mxu1 }
 0x1fb   : > { %8069 = vst [vmem:[#allocation41_spill] sm:$0xff] %v7735_v57  ;;  %8070 = vst [vmem:[#allocation42_spill] sm:$0xff] %v7737_v54  ;;  %v3589_v34 = vadd.f32 %v7635_v2, %v3198_v53  ;;  %v3202_v53 = vadd.f32 %v7637_v60, %v7547_v32 }
 0x1fc   : > { %v7741_v13 = vpop.f32.mrf.mxu0  ;;  %v5662_v19 = vpop.f32.mrf.mxu1 }
 0x1fd   : > { %8071 = vst [vmem:[#allocation43_spill] sm:$0xff] %v7741_v13  ;;  %v3977_v36 = vadd.f32 %v5662_v19, %v3587_v38  ;;  %v3199_v19 = vadd.f32 %v7633_v20, %v7544_v6 }
 0x1fe   : > { %v7745_v37 = vpop.f32.mrf.mxu0  ;;  %v3817_v40 = vpop.f32.mrf.mxu1 }
 0x1ff   : > { %v3976_v9 = vadd.f32 %v3817_v40, %v3586_v14  ;;  %v3591_v14 = vadd.f32 %v7643_v45, %v3200_v35  ;;  %v3590_v20 = vadd.f32 %v7647_v62, %v3199_v19  ;;  %v3204_v45 = vadd.f32 %v7645_v51, %v7553_v55 }
 0x200   : > { %v7749_v57 = vpop.f32.mrf.mxu0  ;;  %v5665_v54 = vpop.f32.mrf.mxu1 }
 0x201   : > { %v3979_v56 = vadd.f32 %v5665_v54, %v3589_v34  ;;  %v3201_v54 = vadd.f32 %v7641_v7, %v7550_v1  ;;  %v3203_v34 = vadd.f32 %v7649_v43, %v7556_v16 }
 0x202   : > { %v7754_v13 = vpop.f32.mrf.mxu0  ;;  %v3827_v24 = vpop.f32.mrf.mxu1 }
 0x203   : > { %v3978_v3 = vadd.f32 %v3827_v24, %v3588_v33  ;;  %v3593_v24 = vadd.f32 %v7651_v21, %v3202_v53 }
 0x204   : > { %v5718_v11 = vpop.f32.mrf.mxu0  ;;  %v5668_v22 = vpop.f32.mrf.mxu1 }
 0x205   : > { %v4367_v38 = vadd.f32 %v5718_v11, %v3977_v36  ;;  %v3981_v44 = vadd.f32 %v5668_v22, %v3591_v14  ;;  %v3592_v11 = vadd.f32 %v7655_v8, %v3201_v54  ;;  %v3206_v22 = vadd.f32 %v7653_v52, %v7559_v31 }
 0x206   : > { %v4207_v39 = vpop.f32.mrf.mxu0  ;;  %v3837_v40 = vpop.f32.mrf.mxu1  ;;  %v3208_v14 = vadd.f32 %v7661_v63, %v7565_v28  ;;  %v3207_v54 = vadd.f32 %v7665_v47, %v7568_v10 }
 0x207   : > { %v4406_v29 = vadd.f32 %v7763_v42, %v4367_v38  ;;  %v4366_v6 = vadd.f32 %v4207_v39, %v3976_v9  ;;  %v3980_v62 = vadd.f32 %v3837_v40, %v3590_v20  ;;  %v3595_v38 = vadd.f32 %v7659_v59, %v3204_v45 }
 0x208   : > { %v5721_v32 = vpop.f32.mrf.mxu0  ;;  %v5671_v18 = vpop.f32.mrf.mxu1  ;;  %v3594_v40 = vadd.f32 %v7663_v46, %v3203_v34  ;;  %v3599_v45 = vadd.f32 %v7675_v61, %v3208_v14 }
 0x209   : > { %4439 = vst.msk [vmem:[%s7773_s21 + $0x8] sm:$0xff] %vm4437_vm3, %v4406_v29  ;;  %v4405_v2 = vadd.f32 %v7763_v42, %v4366_v6  ;;  %v4369_v60 = vadd.f32 %v5721_v32, %v3979_v56  ;;  %v3983_v21 = vadd.f32 %v5671_v18, %v3593_v24  ;;  %v3205_v56 = vadd.f32 %v7657_v49, %v7562_v26 }
 0x20a   : > { %v4217_v12 = vpop.f32.mrf.mxu0  ;;  %v3847_v36 = vpop.f32.mrf.mxu1 }
 0x20b   : > { %4438 = vst.msk [vmem:[%s7773_s21] sm:$0xff] %vm4437_vm3, %v4405_v2  ;;  %v4408_v1 = vadd.f32 %v7763_v42, %v4369_v60  ;;  %v4368_v7 = vadd.f32 %v4217_v12, %v3978_v3  ;;  %v3982_v8 = vadd.f32 %v3847_v36, %v3592_v11  ;;  %v3597_v3 = vadd.f32 %v7667_v15, %v3206_v22  ;;  %v8073_v22 = vld [vmem:[#allocation17_spill] sm:$0xff] }
 0x20c   : > { %v5724_v35 = vpop.f32.mrf.mxu0  ;;  %v5674_v9 = vpop.f32.mrf.mxu1  ;;  %v3596_v20 = vadd.f32 %v7671_v0, %v3205_v56  ;;  %v3210_v2 = vadd.f32 %v7669_v25, %v7571_v23  ;;  %v3209_v12 = vadd.f32 %v7673_v41, %v7574_v48  ;;  %v8076_v56 = vld [vmem:[#allocation18_spill] sm:$0xff] }
 0x20d   : > { %4441 = vst.msk [vmem:[%s7773_s21 + $0x18] sm:$0xff] %vm4437_vm3, %v4408_v1  ;;  %v4407_v55 = vadd.f32 %v7763_v42, %v4368_v7  ;;  %v4371_v51 = vadd.f32 %v5724_v35, %v3981_v44  ;;  %v3985_v59 = vadd.f32 %v5674_v9, %v3595_v38  ;;  %v3598_v1 = vadd.f32 %v7679_v4, %v3207_v54  ;;  %v8080_v54 = vld [vmem:[#allocation23_spill] sm:$0xff] }
 0x20e   : > { %v4227_v33 = vpop.f32.mrf.mxu0  ;;  %v3857_v19 = vpop.f32.mrf.mxu1  ;;  %v3212_v7 = vadd.f32 %v7677_v17, %v7577_v50  ;;  %v3601_v35 = vadd.f32 %v7683_v30, %v3210_v2  ;;  %v3211_v9 = vadd.f32 %v7681_v5, %v7580_v58 }
 0x20f   : > { %4440 = vst.msk [vmem:[%s7773_s21 + $0x10] sm:$0xff] %vm4437_vm3, %v4407_v55  ;;  %v4410_v16 = vadd.f32 %v7763_v42, %v4371_v51  ;;  %v4370_v43 = vadd.f32 %v4227_v33, %v3980_v62  ;;  %v3984_v46 = vadd.f32 %v3857_v19, %v3594_v40  ;;  %v3600_v51 = vadd.f32 %v7687_v27, %v3209_v12 }
 0x210   : > { %v5727_v53 = vpop.f32.mrf.mxu0  ;;  %v5677_v39 = vpop.f32.mrf.mxu1 }
 0x211   : > { %4443 = vst.msk [vmem:[%s7773_s21 + $0x28] sm:$0xff] %vm4437_vm3, %v4410_v16  ;;  %v4409_v31 = vadd.f32 %v7763_v42, %v4370_v43  ;;  %v4373_v52 = vadd.f32 %v5727_v53, %v3983_v21  ;;  %v3987_v15 = vadd.f32 %v5677_v39, %v3597_v3  ;;  %v8072_v21 = vld [vmem:[#allocation3_spill] sm:$0xff]  ;;  %v8079_v3 = vld [vmem:[#allocation20_spill] sm:$0xff] }
 0x212   : > { %v4237_v29 = vpop.f32.mrf.mxu0  ;;  %v3867_v6 = vpop.f32.mrf.mxu1  ;;  %v3214_v33 = vadd.f32 %v8073_v22, %v8072_v21  ;;  %v8074_v16 = vld [vmem:[#allocation19_spill] sm:$0xff]  ;;  %v8090_v21 = vld [vmem:[#allocation9_spill] sm:$0xff]  ;;  %v8091_v22 = vld [vmem:[#allocation28_spill] sm:$0xff] }
 0x213   : > { %4442 = vst.msk [vmem:[%s7773_s21 + $0x20] sm:$0xff] %vm4437_vm3, %v4409_v31  ;;  %v4412_v26 = vadd.f32 %v7763_v42, %v4373_v52  ;;  %v4372_v49 = vadd.f32 %v4237_v29, %v3982_v8  ;;  %v3986_v0 = vadd.f32 %v3867_v6, %v3596_v20  ;;  %v3603_v43 = vadd.f32 %v8074_v16, %v3212_v7  ;;  %v8075_v8 = vld [vmem:[#allocation4_spill] sm:$0xff]  ;;  %v8077_v31 = vld [vmem:[#allocation21_spill] sm:$0xff]  ;;  %v8092_v16 = vld [vmem:[#allocation31_spill] sm:$0xff] }
 0x214   : > { %v5730_v32 = vpop.f32.mrf.mxu0  ;;  %v5680_v18 = vpop.f32.mrf.mxu1  ;;  %v3213_v53 = vadd.f32 %v8076_v56, %v8075_v8  ;;  %v3602_v52 = vadd.f32 %v8077_v31, %v3211_v9  ;;  %v8078_v6 = vld [vmem:[#allocation5_spill] sm:$0xff]  ;;  %v8093_v8 = vld [vmem:[#allocation10_spill] sm:$0xff] }
 0x215   : > { %4445 = vst.msk [vmem:[%s7773_s21 + $0x38] sm:$0xff] %vm4437_vm3, %v4412_v26  ;;  %v4411_v28 = vadd.f32 %v7763_v42, %v4372_v49  ;;  %v4375_v63 = vadd.f32 %v5730_v32, %v3985_v59  ;;  %v3989_v61 = vadd.f32 %v5680_v18, %v3599_v45  ;;  %v3216_v26 = vadd.f32 %v8079_v3, %v8078_v6  ;;  %v8083_v45 = vld [vmem:[#allocation25_spill] sm:$0xff]  ;;  %v8094_v56 = vld [vmem:[#allocation30_spill] sm:$0xff]  ;;  %v8096_v6 = vld [vmem:[#allocation11_spill] sm:$0xff] }
 0x216   : > { %v4247_v60 = vpop.f32.mrf.mxu0  ;;  %v3877_v44 = vpop.f32.mrf.mxu1  ;;  %v3605_v32 = vadd.f32 %v8080_v54, %v3214_v33  ;;  %v3220_v33 = vadd.f32 %v8091_v22, %v8090_v21  ;;  %v8095_v31 = vld [vmem:[#allocation33_spill] sm:$0xff]  ;;  %v8097_v3 = vld [vmem:[#allocation32_spill] sm:$0xff]  ;;  %v8098_v54 = vld [vmem:[#allocation35_spill] sm:$0xff] }
 0x217   : > { %4444 = vst.msk [vmem:[%s7773_s21 + $0x30] sm:$0xff] %vm4437_vm3, %v4411_v28  ;;  %v4414_v10 = vadd.f32 %v7763_v42, %v4375_v63  ;;  %v4374_v47 = vadd.f32 %v4247_v60, %v3984_v46  ;;  %v3988_v4 = vadd.f32 %v3877_v44, %v3598_v1  ;;  %v8081_v63 = vld [vmem:[#allocation6_spill] sm:$0xff]  ;;  %v8108_v21 = vld [vmem:[#allocation15_spill] sm:$0xff]  ;;  %v8109_v22 = vld [vmem:[#allocation40_spill] sm:$0xff] }
 0x218   : > { %v5733_v36 = vpop.f32.mrf.mxu0  ;;  %v5683_v24 = vpop.f32.mrf.mxu1 }
 0x219   : > { %4447 = vst.msk [vmem:[%s7773_s21 + $0x48] sm:$0xff] %vm4437_vm3, %v4414_v10  ;;  %v4413_v23 = vadd.f32 %v7763_v42, %v4374_v47  ;;  %v4377_v25 = vadd.f32 %v5733_v36, %v3987_v15  ;;  %v3991_v17 = vadd.f32 %v5683_v24, %v3601_v35  ;;  %v8082_v15 = vld [vmem:[#allocation22_spill] sm:$0xff]  ;;  %v3604_v10 = vadd.f32 %v8083_v45, %v3213_v53  ;;  %v8084_v36 = vld [vmem:[#allocation7_spill] sm:$0xff]  ;;  %v8085_v24 = vld [vmem:[#allocation24_spill] sm:$0xff] }
 0x21a   : > { %v4257_v62 = vpop.f32.mrf.mxu0  ;;  %v3887_v34 = vpop.f32.mrf.mxu1  ;;  %v3215_v2 = vadd.f32 %v8082_v15, %v8081_v63  ;;  %v3218_v1 = vadd.f32 %v8085_v24, %v8084_v36  ;;  %v3219_v53 = vadd.f32 %v8094_v56, %v8093_v8  ;;  %v8099_v63 = vld [vmem:[#allocation12_spill] sm:$0xff]  ;;  %v8100_v15 = vld [vmem:[#allocation34_spill] sm:$0xff]  ;;  %v8101_v45 = vld [vmem:[#allocation37_spill] sm:$0xff] }
 0x21b   : > { %4446 = vst.msk [vmem:[%s7773_s21 + $0x40] sm:$0xff] %vm4437_vm3, %v4413_v23  ;;  %v4416_v48 = vadd.f32 %v7763_v42, %v4377_v25  ;;  %v4376_v41 = vadd.f32 %v4257_v62, %v3986_v0  ;;  %v3990_v5 = vadd.f32 %v3887_v34, %v3600_v51  ;;  %v8102_v36 = vld [vmem:[#allocation13_spill] sm:$0xff]  ;;  %v8103_v24 = vld [vmem:[#allocation36_spill] sm:$0xff]  ;;  %v8112_v56 = vld [vmem:[#allocation42_spill] sm:$0xff] }
 0x21c   : > { %v5736_v11 = vpop.f32.mrf.mxu0  ;;  %v5686_v55 = vpop.f32.mrf.mxu1  ;;  %v8111_v8 = vld [vmem:[#allocation16_spill] sm:$0xff] }
 0x21d   : > { %4449 = vst.msk [vmem:[%s7773_s21 + $0x58] sm:$0xff] %vm4437_vm3, %v4416_v48  ;;  %v4415_v50 = vadd.f32 %v7763_v42, %v4376_v41  ;;  %v4379_v30 = vadd.f32 %v5736_v11, %v3989_v61  ;;  %v3993_v29 = vadd.f32 %v5686_v55, %v3603_v43  ;;  %v8086_v61 = vld [vmem:[#allocation27_spill] sm:$0xff]  ;;  %v8087_v48 = vld [vmem:[#allocation8_spill] sm:$0xff]  ;;  %v8088_v41 = vld [vmem:[#allocation26_spill] sm:$0xff]  ;;  %v3609_v43 = vadd.f32 %v8092_v16, %v3218_v1 }
 0x21e   : > { %v4267_v19 = vpop.f32.mrf.mxu0  ;;  %v3897_v38 = vpop.f32.mrf.mxu1  ;;  %v3607_v7 = vadd.f32 %v8086_v61, %v3216_v26  ;;  %v8089_v55 = vld [vmem:[#allocation29_spill] sm:$0xff]  ;;  %v3222_v26 = vadd.f32 %v8097_v3, %v8096_v6  ;;  %v3224_v1 = vadd.f32 %v8103_v24, %v8102_v36  ;;  %v8104_v61 = vld [vmem:[#allocation39_spill] sm:$0xff] }
 0x21f   : > { %4448 = vst.msk [vmem:[%s7773_s21 + $0x50] sm:$0xff] %vm4437_vm3, %v4415_v50  ;;  %v4418_v58 = vadd.f32 %v7763_v42, %v4379_v30  ;;  %v4378_v27 = vadd.f32 %v4267_v19, %v3988_v4  ;;  %v3992_v28 = vadd.f32 %v3897_v38, %v3602_v52  ;;  %v3217_v4 = vadd.f32 %v8088_v41, %v8087_v48  ;;  %v8105_v48 = vld [vmem:[#allocation14_spill] sm:$0xff]  ;;  %v8110_v16 = vld [vmem:[#allocation43_spill] sm:$0xff] }
 0x220   : > { %v5739_v39 = vpop.f32.mrf.mxu0  ;;  %v5689_v40 = vpop.f32.mrf.mxu1  ;;  %v3606_v51 = vadd.f32 %v8089_v55, %v3215_v2  ;;  %v3221_v2 = vadd.f32 %v8100_v15, %v8099_v63  ;;  %v8106_v41 = vld [vmem:[#allocation38_spill] sm:$0xff]  ;;  %v8107_v55 = vld [vmem:[#allocation41_spill] sm:$0xff] }
 0x221   : > { %4451 = vst.msk [vmem:[%s7773_s21 + $0x68] sm:$0xff] %vm4437_vm3, %v4418_v58  ;;  %v4417_v59 = vadd.f32 %v7763_v42, %v4378_v27  ;;  %v4381_v14 = vadd.f32 %v5739_v39, %v3991_v17  ;;  %v3995_v12 = vadd.f32 %v5689_v40, %v3605_v32  ;;  %v3608_v52 = vadd.f32 %v8095_v31, %v3217_v4 }
 0x222   : > { %v4277_v49 = vpop.f32.mrf.mxu0  ;;  %v3907_v46 = vpop.f32.mrf.mxu1  ;;  %v3611_v32 = vadd.f32 %v8098_v54, %v3220_v33  ;;  %v3223_v4 = vadd.f32 %v8106_v41, %v8105_v48  ;;  %v3226_v33 = vadd.f32 %v8109_v22, %v8108_v21 }
 0x223   : > { %4450 = vst.msk [vmem:[%s7773_s21 + $0x60] sm:$0xff] %vm4437_vm3, %v4417_v59  ;;  %v4420_v18 = vadd.f32 %v7763_v42, %v4381_v14  ;;  %v4380_v20 = vadd.f32 %v4277_v49, %v3990_v5  ;;  %v3994_v35 = vadd.f32 %v3907_v46, %v3604_v10  ;;  %v3610_v10 = vadd.f32 %v8101_v45, %v3219_v53 }
 0x224   : > { %v5742_v60 = vpop.f32.mrf.mxu0  ;;  %v5692_v44 = vpop.f32.mrf.mxu1  ;;  %v3225_v53 = vadd.f32 %v8112_v56, %v8111_v8  ;;  %v3614_v31 = vadd.f32 %v7745_v37, %v3223_v4  ;;  %v3617_v6 = vadd.f32 %v7749_v57, %v3226_v33 }
 0x225   : > { %4453 = vst.msk [vmem:[%s7773_s21 + $0x78] sm:$0xff] %vm4437_vm3, %v4420_v18  ;;  %v4419_v47 = vadd.f32 %v7763_v42, %v4380_v20  ;;  %v4383_v0 = vadd.f32 %v5742_v60, %v3993_v29  ;;  %v3997_v17 = vadd.f32 %v5692_v44, %v3607_v7  ;;  %v3613_v7 = vadd.f32 %v8104_v61, %v3222_v26 }
 0x226   : > { %v4287_v23 = vpop.f32.mrf.mxu0  ;;  %v3917_v25 = vpop.f32.mrf.mxu1  ;;  %v3616_v37 = vadd.f32 %v7754_v13, %v3225_v53 }
 0x227   : > { %4452 = vst.msk [vmem:[%s7773_s21 + $0x70] sm:$0xff] %vm4437_vm3, %v4419_v47  ;;  %v4422_v62 = vadd.f32 %v7763_v42, %v4383_v0  ;;  %v4382_v34 = vadd.f32 %v4287_v23, %v3992_v28  ;;  %v3996_v5 = vadd.f32 %v3917_v25, %v3606_v51  ;;  %v3612_v51 = vadd.f32 %v8107_v55, %v3221_v2 }
 0x228   : > { %v5745_v9 = vpop.f32.mrf.mxu0  ;;  %v5695_v11 = vpop.f32.mrf.mxu1 }
 0x229   : > { %4455 = vst.msk [vmem:[%s7773_s21 + $0x88] sm:$0xff] %vm4437_vm3, %v4422_v62  ;;  %v4421_v50 = vadd.f32 %v7763_v42, %v4382_v34  ;;  %v4385_v30 = vadd.f32 %v5745_v9, %v3995_v12  ;;  %v3999_v29 = vadd.f32 %v5695_v11, %v3609_v43  ;;  %v3615_v43 = vadd.f32 %v8110_v16, %v3224_v1 }
 0x22a   : > { %v4297_v19 = vpop.f32.mrf.mxu0  ;;  %v3927_v38 = vpop.f32.mrf.mxu1 }
 0x22b   : > { %4454 = vst.msk [vmem:[%s7773_s21 + $0x80] sm:$0xff] %vm4437_vm3, %v4421_v50  ;;  %v4424_v58 = vadd.f32 %v7763_v42, %v4385_v30  ;;  %v4384_v27 = vadd.f32 %v4297_v19, %v3994_v35  ;;  %v3998_v28 = vadd.f32 %v3927_v38, %v3608_v52 }
 0x22c   : > { %v5748_v39 = vpop.f32.mrf.mxu0  ;;  %v5698_v40 = vpop.f32.mrf.mxu1 }
 0x22d   : > { %4457 = vst.msk [vmem:[%s7773_s21 + $0x98] sm:$0xff] %vm4437_vm3, %v4424_v58  ;;  %v4423_v59 = vadd.f32 %v7763_v42, %v4384_v27  ;;  %v4387_v14 = vadd.f32 %v5748_v39, %v3997_v17  ;;  %v4001_v12 = vadd.f32 %v5698_v40, %v3611_v32 }
 0x22e   : > { %v4307_v49 = vpop.f32.mrf.mxu0  ;;  %v3937_v46 = vpop.f32.mrf.mxu1 }
 0x22f   : > { %4456 = vst.msk [vmem:[%s7773_s21 + $0x90] sm:$0xff] %vm4437_vm3, %v4423_v59  ;;  %v4426_v18 = vadd.f32 %v7763_v42, %v4387_v14  ;;  %v4386_v20 = vadd.f32 %v4307_v49, %v3996_v5  ;;  %v4000_v35 = vadd.f32 %v3937_v46, %v3610_v10 }
 0x230   : > { %v5751_v60 = vpop.f32.mrf.mxu0  ;;  %v5701_v44 = vpop.f32.mrf.mxu1 }
 0x231   : > { %4459 = vst.msk [vmem:[%s7773_s21 + $0xa8] sm:$0xff] %vm4437_vm3, %v4426_v18  ;;  %v4425_v47 = vadd.f32 %v7763_v42, %v4386_v20  ;;  %v4389_v0 = vadd.f32 %v5751_v60, %v3999_v29  ;;  %v4003_v17 = vadd.f32 %v5701_v44, %v3613_v7 }
 0x232   : > { %v4317_v23 = vpop.f32.mrf.mxu0  ;;  %v3947_v25 = vpop.f32.mrf.mxu1 }
 0x233   : > { %4458 = vst.msk [vmem:[%s7773_s21 + $0xa0] sm:$0xff] %vm4437_vm3, %v4425_v47  ;;  %v4428_v62 = vadd.f32 %v7763_v42, %v4389_v0  ;;  %v4388_v34 = vadd.f32 %v4317_v23, %v3998_v28  ;;  %v4002_v5 = vadd.f32 %v3947_v25, %v3612_v51 }
 0x234   : > { %v5754_v9 = vpop.f32.mrf.mxu0  ;;  %v5704_v11 = vpop.f32.mrf.mxu1 }
 0x235   : > { %4461 = vst.msk [vmem:[%s7773_s21 + $0xb8] sm:$0xff] %vm4437_vm3, %v4428_v62  ;;  %v4427_v50 = vadd.f32 %v7763_v42, %v4388_v34  ;;  %v4391_v30 = vadd.f32 %v5754_v9, %v4001_v12  ;;  %v4005_v14 = vadd.f32 %v5704_v11, %v3615_v43 }
 0x236   : > { %v4327_v19 = vpop.f32.mrf.mxu0  ;;  %v3957_v38 = vpop.f32.mrf.mxu1 }
 0x237   : > { %4460 = vst.msk [vmem:[%s7773_s21 + $0xb0] sm:$0xff] %vm4437_vm3, %v4427_v50  ;;  %v4430_v58 = vadd.f32 %v7763_v42, %v4391_v30  ;;  %v4390_v27 = vadd.f32 %v4327_v19, %v4000_v35  ;;  %v4004_v49 = vadd.f32 %v3957_v38, %v3614_v31 }
 0x238   : > { %v5757_v39 = vpop.f32.mrf.mxu0  ;;  %v5707_v40 = vpop.f32.mrf.mxu1 }
 0x239   : > { %4463 = vst.msk [vmem:[%s7773_s21 + $0xc8] sm:$0xff] %vm4437_vm3, %v4430_v58  ;;  %v4429_v52 = vadd.f32 %v7763_v42, %v4390_v27  ;;  %v4393_v59 = vadd.f32 %v5757_v39, %v4003_v17  ;;  %v4007_v20 = vadd.f32 %v5707_v40, %v3617_v6 }
 0x23a   : > { %v4337_v29 = vpop.f32.mrf.mxu0  ;;  %v3967_v54 = vpop.f32.mrf.mxu1 }
 0x23b   : > { %4462 = vst.msk [vmem:[%s7773_s21 + $0xc0] sm:$0xff] %vm4437_vm3, %v4429_v52  ;;  %v4432_v3 = vadd.f32 %v7763_v42, %v4393_v59  ;;  %v4392_v26 = vadd.f32 %v4337_v29, %v4002_v5  ;;  %v4006_v15 = vadd.f32 %v3967_v54, %v3616_v37 }
 0x23c   : > { %v5760_v46 = vpop.f32.mrf.mxu0 }
 0x23d   : > { %4465 = vst.msk [vmem:[%s7773_s21 + $0xd8] sm:$0xff] %vm4437_vm3, %v4432_v3  ;;  %v4431_v32 = vadd.f32 %v7763_v42, %v4392_v26  ;;  %v4395_v18 = vadd.f32 %v5760_v46, %v4005_v14 }
 0x23e   : > { %v4347_v57 = vpop.f32.mrf.mxu0 }
 0x23f   : > { %4464 = vst.msk [vmem:[%s7773_s21 + $0xd0] sm:$0xff] %vm4437_vm3, %v4431_v32  ;;  %v4434_v28 = vadd.f32 %v7763_v42, %v4395_v18  ;;  %v4394_v63 = vadd.f32 %v4347_v57, %v4004_v49 }
 0x240   : > { %v5763_v2 = vpop.f32.mrf.mxu0 }
 0x241   : > { %4467 = vst.msk [vmem:[%s7773_s21 + $0xe8] sm:$0xff] %vm4437_vm3, %v4434_v28  ;;  %v4433_v13 = vadd.f32 %v7763_v42, %v4394_v63  ;;  %v4397_v60 = vadd.f32 %v5763_v2, %v4007_v20 }
 0x242   : > { %v4357_v44 = vpop.f32.mrf.mxu0 }
 0x243   : > { %4466 = vst.msk [vmem:[%s7773_s21 + $0xe0] sm:$0xff] %vm4437_vm3, %v4433_v13  ;;  %v4436_v45 = vadd.f32 %v7763_v42, %v4397_v60  ;;  %v4396_v10 = vadd.f32 %v4357_v44, %v4006_v15 }
 0x245   : > { %4469 = vst.msk [vmem:[%s7773_s21 + $0xf8] sm:$0xff] %vm4437_vm3, %v4436_v45  ;;  %v4435_v47 = vadd.f32 %v7763_v42, %v4396_v10 }
 0x247   : > { %4468 = vst.msk [vmem:[%s7773_s21 + $0xf0] sm:$0xff] %vm4437_vm3, %v4435_v47 }
 0x248 PF: > { %s16_s23 = sadd.s32 1, %s5932_s23   ;;  %s8113_s21 = smov %s5928_s22 }
 0x249   : > { %p13_p5 = scmp.ge.s32.totalorder %s16_s23, 4   ;;  %s8114_s22 = smov %s8116_s24 }
 0x24b   :  { %15 = sbr.rel (!%p13_p5) target bundleno = 2 (0x2), region = 99 }

// kernel: vae_residual_block.7
= control target key start
LH: loop header
LB: loop body
LE: loop exit
PB: predicated region body
PF: predicated region fallthrough
CT: control target
= control target key end

     0   :  { %14 = vsyncpa [#allocation4], 0  ;;  %s9189_s0 = inlined_call_operand.vmem [shape: f32[2,18,24,64], index: 0, kind: input, shape index: {}, may-alias: {0,1}]   ;;  %s9190_s1 = inlined_call_operand.vmem [shape: f32[2,18,24,64], index: 1, kind: input, shape index: {}, may-alias: {0,1}]   ;;  %s9191_s2 = inlined_call_operand.vmem [shape: f32[2,1,64], index: 2, kind: input, shape index: {}]   ;;  %s9192_s3 = inlined_call_operand.vmem [shape: f32[2,1,64], index: 3, kind: input, shape index: {}]   ;;  %s9193_s4 = inlined_call_operand.vmem [shape: f32[9,64,64], index: 4, kind: input, shape index: {}]   ;;  %s9194_s5 = inlined_call_operand.vmem [shape: f32[1,64], index: 5, kind: input, shape index: {}]   ;;  %s9195_s6 = inlined_call_operand.vmem [shape: f32[2,256,32], index: 6, kind: input, shape index: {}]   ;;  %s9196_s7 = inlined_call_operand.vmem [shape: f32[32,64], index: 7, kind: input, shape index: {}]   ;;  %s9197_s8 = inlined_call_operand.vmem [shape: f32[1,64], index: 8, kind: input, shape index: {}]   ;;  %s9198_s9 = inlined_call_operand.hbm [shape: f32[2,256,64], index: 9, kind: output, shape index: {}]  }
   0x1   :  { %16 = vsyncpa [#allocation4 + $0x1], 0  ;;  %s6934_s30 = smov 0   ;;  %s6936_s10 = smov 0  }
   0x2   :  { %s6938_s11 = smov 0   ;;  %s6940_s12 = smov 0  }
   0x3   :  { %s6942_s13 = smov 0   ;;  %s6944_s14 = smov 0  }
   0x4 LB: > { %s5196_s15 = sadd.s32 4294967295, %s6878_s14   ;;  %s5197_s16 = sadd.s32 4294967294, %s6878_s14   ;;  %s6878_s14 = sphi %s6944_s14, %s22_s14   ;;  %s6874_s13 = sphi %s6942_s13, %s9294_s13   ;;  %s6870_s12 = sphi %s6940_s12, %s9293_s12   ;;  %s6866_s11 = sphi %s6938_s11, %s9292_s11   ;;  %s6862_s10 = sphi %s6936_s10, %s9291_s10   ;;  %s6858_s30 = sphi %s6934_s30, %s9290_s30  }
   0x5   : > { %s34_s17 = sadd.s32 1, %s6874_s13  ;;  %s267_s18 = sadd.s32 1, %s6866_s11 }
   0x6   : > { %p36_p0 = scmp.ge.s32.totalorder %s34_s17, 2  ;;  %p277_p1 = scmp.ne.s32.totalorder %s6866_s11, %s6862_s10 }
   0x7   : > { %p278_p2 = scmp.eq.s32.totalorder %s5196_s15, 1  ;;  %p283_p3 = scmp.ne.s32.totalorder %s6862_s10, %s6858_s30 }
   0x8   : > { %s9296_s17 = smov (%p36_p0, %s34_s17), 0  ;;  %p284_p5 = scmp.eq.s32.totalorder %s5197_s16, 1 }
   0x9   : > { %9200 = sst [smem:[#allocation6_spill]] %s9296_s17  ;;  %p6974_p4 = por %p278_p2, %p277_p1 }
   0xa   : > { %s262_s20 = ssub.s32 %s6874_s13, %s9296_s17  ;;  %p5200_p6 = scmp.ge.s32.totalorder %s6878_s14, 1 }
   0xb   : > { %p265_p7 = scmp.eq.s32.totalorder %s262_s20, 0  ;;  %p6981_p8 = por %p284_p5, %p283_p3 }
   0xc   : > { %p381_p9 = scmp.lt.s32.totalorder %s6878_s14, 3 }
   0xd   : > { %s6987_s22 = scalar_select %p265_p7, %s6866_s11, %s267_s18  }
   0xe   : > { %p382_p10 = pnand %p5200_p6, %p381_p9 }
  0x10   : > { %385 = sbr.rel (%p382_p10) target bundleno = 613 (0x265), region = 56 }
  0x15   : > { %v5215_v0 = vld [vmem:[%s9193_s4 + $0x78] sm:$0xff]  ;;  %v5214_v2 = vld [vmem:[%s9193_s4 + $0x70] sm:$0xff]  ;;  %p460_p11 = scmp.lt.s32.totalorder %s6870_s12, 1  ;;  %v5213_v4 = vld [vmem:[%s9193_s4 + $0x68] sm:$0xff]  ;;  %vm905_vm0 = vcmask 523264   ;;  %vm1009_vm1 = vcmask 516096  }
  0x16   : > { %v1097_v1 = vld [vmem:[%s9193_s4 + $0x38] sm:$0xff]  ;;  %5999 = vmatprep.subr.mxu0 %v5215_v0  ;;  %v1096_v3 = vld [vmem:[%s9193_s4 + $0x30] sm:$0xff]  ;;  %v1095_v5 = vld [vmem:[%s9193_s4 + $0x28] sm:$0xff]  ;;  %vm1028_vm2 = vcmask 522240   ;;  %vm4616_vm3 = vcmask 261120   ;;  %s6881_s17 = smov [#allocation3]  }
  0x17   : > { %6063 = vmatprep.subr.mxu1 %v1097_v1  ;;  %6000 = vmatpush3.msra.mxu0 %v5215_v0  ;;  %s7009_s24 = scalar_select %p460_p11, %s6870_s12, 1  ;;  %v5212_v6 = vld [vmem:[%s9193_s4 + $0x60] sm:$0xff]  ;;  %v5211_v8 = vld [vmem:[%s9193_s4 + $0x58] sm:$0xff]  ;;  %v5210_v11 = vld [vmem:[%s9193_s4 + $0x50] sm:$0xff] }
  0x18   : > { %6064 = vmatpush3.msra.mxu1 %v1097_v1  ;;  %6001 = vmatprep.subr.mxu0 %v5214_v2  ;;  %v1094_v7 = vld [vmem:[%s9193_s4 + $0x20] sm:$0xff]  ;;  %v1093_v9 = vld [vmem:[%s9193_s4 + $0x18] sm:$0xff]  ;;  %v1092_v12 = vld [vmem:[%s9193_s4 + $0x10] sm:$0xff] }
  0x19   : > { %6065 = vmatprep.subr.mxu1 %v1096_v3  ;;  %6002 = vmatpush3.msra.mxu0 %v5214_v2  ;;  %s6631_s29 = smul.u32 432, %s7009_s24  ;;  %s7022_s18 = scalar_lea.vmem %s9191_s2, %s7009_s24  ;;  %v5209_v27 = vld [vmem:[%s9193_s4 + $0x48] sm:$0xff]  ;;  %v5208_v33 = vld [vmem:[%s9193_s4 + $0x40] sm:$0xff]  ;;  %v7114_v50 = vld [vmem:[%s9193_s4 + $0xb8] sm:$0xff] }
  0x1a   : > { %6066 = vmatpush3.msra.mxu1 %v1096_v3  ;;  %6003 = vmatprep.subr.mxu0 %v5213_v4  ;;  %s7034_s28 = scalar_lea.vmem %s9192_s3, %s7009_s24  ;;  %v7037_v10 = vld [vmem:[%s7022_s18] ss:$0 sm:$0xff]  ;;  %v1091_v28 = vld [vmem:[%s9193_s4 + $0x8] sm:$0xff]  ;;  %v7119_v51 = vld [vmem:[%s9193_s4 + $0xf8] sm:$0xff]  ;;  %s5601_s16 = sshll.u32 %s7009_s24, 8 }
  0x1b   : > { %6067 = vmatprep.subr.mxu1 %v1095_v5  ;;  %6004 = vmatpush3.msra.mxu0 %v5213_v4  ;;  %s7050_s26 = scalar_lea.vmem %s9189_s0, %s6631_s29  ;;  %v7053_v13 = vld [vmem:[%s7034_s28] ss:$0 sm:$0xff]  ;;  %s7556_s15 = sadd.s32 384, %s6631_s29 }
  0x1c   : > { %6068 = vmatpush3.msra.mxu1 %v1095_v5  ;;  %6005 = vmatprep.subr.mxu0 %v5212_v6  ;;  %v509_v14 = vld [vmem:[%s7050_s26] sm:$0xff]  ;;  %v510_v15 = vld [vmem:[%s7050_s26 + $0x8] sm:$0xff]  ;;  %v511_v16 = vld [vmem:[%s7050_s26 + $0x10] sm:$0xff]  ;;  %s7588_s20 = scalar_lea.vmem %s9190_s1, %s7556_s15  ;;  %s451_s24 = sand.u32 1, %s6862_s10  }
  0x1d   : > { %6069 = vmatprep.subr.mxu1 %v1094_v7  ;;  %6006 = vmatpush3.msra.mxu0 %v5212_v6  ;;  %v563_v17 = vmul.f32 %v7037_v10, %v509_v14  ;;  %v564_v18 = vmul.f32 %v7037_v10, %v510_v15  ;;  %v565_v19 = vmul.f32 %v7037_v10, %v511_v16  ;;  %v512_v20 = vld [vmem:[%s7050_s26 + $0x18] sm:$0xff]  ;;  %v513_v21 = vld [vmem:[%s7050_s26 + $0x20] sm:$0xff]  ;;  %v514_v22 = vld [vmem:[%s7050_s26 + $0x28] sm:$0xff]  ;;  %s5201_s25 = sshll.u32 %s451_s24, 8  ;;  %s5602_s29 = sshll.u32 %s6870_s12, 12 }
  0x1e   : > { %6070 = vmatpush3.msra.mxu1 %v1094_v7  ;;  %6007 = vmatprep.subr.mxu0 %v5211_v8  ;;  %v566_v23 = vmul.f32 %v7037_v10, %v512_v20  ;;  %v567_v24 = vmul.f32 %v7037_v10, %v513_v21  ;;  %v568_v25 = vmul.f32 %v7037_v10, %v514_v22  ;;  %v515_v26 = vld [vmem:[%s7050_s26 + $0x30] sm:$0xff]  ;;  %v516_v32 = vld [vmem:[%s7050_s26 + $0x38] sm:$0xff]  ;;  %v517_v37 = vld [vmem:[%s7050_s26 + $0x40] sm:$0xff]  ;;  %s8933_s15 = scalar_lea.vmem [#allocation3], %s5201_s25  ;;  %s9144_s12 = scalar_lea.sflag [#allocation4], %s451_s24 }
  0x1f   : > { %6071 = vmatprep.subr.mxu1 %v1093_v9  ;;  %6008 = vmatpush3.msra.mxu0 %v5211_v8  ;;  %v7075_v29 = vadd.f32 %v7053_v13, %v563_v17  ;;  %v7078_v30 = vadd.f32 %v7053_v13, %v564_v18  ;;  %v7081_v31 = vadd.f32 %v7053_v13, %v565_v19  ;;  %v518_v38 = vld [vmem:[%s7050_s26 + $0x48] sm:$0xff]  ;;  %v1090_v39 = vld [vmem:[%s9193_s4] sm:$0xff]  ;;  %v519_v44 = vld [vmem:[%s7050_s26 + $0x50] sm:$0xff]  ;;  %s6806_s25 = sshll.u32 %s6881_s17, 4  ;;  %s6807_s25 = int_to_ptr.vmem [resolvable:$false] %s6806_s25 }
  0x20   : > { %6072 = vmatpush3.msra.mxu1 %v1093_v9  ;;  %6009 = vmatprep.subr.mxu0 %v5210_v11  ;;  %v7088_v34 = vadd.f32 %v7053_v13, %v566_v23  ;;  %v7091_v35 = vadd.f32 %v7053_v13, %v567_v24  ;;  %v7094_v36 = vadd.f32 %v7053_v13, %v568_v25  ;;  %v520_v45 = vld [vmem:[%s7050_s26 + $0x58] sm:$0xff]  ;;  %v521_v58 = vld [vmem:[%s7050_s26 + $0x60] sm:$0xff]  ;;  %v522_v62 = vld [vmem:[%s7050_s26 + $0x68] sm:$0xff] }
  0x21   : > { %6073 = vmatprep.subr.mxu1 %v1092_v12  ;;  %6010 = vmatpush3.msra.mxu0 %v5210_v11  ;;  %v665_v40 = vmul.f32 0.5, %v7075_v29  ;;  %v666_v41 = vmul.f32 0.5, %v7078_v30  ;;  %v667_v42 = vmul.f32 0.5, %v7081_v31  ;;  %v569_v43 = vmul.f32 %v7037_v10, %v515_v26  ;;  %v523_v2 = vld [vmem:[%s7050_s26 + $0x70] sm:$0xff]  ;;  %v524_v3 = vld [vmem:[%s7050_s26 + $0x78] sm:$0xff]  ;;  %v525_v7 = vld [vmem:[%s7050_s26 + $0x80] sm:$0xff] }
  0x22   : > { %6074 = vmatpush3.msra.mxu1 %v1092_v12  ;;  %6011 = vmatprep.subr.mxu0 %v5209_v27  ;;  %v668_v46 = vmul.f32 0.5, %v7088_v34  ;;  %v669_v47 = vmul.f32 0.5, %v7091_v35  ;;  %v670_v48 = vmul.f32 0.5, %v7094_v36  ;;  %v570_v49 = vmul.f32 %v7037_v10, %v516_v32  ;;  %v526_v8 = vld [vmem:[%s7050_s26 + $0x88] sm:$0xff]  ;;  %v527_v20 = vld [vmem:[%s7050_s26 + $0x90] sm:$0xff]  ;;  %v528_v24 = vld [vmem:[%s7050_s26 + $0x98] sm:$0xff] }
  0x23   : > { %6075 = vmatprep.subr.mxu1 %v1091_v28  ;;  %6012 = vmatpush3.msra.mxu0 %v5209_v27  ;;  %6692 = vtanh.f32 %v665_v40  ;;  %v7122_v52 = vadd.f32 %v7053_v13, %v569_v43  ;;  %v571_v53 = vmul.f32 %v7037_v10, %v517_v37  ;;  %v572_v54 = vmul.f32 %v7037_v10, %v518_v38  ;;  %v530_v32 = vld [vmem:[%s7050_s26 + $0xa8] sm:$0xff]  ;;  %v532_v40 = vld [vmem:[%s7050_s26 + $0xb8] sm:$0xff] }
  0x24   : > { %6076 = vmatpush3.msra.mxu1 %v1091_v28  ;;  %6013 = vmatprep.subr.mxu0 %v5208_v33  ;;  %6694 = vtanh.f32 %v666_v41  ;;  %v7127_v55 = vadd.f32 %v7053_v13, %v570_v49  ;;  %v573_v56 = vmul.f32 %v7037_v10, %v519_v44  ;;  %v574_v57 = vmul.f32 %v7037_v10, %v520_v45  ;;  %v529_v28 = vld [vmem:[%s7050_s26 + $0xa0] sm:$0xff] }
  0x25   : > { %6077 = vmatprep.subr.mxu1 %v1090_v39  ;;  %6014 = vmatpush3.msra.mxu0 %v5208_v33  ;;  %6696 = vtanh.f32 %v667_v42  ;;  %v671_v59 = vmul.f32 0.5, %v7122_v52  ;;  %v7134_v60 = vadd.f32 %v7053_v13, %v571_v53  ;;  %v7137_v61 = vadd.f32 %v7053_v13, %v572_v54 }
  0x26   : > { %6078 = vmatpush3.msra.mxu1 %v1090_v39  ;;  %6127 = vmatprep.subr.mxu0 %v7114_v50  ;;  %6698 = vtanh.f32 %v668_v46  ;;  %v672_v63 = vmul.f32 0.5, %v7127_v55  ;;  %v7144_v0 = vadd.f32 %v7053_v13, %v573_v56  ;;  %v7147_v1 = vadd.f32 %v7053_v13, %v574_v57  ;;  %v531_v39 = vld [vmem:[%s7050_s26 + $0xb0] sm:$0xff] }
  0x27   : > { %6191 = vmatprep.subr.mxu1 %v7119_v51  ;;  %6700 = vtanh.f32 %v669_v47  ;;  %v673_v4 = vmul.f32 0.5, %v7134_v60  ;;  %v674_v5 = vmul.f32 0.5, %v7137_v61  ;;  %v575_v6 = vmul.f32 %v7037_v10, %v521_v58 }
  0x28   : > { %6702 = vtanh.f32 %v670_v48  ;;  %v675_v9 = vmul.f32 0.5, %v7144_v0  ;;  %v676_v11 = vmul.f32 0.5, %v7147_v1  ;;  %v576_v12 = vmul.f32 %v7037_v10, %v522_v62 }
  0x29   : > { %6704 = vtanh.f32 %v671_v59  ;;  %v7160_v14 = vadd.f32 %v7053_v13, %v575_v6  ;;  %v577_v15 = vmul.f32 %v7037_v10, %v523_v2  ;;  %v578_v16 = vmul.f32 %v7037_v10, %v524_v3 }
  0x2a   : > { %6706 = vtanh.f32 %v672_v63  ;;  %v7165_v17 = vadd.f32 %v7053_v13, %v576_v12  ;;  %v579_v18 = vmul.f32 %v7037_v10, %v525_v7  ;;  %v580_v19 = vmul.f32 %v7037_v10, %v526_v8 }
  0x2b   : > { %6708 = vtanh.f32 %v673_v4  ;;  %v677_v21 = vmul.f32 0.5, %v7160_v14  ;;  %v7172_v22 = vadd.f32 %v7053_v13, %v577_v15  ;;  %v7175_v23 = vadd.f32 %v7053_v13, %v578_v16 }
  0x2c   : > { %6710 = vtanh.f32 %v674_v5  ;;  %v678_v25 = vmul.f32 0.5, %v7165_v17  ;;  %v7180_v26 = vadd.f32 %v7053_v13, %v579_v18  ;;  %v7183_v27 = vadd.f32 %v7053_v13, %v580_v19 }
  0x2d   : > { %6712 = vtanh.f32 %v675_v9  ;;  %v679_v33 = vmul.f32 0.5, %v7172_v22  ;;  %v680_v37 = vmul.f32 0.5, %v7175_v23  ;;  %v581_v38 = vmul.f32 %v7037_v10, %v527_v20 }
  0x2e   : > { %6714 = vtanh.f32 %v676_v11  ;;  %v681_v41 = vmul.f32 0.5, %v7180_v26  ;;  %v682_v42 = vmul.f32 0.5, %v7183_v27  ;;  %v582_v43 = vmul.f32 %v7037_v10, %v528_v24 }
  0x2f   : > { %6716 = vtanh.f32 %v677_v21  ;;  %v7196_v44 = vadd.f32 %v7053_v13, %v581_v38  ;;  %v583_v45 = vmul.f32 %v7037_v10, %v529_v28  ;;  %v584_v46 = vmul.f32 %v7037_v10, %v530_v32 }
  0x30   : > { %v6693_v47 = vpop.eup %6692  ;;  %6718 = vtanh.f32 %v678_v25  ;;  %v7201_v48 = vadd.f32 %v7053_v13, %v582_v43  ;;  %v585_v49 = vmul.f32 %v7037_v10, %v531_v39  ;;  %v7205_v53 = vmul.f32 %v7037_v10, %v532_v40 }
  0x31   : > { %v6695_v54 = vpop.eup %6694  ;;  %v761_v56 = vadd.f32 1.0, %v6693_v47  ;;  %6720 = vtanh.f32 %v679_v33  ;;  %v683_v57 = vmul.f32 0.5, %v7196_v44  ;;  %v7209_v58 = vadd.f32 %v7053_v13, %v583_v45 }
  0x32   : > { %v6697_v59 = vpop.eup %6696  ;;  %v762_v62 = vadd.f32 1.0, %v6695_v54  ;;  %6722 = vtanh.f32 %v680_v37  ;;  %v684_v63 = vmul.f32 0.5, %v7201_v48  ;;  %v7213_v2 = vadd.f32 %v7053_v13, %v584_v46  ;;  %v533_v54 = vld [vmem:[%s7050_s26 + $0xc0] sm:$0xff] }
  0x33   : > { %v6699_v3 = vpop.eup %6698  ;;  %v809_v4 = vmul.f32 0.5, %v761_v56  ;;  %v763_v5 = vadd.f32 1.0, %v6697_v59  ;;  %6724 = vtanh.f32 %v681_v41  ;;  %v685_v6 = vmul.f32 0.5, %v7209_v58 }
  0x34   : > { %v6701_v7 = vpop.eup %6700  ;;  %v810_v8 = vmul.f32 0.5, %v762_v62  ;;  %v764_v9 = vadd.f32 1.0, %v6699_v3  ;;  %6726 = vtanh.f32 %v682_v42  ;;  %v7217_v11 = vadd.f32 %v7053_v13, %v585_v49 }
  0x35   : > { %v6703_v12 = vpop.eup %6702  ;;  %v857_v15 = vmul.f32 %v809_v4, %v7075_v29  ;;  %v811_v16 = vmul.f32 0.5, %v763_v5  ;;  %v765_v18 = vadd.f32 1.0, %v6701_v7  ;;  %6728 = vtanh.f32 %v683_v57  ;;  %v534_v5 = vld [vmem:[%s7050_s26 + $0xc8] sm:$0xff] }
  0x36   : > { %v6705_v19 = vpop.eup %6704  ;;  %v858_v20 = vmul.f32 %v810_v8, %v7078_v30  ;;  %v812_v21 = vmul.f32 0.5, %v764_v9  ;;  %v766_v24 = vadd.f32 1.0, %v6703_v12  ;;  %6730 = vtanh.f32 %v684_v63 }
  0x37   : > { %v6707_v25 = vpop.eup %6706  ;;  %906 = vst.msk [vmem:[#allocation2] sm:$0xff] %vm905_vm0, %v857_v15  ;;  %v859_v28 = vmul.f32 %v811_v16, %v7081_v31  ;;  %v813_v32 = vmul.f32 0.5, %v765_v18  ;;  %v767_v33 = vadd.f32 1.0, %v6705_v19  ;;  %6732 = vtanh.f32 %v685_v6 }
  0x38   : > { %v6709_v37 = vpop.eup %6708  ;;  %907 = vst.msk [vmem:[#allocation2 + $0x8] sm:$0xff] %vm905_vm0, %v858_v20  ;;  %v6880_v29 = vmov 0.0   ;;  %v860_v30 = vmul.f32 %v812_v21, %v7088_v34  ;;  %v814_v38 = vmul.f32 0.5, %v766_v24  ;;  %v768_v39 = vadd.f32 1.0, %v6707_v25 }
  0x39   : > { %1010 = vst.msk [vmem:[#allocation2] sm:$0x1] %vm1009_vm1, %v6880_v29  ;;  %v686_v40 = vmul.f32 0.5, %v7213_v2  ;;  %v6711_v41 = vpop.eup %6710  ;;  %v861_v31 = vmul.f32 %v813_v32, %v7091_v35  ;;  %v815_v42 = vmul.f32 0.5, %v767_v33  ;;  %v769_v43 = vadd.f32 1.0, %v6709_v37 }
  0x3a   : > { %1051 = vst.msk [vmem:[#allocation2] sm:$0xff] %vm905_vm0, %v6880_v29  ;;  %1052 = vst.msk [vmem:[#allocation2 + $0x8] sm:$0xff] %vm905_vm0, %v6880_v29  ;;  %v687_v34 = vmul.f32 0.5, %v7217_v11  ;;  %v6713_v45 = vpop.eup %6712  ;;  %v862_v46 = vmul.f32 %v814_v38, %v7094_v36  ;;  %v816_v47 = vmul.f32 0.5, %v768_v39  ;;  %v770_v49 = vadd.f32 1.0, %v6711_v41 }
  0x3b   : > { %908 = vst.msk [vmem:[#allocation2 + $0x10] sm:$0xff] %vm905_vm0, %v859_v28  ;;  %909 = vst.msk [vmem:[#allocation2 + $0x18] sm:$0xff] %vm905_vm0, %v860_v30  ;;  %6734 = vtanh.f32 %v686_v40  ;;  %v6715_v56 = vpop.eup %6714  ;;  %v863_v35 = vmul.f32 %v815_v42, %v7122_v52  ;;  %v817_v57 = vmul.f32 0.5, %v769_v43  ;;  %v771_v59 = vadd.f32 1.0, %v6713_v45 }
  0x3c   : > { %1029 = vst.msk [vmem:[#allocation2 + $0x11] sm:$0x7f] %vm1028_vm2, %v6880_v29  ;;  %6736 = vtanh.f32 %v687_v34  ;;  %v6717_v36 = vpop.eup %6716  ;;  %v864_v62 = vmul.f32 %v816_v47, %v7127_v55  ;;  %v818_v63 = vmul.f32 0.5, %v770_v49  ;;  %v772_v3 = vadd.f32 1.0, %v6715_v56 }
  0x3d   : > { %1053 = vst.msk [vmem:[#allocation2 + $0x10] sm:$0xff] %vm905_vm0, %v6880_v29  ;;  %910 = vst.msk [vmem:[#allocation2 + $0x20] sm:$0xff] %vm905_vm0, %v861_v31  ;;  %v7250_v4 = vadd.f32 %v7053_v13, %v7205_v53  ;;  %v6719_v6 = vpop.eup %6718  ;;  %v865_v52 = vmul.f32 %v817_v57, %v7134_v60  ;;  %v819_v7 = vmul.f32 0.5, %v771_v59  ;;  %v773_v8 = vadd.f32 1.0, %v6717_v36  ;;  %v535_v59 = vld [vmem:[%s7050_s26 + $0xd0] sm:$0xff] }
  0x3e   : > { %1011 = vst.msk [vmem:[#allocation2 + $0x18] sm:$0x1] %vm1009_vm1, %v6880_v29  ;;  %v587_v9 = vmul.f32 %v7037_v10, %v533_v54  ;;  %v6721_v55 = vpop.eup %6720  ;;  %v866_v53 = vmul.f32 %v818_v63, %v7137_v61  ;;  %v820_v12 = vmul.f32 0.5, %v772_v3  ;;  %v774_v15 = vadd.f32 1.0, %v6719_v6  ;;  %v5326_v54 = vld [vmem:[%s9193_s4 + $0xf0] sm:$0xff]  ;;  %v536_v6 = vld [vmem:[%s7050_s26 + $0xd8] sm:$0xff] }
  0x3f   : > { %911 = vst.msk [vmem:[#allocation2 + $0x28] sm:$0xff] %vm905_vm0, %v862_v46  ;;  %912 = vst.msk [vmem:[#allocation2 + $0x30] sm:$0xff] %vm905_vm0, %v863_v35  ;;  %v688_v16 = vmul.f32 0.5, %v7250_v4  ;;  %v6723_v18 = vpop.eup %6722  ;;  %v867_v60 = vmul.f32 %v819_v7, %v7144_v0  ;;  %v821_v19 = vmul.f32 0.5, %v773_v8  ;;  %v775_v20 = vadd.f32 1.0, %v6721_v55  ;;  %v5286_v0 = vld [vmem:[%s9193_s4 + $0xb0] sm:$0xff] }
  0x40   : > { %1030 = vst.msk [vmem:[#allocation2 + $0x29] sm:$0x7f] %vm1028_vm2, %v6880_v29  ;;  %v588_v21 = vmul.f32 %v7037_v10, %v534_v5  ;;  %v6725_v24 = vpop.eup %6724  ;;  %v868_v61 = vmul.f32 %v820_v12, %v7147_v1  ;;  %v822_v33 = vmul.f32 0.5, %v774_v15  ;;  %v776_v37 = vadd.f32 1.0, %v6723_v18 }
  0x41   : > { %913 = vst.msk [vmem:[#allocation2 + $0x38] sm:$0xff] %vm905_vm0, %v864_v62  ;;  %914 = vst.msk [vmem:[#allocation2 + $0x40] sm:$0xff] %vm905_vm0, %v865_v52  ;;  %v1098_v25 = vld [vmem:[#allocation2 + $0x1] sm:$0xff]  ;;  %6738 = vtanh.f32 %v688_v16  ;;  %v6727_v30 = vpop.eup %6726  ;;  %v869_v38 = vmul.f32 %v821_v19, %v7160_v14  ;;  %v823_v1 = vmul.f32 0.5, %v775_v20  ;;  %v777_v39 = vadd.f32 1.0, %v6725_v24  ;;  %v539_v20 = vld [vmem:[%s7050_s26 + $0xf0] sm:$0xff] }
  0x42   : > { %1012 = vst.msk [vmem:[#allocation2 + $0x30] sm:$0x1] %vm1009_vm1, %v6880_v29  ;;  %v1058_v28 = vld [vmem:[#allocation2] sm:$0xff]  ;;  %v1059_v32 = vld [vmem:[#allocation2 + $0x8] sm:$0xff]  ;;  %6015 = vmatprep.mubr.msk.f32.mxu0 %vm905_vm0, %v1098_v25  ;;  %v7280_v40 = vadd.f32 %v7053_v13, %v587_v9  ;;  %v6729_v41 = vpop.eup %6728  ;;  %v870_v34 = vmul.f32 %v822_v33, %v7165_v17  ;;  %v824_v45 = vmul.f32 0.5, %v776_v37  ;;  %v778_v46 = vadd.f32 1.0, %v6727_v30 }
  0x43   : > { %1031 = vst.msk [vmem:[#allocation2 + $0x41] sm:$0x7f] %vm1028_vm2, %v6880_v29  ;;  %6079 = vmatprep.mubr.msk.f32.mxu1 %vm905_vm0, %v1058_v28  ;;  %v7286_v14 = vadd.f32 %v7053_v13, %v588_v21  ;;  %v6731_v47 = vpop.eup %6730  ;;  %v871_v17 = vmul.f32 %v823_v1, %v7172_v22  ;;  %v825_v56 = vmul.f32 0.5, %v777_v39  ;;  %v779_v35 = vadd.f32 1.0, %v6729_v41  ;;  %v537_v52 = vld [vmem:[%s7050_s26 + $0xe0] sm:$0xff]  ;;  %v540_v33 = vld [vmem:[%s7050_s26 + $0xf8] sm:$0xff] }
  0x44   : > { %915 = vst.msk [vmem:[#allocation2 + $0x48] sm:$0xff] %vm905_vm0, %v866_v53  ;;  %916 = vst.msk [vmem:[#allocation2 + $0x50] sm:$0xff] %vm905_vm0, %v867_v60  ;;  %v1099_v31 = vld [vmem:[#allocation2 + $0x9] sm:$0xff]  ;;  %6080 = vmatmul.mubr.msk.f32.vlgmr.msra.gmra.mxu1 %vm905_vm0, %v1059_v32  ;;  %v1100_v42 = vld [vmem:[#allocation2 + $0x19] sm:$0xff]  ;;  %v689_v57 = vmul.f32 0.5, %v7280_v40  ;;  %v6733_v36 = vpop.eup %6732  ;;  %v872_v22 = vmul.f32 %v824_v45, %v7175_v23  ;;  %v826_v63 = vmul.f32 0.5, %v778_v46  ;;  %v589_v12 = vmul.f32 %v7037_v10, %v535_v59 }
  0x45   : > { %1013 = vst.msk [vmem:[#allocation2 + $0x48] sm:$0x1] %vm1009_vm1, %v6880_v29  ;;  %v1060_v43 = vld [vmem:[#allocation2 + $0x18] sm:$0xff]  ;;  %6016 = vmatmul.mubr.msk.f32.vlgmr.msra.gmra.mxu0 %vm905_vm0, %v1099_v31  ;;  %v1061_v49 = vld [vmem:[#allocation2 + $0x20] sm:$0xff]  ;;  %v780_v3 = vadd.f32 1.0, %v6731_v47  ;;  %v690_v5 = vmul.f32 0.5, %v7286_v14  ;;  %6192 = vmatpush3.msra.mxu1 %v7119_v51  ;;  %v873_v8 = vmul.f32 %v825_v56, %v7180_v26  ;;  %v591_v19 = vmul.f32 %v7037_v10, %v537_v52 }
  0x46   : > { %917 = vst.msk [vmem:[#allocation2 + $0x58] sm:$0xff] %vm905_vm0, %v868_v61  ;;  %6082 = vmatprep.mubr.msk.f32.mxu1 %vm905_vm0, %v1060_v43  ;;  %918 = vst.msk [vmem:[#allocation2 + $0x60] sm:$0xff] %vm905_vm0, %v869_v38  ;;  %6128 = vmatpush3.msra.mxu0 %v7114_v50  ;;  %v1101_v62 = vld [vmem:[#allocation2 + $0x21] sm:$0xff]  ;;  %v827_v9 = vmul.f32 0.5, %v779_v35  ;;  %v781_v55 = vadd.f32 1.0, %v6733_v36  ;;  %6740 = vtanh.f32 %v689_v57  ;;  %v874_v51 = vmul.f32 %v826_v63, %v7183_v27  ;;  %v543_v36 = vld [vmem:[%s7050_s26 + $0x110] sm:$0xff] }
  0x47   : > { %1032 = vst.msk [vmem:[#allocation2 + $0x59] sm:$0x7f] %vm1028_vm2, %v6880_v29  ;;  %6018 = vmatprep.mubr.msk.f32.mxu0 %vm905_vm0, %v1100_v42  ;;  %6129 = vmatprep.subr.mxu0 %v5286_v0  ;;  %v538_v53 = vld [vmem:[%s7050_s26 + $0xe8] sm:$0xff]  ;;  %v828_v26 = vmul.f32 0.5, %v780_v3  ;;  %6742 = vtanh.f32 %v690_v5  ;;  %v590_v27 = vmul.f32 %v7037_v10, %v536_v6  ;;  %v7334_v61 = vadd.f32 %v7053_v13, %v589_v12  ;;  %v541_v43 = vld [vmem:[%s7050_s26 + $0x100] sm:$0xff]  ;;  %v544_v6 = vld [vmem:[%s7050_s26 + $0x118] sm:$0xff] }
  0x48   : > { %919 = vst.msk [vmem:[#allocation2 + $0x68] sm:$0xff] %vm905_vm0, %v870_v34  ;;  %v1102_v50 = vld [vmem:[#allocation2 + $0x31] sm:$0xff]  ;;  %920 = vst.msk [vmem:[#allocation2 + $0x70] sm:$0xff] %vm905_vm0, %v871_v17  ;;  %6083 = vmatmul.mubr.msk.f32.gmra.mxu1 %vm905_vm0, %v1061_v49  ;;  %6130 = vmatpush3.msra.mxu0 %v5286_v0  ;;  %v5285_v23 = vld [vmem:[%s9193_s4 + $0xa8] sm:$0xff]  ;;  %v6735_v15 = vpop.eup %6734  ;;  %v875_v18 = vmul.f32 %v827_v9, %v7196_v44  ;;  %v829_v60 = vmul.f32 0.5, %v781_v55  ;;  %v592_v44 = vmul.f32 %v7037_v10, %v538_v53 }
  0x49   : > { %1014 = vst.msk [vmem:[#allocation2 + $0x60] sm:$0x1] %vm1009_vm1, %v6880_v29  ;;  %v1062_v7 = vld [vmem:[#allocation2 + $0x30] sm:$0xff]  ;;  %6019 = vmatmul.mubr.msk.f32.gmra.mxu0 %vm905_vm0, %v1101_v62  ;;  %v1063_v16 = vld [vmem:[#allocation2 + $0x38] sm:$0xff]  ;;  %v6737_v21 = vpop.eup %6736  ;;  %6193 = vmatprep.subr.mxu1 %v5326_v54  ;;  %v876_v28 = vmul.f32 %v828_v26, %v7201_v48  ;;  %v782_v32 = vadd.f32 1.0, %v6735_v15  ;;  %v5325_v30 = vld [vmem:[%s9193_s4 + $0xe8] sm:$0xff]  ;;  %v7346_v38 = vadd.f32 %v7053_v13, %v590_v27 }
  0x4a   : > { %1033 = vst.msk [vmem:[#allocation2 + $0x71] sm:$0x7f] %vm1028_vm2, %v6880_v29  ;;  %6085 = vmatprep.mubr.msk.f32.mxu1 %vm905_vm0, %v1062_v7  ;;  %6021 = vmatprep.mubr.msk.f32.mxu0 %vm905_vm0, %v1102_v50  ;;  %v1103_v24 = vld [vmem:[#allocation2 + $0x39] sm:$0xff]  ;;  %v877_v48 = vmul.f32 %v829_v60, %v7209_v58  ;;  %v783_v0 = vadd.f32 1.0, %v6737_v21  ;;  %v7349_v1 = vadd.f32 %v7053_v13, %v591_v19  ;;  %v691_v41 = vmul.f32 0.5, %v7334_v61 }
  0x4b   : > { %921 = vst.msk [vmem:[#allocation2 + $0x78] sm:$0xff] %vm905_vm0, %v872_v22  ;;  %922 = vst.msk [vmem:[#allocation2 + $0x80] sm:$0xff] %vm905_vm0, %v873_v8  ;;  %v1104_v37 = vld [vmem:[#allocation2 + $0x49] sm:$0xff]  ;;  %6194 = vmatpush3.msra.mxu1 %v5326_v54  ;;  %6131 = vmatprep.subr.mxu0 %v5285_v23  ;;  %v5284_v58 = vld [vmem:[%s9193_s4 + $0xa0] sm:$0xff]  ;;  %v830_v39 = vmul.f32 0.5, %v782_v32  ;;  %v7360_v31 = vadd.f32 %v7053_v13, %v592_v44  ;;  %v593_v42 = vmul.f32 %v7037_v10, %v539_v20 }
  0x4c   : > { %1015 = vst.msk [vmem:[#allocation2 + $0x78] sm:$0x1] %vm1009_vm1, %v6880_v29  ;;  %v1064_v25 = vld [vmem:[#allocation2 + $0x48] sm:$0xff]  ;;  %6086 = vmatmul.mubr.msk.f32.gmra.mxu1 %vm905_vm0, %v1063_v16  ;;  %6132 = vmatpush3.msra.mxu0 %v5285_v23  ;;  %v1065_v34 = vld [vmem:[#allocation2 + $0x50] sm:$0xff]  ;;  %v831_v45 = vmul.f32 0.5, %v783_v0  ;;  %v692_v46 = vmul.f32 0.5, %v7346_v38  ;;  %v594_v49 = vmul.f32 %v7037_v10, %v540_v33  ;;  %6744 = vtanh.f32 %v691_v41 }
  0x4d   : > { %923 = vst.msk [vmem:[#allocation2 + $0x88] sm:$0xff] %vm905_vm0, %v874_v51  ;;  %924 = vst.msk [vmem:[#allocation2 + $0x90] sm:$0xff] %vm905_vm0, %v875_v18  ;;  %6022 = vmatmul.mubr.msk.f32.gmra.mxu0 %vm905_vm0, %v1103_v24  ;;  %6088 = vmatprep.mubr.msk.f32.mxu1 %vm905_vm0, %v1064_v25  ;;  %v693_v47 = vmul.f32 0.5, %v7349_v1  ;;  %v542_v54 = vld [vmem:[%s7050_s26 + $0x108] sm:$0xff]  ;;  %v1105_v17 = vld [vmem:[#allocation2 + $0x51] sm:$0xff]  ;;  %v878_v35 = vmul.f32 %v830_v39, %v7213_v2  ;;  %v694_v57 = vmul.f32 0.5, %v7360_v31 }
  0x4e   : > { %1034 = vst.msk [vmem:[#allocation2 + $0x89] sm:$0x7f] %vm1028_vm2, %v6880_v29  ;;  %6024 = vmatprep.mubr.msk.f32.mxu0 %vm905_vm0, %v1104_v37  ;;  %6195 = vmatprep.subr.mxu1 %v5325_v30  ;;  %v7379_v59 = vadd.f32 %v7053_v13, %v593_v42  ;;  %v6739_v62 = vpop.eup %6738  ;;  %v879_v63 = vmul.f32 %v831_v45, %v7217_v11  ;;  %v5324_v3 = vld [vmem:[%s9193_s4 + $0xe0] sm:$0xff]  ;;  %6746 = vtanh.f32 %v692_v46  ;;  %v5283_v11 = vld [vmem:[%s9193_s4 + $0x98] sm:$0xff]  ;;  %v546_v51 = vld [vmem:[%s7050_s26 + $0x128] sm:$0xff] }
  0x4f   : > { %925 = vst.msk [vmem:[#allocation2 + $0x98] sm:$0xff] %vm905_vm0, %v876_v28  ;;  %926 = vst.msk [vmem:[#allocation2 + $0xa0] sm:$0xff] %vm905_vm0, %v877_v48  ;;  %v1106_v22 = vld [vmem:[#allocation2 + $0x61] sm:$0xff]  ;;  %6196 = vmatpush3.msra.mxu1 %v5325_v30  ;;  %6133 = vmatprep.subr.mxu0 %v5284_v58  ;;  %v7387_v2 = vadd.f32 %v7053_v13, %v594_v49  ;;  %v595_v5 = vmul.f32 %v7037_v10, %v541_v43  ;;  %v784_v52 = vadd.f32 1.0, %v6739_v62  ;;  %v1107_v26 = vld [vmem:[#allocation2 + $0x69] sm:$0xff] }
  0x50   : > { %1016 = vst.msk [vmem:[#allocation2 + $0x90] sm:$0x1] %vm1009_vm1, %v6880_v29  ;;  %v7372_v56 = vld [vmem:[#allocation2 + $0x60] sm:$0xff]  ;;  %6089 = vmatmul.mubr.msk.f32.gmra.mxu1 %vm905_vm0, %v1065_v34  ;;  %6134 = vmatpush3.msra.mxu0 %v5284_v58  ;;  %6748 = vtanh.f32 %v693_v47  ;;  %v695_v50 = vmul.f32 0.5, %v7379_v59  ;;  %v596_v7 = vmul.f32 %v7037_v10, %v542_v54  ;;  %v7402_v9 = vld [vmem:[#allocation2 + $0x68] sm:$0xff]  ;;  %v597_v23 = vmul.f32 %v7037_v10, %v543_v36  ;;  %v5323_v27 = vld [vmem:[%s9193_s4 + $0xd8] sm:$0xff] }
  0x51   : > { %1035 = vst.msk [vmem:[#allocation2 + $0xa1] sm:$0x7f] %vm1028_vm2, %v6880_v29  ;;  %v545_v8 = vld [vmem:[%s7050_s26 + $0x120] sm:$0xff]  ;;  %6025 = vmatmul.mubr.msk.f32.gmra.mxu0 %vm905_vm0, %v1105_v17  ;;  %6091 = vmatprep.mubr.msk.f32.mxu1 %vm905_vm0, %v7372_v56  ;;  %6750 = vtanh.f32 %v694_v57  ;;  %v696_v55 = vmul.f32 0.5, %v7387_v2  ;;  %v7409_v53 = vadd.f32 %v7053_v13, %v595_v5  ;;  %v832_v15 = vmul.f32 0.5, %v784_v52  ;;  %v5282_v28 = vld [vmem:[%s9193_s4 + $0x90] sm:$0xff] }
  0x52   : > { %927 = vst.msk [vmem:[#allocation2 + $0xa8] sm:$0xff] %vm905_vm0, %v878_v35  ;;  %928 = vst.msk [vmem:[#allocation2 + $0xb0] sm:$0xff] %vm905_vm0, %v879_v63  ;;  %6027 = vmatprep.mubr.msk.f32.mxu0 %vm905_vm0, %v1106_v22  ;;  %6197 = vmatprep.subr.mxu1 %v5324_v3  ;;  %6752 = vtanh.f32 %v695_v50  ;;  %v7417_v16 = vadd.f32 %v7053_v13, %v596_v7  ;;  %v598_v18 = vmul.f32 %v7037_v10, %v544_v6  ;;  %v1108_v60 = vld [vmem:[#allocation2 + $0x79] sm:$0xff]  ;;  %v547_v37 = vld [vmem:[%s7050_s26 + $0x130] sm:$0xff] }
  0x53   : > { %1017 = vst.msk [vmem:[#allocation2 + $0xa8] sm:$0x1] %vm1009_vm1, %v6880_v29  ;;  %v7414_v12 = vld [vmem:[#allocation2 + $0x78] sm:$0xff]  ;;  %6198 = vmatpush3.msra.mxu1 %v5324_v3  ;;  %6135 = vmatprep.subr.mxu0 %v5283_v11  ;;  %6754 = vtanh.f32 %v696_v55  ;;  %v697_v19 = vmul.f32 0.5, %v7409_v53  ;;  %v7425_v20 = vadd.f32 %v7053_v13, %v597_v23  ;;  %v599_v21 = vmul.f32 %v7037_v10, %v545_v8  ;;  %v6741_v24 = vpop.eup %6740  ;;  %v549_v46 = vld [vmem:[%s7050_s26 + $0x140] sm:$0xff]  ;;  %v5322_v54 = vld [vmem:[%s9193_s4 + $0xd0] sm:$0xff] }
  0x54   : > { %6092 = vmatmul.mubr.msk.f32.gmra.mxu1 %vm905_vm0, %v7402_v9  ;;  %v880_v25 = vmul.f32 %v832_v15, %v7250_v4  ;;  %6136 = vmatpush3.msra.mxu0 %v5283_v11  ;;  %v698_v32 = vmul.f32 0.5, %v7417_v16  ;;  %v7436_v44 = vadd.f32 %v7053_v13, %v598_v18  ;;  %v600_v33 = vmul.f32 %v7037_v10, %v546_v51  ;;  %v6743_v30 = vpop.eup %6742  ;;  %v7443_v4 = vld [vmem:[#allocation2 + $0x80] sm:$0xff]  ;;  %v548_v39 = vld [vmem:[%s7050_s26 + $0x138] sm:$0xff]  ;;  %v550_v57 = vld [vmem:[%s7050_s26 + $0x148] sm:$0xff] }
  0x55   : > { %6028 = vmatmul.mubr.msk.f32.gmra.mxu0 %vm905_vm0, %v1107_v26  ;;  %6094 = vmatprep.mubr.msk.f32.mxu1 %vm905_vm0, %v7414_v12  ;;  %v785_v48 = vadd.f32 1.0, %v6741_v24  ;;  %6756 = vtanh.f32 %v697_v19  ;;  %v699_v0 = vmul.f32 0.5, %v7425_v20  ;;  %v7447_v58 = vadd.f32 %v7053_v13, %v599_v21  ;;  %v1109_v41 = vld [vmem:[#allocation2 + $0x81] sm:$0xff]  ;;  %v551_v3 = vld [vmem:[%s7050_s26 + $0x150] sm:$0xff]  ;;  %v552_v5 = vld [vmem:[%s7050_s26 + $0x158] sm:$0xff] }
  0x56   : > { %6030 = vmatprep.mubr.msk.f32.mxu0 %vm905_vm0, %v1108_v60  ;;  %929 = vst.msk [vmem:[#allocation2 + $0xb8] sm:$0xff] %vm905_vm0, %v880_v25  ;;  %v786_v43 = vadd.f32 1.0, %v6743_v30  ;;  %6199 = vmatprep.subr.mxu1 %v5323_v27  ;;  %6758 = vtanh.f32 %v698_v32  ;;  %v700_v34 = vmul.f32 0.5, %v7436_v44  ;;  %v7456_v45 = vadd.f32 %v7053_v13, %v600_v33  ;;  %v1110_v47 = vld [vmem:[#allocation2 + $0x91] sm:$0xff]  ;;  %v5281_v22 = vld [vmem:[%s9193_s4 + $0x88] sm:$0xff]  ;;  %v553_v7 = vld [vmem:[%s7050_s26 + $0x160] sm:$0xff] }
  0x57   : > { %v7451_v42 = vld [vmem:[#allocation2 + $0x90] sm:$0xff]  ;;  %1036 = vst.msk [vmem:[#allocation2 + $0xb9] sm:$0x7f] %vm1028_vm2, %v6880_v29  ;;  %v833_v49 = vmul.f32 0.5, %v785_v48  ;;  %6200 = vmatpush3.msra.mxu1 %v5323_v27  ;;  %6137 = vmatprep.subr.mxu0 %v5282_v28  ;;  %6760 = vtanh.f32 %v699_v0  ;;  %v701_v17 = vmul.f32 0.5, %v7447_v58  ;;  %v601_v35 = vmul.f32 %v7037_v10, %v547_v37  ;;  %v7479_v6 = vld [vmem:[#allocation2 + $0x98] sm:$0xff] }
  0x58   : > { %6095 = vmatmul.mubr.msk.f32.gmra.mxu1 %vm905_vm0, %v7443_v4  ;;  %v834_v36 = vmul.f32 0.5, %v786_v43  ;;  %6138 = vmatpush3.msra.mxu0 %v5282_v28  ;;  %6762 = vtanh.f32 %v700_v34  ;;  %v702_v62 = vmul.f32 0.5, %v7456_v45  ;;  %v602_v63 = vmul.f32 %v7037_v10, %v548_v39  ;;  %v1111_v8 = vld [vmem:[#allocation2 + $0x99] sm:$0xff] }
  0x59   : > { %6031 = vmatmul.mubr.msk.f32.gmra.mxu0 %vm905_vm0, %v1109_v41  ;;  %6097 = vmatprep.mubr.msk.f32.mxu1 %vm905_vm0, %v7451_v42  ;;  %v881_v52 = vmul.f32 %v833_v49, %v7280_v40  ;;  %6764 = vtanh.f32 %v701_v17  ;;  %v7483_v11 = vadd.f32 %v7053_v13, %v601_v35  ;;  %v603_v50 = vmul.f32 %v7037_v10, %v549_v46  ;;  %v6745_v26 = vpop.eup %6744  ;;  %v1112_v15 = vld [vmem:[#allocation2 + $0xa9] sm:$0xff]  ;;  %v5280_v32 = vld [vmem:[%s9193_s4 + $0x80] sm:$0xff] }
  0x5a   : > { %6033 = vmatprep.mubr.msk.f32.mxu0 %vm905_vm0, %v1110_v47  ;;  %v7488_v55 = vld [vmem:[#allocation2 + $0xa8] sm:$0xff]  ;;  %v882_v23 = vmul.f32 %v834_v36, %v7286_v14  ;;  %6201 = vmatprep.subr.mxu1 %v5322_v54  ;;  %6766 = vtanh.f32 %v702_v62  ;;  %v7492_v51 = vadd.f32 %v7053_v13, %v602_v63  ;;  %v604_v40 = vmul.f32 %v7037_v10, %v550_v57  ;;  %v7521_v30 = vld [vmem:[#allocation2 + $0xb0] sm:$0xff]  ;;  %v5320_v47 = vld [vmem:[%s9193_s4 + $0xc0] sm:$0xff] }
  0x5b   : > { %930 = vst.msk [vmem:[#allocation2 + $0xc0] sm:$0xff] %vm905_vm0, %v881_v52  ;;  %6202 = vmatpush3.msra.mxu1 %v5322_v54  ;;  %6139 = vmatprep.subr.mxu0 %v5281_v22  ;;  %v703_v18 = vmul.f32 0.5, %v7483_v11  ;;  %v7498_v60 = vadd.f32 %v7053_v13, %v603_v50  ;;  %v5321_v14 = vld [vmem:[%s9193_s4 + $0xc8] sm:$0xff]  ;;  %v605_v27 = vmul.f32 %v7037_v10, %v551_v3  ;;  %v6747_v21 = vpop.eup %6746  ;;  %v787_v24 = vadd.f32 1.0, %v6745_v26  ;;  %v7541_v57 = vld [vmem:[%s9193_s4 + $0x138] sm:$0xff] }
  0x5c   : > { %v606_v19 = vmul.f32 %v7037_v10, %v552_v5  ;;  %6098 = vmatmul.mubr.msk.f32.gmra.mxu1 %vm905_vm0, %v7479_v6  ;;  %931 = vst.msk [vmem:[#allocation2 + $0xc8] sm:$0xff] %vm905_vm0, %v882_v23  ;;  %6140 = vmatpush3.msra.mxu0 %v5281_v22  ;;  %v704_v25 = vmul.f32 0.5, %v7492_v51  ;;  %v7512_v28 = vadd.f32 %v7053_v13, %v604_v40  ;;  %v788_v48 = vadd.f32 1.0, %v6747_v21  ;;  %v7549_v3 = vld [vmem:[%s9193_s4 + $0x178] sm:$0xff] }
  0x5d   : > { %1018 = vst.msk [vmem:[#allocation2 + $0xc0] sm:$0x1] %vm1009_vm1, %v6880_v29  ;;  %v607_v33 = vmul.f32 %v7037_v10, %v553_v7  ;;  %v6749_v37 = vpop.eup %6748  ;;  %6034 = vmatmul.mubr.msk.f32.gmra.mxu0 %vm905_vm0, %v1111_v8  ;;  %6100 = vmatprep.mubr.msk.f32.mxu1 %vm905_vm0, %v7488_v55  ;;  %6768 = vtanh.f32 %v703_v18  ;;  %v705_v0 = vmul.f32 0.5, %v7498_v60  ;;  %v7525_v39 = vadd.f32 %v7053_v13, %v605_v27  ;;  %v1113_v10 = vld [vmem:[#allocation2 + $0xb1] sm:$0xff]  ;;  %v7533_v13 = vld [vmem:[%s7034_s28] ss:$0 sm:$0xff] }
  0x5e   : > { %v6751_v41 = vpop.eup %6750  ;;  %6036 = vmatprep.mubr.msk.f32.mxu0 %vm905_vm0, %v1112_v15  ;;  %v835_v43 = vmul.f32 0.5, %v787_v24  ;;  %v789_v34 = vadd.f32 1.0, %v6749_v37  ;;  %6770 = vtanh.f32 %v704_v25  ;;  %6203 = vmatprep.subr.mxu1 %v5321_v14  ;;  %v706_v46 = vmul.f32 0.5, %v7512_v28  ;;  %v555_v15 = vld [vmem:[%s7050_s26 + $0x170] sm:$0xff]  ;;  %s6808_s28 = scalar_lea.vmem %s6807_s25, 8192 }
  0x5f   : > { %v6753_v49 = vpop.eup %6752  ;;  %v836_v54 = vmul.f32 0.5, %v788_v48  ;;  %v790_v17 = vadd.f32 1.0, %v6751_v41  ;;  %6772 = vtanh.f32 %v705_v0  ;;  %6204 = vmatpush3.msra.mxu1 %v5321_v14  ;;  %v7536_v35 = vadd.f32 %v7533_v13, %v606_v19  ;;  %6141 = vmatprep.subr.mxu0 %v5280_v32  ;;  %v7595_v41 = vld [vmem:[%s7022_s18] ss:$0 sm:$0xff] }
  0x60   : > { %v6755_v36 = vpop.eup %6754  ;;  %6101 = vmatmul.mubr.msk.f32.gmra.mxu1 %vm905_vm0, %v7521_v30  ;;  %v883_v62 = vmul.f32 %v835_v43, %v7334_v61  ;;  %v837_v22 = vmul.f32 0.5, %v789_v34  ;;  %v791_v63 = vadd.f32 1.0, %v6753_v49  ;;  %6774 = vtanh.f32 %v706_v46  ;;  %6142 = vmatpush3.msra.mxu0 %v5280_v32  ;;  %v556_v49 = vld [vmem:[%s7050_s26 + $0x178] sm:$0xff] }
  0x61   : > { %6037 = vmatmul.mubr.msk.f32.gmra.mxu0 %vm905_vm0, %v1113_v10  ;;  %v884_v5 = vmul.f32 %v836_v54, %v7346_v38  ;;  %v838_v52 = vmul.f32 0.5, %v790_v17  ;;  %v792_v50 = vadd.f32 1.0, %v6755_v36  ;;  %v707_v7 = vmul.f32 0.5, %v7525_v39  ;;  %6205 = vmatprep.subr.mxu1 %v5320_v47  ;;  %v554_v38 = vld [vmem:[%s7050_s26 + $0x168] sm:$0xff] }
  0x62   : > { %v6757_v61 = vpop.eup %6756  ;;  %932 = vst.msk [vmem:[#allocation2 + $0xd0] sm:$0xff] %vm905_vm0, %v883_v62  ;;  %v885_v8 = vmul.f32 %v837_v22, %v7349_v1  ;;  %v839_v23 = vmul.f32 0.5, %v791_v63  ;;  %v708_v40 = vmul.f32 0.5, %v7536_v35  ;;  %v7562_v26 = vadd.f32 %v7533_v13, %v607_v33  ;;  %6206 = vmatpush3.msra.mxu1 %v5320_v47  ;;  %6255 = vmatprep.subr.mxu0 %v7541_v57  ;;  %v954_v22 = vld [vmem:[%s7588_s20] sm:$0xff] }
  0x63   : > { %v6759_v18 = vpop.eup %6758  ;;  %v1114_v14 = vld [vmem:[#allocation2 + $0xc1] sm:$0xff]  ;;  %1037 = vst.msk [vmem:[#allocation2 + $0xd1] sm:$0x7f] %vm1028_vm2, %v6880_v29  ;;  %v886_v1 = vmul.f32 %v838_v52, %v7360_v31  ;;  %v840_v21 = vmul.f32 0.5, %v792_v50  ;;  %v793_v24 = vadd.f32 1.0, %v6757_v61  ;;  %6776 = vtanh.f32 %v707_v7  ;;  %6319 = vmatprep.subr.mxu1 %v7549_v3 }
  0x64   : > { %v7567_v27 = vld [vmem:[#allocation2 + $0xc0] sm:$0xff]  ;;  %v7571_v19 = vld [vmem:[#allocation2 + $0xc8] sm:$0xff]  ;;  %933 = vst.msk [vmem:[#allocation2 + $0xd8] sm:$0xff] %vm905_vm0, %v884_v5  ;;  %v6761_v25 = vpop.eup %6760  ;;  %6039 = vmatprep.mubr.msk.f32.mxu0 %vm905_vm0, %v1114_v14  ;;  %934 = vst.msk [vmem:[#allocation2 + $0xe0] sm:$0xff] %vm905_vm0, %v885_v8  ;;  %v887_v32 = vmul.f32 %v839_v23, %v7379_v59  ;;  %v794_v31 = vadd.f32 1.0, %v6759_v18  ;;  %6778 = vtanh.f32 %v708_v40  ;;  %v709_v33 = vmul.f32 0.5, %v7562_v26 }
  0x65   : > { %6103 = vmatprep.mubr.msk.f32.mxu1 %vm905_vm0, %v7567_v27  ;;  %1019 = vst.msk [vmem:[#allocation2 + $0xd8] sm:$0x1] %vm1009_vm1, %v6880_v29  ;;  %v6763_v37 = vpop.eup %6762  ;;  %v888_v48 = vmul.f32 %v840_v21, %v7387_v2  ;;  %v841_v0 = vmul.f32 0.5, %v793_v24  ;;  %v795_v59 = vadd.f32 1.0, %v6761_v25  ;;  %v608_v10 = vmul.f32 %v7595_v41, %v554_v38  ;;  %v955_v18 = vld [vmem:[%s7588_s20 + $0x8] sm:$0xff]  ;;  %v956_v14 = vld [vmem:[%s7588_s20 + $0x10] sm:$0xff] }
  0x66   : > { %6104 = vmatmul.mubr.msk.f32.gmra.mxu1 %vm905_vm0, %v7571_v19  ;;  %935 = vst.msk [vmem:[#allocation2 + $0xe8] sm:$0xff] %vm905_vm0, %v886_v1  ;;  %v6765_v43 = vpop.eup %6764  ;;  %936 = vst.msk [vmem:[#allocation2 + $0xf0] sm:$0xff] %vm905_vm0, %v887_v32  ;;  %v842_v34 = vmul.f32 0.5, %v794_v31  ;;  %v796_v46 = vadd.f32 1.0, %v6763_v37  ;;  %6780 = vtanh.f32 %v709_v33  ;;  %v609_v47 = vmul.f32 %v7595_v41, %v555_v15 }
  0x67   : > { %1038 = vst.msk [vmem:[#allocation2 + $0xe9] sm:$0x7f] %vm1028_vm2, %v6880_v29  ;;  %v6767_v2 = vpop.eup %6766  ;;  %v889_v54 = vmul.f32 %v841_v0, %v7409_v53  ;;  %v843_v17 = vmul.f32 0.5, %v795_v59  ;;  %v797_v36 = vadd.f32 1.0, %v6765_v43  ;;  %v7608_v62 = vadd.f32 %v7533_v13, %v608_v10 }
  0x68   : > { %937 = vst.msk [vmem:[#allocation2 + $0xf8] sm:$0xff] %vm905_vm0, %v888_v48  ;;  %v890_v63 = vmul.f32 %v842_v34, %v7417_v16  ;;  %v844_v5 = vmul.f32 0.5, %v796_v46  ;;  %v798_v52 = vadd.f32 1.0, %v6767_v2  ;;  %v7613_v50 = vadd.f32 %v7533_v13, %v609_v47 }
  0x69   : > { %1020 = vst.msk [vmem:[#allocation2 + $0xf0] sm:$0x1] %vm1009_vm1, %v6880_v29  ;;  %v1115_v7 = vld [vmem:[#allocation2 + $0xc9] sm:$0xff]  ;;  %v891_v53 = vmul.f32 %v843_v17, %v7425_v20  ;;  %v845_v61 = vmul.f32 0.5, %v797_v36  ;;  %v710_v8 = vmul.f32 0.5, %v7608_v62  ;;  %v610_v23 = vmul.f32 %v7595_v41, %v556_v49 }
  0x6a   : > { %938 = vst.msk [vmem:[#allocation2 + $0x100] sm:$0xff] %vm905_vm0, %v889_v54  ;;  %v6769_v40 = vpop.eup %6768  ;;  %6040 = vmatmul.mubr.msk.f32.gmra.mxu0 %vm905_vm0, %v1115_v7  ;;  %939 = vst.msk [vmem:[#allocation2 + $0x108] sm:$0xff] %vm905_vm0, %v890_v63  ;;  %v892_v16 = vmul.f32 %v844_v5, %v7436_v44  ;;  %v846_v38 = vmul.f32 0.5, %v798_v52  ;;  %v711_v15 = vmul.f32 0.5, %v7613_v50  ;;  %v960_v20 = vmul.f32 %v7595_v41, %v954_v22 }
  0x6b   : > { %1039 = vst.msk [vmem:[#allocation2 + $0x101] sm:$0x7f] %vm1028_vm2, %v6880_v29  ;;  %v6771_v1 = vpop.eup %6770  ;;  %v1116_v21 = vld [vmem:[#allocation2 + $0xd9] sm:$0xff]  ;;  %v893_v44 = vmul.f32 %v845_v61, %v7447_v58  ;;  %v799_v32 = vadd.f32 1.0, %v6769_v40  ;;  %6782 = vtanh.f32 %v710_v8  ;;  %v7637_v31 = vadd.f32 %v7533_v13, %v610_v23 }
  0x6c   : > { %v7628_v24 = vld [vmem:[#allocation2 + $0xd8] sm:$0xff]  ;;  %v7630_v25 = vld [vmem:[#allocation2 + $0xe0] sm:$0xff]  ;;  %940 = vst.msk [vmem:[#allocation2 + $0x110] sm:$0xff] %vm905_vm0, %v891_v53  ;;  %v6773_v33 = vpop.eup %6772  ;;  %6042 = vmatprep.mubr.msk.f32.mxu0 %vm905_vm0, %v1116_v21  ;;  %941 = vst.msk [vmem:[#allocation2 + $0x118] sm:$0xff] %vm905_vm0, %v892_v16  ;;  %v894_v48 = vmul.f32 %v846_v38, %v7456_v45  ;;  %v800_v0 = vadd.f32 1.0, %v6771_v1  ;;  %6784 = vtanh.f32 %v711_v15  ;;  %v7645_v58 = vadd.f32 %v7533_v13, %v960_v20 }
  0x6d   : > { %1021 = vst.msk [vmem:[#allocation2 + $0x108] sm:$0x1] %vm1009_vm1, %v6880_v29  ;;  %6106 = vmatprep.mubr.msk.f32.mxu1 %vm905_vm0, %v7628_v24  ;;  %v1117_v37 = vld [vmem:[#allocation2 + $0xe1] sm:$0xff]  ;;  %v6775_v59 = vpop.eup %6774  ;;  %v847_v10 = vmul.f32 0.5, %v799_v32  ;;  %v801_v43 = vadd.f32 1.0, %v6773_v33  ;;  %v712_v34 = vmul.f32 0.5, %v7637_v31  ;;  %v961_v45 = vmul.f32 %v7595_v41, %v955_v18 }
  0x6e   : > { %6107 = vmatmul.mubr.msk.f32.gmra.mxu1 %vm905_vm0, %v7630_v25  ;;  %1040 = vst.msk [vmem:[#allocation2 + $0x119] sm:$0x7f] %vm1028_vm2, %v6880_v29  ;;  %6043 = vmatmul.mubr.msk.f32.gmra.mxu0 %vm905_vm0, %v1117_v37  ;;  %v848_v2 = vmul.f32 0.5, %v800_v0  ;;  %v802_v54 = vadd.f32 1.0, %v6775_v59  ;;  %v972_v17 = vmul.f32 0.5, %v7645_v58  ;;  %v962_v36 = vmul.f32 %v7595_v41, %v956_v14 }
  0x6f   : > { %942 = vst.msk [vmem:[#allocation2 + $0x120] sm:$0xff] %vm905_vm0, %v893_v44  ;;  %v1118_v46 = vld [vmem:[#allocation2 + $0xf1] sm:$0xff]  ;;  %943 = vst.msk [vmem:[#allocation2 + $0x128] sm:$0xff] %vm905_vm0, %v894_v48  ;;  %v895_v22 = vmul.f32 %v847_v10, %v7483_v11  ;;  %v849_v63 = vmul.f32 0.5, %v801_v43  ;;  %6786 = vtanh.f32 %v712_v34  ;;  %v7669_v5 = vadd.f32 %v7533_v13, %v961_v45 }
  0x70   : > { %v7655_v47 = vld [vmem:[#allocation2 + $0xf0] sm:$0xff]  ;;  %v7657_v49 = vld [vmem:[#allocation2 + $0xf8] sm:$0xff]  ;;  %1022 = vst.msk [vmem:[#allocation2 + $0x120] sm:$0x1] %vm1009_vm1, %v6880_v29  ;;  %6045 = vmatprep.mubr.msk.f32.mxu0 %vm905_vm0, %v1118_v46  ;;  %v6777_v52 = vpop.eup %6776  ;;  %v896_v53 = vmul.f32 %v848_v2, %v7492_v51  ;;  %v850_v61 = vmul.f32 0.5, %v802_v54  ;;  %6788 = vtanh.f32 %v972_v17  ;;  %v7675_v8 = vadd.f32 %v7533_v13, %v962_v36 }
  0x71   : > { %6109 = vmatprep.mubr.msk.f32.mxu1 %vm905_vm0, %v7655_v47  ;;  %v7671_v7 = vld [vmem:[#allocation2 + $0xf9] sm:$0xff]  ;;  %v6779_v23 = vpop.eup %6778  ;;  %944 = vst.msk [vmem:[#allocation2 + $0x130] sm:$0xff] %vm905_vm0, %v895_v22  ;;  %v897_v11 = vmul.f32 %v849_v63, %v7498_v60  ;;  %v803_v40 = vadd.f32 1.0, %v6777_v52  ;;  %v973_v16 = vmul.f32 0.5, %v7669_v5 }
  0x72   : > { %6110 = vmatmul.mubr.msk.f32.gmra.mxu1 %vm905_vm0, %v7657_v49  ;;  %6046 = vmatmul.mubr.msk.f32.gmra.mxu0 %vm905_vm0, %v7671_v7  ;;  %1041 = vst.msk [vmem:[#allocation2 + $0x131] sm:$0x7f] %vm1028_vm2, %v6880_v29  ;;  %v898_v20 = vmul.f32 %v850_v61, %v7512_v28  ;;  %v804_v60 = vadd.f32 1.0, %v6779_v23  ;;  %v974_v18 = vmul.f32 0.5, %v7675_v8 }
  0x73   : > { %v7684_v51 = vld [vmem:[#allocation2 + $0x109] sm:$0xff]  ;;  %945 = vst.msk [vmem:[#allocation2 + $0x138] sm:$0xff] %vm905_vm0, %v896_v53  ;;  %v6781_v14 = vpop.eup %6780  ;;  %v7699_v1 = vld [vmem:[#allocation2 + $0x111] sm:$0xff]  ;;  %946 = vst.msk [vmem:[#allocation2 + $0x140] sm:$0xff] %vm905_vm0, %v897_v11  ;;  %v851_v21 = vmul.f32 0.5, %v803_v40  ;;  %6790 = vtanh.f32 %v973_v16 }
  0x74   : > { %v7686_v38 = vld [vmem:[#allocation2 + $0x108] sm:$0xff]  ;;  %v7688_v15 = vld [vmem:[#allocation2 + $0x110] sm:$0xff]  ;;  %6048 = vmatprep.mubr.msk.f32.mxu0 %vm905_vm0, %v7684_v51  ;;  %1023 = vst.msk [vmem:[#allocation2 + $0x138] sm:$0x1] %vm1009_vm1, %v6880_v29  ;;  %v852_v28 = vmul.f32 0.5, %v804_v60  ;;  %v805_v44 = vadd.f32 1.0, %v6781_v14  ;;  %6792 = vtanh.f32 %v974_v18 }
  0x75   : > { %6112 = vmatprep.mubr.msk.f32.mxu1 %vm905_vm0, %v7686_v38  ;;  %947 = vst.msk [vmem:[#allocation2 + $0x148] sm:$0xff] %vm905_vm0, %v898_v20  ;;  %v899_v37 = vmul.f32 %v851_v21, %v7525_v39 }
  0x76   : > { %6113 = vmatmul.mubr.msk.f32.gmra.mxu1 %vm905_vm0, %v7688_v15  ;;  %v7707_v32 = vld [vmem:[#allocation2 + $0x121] sm:$0xff]  ;;  %1042 = vst.msk [vmem:[#allocation2 + $0x149] sm:$0x7f] %vm1028_vm2, %v6880_v29  ;;  %6049 = vmatmul.mubr.msk.f32.gmra.mxu0 %vm905_vm0, %v7699_v1  ;;  %v900_v0 = vmul.f32 %v852_v28, %v7536_v35  ;;  %v853_v59 = vmul.f32 0.5, %v805_v44 }
  0x77   : > { %v7709_v33 = vld [vmem:[#allocation2 + $0x120] sm:$0xff]  ;;  %v7718_v48 = vld [vmem:[#allocation2 + $0x128] sm:$0xff]  ;;  %6051 = vmatprep.mubr.msk.f32.mxu0 %vm905_vm0, %v7707_v32  ;;  %948 = vst.msk [vmem:[#allocation2 + $0x150] sm:$0xff] %vm905_vm0, %v899_v37 }
  0x78   : > { %6115 = vmatprep.mubr.msk.f32.mxu1 %vm905_vm0, %v7709_v33  ;;  %v6783_v10 = vpop.eup %6782  ;;  %v7724_v43 = vld [vmem:[#allocation2 + $0x129] sm:$0xff]  ;;  %949 = vst.msk [vmem:[#allocation2 + $0x158] sm:$0xff] %vm905_vm0, %v900_v0  ;;  %v901_v39 = vmul.f32 %v853_v59, %v7562_v26  ;;  %v2176_v59 = vld [vmem:[#allocation2 + $0x18] sm:$0xff] }
  0x79   : > { %1024 = vst.msk [vmem:[#allocation2 + $0x150] sm:$0x1] %vm1009_vm1, %v6880_v29  ;;  %v6785_v34 = vpop.eup %6784  ;;  %v806_v35 = vadd.f32 1.0, %v6783_v10 }
  0x7a   : > { %6116 = vmatmul.mubr.msk.f32.gmra.mxu1 %vm905_vm0, %v7718_v48  ;;  %6052 = vmatmul.mubr.msk.f32.gmra.mxu0 %vm905_vm0, %v7724_v43  ;;  %v7734_v45 = vld [vmem:[#allocation2 + $0x139] sm:$0xff]  ;;  %950 = vst.msk [vmem:[#allocation2 + $0x160] sm:$0xff] %vm905_vm0, %v901_v39  ;;  %v807_v54 = vadd.f32 1.0, %v6785_v34 }
  0x7b   : > { %v7736_v46 = vld [vmem:[#allocation2 + $0x138] sm:$0xff]  ;;  %v7738_v2 = vld [vmem:[#allocation2 + $0x140] sm:$0xff]  ;;  %6054 = vmatprep.mubr.msk.f32.mxu0 %vm905_vm0, %v7734_v45  ;;  %1043 = vst.msk [vmem:[#allocation2 + $0x161] sm:$0x7f] %vm1028_vm2, %v6880_v29  ;;  %v854_v17 = vmul.f32 0.5, %v806_v35 }
  0x7c   : > { %6118 = vmatprep.mubr.msk.f32.mxu1 %vm905_vm0, %v7736_v46  ;;  %v7745_v26 = vld [vmem:[#allocation2 + $0x141] sm:$0xff]  ;;  %v6787_v36 = vpop.eup %6786  ;;  %v855_v22 = vmul.f32 0.5, %v807_v54  ;;  %v7806_v54 = vld [vmem:[#allocation2 + $0x30] sm:$0xff] }
  0x7d   : > { %v6789_v63 = vpop.eup %6788  ;;  %v902_v52 = vmul.f32 %v854_v17, %v7608_v62  ;;  %v808_v53 = vadd.f32 1.0, %v6787_v36  ;;  %v2177_v35 = vld [vmem:[#allocation2 + $0x20] sm:$0xff]  ;;  %v1782_v17 = vld [vmem:[#allocation2 + $0xa] sm:$0xff] }
  0x7e   : > { %6119 = vmatmul.mubr.msk.f32.gmra.mxu1 %vm905_vm0, %v7738_v2  ;;  %6055 = vmatmul.mubr.msk.f32.gmra.mxu0 %vm905_vm0, %v7745_v26  ;;  %v903_v61 = vmul.f32 %v855_v22, %v7613_v50  ;;  %v984_v23 = vadd.f32 1.0, %v6789_v63  ;;  %v5406_v36 = vld [vmem:[%s9193_s4 + $0x170] sm:$0xff]  ;;  %v7813_v22 = vld [vmem:[#allocation2 + $0x1a] sm:$0xff] }
  0x7f   : > { %v7755_v11 = vld [vmem:[#allocation2 + $0x151] sm:$0xff]  ;;  %951 = vst.msk [vmem:[#allocation2 + $0x168] sm:$0xff] %vm905_vm0, %v902_v52  ;;  %v856_v20 = vmul.f32 0.5, %v808_v53  ;;  %v7824_v53 = vld [vmem:[#allocation2 + $0x48] sm:$0xff] }
  0x80   : > { %v7757_v40 = vld [vmem:[#allocation2 + $0x150] sm:$0xff]  ;;  %v7759_v16 = vld [vmem:[#allocation2 + $0x158] sm:$0xff]  ;;  %v6791_v60 = vpop.eup %6790  ;;  %6057 = vmatprep.mubr.msk.f32.mxu0 %vm905_vm0, %v7755_v11  ;;  %952 = vst.msk [vmem:[#allocation2 + $0x170] sm:$0xff] %vm905_vm0, %v903_v61  ;;  %v990_v62 = vmul.f32 0.5, %v984_v23  ;;  %v5365_v23 = vld [vmem:[%s9193_s4 + $0x128] sm:$0xff] }
  0x81   : > { %6121 = vmatprep.mubr.msk.f32.mxu1 %vm905_vm0, %v7757_v40  ;;  %1025 = vst.msk [vmem:[#allocation2 + $0x168] sm:$0x1] %vm1009_vm1, %v6880_v29  ;;  %v6793_v50 = vpop.eup %6792  ;;  %v7769_v18 = vld [vmem:[#allocation2 + $0x159] sm:$0xff]  ;;  %v904_v14 = vmul.f32 %v856_v20, %v7637_v31  ;;  %v985_v21 = vadd.f32 1.0, %v6791_v60  ;;  %v5366_v52 = vld [vmem:[%s9193_s4 + $0x130] sm:$0xff]  ;;  %v5405_v20 = vld [vmem:[%s9193_s4 + $0x168] sm:$0xff] }
  0x82   : > { %6122 = vmatmul.mubr.msk.f32.gmra.mxu1 %vm905_vm0, %v7759_v16  ;;  %6058 = vmatmul.mubr.msk.f32.gmra.mxu0 %vm905_vm0, %v7769_v18  ;;  %v996_v28 = vmul.f32 %v990_v62, %v7645_v58  ;;  %v986_v44 = vadd.f32 1.0, %v6793_v50  ;;  %v7818_v63 = vld [vmem:[#allocation2 + $0x38] sm:$0xff]  ;;  %v7853_v62 = vld [vmem:[#allocation2 + $0x4a] sm:$0xff]  ;;  %v5364_v50 = vld [vmem:[%s9193_s4 + $0x120] sm:$0xff] }
  0x83   : > { %953 = vst.msk [vmem:[#allocation2 + $0x178] sm:$0xff] %vm905_vm0, %v904_v14  ;;  %v991_v37 = vmul.f32 0.5, %v985_v21  ;;  %v7833_v61 = vld [vmem:[#allocation2 + $0x32] sm:$0xff]  ;;  %v7849_v60 = vld [vmem:[#allocation2 + $0x3a] sm:$0xff] }
  0x84   : > { %1044 = vst.msk [vmem:[#allocation2 + $0x179] sm:$0x7f] %vm1028_vm2, %v6880_v29  ;;  %v992_v0 = vmul.f32 0.5, %v986_v44  ;;  %v5404_v14 = vld [vmem:[%s9193_s4 + $0x160] sm:$0xff]  ;;  %v7867_v21 = vld [vmem:[#allocation2 + $0x52] sm:$0xff] }
  0x85   : > { %1003 = vst.msk [vmem:[#allocation2 + $0x180] sm:$0xff] %vm905_vm0, %v996_v28  ;;  %v997_v31 = vmul.f32 %v991_v37, %v7669_v5  ;;  %v1781_v5 = vld [vmem:[#allocation2 + $0x2] sm:$0xff]  ;;  %v5403_v44 = vld [vmem:[%s9193_s4 + $0x158] sm:$0xff] }
  0x86   : > { %1026 = vst.msk [vmem:[#allocation2 + $0x180] sm:$0x1] %vm1009_vm1, %v6880_v29  ;;  %v998_v10 = vmul.f32 %v992_v0, %v7675_v8  ;;  %v7871_v28 = vld [vmem:[#allocation2 + $0x62] sm:$0xff]  ;;  %v7889_v37 = vld [vmem:[#allocation2 + $0x7a] sm:$0xff]  ;;  %v5402_v0 = vld [vmem:[%s9193_s4 + $0x150] sm:$0xff] }
  0x87   : > { %v7785_v39 = vld [vmem:[#allocation2 + $0x169] sm:$0xff]  ;;  %1004 = vst.msk [vmem:[#allocation2 + $0x188] sm:$0xff] %vm905_vm0, %v997_v31 }
  0x88   : > { %v7787_v58 = vld [vmem:[#allocation2 + $0x168] sm:$0xff]  ;;  %v7789_v34 = vld [vmem:[#allocation2 + $0x170] sm:$0xff]  ;;  %6060 = vmatprep.mubr.msk.f32.mxu0 %vm905_vm0, %v7785_v39  ;;  %1005 = vst.msk [vmem:[#allocation2 + $0x190] sm:$0xff] %vm905_vm0, %v998_v10  ;;  %v5360_v10 = vld [vmem:[%s9193_s4 + $0x100] sm:$0xff] }
  0x89   : > { %6124 = vmatprep.mubr.msk.f32.mxu1 %vm905_vm0, %v7787_v58  ;;  %1045 = vst.msk [vmem:[#allocation2 + $0x191] sm:$0x7f] %vm1028_vm2, %v6880_v29  ;;  %v5361_v31 = vld [vmem:[%s9193_s4 + $0x108] sm:$0xff] }
  0x8a   : > { %6125 = vmatmul.mubr.msk.f32.gmra.mxu1 %vm905_vm0, %v7789_v34  ;;  %v7801_v8 = vld [vmem:[#allocation2 + $0x171] sm:$0xff] }
  0x8b   : > { %6207 = vmatprep.mubr.msk.f32.mxu1 %vm905_vm0, %v2176_v59  ;;  %6061 = vmatmul.mubr.msk.f32.gmra.mxu0 %vm905_vm0, %v7801_v8  ;;  %v7921_v59 = vld [vmem:[#allocation2 + $0x9a] sm:$0xff] }
  0x8c   : > { %6143 = vmatprep.mubr.msk.f32.mxu0 %vm905_vm0, %v1781_v5  ;;  %v957_v5 = vld [vmem:[%s7588_s20 + $0x18] sm:$0xff] }
  0x8e   : > { %6208 = vmatmul.mubr.msk.f32.vlgmr.msra.gmra.mxu1 %vm905_vm0, %v2177_v35  ;;  %v963_v35 = vmul.f32 %v7595_v41, %v957_v5 }
  0x8f   : > { %6320 = vmatpush3.msra.mxu1 %v7549_v3  ;;  %6210 = vmatprep.mubr.msk.f32.mxu1 %vm905_vm0, %v7806_v54  ;;  %v7829_v3 = vld [vmem:[#allocation2 + $0x22] sm:$0xff] }
  0x90   : > { %6144 = vmatmul.mubr.msk.f32.vlgmr.msra.gmra.mxu0 %vm905_vm0, %v1782_v17  ;;  %6321 = vmatprep.subr.mxu1 %v5406_v36  ;;  %v958_v17 = vld [vmem:[%s7588_s20 + $0x20] sm:$0xff] }
  0x91   : > { %6256 = vmatpush3.msra.mxu0 %v7541_v57  ;;  %6146 = vmatprep.mubr.msk.f32.mxu0 %vm905_vm0, %v7813_v22  ;;  %v7840_v57 = vld [vmem:[#allocation2 + $0x50] sm:$0xff] }
  0x92   : > { %6211 = vmatmul.mubr.msk.f32.gmra.mxu1 %vm905_vm0, %v7818_v63  ;;  %6257 = vmatprep.subr.mxu0 %v5366_v52 }
  0x93   : > { %6258 = vmatpush3.msra.mxu0 %v5366_v52  ;;  %6213 = vmatprep.mubr.msk.f32.mxu1 %vm905_vm0, %v7824_v53  ;;  %v964_v52 = vmul.f32 %v7595_v41, %v958_v17 }
  0x94   : > { %6147 = vmatmul.mubr.msk.f32.gmra.mxu0 %vm905_vm0, %v7829_v3  ;;  %6322 = vmatpush3.msra.mxu1 %v5406_v36  ;;  %v7942_v36 = vld [vmem:[#allocation2 + $0xb2] sm:$0xff] }
  0x95   : > { %6149 = vmatprep.mubr.msk.f32.mxu0 %vm905_vm0, %v7833_v61  ;;  %6259 = vmatprep.subr.mxu0 %v5365_v23 }
  0x96   : > { %6214 = vmatmul.mubr.msk.f32.gmra.mxu1 %vm905_vm0, %v7840_v57  ;;  %6260 = vmatpush3.msra.mxu0 %v5365_v23  ;;  %v959_v23 = vld [vmem:[%s7588_s20 + $0x28] sm:$0xff]  ;;  %s8468_s20 = scalar_lea.vmem %s9195_s6, %s5601_s16  ;;  %s5057_s16 = sshll.u32 %s8933_s15, 4  ;;  %s9135_s16 = int_to_ptr.vmem [resolvable:$true] %s5057_s16 }
  0x97   : > { %6216 = vmatprep.mubr.msk.f32.mxu1 %vm905_vm0, %v7372_v56  ;;  %6323 = vmatprep.subr.mxu1 %v5405_v20  ;;  %v5363_v56 = vld [vmem:[%s9193_s4 + $0x118] sm:$0xff]  ;;  %s6802_s23 = scalar_lea.vmem %s9135_s16, 4096  ;;  %p6809_p1 = scmp.lt.s32.totalorder %s9135_s16, %s6807_s25 }
  0x98   : > { %6150 = vmatmul.mubr.msk.f32.gmra.mxu0 %vm905_vm0, %v7849_v60  ;;  %6324 = vmatpush3.msra.mxu1 %v5405_v20  ;;  %v7949_v20 = vld [vmem:[#allocation2 + $0xc2] sm:$0xff]  ;;  %p6803_p12 = scmp.ne.s32.totalorder %s9135_s16, %s6802_s23  ;;  %p6810_p2 = scmp.lt.s32.totalorder %s6808_s28, %s6802_s23 }
  0x99   : > { %6152 = vmatprep.mubr.msk.f32.mxu0 %vm905_vm0, %v7853_v62  ;;  %6261 = vmatprep.subr.mxu0 %v5364_v50 }
  0x9a   : > { %6217 = vmatmul.mubr.msk.f32.gmra.mxu1 %vm905_vm0, %v7402_v9  ;;  %6262 = vmatpush3.msra.mxu0 %v5364_v50  ;;  %v7885_v9 = vld [vmem:[#allocation2 + $0x6a] sm:$0xff]  ;;  %v7954_v50 = vld [vmem:[%s9193_s4 + $0x1b8] sm:$0xff]  ;;  %p6804_p13 = pnand %p6803_p12, %p6974_p4  ;;  %p6811_p3 = por %p6810_p2, %p6809_p1 }
  0x9b   : > { %6219 = vmatprep.mubr.msk.f32.mxu1 %vm905_vm0, %v7414_v12  ;;  %6325 = vmatprep.subr.mxu1 %v5404_v14  ;;  %v5362_v12 = vld [vmem:[%s9193_s4 + $0x110] sm:$0xff] }
  0x9c   : > { %6153 = vmatmul.mubr.msk.f32.gmra.mxu0 %vm905_vm0, %v7867_v21  ;;  %6326 = vmatpush3.msra.mxu1 %v5404_v14  ;;  %v965_v14 = vmul.f32 %v7595_v41, %v959_v23  ;;  %v7970_v41 = vld [vmem:[#allocation2 + $0xca] sm:$0xff]  ;;  %p6805_p0 = pneg %p6804_p13 }
  0x9d   : > { %6155 = vmatprep.mubr.msk.f32.mxu0 %vm905_vm0, %v7871_v28  ;;  %6263 = vmatprep.subr.mxu0 %v5363_v56 }
  0x9e   : > { %6220 = vmatmul.mubr.msk.f32.gmra.mxu1 %vm905_vm0, %v7443_v4  ;;  %6264 = vmatpush3.msra.mxu0 %v5363_v56  ;;  %v7903_v4 = vld [vmem:[#allocation2 + $0x82] sm:$0xff]  ;;  %v7962_v56 = vld [vmem:[%s9193_s4 + $0x1f8] sm:$0xff]  ;;  %p6812_p5 = pnand %p6811_p3, %p6805_p0 }
  0x9f   : > { %6222 = vmatprep.mubr.msk.f32.mxu1 %vm905_vm0, %v7451_v42  ;;  %6327 = vmatprep.subr.mxu1 %v5403_v44  ;;  %v7907_v42 = vld [vmem:[#allocation2 + $0x92] sm:$0xff] }
  0xa0   : > { %6156 = vmatmul.mubr.msk.f32.gmra.mxu0 %vm905_vm0, %v7885_v9  ;;  %6328 = vmatpush3.msra.mxu1 %v5403_v44  ;;  %v970_v44 = vadd.f32 %v7533_v13, %v964_v52 }
  0xa1   : > { %6158 = vmatprep.mubr.msk.f32.mxu0 %vm905_vm0, %v7889_v37  ;;  %6265 = vmatprep.subr.mxu0 %v5362_v12 }
  0xa2   : > { %6223 = vmatmul.mubr.msk.f32.gmra.mxu1 %vm905_vm0, %v7479_v6  ;;  %6266 = vmatpush3.msra.mxu0 %v5362_v12  ;;  %v5401_v6 = vld [vmem:[%s9193_s4 + $0x148] sm:$0xff]  ;;  %v971_v12 = vadd.f32 %v7533_v13, %v965_v14 }
  0xa3   : > { %6225 = vmatprep.mubr.msk.f32.mxu1 %vm905_vm0, %v7488_v55  ;;  %6329 = vmatprep.subr.mxu1 %v5402_v0  ;;  %v7925_v55 = vld [vmem:[#allocation2 + $0xaa] sm:$0xff] }
  0xa4   : > { %6159 = vmatmul.mubr.msk.f32.gmra.mxu0 %vm905_vm0, %v7903_v4  ;;  %6330 = vmatpush3.msra.mxu1 %v5402_v0  ;;  %v7975_v0 = vld [vmem:[#allocation2 + $0xda] sm:$0xff] }
  0xa5   : > { %6161 = vmatprep.mubr.msk.f32.mxu0 %vm905_vm0, %v7907_v42  ;;  %6267 = vmatprep.subr.mxu0 %v5361_v31 }
  0xa6   : > { %6226 = vmatmul.mubr.msk.f32.gmra.mxu1 %vm905_vm0, %v7521_v30  ;;  %6268 = vmatpush3.msra.mxu0 %v5361_v31  ;;  %v5400_v30 = vld [vmem:[%s9193_s4 + $0x140] sm:$0xff]  ;;  %v977_v31 = vmul.f32 0.5, %v971_v12 }
  0xa7   : > { %6228 = vmatprep.mubr.msk.f32.mxu1 %vm905_vm0, %v7567_v27  ;;  %6331 = vmatprep.subr.mxu1 %v5401_v6  ;;  %v969_v27 = vadd.f32 %v7533_v13, %v963_v35  ;;  %v7984_v13 = vld [vmem:[#allocation2 + $0xe2] sm:$0xff]  ;;  %v8020_v35 = vld [vmem:[#allocation2 + $0x12a] sm:$0xff] }
  0xa8   : > { %6162 = vmatmul.mubr.msk.f32.gmra.mxu0 %vm905_vm0, %v7921_v59  ;;  %6332 = vmatpush3.msra.mxu1 %v5401_v6  ;;  %v8000_v6 = vld [vmem:[#allocation2 + $0x10a] sm:$0xff] }
  0xa9   : > { %6164 = vmatprep.mubr.msk.f32.mxu0 %vm905_vm0, %v7925_v55  ;;  %6269 = vmatprep.subr.mxu0 %v5360_v10 }
  0xaa   : > { %6229 = vmatmul.mubr.msk.f32.gmra.mxu1 %vm905_vm0, %v7571_v19  ;;  %6270 = vmatpush3.msra.mxu0 %v5360_v10  ;;  %v975_v19 = vmul.f32 0.5, %v969_v27  ;;  %v8012_v10 = vld [vmem:[#allocation2 + $0x122] sm:$0xff] }
  0xab   : > { %6231 = vmatprep.mubr.msk.f32.mxu1 %vm905_vm0, %v7628_v24  ;;  %6333 = vmatprep.subr.mxu1 %v5400_v30  ;;  %v976_v24 = vmul.f32 0.5, %v970_v44 }
  0xac   : > { %6165 = vmatmul.mubr.msk.f32.gmra.mxu0 %vm905_vm0, %v7942_v36  ;;  %6334 = vmatpush3.msra.mxu1 %v5400_v30  ;;  %6794 = vtanh.f32 %v975_v19  ;;  %v8032_v19 = vld [vmem:[#allocation2 + $0x142] sm:$0xff] }
  0xad   : > { %6167 = vmatprep.mubr.msk.f32.mxu0 %vm905_vm0, %v7949_v20  ;;  %6383 = vmatprep.subr.mxu0 %v7954_v50  ;;  %6796 = vtanh.f32 %v976_v24  ;;  %v8037_v24 = vld [vmem:[#allocation2 + $0x152] sm:$0xff] }
  0xae   : > { %6232 = vmatmul.mubr.msk.f32.gmra.mxu1 %vm905_vm0, %v7630_v25  ;;  %6447 = vmatprep.subr.mxu1 %v7962_v56  ;;  %6798 = vtanh.f32 %v977_v31  ;;  %v7988_v25 = vld [vmem:[#allocation2 + $0xf2] sm:$0xff] }
  0xaf   : > { %6234 = vmatprep.mubr.msk.f32.mxu1 %vm905_vm0, %v7655_v47  ;;  %v7996_v47 = vld [vmem:[#allocation2 + $0xfa] sm:$0xff]  ;;  %v5486_v31 = vld [vmem:[%s9193_s4 + $0x1f0] sm:$0xff] }
  0xb0   : > { %6168 = vmatmul.mubr.msk.f32.gmra.mxu0 %vm905_vm0, %v7970_v41 }
  0xb1   : > { %6170 = vmatprep.mubr.msk.f32.mxu0 %vm905_vm0, %v7975_v0 }
  0xb2   : > { %6235 = vmatmul.mubr.msk.f32.gmra.mxu1 %vm905_vm0, %v7657_v49  ;;  %v8008_v49 = vld [vmem:[#allocation2 + $0x112] sm:$0xff] }
  0xb3   : > { %6237 = vmatprep.mubr.msk.f32.mxu1 %vm905_vm0, %v7686_v38 }
  0xb4   : > { %6171 = vmatmul.mubr.msk.f32.gmra.mxu0 %vm905_vm0, %v7984_v13 }
  0xb5   : > { %6173 = vmatprep.mubr.msk.f32.mxu0 %vm905_vm0, %v7988_v25 }
  0xb6   : > { %6238 = vmatmul.mubr.msk.f32.gmra.mxu1 %vm905_vm0, %v7688_v15 }
  0xb7   : > { %6240 = vmatprep.mubr.msk.f32.mxu1 %vm905_vm0, %v7709_v33 }
  0xb8   : > { %6174 = vmatmul.mubr.msk.f32.gmra.mxu0 %vm905_vm0, %v7996_v47 }
  0xb9   : > { %6176 = vmatprep.mubr.msk.f32.mxu0 %vm905_vm0, %v8000_v6  ;;  %v6795_v38 = vpop.eup %6794 }
  0xba   : > { %6241 = vmatmul.mubr.msk.f32.gmra.mxu1 %vm905_vm0, %v7718_v48  ;;  %v987_v15 = vadd.f32 1.0, %v6795_v38  ;;  %v6797_v5 = vpop.eup %6796  ;;  %v8024_v48 = vld [vmem:[#allocation2 + $0x13a] sm:$0xff]  ;;  %v8087_v38 = vld [vmem:[#allocation2 + $0x31] sm:$0xff] }
  0xbb   : > { %6243 = vmatprep.mubr.msk.f32.mxu1 %vm905_vm0, %v7736_v46  ;;  %v6799_v33 = vpop.eup %6798  ;;  %v988_v17 = vadd.f32 1.0, %v6797_v5  ;;  %v5484_v5 = vld [vmem:[%s9193_s4 + $0x1e0] sm:$0xff] }
  0xbc   : > { %6177 = vmatmul.mubr.msk.f32.gmra.mxu0 %vm905_vm0, %v8008_v49  ;;  %v993_v30 = vmul.f32 0.5, %v987_v15  ;;  %v989_v52 = vadd.f32 1.0, %v6799_v33  ;;  %v8121_v15 = vld [vmem:[#allocation2 + $0x61] sm:$0xff]  ;;  %v8139_v33 = vld [vmem:[#allocation2 + $0x79] sm:$0xff] }
  0xbd   : > { %6179 = vmatprep.mubr.msk.f32.mxu0 %vm905_vm0, %v8012_v10  ;;  %v994_v23 = vmul.f32 0.5, %v988_v17  ;;  %v8157_v17 = vld [vmem:[#allocation2 + $0x91] sm:$0xff] }
  0xbe   : > { %6244 = vmatmul.mubr.msk.f32.gmra.mxu1 %vm905_vm0, %v7738_v2  ;;  %v999_v46 = vmul.f32 %v993_v30, %v969_v27  ;;  %v995_v14 = vmul.f32 0.5, %v989_v52  ;;  %v8048_v27 = vld [vmem:[#allocation2 + $0x180] sm:$0xff]  ;;  %v5483_v30 = vld [vmem:[%s9193_s4 + $0x1d8] sm:$0xff]  ;;  %v5482_v52 = vld [vmem:[%s9193_s4 + $0x1d0] sm:$0xff] }
  0xbf   : > { %6246 = vmatprep.mubr.msk.f32.mxu1 %vm905_vm0, %v7757_v40  ;;  %v1000_v2 = vmul.f32 %v994_v23, %v970_v44  ;;  %v8067_v44 = vld [vmem:[#allocation2 + $0x188] sm:$0xff] }
  0xc0   : > { %6180 = vmatmul.mubr.msk.f32.gmra.mxu0 %vm905_vm0, %v8020_v35  ;;  %1006 = vst.msk [vmem:[#allocation2 + $0x198] sm:$0xff] %vm905_vm0, %v999_v46  ;;  %v1001_v40 = vmul.f32 %v995_v14, %v971_v12  ;;  %v8073_v12 = vld [vmem:[#allocation2 + $0x172] sm:$0xff]  ;;  %v8175_v46 = vld [vmem:[#allocation2 + $0xa9] sm:$0xff]  ;;  %v8193_v14 = vld [vmem:[#allocation2 + $0xc1] sm:$0xff] }
  0xc1   : > { %6182 = vmatprep.mubr.msk.f32.mxu0 %vm905_vm0, %v8024_v48  ;;  %1027 = vst.msk [vmem:[#allocation2 + $0x198] sm:$0x1] %vm1009_vm1, %v6880_v29  ;;  %v5481_v23 = vld [vmem:[%s9193_s4 + $0x1c8] sm:$0xff] }
  0xc2   : > { %6247 = vmatmul.mubr.msk.f32.gmra.mxu1 %vm905_vm0, %v7759_v16  ;;  %1055 = vst.msk [vmem:[#allocation2 + $0x198] sm:$0xff] %vm905_vm0, %v6880_v29  ;;  %1007 = vst.msk [vmem:[#allocation2 + $0x1a0] sm:$0xff] %vm905_vm0, %v1000_v2  ;;  %v8055_v16 = vld [vmem:[#allocation2 + $0x15a] sm:$0xff] }
  0xc3   : > { %6249 = vmatprep.mubr.msk.f32.mxu1 %vm905_vm0, %v7787_v58  ;;  %1056 = vst.msk [vmem:[#allocation2 + $0x1a0] sm:$0xff] %vm905_vm0, %v6880_v29  ;;  %1008 = vst.msk [vmem:[#allocation2 + $0x1a8] sm:$0xff] %vm905_vm0, %v1001_v40  ;;  %v8061_v58 = vld [vmem:[#allocation2 + $0x16a] sm:$0xff]  ;;  %v5480_v2 = vld [vmem:[%s9193_s4 + $0x1c0] sm:$0xff] }
  0xc4   : > { %6183 = vmatmul.mubr.msk.f32.gmra.mxu0 %vm905_vm0, %v8032_v19  ;;  %1046 = vst.msk [vmem:[#allocation2 + $0x1a9] sm:$0x7f] %vm1028_vm2, %v6880_v29  ;;  %v8211_v40 = vld [vmem:[#allocation2 + $0xd9] sm:$0xff] }
  0xc5   : > { %6185 = vmatprep.mubr.msk.f32.mxu0 %vm905_vm0, %v8037_v24  ;;  %1057 = vst.msk [vmem:[#allocation2 + $0x1a8] sm:$0xff] %vm905_vm0, %v6880_v29  ;;  %v2571_v29 = vld [vmem:[#allocation2 + $0x21] sm:$0xff] }
  0xc6   : > { %6250 = vmatmul.mubr.msk.f32.gmra.mxu1 %vm905_vm0, %v7789_v34  ;;  %v2570_v34 = vld [vmem:[#allocation2 + $0x19] sm:$0xff] }
  0xc7   : > { %6252 = vmatprep.mubr.msk.f32.mxu1 %vm905_vm0, %v8048_v27 }
  0xc8   : > { %6186 = vmatmul.mubr.msk.f32.gmra.mxu0 %vm905_vm0, %v8055_v16 }
  0xc9   : > { %6188 = vmatprep.mubr.msk.f32.mxu0 %vm905_vm0, %v8061_v58 }
  0xca   : > { %6253 = vmatmul.mubr.msk.f32.gmra.mxu1 %vm905_vm0, %v8067_v44 }
  0xcb   : > { %6335 = vmatprep.mubr.msk.f32.mxu1 %vm905_vm0, %v7813_v22  ;;  %v5446_v22 = vld [vmem:[%s9193_s4 + $0x1b0] sm:$0xff] }
  0xcc   : > { %6189 = vmatmul.mubr.msk.f32.gmra.mxu0 %vm905_vm0, %v8073_v12 }
  0xcd   : > { %6271 = vmatprep.mubr.msk.f32.mxu0 %vm905_vm0, %v2570_v34  ;;  %v4615_v34 = vld [vmem:[%s9196_s7 + $0x18] sm:$0xff] }
  0xce   : > { %6336 = vmatmul.mubr.msk.f32.vlgmr.msra.gmra.mxu1 %vm905_vm0, %v7829_v3  ;;  %v8099_v3 = vld [vmem:[#allocation2 + $0x39] sm:$0xff] }
  0xcf   : > { %6448 = vmatpush3.msra.mxu1 %v7962_v56  ;;  %6338 = vmatprep.mubr.msk.f32.mxu1 %vm905_vm0, %v7833_v61  ;;  %v8103_v56 = vld [vmem:[#allocation2 + $0x49] sm:$0xff] }
  0xd0   : > { %6272 = vmatmul.mubr.msk.f32.vlgmr.msra.gmra.mxu0 %vm905_vm0, %v2571_v29  ;;  %6449 = vmatprep.subr.mxu1 %v5486_v31  ;;  %v5445_v61 = vld [vmem:[%s9193_s4 + $0x1a8] sm:$0xff] }
  0xd1   : > { %6384 = vmatpush3.msra.mxu0 %v7954_v50  ;;  %6274 = vmatprep.mubr.msk.f32.mxu0 %vm905_vm0, %v8087_v38  ;;  %v5485_v50 = vld [vmem:[%s9193_s4 + $0x1e8] sm:$0xff] }
  0xd2   : > { %6339 = vmatmul.mubr.msk.f32.gmra.mxu1 %vm905_vm0, %v7849_v60  ;;  %6385 = vmatprep.subr.mxu0 %v5446_v22  ;;  %v8117_v60 = vld [vmem:[#allocation2 + $0x51] sm:$0xff]  ;;  %v5525_v29 = vld [vmem:[%s9193_s4 + $0x228] sm:$0xff] }
  0xd3   : > { %6386 = vmatpush3.msra.mxu0 %v5446_v22  ;;  %6341 = vmatprep.mubr.msk.f32.mxu1 %vm905_vm0, %v7853_v62  ;;  %v5444_v62 = vld [vmem:[%s9193_s4 + $0x1a0] sm:$0xff] }
  0xd4   : > { %6275 = vmatmul.mubr.msk.f32.gmra.mxu0 %vm905_vm0, %v8099_v3  ;;  %6450 = vmatpush3.msra.mxu1 %v5486_v31  ;;  %v3363_v31 = vld [vmem:[#allocation2 + $0x60] sm:$0xff] }
  0xd5   : > { %6277 = vmatprep.mubr.msk.f32.mxu0 %vm905_vm0, %v8103_v56  ;;  %6387 = vmatprep.subr.mxu0 %v5445_v61  ;;  %v5524_v22 = vld [vmem:[%s9193_s4 + $0x220] sm:$0xff] }
  0xd6   : > { %6342 = vmatmul.mubr.msk.f32.gmra.mxu1 %vm905_vm0, %v7867_v21  ;;  %6388 = vmatpush3.msra.mxu0 %v5445_v61  ;;  %v8135_v21 = vld [vmem:[#allocation2 + $0x69] sm:$0xff] }
  0xd7   : > { %6344 = vmatprep.mubr.msk.f32.mxu1 %vm905_vm0, %v7871_v28  ;;  %6451 = vmatprep.subr.mxu1 %v5485_v50  ;;  %v5443_v28 = vld [vmem:[%s9193_s4 + $0x198] sm:$0xff] }
  0xd8   : > { %6278 = vmatmul.mubr.msk.f32.gmra.mxu0 %vm905_vm0, %v8117_v60  ;;  %6452 = vmatpush3.msra.mxu1 %v5485_v50 }
  0xd9   : > { %6280 = vmatprep.mubr.msk.f32.mxu0 %vm905_vm0, %v8121_v15  ;;  %6389 = vmatprep.subr.mxu0 %v5444_v62 }
  0xda   : > { %6345 = vmatmul.mubr.msk.f32.gmra.mxu1 %vm905_vm0, %v7885_v9  ;;  %6390 = vmatpush3.msra.mxu0 %v5444_v62  ;;  %v8153_v9 = vld [vmem:[#allocation2 + $0x81] sm:$0xff] }
  0xdb   : > { %6347 = vmatprep.mubr.msk.f32.mxu1 %vm905_vm0, %v7889_v37  ;;  %6453 = vmatprep.subr.mxu1 %v5484_v5  ;;  %v5442_v37 = vld [vmem:[%s9193_s4 + $0x190] sm:$0xff] }
  0xdc   : > { %6281 = vmatmul.mubr.msk.f32.gmra.mxu0 %vm905_vm0, %v8135_v21  ;;  %6454 = vmatpush3.msra.mxu1 %v5484_v5 }
  0xdd   : > { %6283 = vmatprep.mubr.msk.f32.mxu0 %vm905_vm0, %v8139_v33  ;;  %6391 = vmatprep.subr.mxu0 %v5443_v28 }
  0xde   : > { %6348 = vmatmul.mubr.msk.f32.gmra.mxu1 %vm905_vm0, %v7903_v4  ;;  %6392 = vmatpush3.msra.mxu0 %v5443_v28  ;;  %v8171_v4 = vld [vmem:[#allocation2 + $0x99] sm:$0xff] }
  0xdf   : > { %6350 = vmatprep.mubr.msk.f32.mxu1 %vm905_vm0, %v7907_v42  ;;  %6455 = vmatprep.subr.mxu1 %v5483_v30  ;;  %v5441_v42 = vld [vmem:[%s9193_s4 + $0x188] sm:$0xff]  ;;  %v5523_v28 = vld [vmem:[%s9193_s4 + $0x218] sm:$0xff] }
  0xe0   : > { %6284 = vmatmul.mubr.msk.f32.gmra.mxu0 %vm905_vm0, %v8153_v9  ;;  %6456 = vmatpush3.msra.mxu1 %v5483_v30 }
  0xe1   : > { %6286 = vmatprep.mubr.msk.f32.mxu0 %vm905_vm0, %v8157_v17  ;;  %6393 = vmatprep.subr.mxu0 %v5442_v37 }
  0xe2   : > { %6351 = vmatmul.mubr.msk.f32.gmra.mxu1 %vm905_vm0, %v7921_v59  ;;  %6394 = vmatpush3.msra.mxu0 %v5442_v37  ;;  %v8189_v59 = vld [vmem:[#allocation2 + $0xb1] sm:$0xff] }
  0xe3   : > { %6353 = vmatprep.mubr.msk.f32.mxu1 %vm905_vm0, %v7925_v55  ;;  %6457 = vmatprep.subr.mxu1 %v5482_v52  ;;  %v5440_v55 = vld [vmem:[%s9193_s4 + $0x180] sm:$0xff] }
  0xe4   : > { %6287 = vmatmul.mubr.msk.f32.gmra.mxu0 %vm905_vm0, %v8171_v4  ;;  %6458 = vmatpush3.msra.mxu1 %v5482_v52 }
  0xe5   : > { %6289 = vmatprep.mubr.msk.f32.mxu0 %vm905_vm0, %v8175_v46  ;;  %6395 = vmatprep.subr.mxu0 %v5441_v42 }
  0xe6   : > { %6354 = vmatmul.mubr.msk.f32.gmra.mxu1 %vm905_vm0, %v7942_v36  ;;  %6396 = vmatpush3.msra.mxu0 %v5441_v42  ;;  %v8207_v36 = vld [vmem:[#allocation2 + $0xc9] sm:$0xff] }
  0xe7   : > { %6356 = vmatprep.mubr.msk.f32.mxu1 %vm905_vm0, %v7949_v20  ;;  %6459 = vmatprep.subr.mxu1 %v5481_v23  ;;  %v8216_v20 = vld [vmem:[%s9193_s4 + $0x238] sm:$0xff] }
  0xe8   : > { %6290 = vmatmul.mubr.msk.f32.gmra.mxu0 %vm905_vm0, %v8189_v59  ;;  %6460 = vmatpush3.msra.mxu1 %v5481_v23  ;;  %v5522_v23 = vld [vmem:[%s9193_s4 + $0x210] sm:$0xff] }
  0xe9   : > { %6292 = vmatprep.mubr.msk.f32.mxu0 %vm905_vm0, %v8193_v14  ;;  %6397 = vmatprep.subr.mxu0 %v5440_v55 }
  0xea   : > { %6357 = vmatmul.mubr.msk.f32.gmra.mxu1 %vm905_vm0, %v7970_v41  ;;  %6398 = vmatpush3.msra.mxu0 %v5440_v55  ;;  %v8227_v41 = vld [vmem:[#allocation2 + $0xe1] sm:$0xff] }
  0xeb   : > { %6359 = vmatprep.mubr.msk.f32.mxu1 %vm905_vm0, %v7975_v0  ;;  %6461 = vmatprep.subr.mxu1 %v5480_v2  ;;  %v8232_v0 = vld [vmem:[#allocation2 + $0xf1] sm:$0xff] }
  0xec   : > { %6293 = vmatmul.mubr.msk.f32.gmra.mxu0 %vm905_vm0, %v8207_v36  ;;  %6462 = vmatpush3.msra.mxu1 %v5480_v2 }
  0xed   : > { %6295 = vmatprep.mubr.msk.f32.mxu0 %vm905_vm0, %v8211_v40  ;;  %6511 = vmatprep.subr.mxu0 %v8216_v20 }
  0xee   : > { %6360 = vmatmul.mubr.msk.f32.gmra.mxu1 %vm905_vm0, %v7984_v13  ;;  %6575 = vmatprep.subr.mxu1 %v4615_v34 }
  0xef   : > { %6362 = vmatprep.mubr.msk.f32.mxu1 %vm905_vm0, %v7988_v25 }
  0xf0   : > { %6296 = vmatmul.mubr.msk.f32.gmra.mxu0 %vm905_vm0, %v8227_v41 }
  0xf1   : > { %6298 = vmatprep.mubr.msk.f32.mxu0 %vm905_vm0, %v8232_v0 }
  0xf2   : > { %6363 = vmatmul.mubr.msk.f32.gmra.mxu1 %vm905_vm0, %v7996_v47 }
  0xf3   : > { %6365 = vmatprep.mubr.msk.f32.mxu1 %vm905_vm0, %v8000_v6 }
  0xf4   : > { %6299 = vmatmul.mubr.msk.f32.gmra.mxu0 %vm905_vm0, %v7671_v7  ;;  %v2994_v7 = vld [vmem:[#allocation2 + $0x182] sm:$0xff] }
  0xf5   : > { %6301 = vmatprep.mubr.msk.f32.mxu0 %vm905_vm0, %v7684_v51 }
  0xf6   : > { %6366 = vmatmul.mubr.msk.f32.gmra.mxu1 %vm905_vm0, %v8008_v49 }
  0xf7   : > { %6368 = vmatprep.mubr.msk.f32.mxu1 %vm905_vm0, %v8012_v10 }
  0xf8   : > { %6302 = vmatmul.mubr.msk.f32.gmra.mxu0 %vm905_vm0, %v7699_v1  ;;  %v8282_v1 = vld [vmem:[#allocation2 + $0x181] sm:$0xff] }
  0xf9   : > { %6304 = vmatprep.mubr.msk.f32.mxu0 %vm905_vm0, %v7707_v32 }
  0xfa   : > { %6369 = vmatmul.mubr.msk.f32.gmra.mxu1 %vm905_vm0, %v8020_v35  ;;  %v4614_v35 = vld [vmem:[%s9196_s7 + $0x10] sm:$0xff] }
  0xfb   : > { %6371 = vmatprep.mubr.msk.f32.mxu1 %vm905_vm0, %v8024_v48 }
  0xfc   : > { %6305 = vmatmul.mubr.msk.f32.gmra.mxu0 %vm905_vm0, %v7724_v43  ;;  %v2995_v43 = vld [vmem:[#allocation2 + $0x18a] sm:$0xff] }
  0xfd   : > { %6307 = vmatprep.mubr.msk.f32.mxu0 %vm905_vm0, %v7734_v45 }
  0xfe   : > { %6372 = vmatmul.mubr.msk.f32.gmra.mxu1 %vm905_vm0, %v8032_v19  ;;  %v5526_v19 = vld [vmem:[%s9193_s4 + $0x230] sm:$0xff] }
  0xff   : > { %6374 = vmatprep.mubr.msk.f32.mxu1 %vm905_vm0, %v8037_v24 }
 0x100   : > { %6308 = vmatmul.mubr.msk.f32.gmra.mxu0 %vm905_vm0, %v7745_v26 }
 0x101   : > { %6310 = vmatprep.mubr.msk.f32.mxu0 %vm905_vm0, %v7755_v11 }
 0x102   : > { %6375 = vmatmul.mubr.msk.f32.gmra.mxu1 %vm905_vm0, %v8055_v16 }
 0x103   : > { %6377 = vmatprep.mubr.msk.f32.mxu1 %vm905_vm0, %v8061_v58 }
 0x104   : > { %6311 = vmatmul.mubr.msk.f32.gmra.mxu0 %vm905_vm0, %v7769_v18  ;;  %v6081_v51 = vpop.f32.mrf.mxu1  ;;  %v8291_v18 = vld [vmem:[#allocation2 + $0x189] sm:$0xff] }
 0x105   : > { %6313 = vmatprep.mubr.msk.f32.mxu0 %vm905_vm0, %v7785_v39  ;;  %v6017_v32 = vpop.f32.mrf.mxu0 }
 0x106   : > { %6378 = vmatmul.mubr.msk.f32.gmra.mxu1 %vm905_vm0, %v8073_v12  ;;  %v8285_v45 = vadd.f32 %v6081_v51, %v6017_v32  ;;  %v1622_v26 = vpop.f32.mrf.mxu1  ;;  %v3369_v32 = vld [vmem:[#allocation2 + $0xa8] sm:$0xff] }
 0x107   : > { %6380 = vmatprep.mubr.msk.f32.mxu1 %vm905_vm0, %v2994_v7  ;;  %v1301_v11 = vpop.f32.mrf.mxu0 }
 0x108   : > { %6314 = vmatmul.mubr.msk.f32.gmra.mxu0 %vm905_vm0, %v7801_v8  ;;  %v8293_v39 = vadd.f32 %v1622_v26, %v1301_v11  ;;  %v6084_v13 = vpop.f32.mrf.mxu1 }
 0x109   : > { %6316 = vmatprep.mubr.msk.f32.mxu0 %vm905_vm0, %v8282_v1  ;;  %v6020_v25 = vpop.f32.mrf.mxu0 }
 0x10a   : > { %6381 = vmatmul.mubr.msk.f32.gmra.mxu1 %vm905_vm0, %v2995_v43  ;;  %v8298_v47 = vadd.f32 %v6084_v13, %v6020_v25  ;;  %v1632_v6 = vpop.f32.mrf.mxu1  ;;  %v5520_v13 = vld [vmem:[%s9193_s4 + $0x200] sm:$0xff] }
 0x10b   : > { %6463 = vmatprep.mubr.msk.f32.mxu1 %vm905_vm0, %v8087_v38  ;;  %v1311_v8 = vpop.f32.mrf.mxu0 }
 0x10c   : > { %6317 = vmatmul.mubr.msk.f32.gmra.mxu0 %vm905_vm0, %v8291_v18  ;;  %v8304_v49 = vadd.f32 %v1632_v6, %v1311_v8  ;;  %v6087_v10 = vpop.f32.mrf.mxu1 }
 0x10d   : > { %6399 = vmatprep.mubr.msk.f32.mxu0 %vm905_vm0, %v7806_v54  ;;  %v6023_v48 = vpop.f32.mrf.mxu0 }
 0x10e   : > { %6464 = vmatmul.mubr.msk.f32.vlgmr.msra.gmra.mxu1 %vm905_vm0, %v8099_v3  ;;  %v8316_v54 = vadd.f32 %v6087_v10, %v6023_v48  ;;  %v1642_v24 = vpop.f32.mrf.mxu1 }
 0x10f   : > { %6576 = vmatpush3.msra.mxu1 %v4615_v34  ;;  %6466 = vmatprep.mubr.msk.f32.mxu1 %vm905_vm0, %v8103_v56  ;;  %v1321_v16 = vpop.f32.mrf.mxu0  ;;  %v3364_v56 = vld [vmem:[#allocation2 + $0x68] sm:$0xff]  ;;  %v3368_v34 = vld [vmem:[#allocation2 + $0x98] sm:$0xff] }
 0x110   : > { %6400 = vmatmul.mubr.msk.f32.vlgmr.msra.gmra.mxu0 %vm905_vm0, %v7818_v63  ;;  %6577 = vmatprep.subr.mxu1 %v4614_v35  ;;  %v8323_v58 = vadd.f32 %v1642_v24, %v1321_v16  ;;  %v6090_v12 = vpop.f32.mrf.mxu1  ;;  %v3372_v24 = vld [vmem:[#allocation2 + $0xc8] sm:$0xff] }
 0x111   : > { %6512 = vmatpush3.msra.mxu0 %v8216_v20  ;;  %6402 = vmatprep.mubr.msk.f32.mxu0 %vm905_vm0, %v7824_v53  ;;  %v6026_v63 = vpop.f32.mrf.mxu0 }
 0x112   : > { %6467 = vmatmul.mubr.msk.f32.gmra.mxu1 %vm905_vm0, %v8117_v60  ;;  %6513 = vmatprep.subr.mxu0 %v5526_v19  ;;  %v8332_v38 = vadd.f32 %v6090_v12, %v6026_v63  ;;  %v1652_v53 = vpop.f32.mrf.mxu1  ;;  %v4613_v60 = vld [vmem:[%s9196_s7 + $0x8] sm:$0xff] }
 0x113   : > { %6514 = vmatpush3.msra.mxu0 %v5526_v19  ;;  %6469 = vmatprep.mubr.msk.f32.mxu1 %vm905_vm0, %v8121_v15  ;;  %v1331_v3 = vpop.f32.mrf.mxu0  ;;  %v3365_v15 = vld [vmem:[#allocation2 + $0x78] sm:$0xff] }
 0x114   : > { %6403 = vmatmul.mubr.msk.f32.gmra.mxu0 %vm905_vm0, %v7840_v57  ;;  %6515 = vmatprep.subr.mxu0 %v5525_v29  ;;  %v8340_v61 = vadd.f32 %v1652_v53, %v1331_v3  ;;  %v6093_v50 = vpop.f32.mrf.mxu1 }
 0x115   : > { %6405 = vmatprep.mubr.msk.f32.mxu0 %vm905_vm0, %v3363_v31  ;;  %6516 = vmatpush3.msra.mxu0 %v5525_v29  ;;  %v6029_v62 = vpop.f32.mrf.mxu0  ;;  %v3375_v29 = vld [vmem:[#allocation2 + $0xf0] sm:$0xff] }
 0x116   : > { %6470 = vmatmul.mubr.msk.f32.gmra.mxu1 %vm905_vm0, %v8135_v21  ;;  %6517 = vmatprep.subr.mxu0 %v5524_v22  ;;  %v8349_v57 = vadd.f32 %v6093_v50, %v6029_v62  ;;  %v1662_v5 = vpop.f32.mrf.mxu1  ;;  %v3366_v21 = vld [vmem:[#allocation2 + $0x80] sm:$0xff] }
 0x117   : > { %6472 = vmatprep.mubr.msk.f32.mxu1 %vm905_vm0, %v8139_v33  ;;  %6578 = vmatpush3.msra.mxu1 %v4614_v35  ;;  %v1341_v30 = vpop.f32.mrf.mxu0  ;;  %v3367_v33 = vld [vmem:[#allocation2 + $0x90] sm:$0xff] }
 0x118   : > { %6406 = vmatmul.mubr.msk.f32.gmra.mxu0 %vm905_vm0, %v3364_v56  ;;  %6579 = vmatprep.subr.mxu1 %v4613_v60  ;;  %v8356_v37 = vadd.f32 %v1662_v5, %v1341_v30  ;;  %v6096_v52 = vpop.f32.mrf.mxu1  ;;  %v3773_v5 = vld [vmem:[#allocation2 + $0x121] sm:$0xff] }
 0x119   : > { %6408 = vmatprep.mubr.msk.f32.mxu0 %vm905_vm0, %v3365_v15  ;;  %6518 = vmatpush3.msra.mxu0 %v5524_v22  ;;  %v6032_v42 = vpop.f32.mrf.mxu0  ;;  %v3376_v22 = vld [vmem:[#allocation2 + $0xf8] sm:$0xff] }
 0x11a   : > { %6473 = vmatmul.mubr.msk.f32.gmra.mxu1 %vm905_vm0, %v8153_v9  ;;  %6519 = vmatprep.subr.mxu0 %v5523_v28  ;;  %v8365_v55 = vadd.f32 %v6096_v52, %v6032_v42  ;;  %v1672_v2 = vpop.f32.mrf.mxu1  ;;  %v5521_v9 = vld [vmem:[%s9193_s4 + $0x208] sm:$0xff]  ;;  %v3379_v52 = vld [vmem:[#allocation2 + $0x120] sm:$0xff] }
 0x11b   : > { %6475 = vmatprep.mubr.msk.f32.mxu1 %vm905_vm0, %v8157_v17  ;;  %6520 = vmatpush3.msra.mxu0 %v5523_v28  ;;  %v1351_v20 = vpop.f32.mrf.mxu0  ;;  %v4612_v17 = vld [vmem:[%s9196_s7] sm:$0xff]  ;;  %v3378_v28 = vld [vmem:[#allocation2 + $0x110] sm:$0xff] }
 0x11c   : > { %6409 = vmatmul.mubr.msk.f32.gmra.mxu0 %vm905_vm0, %v3366_v21  ;;  %6580 = vmatpush3.msra.mxu1 %v4613_v60  ;;  %v8372_v7 = vadd.f32 %v1672_v2, %v1351_v20  ;;  %v6099_v51 = vpop.f32.mrf.mxu1 }
 0x11d   : > { %6411 = vmatprep.mubr.msk.f32.mxu0 %vm905_vm0, %v3367_v33  ;;  %6521 = vmatprep.subr.mxu0 %v5522_v23  ;;  %v6035_v43 = vpop.f32.mrf.mxu0 }
 0x11e   : > { %6476 = vmatmul.mubr.msk.f32.gmra.mxu1 %vm905_vm0, %v8171_v4  ;;  %6522 = vmatpush3.msra.mxu0 %v5522_v23  ;;  %v8381_v26 = vadd.f32 %v6099_v51, %v6035_v43  ;;  %v1682_v11 = vpop.f32.mrf.mxu1  ;;  %v3370_v4 = vld [vmem:[#allocation2 + $0xb0] sm:$0xff] }
 0x11f   : > { %6478 = vmatprep.mubr.msk.f32.mxu1 %vm905_vm0, %v8175_v46  ;;  %6523 = vmatprep.subr.mxu0 %v5521_v9  ;;  %v1361_v25 = vpop.f32.mrf.mxu0  ;;  %v3371_v46 = vld [vmem:[#allocation2 + $0xc0] sm:$0xff]  ;;  %v3774_v23 = vld [vmem:[#allocation2 + $0x129] sm:$0xff] }
 0x120   : > { %6412 = vmatmul.mubr.msk.f32.gmra.mxu0 %vm905_vm0, %v3368_v34  ;;  %6581 = vmatprep.subr.mxu1 %v4612_v17  ;;  %v8388_v6 = vadd.f32 %v1682_v11, %v1361_v25  ;;  %v6102_v8 = vpop.f32.mrf.mxu1  ;;  %v3380_v34 = vld [vmem:[#allocation2 + $0x128] sm:$0xff] }
 0x121   : > { %6414 = vmatprep.mubr.msk.f32.mxu0 %vm905_vm0, %v3369_v32  ;;  %6524 = vmatpush3.msra.mxu0 %v5521_v9  ;;  %v6038_v10 = vpop.f32.mrf.mxu0  ;;  %v3775_v9 = vld [vmem:[#allocation2 + $0x139] sm:$0xff] }
 0x122   : > { %6479 = vmatmul.mubr.msk.f32.gmra.mxu1 %vm905_vm0, %v8189_v59  ;;  %6525 = vmatprep.subr.mxu0 %v5520_v13  ;;  %v8394_v35 = vadd.f32 %v6102_v8, %v6038_v10  ;;  %v1692_v48 = vpop.f32.mrf.mxu1  ;;  %v3373_v59 = vld [vmem:[#allocation2 + $0xd8] sm:$0xff] }
 0x123   : > { %6481 = vmatprep.mubr.msk.f32.mxu1 %vm905_vm0, %v8193_v14  ;;  %6582 = vmatpush3.msra.mxu1 %v4612_v17  ;;  %v1371_v19 = vpop.f32.mrf.mxu0  ;;  %v3374_v14 = vld [vmem:[#allocation2 + $0xe0] sm:$0xff]  ;;  %v3381_v32 = vld [vmem:[#allocation2 + $0x138] sm:$0xff] }
 0x124   : > { %6415 = vmatmul.mubr.msk.f32.gmra.mxu0 %vm905_vm0, %v3370_v4  ;;  %v8398_v16 = vadd.f32 %v1692_v48, %v1371_v19  ;;  %v3777_v8 = vld [vmem:[#allocation2 + $0x151] sm:$0xff] }
 0x125   : > { %6417 = vmatprep.mubr.msk.f32.mxu0 %vm905_vm0, %v3371_v46  ;;  %6526 = vmatpush3.msra.mxu0 %v5520_v13  ;;  %v3776_v13 = vld [vmem:[#allocation2 + $0x141] sm:$0xff]  ;;  %v3383_v19 = vld [vmem:[#allocation2 + $0x150] sm:$0xff] }
 0x126   : > { %6482 = vmatmul.mubr.msk.f32.gmra.mxu1 %vm905_vm0, %v8207_v36  ;;  %v6105_v12 = vpop.f32.mrf.mxu1  ;;  %v3770_v36 = vld [vmem:[#allocation2 + $0xf9] sm:$0xff] }
 0x127   : > { %6484 = vmatprep.mubr.msk.f32.mxu1 %vm905_vm0, %v8211_v40  ;;  %v3771_v40 = vld [vmem:[#allocation2 + $0x109] sm:$0xff]  ;;  %v3382_v46 = vld [vmem:[#allocation2 + $0x140] sm:$0xff] }
 0x128   : > { %6418 = vmatmul.mubr.msk.f32.gmra.mxu0 %vm905_vm0, %v3372_v24  ;;  %v1702_v31 = vpop.f32.mrf.mxu1 }
 0x129   : > { %6420 = vmatprep.mubr.msk.f32.mxu0 %vm905_vm0, %v3373_v59 }
 0x12a   : > { %6485 = vmatmul.mubr.msk.f32.gmra.mxu1 %vm905_vm0, %v8227_v41  ;;  %v6041_v63 = vpop.f32.mrf.mxu0  ;;  %v3377_v41 = vld [vmem:[#allocation2 + $0x108] sm:$0xff] }
 0x12b   : > { %6487 = vmatprep.mubr.msk.f32.mxu1 %vm905_vm0, %v8232_v0  ;;  %v8411_v53 = vadd.f32 %v6105_v12, %v6041_v63  ;;  %v3772_v0 = vld [vmem:[#allocation2 + $0x111] sm:$0xff]  ;;  %v3778_v12 = vld [vmem:[#allocation2 + $0x159] sm:$0xff] }
 0x12c   : > { %6421 = vmatmul.mubr.msk.f32.gmra.mxu0 %vm905_vm0, %v3374_v14  ;;  %v1381_v3 = vpop.f32.mrf.mxu0  ;;  %v3384_v63 = vld [vmem:[#allocation2 + $0x158] sm:$0xff] }
 0x12d   : > { %6423 = vmatprep.mubr.msk.f32.mxu0 %vm905_vm0, %v3375_v29  ;;  %v8414_v56 = vadd.f32 %v1702_v31, %v1381_v3  ;;  %v3779_v31 = vld [vmem:[#allocation2 + $0x169] sm:$0xff] }
 0x12e   : > { %6488 = vmatmul.mubr.msk.f32.gmra.mxu1 %vm905_vm0, %v3770_v36  ;;  %v6108_v50 = vpop.f32.mrf.mxu1  ;;  %v6044_v60 = vpop.f32.mrf.mxu0 }
 0x12f   : > { %6490 = vmatprep.mubr.msk.f32.mxu1 %vm905_vm0, %v3771_v40  ;;  %v8419_v15 = vadd.f32 %v6108_v50, %v6044_v60  ;;  %v3780_v50 = vld [vmem:[#allocation2 + $0x171] sm:$0xff] }
 0x130   : > { %6424 = vmatmul.mubr.msk.f32.gmra.mxu0 %vm905_vm0, %v3376_v22  ;;  %v1712_v62 = vpop.f32.mrf.mxu1  ;;  %v1391_v30 = vpop.f32.mrf.mxu0  ;;  %v3385_v22 = vld [vmem:[#allocation2 + $0x168] sm:$0xff] }
 0x131   : > { %6426 = vmatprep.mubr.msk.f32.mxu0 %vm905_vm0, %v3377_v41  ;;  %v8422_v21 = vadd.f32 %v1712_v62, %v1391_v30  ;;  %v3386_v62 = vld [vmem:[#allocation2 + $0x170] sm:$0xff] }
 0x132   : > { %6491 = vmatmul.mubr.msk.f32.gmra.mxu1 %vm905_vm0, %v3772_v0  ;;  %v6111_v33 = vpop.f32.mrf.mxu1  ;;  %v6047_v42 = vpop.f32.mrf.mxu0 }
 0x133   : > { %6493 = vmatprep.mubr.msk.f32.mxu1 %vm905_vm0, %v3773_v5  ;;  %v8427_v2 = vadd.f32 %v6111_v33, %v6047_v42 }
 0x134   : > { %6427 = vmatmul.mubr.msk.f32.gmra.mxu0 %vm905_vm0, %v3378_v28  ;;  %v1722_v20 = vpop.f32.mrf.mxu1  ;;  %v1401_v51 = vpop.f32.mrf.mxu0 }
 0x135   : > { %6429 = vmatprep.mubr.msk.f32.mxu0 %vm905_vm0, %v3379_v52  ;;  %v8430_v17 = vadd.f32 %v1722_v20, %v1401_v51  ;;  %v3390_v51 = vld [vmem:[#allocation2 + $0x1a0] sm:$0xff] }
 0x136   : > { %6494 = vmatmul.mubr.msk.f32.gmra.mxu1 %vm905_vm0, %v3774_v23  ;;  %v6114_v43 = vpop.f32.mrf.mxu1  ;;  %v6050_v11 = vpop.f32.mrf.mxu0  ;;  %v3783_v23 = vld [vmem:[#allocation2 + $0x199] sm:$0xff] }
 0x137   : > { %6496 = vmatprep.mubr.msk.f32.mxu1 %vm905_vm0, %v3775_v9  ;;  %v8435_v25 = vadd.f32 %v6114_v43, %v6050_v11  ;;  %v4147_v43 = vld [vmem:[#allocation2 + $0x32] sm:$0xff] }
 0x138   : > { %6430 = vmatmul.mubr.msk.f32.gmra.mxu0 %vm905_vm0, %v3380_v34  ;;  %v1732_v4 = vpop.f32.mrf.mxu1  ;;  %v1411_v10 = vpop.f32.mrf.mxu0  ;;  %v3784_v34 = vld [vmem:[#allocation2 + $0x1a1] sm:$0xff] }
 0x139   : > { %6432 = vmatprep.mubr.msk.f32.mxu0 %vm905_vm0, %v3381_v32  ;;  %v8438_v48 = vadd.f32 %v1732_v4, %v1411_v10  ;;  %v4582_v4 = vld [vmem:[%s8468_s20 + $0x10] sm:$0xff] }
 0x13a   : > { %6497 = vmatmul.mubr.msk.f32.gmra.mxu1 %vm905_vm0, %v3776_v13  ;;  %v6117_v24 = vpop.f32.mrf.mxu1  ;;  %v6053_v59 = vpop.f32.mrf.mxu0 }
 0x13b   : > { %6499 = vmatprep.mubr.msk.f32.mxu1 %vm905_vm0, %v3777_v8  ;;  %v8443_v14 = vadd.f32 %v6117_v24, %v6053_v59  ;;  %v4148_v8 = vld [vmem:[#allocation2 + $0x3a] sm:$0xff] }
 0x13c   : > { %6433 = vmatmul.mubr.msk.f32.gmra.mxu0 %vm905_vm0, %v3382_v46  ;;  %v1742_v29 = vpop.f32.mrf.mxu1  ;;  %v1421_v36 = vpop.f32.mrf.mxu0  ;;  %v4583_v59 = vld [vmem:[%s8468_s20 + $0x18] sm:$0xff] }
 0x13d   : > { %6435 = vmatprep.mubr.msk.f32.mxu0 %vm905_vm0, %v3383_v19  ;;  %v8446_v40 = vadd.f32 %v1742_v29, %v1421_v36  ;;  %v4149_v19 = vld [vmem:[#allocation2 + $0x4a] sm:$0xff]  ;;  %v4150_v36 = vld [vmem:[#allocation2 + $0x52] sm:$0xff] }
 0x13e   : > { %6500 = vmatmul.mubr.msk.f32.gmra.mxu1 %vm905_vm0, %v3778_v12  ;;  %v6120_v3 = vpop.f32.mrf.mxu1  ;;  %v6056_v41 = vpop.f32.mrf.mxu0 }
 0x13f   : > { %6502 = vmatprep.mubr.msk.f32.mxu1 %vm905_vm0, %v3779_v31  ;;  %v8451_v60 = vadd.f32 %v6120_v3, %v6056_v41  ;;  %v4584_v31 = vld [vmem:[%s8468_s20 + $0x20] sm:$0xff] }
 0x140   : > { %6436 = vmatmul.mubr.msk.f32.gmra.mxu0 %vm905_vm0, %v3384_v63  ;;  %v1752_v0 = vpop.f32.mrf.mxu1  ;;  %v1431_v5 = vpop.f32.mrf.mxu0  ;;  %v4151_v41 = vld [vmem:[#allocation2 + $0x62] sm:$0xff] }
 0x141   : > { %6438 = vmatprep.mubr.msk.f32.mxu0 %vm905_vm0, %v3385_v22  ;;  %v8454_v28 = vadd.f32 %v1752_v0, %v1431_v5 }
 0x142   : > { %6503 = vmatmul.mubr.msk.f32.gmra.mxu1 %vm905_vm0, %v3780_v50  ;;  %v6123_v30 = vpop.f32.mrf.mxu1  ;;  %v6059_v52 = vpop.f32.mrf.mxu0 }
 0x143   : > { %6505 = vmatprep.mubr.msk.f32.mxu1 %vm905_vm0, %v8282_v1  ;;  %v8461_v33 = vadd.f32 %v6123_v30, %v6059_v52  ;;  %v3389_v1 = vld [vmem:[#allocation2 + $0x198] sm:$0xff]  ;;  %v4586_v30 = vld [vmem:[%s8468_s20 + $0x30] sm:$0xff] }
 0x144   : > { %6439 = vmatmul.mubr.msk.f32.gmra.mxu0 %vm905_vm0, %v3386_v62  ;;  %v1762_v42 = vpop.f32.mrf.mxu1  ;;  %v1441_v20 = vpop.f32.mrf.mxu0  ;;  %v4585_v62 = vld [vmem:[%s8468_s20 + $0x28] sm:$0xff] }
 0x145   : > { %6441 = vmatprep.mubr.msk.f32.mxu0 %vm905_vm0, %v8048_v27  ;;  %v8470_v9 = vadd.f32 %v1762_v42, %v1441_v20  ;;  %v4580_v27 = vld [vmem:[%s8468_s20] sm:$0xff] }
 0x146   : > { %6506 = vmatmul.mubr.msk.f32.gmra.mxu1 %vm905_vm0, %v8291_v18  ;;  %v4581_v18 = vld [vmem:[%s8468_s20 + $0x8] sm:$0xff] }
 0x147   : > { %6508 = vmatprep.mubr.msk.f32.mxu1 %vm905_vm0, %v3783_v23  ;;  %v4152_v23 = vld [vmem:[#allocation2 + $0x6a] sm:$0xff] }
 0x148   : > { %6442 = vmatmul.mubr.msk.f32.gmra.mxu0 %vm905_vm0, %v8067_v44 }
 0x149   : > { %6444 = vmatprep.mubr.msk.f32.mxu0 %vm905_vm0, %v3389_v1  ;;  %v4153_v1 = vld [vmem:[#allocation2 + $0x7a] sm:$0xff] }
 0x14a   : > { %v6126_v32 = vpop.f32.mrf.mxu1  ;;  %6509 = vmatmul.mubr.msk.f32.gmra.mxu1 %vm905_vm0, %v3784_v34 }
 0x14b   : > { %6583 = vmatprep.mubr.msk.f32.mxu1 %vm4616_vm3, %v4580_v27  ;;  %v6062_v11 = vpop.f32.mrf.mxu0 }
 0x14c   : > { %6445 = vmatmul.mubr.msk.f32.gmra.mxu0 %vm905_vm0, %v3390_v51  ;;  %v1772_v13 = vpop.f32.mrf.mxu1  ;;  %v8484_v44 = vadd.f32 %v6126_v32, %v6062_v11  ;;  %v4587_v51 = vld [vmem:[%s8468_s20 + $0x38] sm:$0xff] }
 0x14d   : > { %6527 = vmatprep.mubr.msk.f32.mxu0 %vm905_vm0, %v4147_v43  ;;  %v1451_v46 = vpop.f32.mrf.mxu0  ;;  %v4588_v43 = vld [vmem:[%s8468_s20 + $0x40] sm:$0xff] }
 0x14e   : > { %v6209_v10 = vpop.f32.mrf.mxu1  ;;  %6584 = vmatmul.mubr.msk.f32.vlgmr.msra.gmra.mxu1 %vm4616_vm3, %v4581_v18  ;;  %v8488_v24 = vadd.f32 %v1772_v13, %v1451_v46  ;;  %v4154_v13 = vld [vmem:[#allocation2 + $0x82] sm:$0xff] }
 0x14f   : > { %6586 = vmatprep.mubr.msk.f32.mxu1 %vm4616_vm3, %v4582_v4 }
 0x150   : > { %v6145_v12 = vpop.f32.mrf.mxu0  ;;  %6528 = vmatmul.mubr.msk.f32.vlgmr.msra.gmra.mxu0 %vm905_vm0, %v4148_v8  ;;  %v2379_v29 = vpop.f32.mrf.mxu1  ;;  %v4155_v8 = vld [vmem:[#allocation2 + $0x92] sm:$0xff] }
 0x151   : > { %v2144_v63 = vadd.f32 %v6145_v12, %v8285_v45  ;;  %6530 = vmatprep.mubr.msk.f32.mxu0 %vm905_vm0, %v4149_v19  ;;  %v4589_v19 = vld [vmem:[%s8468_s20 + $0x48] sm:$0xff]  ;;  %v4590_v12 = vld [vmem:[%s8468_s20 + $0x50] sm:$0xff] }
 0x152   : > { %v1984_v22 = vpop.f32.mrf.mxu0  ;;  %v6212_v3 = vpop.f32.mrf.mxu1  ;;  %6587 = vmatmul.mubr.msk.f32.gmra.mxu1 %vm4616_vm3, %v4583_v59 }
 0x153   : > { %v2143_v50 = vadd.f32 %v1984_v22, %v8293_v39  ;;  %v8498_v0 = vadd.f32 %v6209_v10, %v2144_v63  ;;  %6589 = vmatprep.mubr.msk.f32.mxu1 %vm4616_vm3, %v4584_v31  ;;  %v4156_v63 = vld [vmem:[#allocation2 + $0x9a] sm:$0xff]  ;;  %v4157_v22 = vld [vmem:[#allocation2 + $0xaa] sm:$0xff] }
 0x154   : > { %v6148_v5 = vpop.f32.mrf.mxu0  ;;  %6531 = vmatmul.mubr.msk.f32.gmra.mxu0 %vm905_vm0, %v4150_v36  ;;  %v2389_v45 = vpop.f32.mrf.mxu1 }
 0x155   : > { %v2146_v52 = vadd.f32 %v6148_v5, %v8298_v47  ;;  %v8505_v42 = vadd.f32 %v2379_v29, %v2143_v50  ;;  %6533 = vmatprep.mubr.msk.f32.mxu0 %vm905_vm0, %v4151_v41  ;;  %v4591_v50 = vld [vmem:[%s8468_s20 + $0x58] sm:$0xff]  ;;  %v4592_v5 = vld [vmem:[%s8468_s20 + $0x60] sm:$0xff] }
 0x156   : > { %v1994_v39 = vpop.f32.mrf.mxu0  ;;  %v6215_v20 = vpop.f32.mrf.mxu1  ;;  %6590 = vmatmul.mubr.msk.f32.gmra.mxu1 %vm4616_vm3, %v4585_v62 }
 0x157   : > { %v2145_v34 = vadd.f32 %v1994_v39, %v8304_v49  ;;  %v8510_v27 = vadd.f32 %v6212_v3, %v2146_v52  ;;  %6592 = vmatprep.mubr.msk.f32.mxu1 %vm4616_vm3, %v4586_v30  ;;  %v4158_v52 = vld [vmem:[#allocation2 + $0xb2] sm:$0xff]  ;;  %v4159_v39 = vld [vmem:[#allocation2 + $0xc2] sm:$0xff] }
 0x158   : > { %v6151_v32 = vpop.f32.mrf.mxu0  ;;  %6534 = vmatmul.mubr.msk.f32.gmra.mxu0 %vm905_vm0, %v4152_v23  ;;  %v2399_v47 = vpop.f32.mrf.mxu1 }
 0x159   : > { %v2148_v18 = vadd.f32 %v6151_v32, %v8316_v54  ;;  %v8517_v11 = vadd.f32 %v2389_v45, %v2145_v34  ;;  %6536 = vmatprep.mubr.msk.f32.mxu0 %vm905_vm0, %v4153_v1  ;;  %v4593_v34 = vld [vmem:[%s8468_s20 + $0x68] sm:$0xff]  ;;  %v4594_v32 = vld [vmem:[%s8468_s20 + $0x70] sm:$0xff] }
 0x15a   : > { %v2004_v49 = vpop.f32.mrf.mxu0  ;;  %v6218_v4 = vpop.f32.mrf.mxu1  ;;  %6593 = vmatmul.mubr.msk.f32.gmra.mxu1 %vm4616_vm3, %v4587_v51 }
 0x15b   : > { %v2147_v46 = vadd.f32 %v2004_v49, %v8323_v58  ;;  %v8522_v10 = vadd.f32 %v6215_v20, %v2148_v18  ;;  %6595 = vmatprep.mubr.msk.f32.mxu1 %vm4616_vm3, %v4588_v43  ;;  %v4160_v18 = vld [vmem:[#allocation2 + $0xca] sm:$0xff]  ;;  %v4161_v49 = vld [vmem:[#allocation2 + $0xda] sm:$0xff] }
 0x15c   : > { %v6154_v59 = vpop.f32.mrf.mxu0  ;;  %6537 = vmatmul.mubr.msk.f32.gmra.mxu0 %vm905_vm0, %v4154_v13  ;;  %v2409_v54 = vpop.f32.mrf.mxu1 }
 0x15d   : > { %v2150_v29 = vadd.f32 %v6154_v59, %v8332_v38  ;;  %v8529_v31 = vadd.f32 %v2399_v47, %v2147_v46  ;;  %6539 = vmatprep.mubr.msk.f32.mxu0 %vm905_vm0, %v4155_v8  ;;  %v4595_v46 = vld [vmem:[%s8468_s20 + $0x78] sm:$0xff]  ;;  %v4596_v59 = vld [vmem:[%s8468_s20 + $0x80] sm:$0xff] }
 0x15e   : > { %v2014_v58 = vpop.f32.mrf.mxu0  ;;  %v6221_v36 = vpop.f32.mrf.mxu1  ;;  %6596 = vmatmul.mubr.msk.f32.gmra.mxu1 %vm4616_vm3, %v4589_v19 }
 0x15f   : > { %v2149_v3 = vadd.f32 %v2014_v58, %v8340_v61  ;;  %v8534_v41 = vadd.f32 %v6218_v4, %v2150_v29  ;;  %6598 = vmatprep.mubr.msk.f32.mxu1 %vm4616_vm3, %v4590_v12  ;;  %v4162_v29 = vld [vmem:[#allocation2 + $0xe2] sm:$0xff]  ;;  %v4163_v58 = vld [vmem:[#allocation2 + $0xf2] sm:$0xff] }
 0x160   : > { %v6157_v62 = vpop.f32.mrf.mxu0  ;;  %6540 = vmatmul.mubr.msk.f32.gmra.mxu0 %vm905_vm0, %v4156_v63  ;;  %v2419_v38 = vpop.f32.mrf.mxu1 }
 0x161   : > { %v2152_v45 = vadd.f32 %v6157_v62, %v8349_v57  ;;  %v8541_v30 = vadd.f32 %v2409_v54, %v2149_v3  ;;  %6542 = vmatprep.mubr.msk.f32.mxu0 %vm905_vm0, %v4157_v22  ;;  %v4597_v3 = vld [vmem:[%s8468_s20 + $0x88] sm:$0xff]  ;;  %v4598_v62 = vld [vmem:[%s8468_s20 + $0x90] sm:$0xff] }
 0x162   : > { %v2024_v61 = vpop.f32.mrf.mxu0  ;;  %v6224_v23 = vpop.f32.mrf.mxu1  ;;  %6599 = vmatmul.mubr.msk.f32.gmra.mxu1 %vm4616_vm3, %v4591_v50 }
 0x163   : > { %v2151_v20 = vadd.f32 %v2024_v61, %v8356_v37  ;;  %v8546_v1 = vadd.f32 %v6221_v36, %v2152_v45  ;;  %6601 = vmatprep.mubr.msk.f32.mxu1 %vm4616_vm3, %v4592_v5  ;;  %v4164_v45 = vld [vmem:[#allocation2 + $0xfa] sm:$0xff]  ;;  %v4165_v61 = vld [vmem:[#allocation2 + $0x10a] sm:$0xff] }
 0x164   : > { %v6160_v51 = vpop.f32.mrf.mxu0  ;;  %6543 = vmatmul.mubr.msk.f32.gmra.mxu0 %vm905_vm0, %v4158_v52  ;;  %v2429_v57 = vpop.f32.mrf.mxu1 }
 0x165   : > { %v2154_v47 = vadd.f32 %v6160_v51, %v8365_v55  ;;  %v8553_v43 = vadd.f32 %v2419_v38, %v2151_v20  ;;  %6545 = vmatprep.mubr.msk.f32.mxu0 %vm905_vm0, %v4159_v39  ;;  %v4599_v20 = vld [vmem:[%s8468_s20 + $0x98] sm:$0xff]  ;;  %v4600_v51 = vld [vmem:[%s8468_s20 + $0xa0] sm:$0xff] }
 0x166   : > { %v2034_v37 = vpop.f32.mrf.mxu0  ;;  %v6227_v13 = vpop.f32.mrf.mxu1  ;;  %6602 = vmatmul.mubr.msk.f32.gmra.mxu1 %vm4616_vm3, %v4593_v34 }
 0x167   : > { %v2153_v4 = vadd.f32 %v2034_v37, %v8372_v7  ;;  %v8558_v8 = vadd.f32 %v6224_v23, %v2154_v47  ;;  %6604 = vmatprep.mubr.msk.f32.mxu1 %vm4616_vm3, %v4594_v32  ;;  %v4166_v47 = vld [vmem:[#allocation2 + $0x112] sm:$0xff]  ;;  %v4167_v37 = vld [vmem:[#allocation2 + $0x122] sm:$0xff] }
 0x168   : > { %v6163_v19 = vpop.f32.mrf.mxu0  ;;  %6546 = vmatmul.mubr.msk.f32.gmra.mxu0 %vm905_vm0, %v4160_v18  ;;  %v2439_v55 = vpop.f32.mrf.mxu1 }
 0x169   : > { %v2156_v54 = vadd.f32 %v6163_v19, %v8381_v26  ;;  %v8565_v12 = vadd.f32 %v2429_v57, %v2153_v4  ;;  %6548 = vmatprep.mubr.msk.f32.mxu0 %vm905_vm0, %v4161_v49  ;;  %v4601_v4 = vld [vmem:[%s8468_s20 + $0xa8] sm:$0xff]  ;;  %v4602_v19 = vld [vmem:[%s8468_s20 + $0xb0] sm:$0xff] }
 0x16a   : > { %v2044_v7 = vpop.f32.mrf.mxu0  ;;  %v6230_v63 = vpop.f32.mrf.mxu1  ;;  %6605 = vmatmul.mubr.msk.f32.gmra.mxu1 %vm4616_vm3, %v4595_v46 }
 0x16b   : > { %v2155_v36 = vadd.f32 %v2044_v7, %v8388_v6  ;;  %v8570_v22 = vadd.f32 %v6227_v13, %v2156_v54  ;;  %6607 = vmatprep.mubr.msk.f32.mxu1 %vm4616_vm3, %v4596_v59  ;;  %v4168_v54 = vld [vmem:[#allocation2 + $0x12a] sm:$0xff]  ;;  %v4169_v7 = vld [vmem:[#allocation2 + $0x13a] sm:$0xff] }
 0x16c   : > { %v6166_v50 = vpop.f32.mrf.mxu0  ;;  %6549 = vmatmul.mubr.msk.f32.gmra.mxu0 %vm905_vm0, %v4162_v29  ;;  %v2449_v26 = vpop.f32.mrf.mxu1 }
 0x16d   : > { %v2158_v38 = vadd.f32 %v6166_v50, %v8394_v35  ;;  %v8577_v5 = vadd.f32 %v2439_v55, %v2155_v36  ;;  %6551 = vmatprep.mubr.msk.f32.mxu0 %vm905_vm0, %v4163_v58  ;;  %v4603_v36 = vld [vmem:[%s8468_s20 + $0xb8] sm:$0xff]  ;;  %v4604_v50 = vld [vmem:[%s8468_s20 + $0xc0] sm:$0xff] }
 0x16e   : > { %v2054_v6 = vpop.f32.mrf.mxu0  ;;  %v6233_v52 = vpop.f32.mrf.mxu1  ;;  %6608 = vmatmul.mubr.msk.f32.gmra.mxu1 %vm4616_vm3, %v4597_v3 }
 0x16f   : > { %v2157_v23 = vadd.f32 %v2054_v6, %v8398_v16  ;;  %v8582_v39 = vadd.f32 %v6230_v63, %v2158_v38  ;;  %6610 = vmatprep.mubr.msk.f32.mxu1 %vm4616_vm3, %v4598_v62  ;;  %v4170_v38 = vld [vmem:[#allocation2 + $0x142] sm:$0xff]  ;;  %v4171_v6 = vld [vmem:[#allocation2 + $0x152] sm:$0xff] }
 0x170   : > { %v6169_v34 = vpop.f32.mrf.mxu0  ;;  %6552 = vmatmul.mubr.msk.f32.gmra.mxu0 %vm905_vm0, %v4164_v45  ;;  %v2459_v35 = vpop.f32.mrf.mxu1 }
 0x171   : > { %v2160_v57 = vadd.f32 %v6169_v34, %v8411_v53  ;;  %v8589_v32 = vadd.f32 %v2449_v26, %v2157_v23  ;;  %6554 = vmatprep.mubr.msk.f32.mxu0 %vm905_vm0, %v4165_v61  ;;  %v4605_v23 = vld [vmem:[%s8468_s20 + $0xc8] sm:$0xff]  ;;  %v4606_v34 = vld [vmem:[%s8468_s20 + $0xd0] sm:$0xff] }
 0x172   : > { %v2064_v16 = vpop.f32.mrf.mxu0  ;;  %v6236_v18 = vpop.f32.mrf.mxu1  ;;  %6611 = vmatmul.mubr.msk.f32.gmra.mxu1 %vm4616_vm3, %v4599_v20 }
 0x173   : > { %v2159_v13 = vadd.f32 %v2064_v16, %v8414_v56  ;;  %v8594_v49 = vadd.f32 %v6233_v52, %v2160_v57  ;;  %6613 = vmatprep.mubr.msk.f32.mxu1 %vm4616_vm3, %v4600_v51  ;;  %v4172_v57 = vld [vmem:[#allocation2 + $0x15a] sm:$0xff]  ;;  %v4173_v16 = vld [vmem:[#allocation2 + $0x16a] sm:$0xff] }
 0x174   : > { %v6172_v46 = vpop.f32.mrf.mxu0  ;;  %6555 = vmatmul.mubr.msk.f32.gmra.mxu0 %vm905_vm0, %v4166_v47  ;;  %v2469_v53 = vpop.f32.mrf.mxu1 }
 0x175   : > { %v2162_v55 = vadd.f32 %v6172_v46, %v8419_v15  ;;  %v8601_v59 = vadd.f32 %v2459_v35, %v2159_v13  ;;  %6557 = vmatprep.mubr.msk.f32.mxu0 %vm905_vm0, %v4167_v37  ;;  %v4607_v13 = vld [vmem:[%s8468_s20 + $0xd8] sm:$0xff]  ;;  %v4608_v46 = vld [vmem:[%s8468_s20 + $0xe0] sm:$0xff] }
 0x176   : > { %v2074_v56 = vpop.f32.mrf.mxu0  ;;  %v6239_v29 = vpop.f32.mrf.mxu1  ;;  %6614 = vmatmul.mubr.msk.f32.gmra.mxu1 %vm4616_vm3, %v4601_v4 }
 0x177   : > { %v2161_v63 = vadd.f32 %v2074_v56, %v8422_v21  ;;  %v8606_v58 = vadd.f32 %v6236_v18, %v2162_v55  ;;  %6616 = vmatprep.mubr.msk.f32.mxu1 %vm4616_vm3, %v4602_v19  ;;  %v4174_v55 = vld [vmem:[#allocation2 + $0x172] sm:$0xff]  ;;  %v4175_v56 = vld [vmem:[#allocation2 + $0x182] sm:$0xff] }
 0x178   : > { %v6175_v3 = vpop.f32.mrf.mxu0  ;;  %6558 = vmatmul.mubr.msk.f32.gmra.mxu0 %vm905_vm0, %v4168_v54  ;;  %v2479_v15 = vpop.f32.mrf.mxu1 }
 0x179   : > { %v2164_v26 = vadd.f32 %v6175_v3, %v8427_v2  ;;  %v8613_v62 = vadd.f32 %v2469_v53, %v2161_v63  ;;  %6560 = vmatprep.mubr.msk.f32.mxu0 %vm905_vm0, %v4169_v7  ;;  %v4609_v63 = vld [vmem:[%s8468_s20 + $0xe8] sm:$0xff]  ;;  %v4610_v3 = vld [vmem:[%s8468_s20 + $0xf0] sm:$0xff] }
 0x17a   : > { %v2084_v21 = vpop.f32.mrf.mxu0  ;;  %v6242_v45 = vpop.f32.mrf.mxu1  ;;  %6617 = vmatmul.mubr.msk.f32.gmra.mxu1 %vm4616_vm3, %v4603_v36 }
 0x17b   : > { %v2163_v52 = vadd.f32 %v2084_v21, %v8430_v17  ;;  %v8618_v61 = vadd.f32 %v6239_v29, %v2164_v26  ;;  %6619 = vmatprep.mubr.msk.f32.mxu1 %vm4616_vm3, %v4604_v50  ;;  %v4176_v26 = vld [vmem:[#allocation2 + $0x18a] sm:$0xff]  ;;  %v4177_v21 = vld [vmem:[#allocation2 + $0x19a] sm:$0xff] }
 0x17c   : > { %v6178_v20 = vpop.f32.mrf.mxu0  ;;  %6561 = vmatmul.mubr.msk.f32.gmra.mxu0 %vm905_vm0, %v4170_v38  ;;  %v2489_v2 = vpop.f32.mrf.mxu1 }
 0x17d   : > { %v2166_v35 = vadd.f32 %v6178_v20, %v8435_v25  ;;  %v8625_v51 = vadd.f32 %v2479_v15, %v2163_v52  ;;  %6563 = vmatprep.mubr.msk.f32.mxu0 %vm905_vm0, %v4171_v6  ;;  %v4611_v52 = vld [vmem:[%s8468_s20 + $0xf8] sm:$0xff]  ;;  %s9133_s20 = scalar_lea.hbm %s9198_s9, %s5602_s29 }
 0x17e   : > { %v2094_v17 = vpop.f32.mrf.mxu0  ;;  %v6245_v47 = vpop.f32.mrf.mxu1  ;;  %6620 = vmatmul.mubr.msk.f32.gmra.mxu1 %vm4616_vm3, %v4605_v23 }
 0x17f   : > { %v2165_v18 = vadd.f32 %v2094_v17, %v8438_v48  ;;  %v8630_v37 = vadd.f32 %v6242_v45, %v2166_v35  ;;  %6622 = vmatprep.mubr.msk.f32.mxu1 %vm4616_vm3, %v4606_v34  ;;  %v4178_v34 = vld [vmem:[#allocation2 + $0x1a2] sm:$0xff] }
 0x180   : > { %v6181_v4 = vpop.f32.mrf.mxu0  ;;  %6564 = vmatmul.mubr.msk.f32.gmra.mxu0 %vm905_vm0, %v4172_v57  ;;  %v2499_v25 = vpop.f32.mrf.mxu1 }
 0x181   : > { %v2168_v53 = vadd.f32 %v6181_v4, %v8443_v14  ;;  %v8637_v19 = vadd.f32 %v2489_v2, %v2165_v18  ;;  %6566 = vmatprep.mubr.msk.f32.mxu0 %vm905_vm0, %v4173_v16 }
 0x182   : > { %v2104_v48 = vpop.f32.mrf.mxu0  ;;  %v6248_v54 = vpop.f32.mrf.mxu1  ;;  %6623 = vmatmul.mubr.msk.f32.gmra.mxu1 %vm4616_vm3, %v4607_v13 }
 0x183   : > { %v2167_v29 = vadd.f32 %v2104_v48, %v8446_v40  ;;  %v8642_v7 = vadd.f32 %v6245_v47, %v2168_v53  ;;  %6625 = vmatprep.mubr.msk.f32.mxu1 %vm4616_vm3, %v4608_v46 }
 0x184   : > { %v6184_v36 = vpop.f32.mrf.mxu0  ;;  %6567 = vmatmul.mubr.msk.f32.gmra.mxu0 %vm905_vm0, %v4174_v55  ;;  %v2509_v14 = vpop.f32.mrf.mxu1 }
 0x185   : > { %v2170_v15 = vadd.f32 %v6184_v36, %v8451_v60  ;;  %v8649_v50 = vadd.f32 %v2499_v25, %v2167_v29  ;;  %6569 = vmatprep.mubr.msk.f32.mxu0 %vm905_vm0, %v4175_v56 }
 0x186   : > { %v2114_v38 = vpop.f32.mrf.mxu0  ;;  %v6251_v40 = vpop.f32.mrf.mxu1  ;;  %6626 = vmatmul.mubr.msk.f32.gmra.mxu1 %vm4616_vm3, %v4609_v63 }
 0x187   : > { %v2169_v45 = vadd.f32 %v2114_v38, %v8454_v28  ;;  %v8654_v6 = vadd.f32 %v6248_v54, %v2170_v15  ;;  %6628 = vmatprep.mubr.msk.f32.mxu1 %vm4616_vm3, %v4610_v3 }
 0x188   : > { %v6187_v23 = vpop.f32.mrf.mxu0  ;;  %6570 = vmatmul.mubr.msk.f32.gmra.mxu0 %vm905_vm0, %v4176_v26  ;;  %v2519_v60 = vpop.f32.mrf.mxu1 }
 0x189   : > { %v2172_v20 = vadd.f32 %v6187_v23, %v8461_v33  ;;  %v8660_v2 = vadd.f32 %v2509_v14, %v2169_v45  ;;  %6572 = vmatprep.mubr.msk.f32.mxu0 %vm905_vm0, %v4177_v21 }
 0x18a   : > { %v2124_v35 = vpop.f32.mrf.mxu0  ;;  %v6254_v57 = vpop.f32.mrf.mxu1  ;;  %6629 = vmatmul.mubr.msk.f32.gmra.mxu1 %vm4616_vm3, %v4611_v52 }
 0x18b   : > { %v2171_v28 = vadd.f32 %v2124_v35, %v8470_v9  ;;  %v8665_v17 = vadd.f32 %v6251_v40, %v2172_v20 }
 0x18c   : > { %v6190_v47 = vpop.f32.mrf.mxu0  ;;  %6573 = vmatmul.mubr.msk.f32.gmra.mxu0 %vm905_vm0, %v4178_v34  ;;  %v2529_v16 = vpop.f32.mrf.mxu1 }
 0x18d   : > { %v2174_v18 = vadd.f32 %v6190_v47, %v8484_v44  ;;  %v8669_v33 = vadd.f32 %v2519_v60, %v2171_v28 }
 0x18e   : > { %v2134_v13 = vpop.f32.mrf.mxu0  ;;  %v6337_v4 = vpop.f32.mrf.mxu1 }
 0x18f   : > { %v2173_v25 = vadd.f32 %v2134_v13, %v8488_v24  ;;  %v8672_v46 = vadd.f32 %v6254_v57, %v2174_v18 }
 0x190   : > { %v6273_v53 = vpop.f32.mrf.mxu0  ;;  %v3167_v55 = vpop.f32.mrf.mxu1 }
 0x191   : > { %v8674_v48 = vadd.f32 %v2529_v16, %v2173_v25  ;;  %v2933_v9 = vadd.f32 %v6273_v53, %v8498_v0 }
 0x192   : > { %v2773_v54 = vpop.f32.mrf.mxu0  ;;  %v6340_v56 = vpop.f32.mrf.mxu1 }
 0x193   : > { %v2932_v29 = vadd.f32 %v2773_v54, %v8505_v42  ;;  %v8678_v63 = vadd.f32 %v6337_v4, %v2933_v9 }
 0x194   : > { %v6276_v44 = vpop.f32.mrf.mxu0  ;;  %v3177_v36 = vpop.f32.mrf.mxu1 }
 0x195   : > { %v2935_v14 = vadd.f32 %v6276_v44, %v8510_v27  ;;  %v8681_v3 = vadd.f32 %v3167_v55, %v2932_v29 }
 0x196   : > { %v2783_v24 = vpop.f32.mrf.mxu0  ;;  %v6343_v15 = vpop.f32.mrf.mxu1 }
 0x197   : > { %v2934_v26 = vadd.f32 %v2783_v24, %v8517_v11  ;;  %v8684_v38 = vadd.f32 %v6340_v56, %v2935_v14 }
 0x198   : > { %v6279_v40 = vpop.f32.mrf.mxu0  ;;  %v3187_v0 = vpop.f32.mrf.mxu1 }
 0x199   : > { %v2937_v21 = vadd.f32 %v6279_v40, %v8522_v10  ;;  %v8687_v45 = vadd.f32 %v3177_v36, %v2934_v26 }
 0x19a   : > { %v2793_v42 = vpop.f32.mrf.mxu0  ;;  %v6346_v52 = vpop.f32.mrf.mxu1 }
 0x19b   : > { %v2936_v23 = vadd.f32 %v2793_v42, %v8529_v31  ;;  %v8690_v60 = vadd.f32 %v6343_v15, %v2937_v21 }
 0x19c   : > { %v6282_v27 = vpop.f32.mrf.mxu0  ;;  %v3197_v20 = vpop.f32.mrf.mxu1 }
 0x19d   : > { %v2939_v34 = vadd.f32 %v6282_v27, %v8534_v41  ;;  %v8693_v35 = vadd.f32 %v3187_v0, %v2936_v23 }
 0x19e   : > { %v2803_v11 = vpop.f32.mrf.mxu0  ;;  %v6349_v57 = vpop.f32.mrf.mxu1 }
 0x19f   : > { %v2938_v28 = vadd.f32 %v2803_v11, %v8541_v30  ;;  %v8696_v47 = vadd.f32 %v6346_v52, %v2939_v34 }
 0x1a0   : > { %v6285_v10 = vpop.f32.mrf.mxu0  ;;  %v3207_v16 = vpop.f32.mrf.mxu1 }
 0x1a1   : > { %v2941_v18 = vadd.f32 %v6285_v10, %v8546_v1  ;;  %v8699_v13 = vadd.f32 %v3197_v20, %v2938_v28 }
 0x1a2   : > { %v2813_v31 = vpop.f32.mrf.mxu0  ;;  %v6352_v4 = vpop.f32.mrf.mxu1 }
 0x1a3   : > { %v2940_v25 = vadd.f32 %v2813_v31, %v8553_v43  ;;  %v8702_v53 = vadd.f32 %v6349_v57, %v2941_v18 }
 0x1a4   : > { %v6288_v41 = vpop.f32.mrf.mxu0  ;;  %v3217_v55 = vpop.f32.mrf.mxu1 }
 0x1a5   : > { %v2943_v9 = vadd.f32 %v6288_v41, %v8558_v8  ;;  %v8705_v54 = vadd.f32 %v3207_v16, %v2940_v25 }
 0x1a6   : > { %v2823_v30 = vpop.f32.mrf.mxu0  ;;  %v6355_v56 = vpop.f32.mrf.mxu1 }
 0x1a7   : > { %v2942_v29 = vadd.f32 %v2823_v30, %v8565_v12  ;;  %v8708_v44 = vadd.f32 %v6352_v4, %v2943_v9 }
 0x1a8   : > { %v6291_v1 = vpop.f32.mrf.mxu0  ;;  %v3227_v36 = vpop.f32.mrf.mxu1 }
 0x1a9   : > { %v2945_v14 = vadd.f32 %v6291_v1, %v8570_v22  ;;  %v8711_v24 = vadd.f32 %v3217_v55, %v2942_v29 }
 0x1aa   : > { %v2833_v43 = vpop.f32.mrf.mxu0  ;;  %v6358_v15 = vpop.f32.mrf.mxu1 }
 0x1ab   : > { %v2944_v26 = vadd.f32 %v2833_v43, %v8577_v5  ;;  %v8714_v40 = vadd.f32 %v6355_v56, %v2945_v14 }
 0x1ac   : > { %v6294_v8 = vpop.f32.mrf.mxu0  ;;  %v3237_v0 = vpop.f32.mrf.mxu1 }
 0x1ad   : > { %v2947_v21 = vadd.f32 %v6294_v8, %v8582_v39  ;;  %v8717_v42 = vadd.f32 %v3227_v36, %v2944_v26 }
 0x1ae   : > { %v2843_v12 = vpop.f32.mrf.mxu0  ;;  %v6361_v52 = vpop.f32.mrf.mxu1 }
 0x1af   : > { %v2946_v23 = vadd.f32 %v2843_v12, %v8589_v32  ;;  %v8720_v27 = vadd.f32 %v6358_v15, %v2947_v21 }
 0x1b0   : > { %v6297_v22 = vpop.f32.mrf.mxu0  ;;  %v3247_v20 = vpop.f32.mrf.mxu1 }
 0x1b1   : > { %v2949_v34 = vadd.f32 %v6297_v22, %v8594_v49  ;;  %v8723_v11 = vadd.f32 %v3237_v0, %v2946_v23 }
 0x1b2   : > { %v2853_v5 = vpop.f32.mrf.mxu0  ;;  %v6364_v57 = vpop.f32.mrf.mxu1 }
 0x1b3   : > { %v2948_v28 = vadd.f32 %v2853_v5, %v8601_v59  ;;  %v8726_v10 = vadd.f32 %v6361_v52, %v2949_v34 }
 0x1b4   : > { %v6300_v39 = vpop.f32.mrf.mxu0  ;;  %v3257_v16 = vpop.f32.mrf.mxu1 }
 0x1b5   : > { %v2951_v18 = vadd.f32 %v6300_v39, %v8606_v58  ;;  %v8729_v31 = vadd.f32 %v3247_v20, %v2948_v28 }
 0x1b6   : > { %v2863_v32 = vpop.f32.mrf.mxu0  ;;  %v6367_v4 = vpop.f32.mrf.mxu1 }
 0x1b7   : > { %v2950_v25 = vadd.f32 %v2863_v32, %v8613_v62  ;;  %v8732_v41 = vadd.f32 %v6364_v57, %v2951_v18 }
 0x1b8   : > { %v6303_v49 = vpop.f32.mrf.mxu0  ;;  %v3267_v55 = vpop.f32.mrf.mxu1 }
 0x1b9   : > { %9203 = vst [vmem:[#allocation7_spill] sm:$0xff] %v8732_v41  ;;  %v2953_v9 = vadd.f32 %v6303_v49, %v8618_v61  ;;  %v8735_v30 = vadd.f32 %v3257_v16, %v2950_v25 }
 0x1ba   : > { %v2873_v59 = vpop.f32.mrf.mxu0  ;;  %v6370_v56 = vpop.f32.mrf.mxu1 }
 0x1bb   : > { %9204 = vst [vmem:[#allocation8_spill] sm:$0xff] %v8735_v30  ;;  %v2952_v29 = vadd.f32 %v2873_v59, %v8625_v51  ;;  %v8738_v1 = vadd.f32 %v6367_v4, %v2953_v9 }
 0x1bc   : > { %v6306_v58 = vpop.f32.mrf.mxu0  ;;  %v3277_v36 = vpop.f32.mrf.mxu1 }
 0x1bd   : > { %9205 = vst [vmem:[#allocation9_spill] sm:$0xff] %v8738_v1  ;;  %v2955_v14 = vadd.f32 %v6306_v58, %v8630_v37  ;;  %v8741_v43 = vadd.f32 %v3267_v55, %v2952_v29 }
 0x1be   : > { %v2883_v62 = vpop.f32.mrf.mxu0  ;;  %v6373_v15 = vpop.f32.mrf.mxu1 }
 0x1bf   : > { %9206 = vst [vmem:[#allocation10_spill] sm:$0xff] %v8741_v43  ;;  %v2954_v26 = vadd.f32 %v2883_v62, %v8637_v19  ;;  %v8744_v8 = vadd.f32 %v6370_v56, %v2955_v14 }
 0x1c0   : > { %v6309_v61 = vpop.f32.mrf.mxu0  ;;  %v3287_v0 = vpop.f32.mrf.mxu1 }
 0x1c1   : > { %9207 = vst [vmem:[#allocation11_spill] sm:$0xff] %v8744_v8  ;;  %v2957_v21 = vadd.f32 %v6309_v61, %v8642_v7  ;;  %v8747_v12 = vadd.f32 %v3277_v36, %v2954_v26 }
 0x1c2   : > { %v2893_v51 = vpop.f32.mrf.mxu0  ;;  %v6376_v52 = vpop.f32.mrf.mxu1 }
 0x1c3   : > { %9208 = vst [vmem:[#allocation12_spill] sm:$0xff] %v8747_v12  ;;  %v2956_v23 = vadd.f32 %v2893_v51, %v8649_v50  ;;  %v8750_v22 = vadd.f32 %v6373_v15, %v2957_v21 }
 0x1c4   : > { %v6312_v37 = vpop.f32.mrf.mxu0  ;;  %v3297_v20 = vpop.f32.mrf.mxu1 }
 0x1c5   : > { %9209 = vst [vmem:[#allocation13_spill] sm:$0xff] %v8750_v22  ;;  %v2959_v34 = vadd.f32 %v6312_v37, %v8654_v6  ;;  %v8753_v5 = vadd.f32 %v3287_v0, %v2956_v23 }
 0x1c6   : > { %v2903_v19 = vpop.f32.mrf.mxu0  ;;  %v6379_v57 = vpop.f32.mrf.mxu1 }
 0x1c7   : > { %9210 = vst [vmem:[#allocation14_spill] sm:$0xff] %v8753_v5  ;;  %v2958_v28 = vadd.f32 %v2903_v19, %v8660_v2  ;;  %v8756_v39 = vadd.f32 %v6376_v52, %v2959_v34 }
 0x1c8   : > { %v6315_v7 = vpop.f32.mrf.mxu0  ;;  %v3307_v16 = vpop.f32.mrf.mxu1 }
 0x1c9   : > { %9211 = vst [vmem:[#allocation15_spill] sm:$0xff] %v8756_v39  ;;  %v2961_v18 = vadd.f32 %v6315_v7, %v8665_v17  ;;  %v8759_v32 = vadd.f32 %v3297_v20, %v2958_v28 }
 0x1ca   : > { %v2913_v50 = vpop.f32.mrf.mxu0  ;;  %v6382_v4 = vpop.f32.mrf.mxu1 }
 0x1cb   : > { %9212 = vst [vmem:[#allocation16_spill] sm:$0xff] %v8759_v32  ;;  %v2960_v25 = vadd.f32 %v2913_v50, %v8669_v33  ;;  %v8762_v49 = vadd.f32 %v6379_v57, %v2961_v18 }
 0x1cc   : > { %v6318_v6 = vpop.f32.mrf.mxu0  ;;  %v3317_v55 = vpop.f32.mrf.mxu1 }
 0x1cd   : > { %9213 = vst [vmem:[#allocation17_spill] sm:$0xff] %v8762_v49  ;;  %v2963_v9 = vadd.f32 %v6318_v6, %v8672_v46  ;;  %v8765_v59 = vadd.f32 %v3307_v16, %v2960_v25 }
 0x1ce   : > { %v2923_v2 = vpop.f32.mrf.mxu0  ;;  %v8767_v56 = vpop.f32.mrf.mxu1 }
 0x1cf   : > { %9214 = vst [vmem:[#allocation18_spill] sm:$0xff] %v8765_v59  ;;  %v2962_v29 = vadd.f32 %v2923_v2, %v8674_v48  ;;  %v8770_v17 = vadd.f32 %v6382_v4, %v2963_v9 }
 0x1d0   : > { %v6401_v58 = vpop.f32.mrf.mxu0  ;;  %v8772_v36 = vpop.f32.mrf.mxu1 }
 0x1d1   : > { %9215 = vst [vmem:[#allocation19_spill] sm:$0xff] %v8770_v17  ;;  %v8774_v14 = vadd.f32 %v3317_v55, %v2962_v29 }
 0x1d2   : > { %v3562_v33 = vpop.f32.mrf.mxu0  ;;  %v8776_v62 = vpop.f32.mrf.mxu1 }
 0x1d3   : > { %9216 = vst [vmem:[#allocation20_spill] sm:$0xff] %v8774_v14 }
 0x1d4   : > { %v8778_v15 = vpop.f32.mrf.mxu0  ;;  %v8780_v46 = vpop.f32.mrf.mxu1 }
 0x1d6   : > { %v8782_v26 = vpop.f32.mrf.mxu0  ;;  %v8784_v61 = vpop.f32.mrf.mxu1 }
 0x1d8   : > { %v8786_v0 = vpop.f32.mrf.mxu0  ;;  %v8788_v48 = vpop.f32.mrf.mxu1 }
 0x1da   : > { %v8790_v21 = vpop.f32.mrf.mxu0  ;;  %v8792_v51 = vpop.f32.mrf.mxu1 }
 0x1dc   : > { %v8794_v52 = vpop.f32.mrf.mxu0  ;;  %v8796_v23 = vpop.f32.mrf.mxu1 }
 0x1de   : > { %v8798_v37 = vpop.f32.mrf.mxu0  ;;  %v8800_v20 = vpop.f32.mrf.mxu1 }
 0x1e0   : > { %v8802_v34 = vpop.f32.mrf.mxu0  ;;  %v8804_v19 = vpop.f32.mrf.mxu1 }
 0x1e2   : > { %v8806_v57 = vpop.f32.mrf.mxu0  ;;  %v8808_v28 = vpop.f32.mrf.mxu1 }
 0x1e4   : > { %v8810_v7 = vpop.f32.mrf.mxu0  ;;  %v8812_v16 = vpop.f32.mrf.mxu1 }
 0x1e6   : > { %v8814_v18 = vpop.f32.mrf.mxu0  ;;  %v8816_v50 = vpop.f32.mrf.mxu1 }
 0x1e8   : > { %v8818_v4 = vpop.f32.mrf.mxu0  ;;  %v8820_v25 = vpop.f32.mrf.mxu1 }
 0x1ea   : > { %v8822_v6 = vpop.f32.mrf.mxu0  ;;  %v8824_v55 = vpop.f32.mrf.mxu1 }
 0x1ec   : > { %v8826_v9 = vpop.f32.mrf.mxu0  ;;  %v8828_v2 = vpop.f32.mrf.mxu1 }
 0x1ee   : > { %v8830_v29 = vpop.f32.mrf.mxu0  ;;  %v8832_v14 = vpop.f32.mrf.mxu1 }
 0x1f0   : > { %v8834_v17 = vpop.f32.mrf.mxu0  ;;  %v8836_v59 = vpop.f32.mrf.mxu1 }
 0x1f1   : > { %9217 = vst [vmem:[#allocation21_spill] sm:$0xff] %v8836_v59 }
 0x1f2   : > { %v8838_v49 = vpop.f32.mrf.mxu0  ;;  %v8840_v32 = vpop.f32.mrf.mxu1 }
 0x1f3   : > { %9218 = vst [vmem:[#allocation22_spill] sm:$0xff] %v8840_v32 }
 0x1f4   : > { %v8842_v39 = vpop.f32.mrf.mxu0  ;;  %v8844_v5 = vpop.f32.mrf.mxu1 }
 0x1f5   : > { %9219 = vst [vmem:[#allocation23_spill] sm:$0xff] %v8842_v39  ;;  %9220 = vst [vmem:[#allocation24_spill] sm:$0xff] %v8844_v5 }
 0x1f6   : > { %v8846_v22 = vpop.f32.mrf.mxu0  ;;  %v8848_v12 = vpop.f32.mrf.mxu1 }
 0x1f7   : > { %9221 = vst [vmem:[#allocation25_spill] sm:$0xff] %v8846_v22  ;;  %9222 = vst [vmem:[#allocation26_spill] sm:$0xff] %v8848_v12 }
 0x1f8   : > { %v8850_v8 = vpop.f32.mrf.mxu0  ;;  %v8852_v43 = vpop.f32.mrf.mxu1 }
 0x1f9   : > { %9223 = vst [vmem:[#allocation27_spill] sm:$0xff] %v8850_v8  ;;  %9224 = vst [vmem:[#allocation28_spill] sm:$0xff] %v8852_v43 }
 0x1fa   : > { %v8854_v1 = vpop.f32.mrf.mxu0  ;;  %v8856_v30 = vpop.f32.mrf.mxu1 }
 0x1fb   : > { %9225 = vst [vmem:[#allocation29_spill] sm:$0xff] %v8854_v1  ;;  %9226 = vst [vmem:[#allocation30_spill] sm:$0xff] %v8856_v30 }
 0x1fc   : > { %v8858_v59 = vpop.f32.mrf.mxu0  ;;  %v8860_v41 = vpop.f32.mrf.mxu1 }
 0x1fd   : > { %9227 = vst [vmem:[#allocation31_spill] sm:$0xff] %v8858_v59  ;;  %9228 = vst [vmem:[#allocation32_spill] sm:$0xff] %v8860_v41 }
 0x1fe   : > { %v8862_v32 = vpop.f32.mrf.mxu0  ;;  %v8864_v39 = vpop.f32.mrf.mxu1 }
 0x1ff   : > { %9229 = vst [vmem:[#allocation33_spill] sm:$0xff] %v8862_v32  ;;  %9230 = vst [vmem:[#allocation34_spill] sm:$0xff] %v8864_v39 }
 0x200   : > { %v8866_v5 = vpop.f32.mrf.mxu0  ;;  %v8868_v22 = vpop.f32.mrf.mxu1 }
 0x201   : > { %9231 = vst [vmem:[#allocation35_spill] sm:$0xff] %v8866_v5  ;;  %9232 = vst [vmem:[#allocation36_spill] sm:$0xff] %v8868_v22 }
 0x202   : > { %v8870_v12 = vpop.f32.mrf.mxu0  ;;  %v8872_v8 = vpop.f32.mrf.mxu1 }
 0x203   : > { %9233 = vst [vmem:[#allocation37_spill] sm:$0xff] %v8870_v12  ;;  %9234 = vst [vmem:[#allocation38_spill] sm:$0xff] %v8872_v8  ;;  %v3722_v12 = vadd.f32 %v6401_v58, %v8678_v63  ;;  %v8905_v63 = vld [vmem:[%s9194_s5] ss:$0 sm:$0xff] }
 0x204   : > { %v8874_v43 = vpop.f32.mrf.mxu0  ;;  %v8876_v1 = vpop.f32.mrf.mxu1 }
 0x205   : > { %9235 = vst [vmem:[#allocation39_spill] sm:$0xff] %v8874_v43  ;;  %9236 = vst [vmem:[#allocation40_spill] sm:$0xff] %v8876_v1  ;;  %v3721_v1 = vadd.f32 %v3562_v33, %v8681_v3  ;;  %v3723_v3 = vadd.f32 %v8782_v26, %v8687_v45  ;;  %v8921_v45 = vld [vmem:[%s9197_s8] ss:$0 sm:$0xff] }
 0x206   : > { %v8878_v30 = vpop.f32.mrf.mxu0  ;;  %v8880_v41 = vpop.f32.mrf.mxu1 }
 0x207   : > { %9237 = vst [vmem:[#allocation41_spill] sm:$0xff] %v8878_v30  ;;  %9238 = vst [vmem:[#allocation42_spill] sm:$0xff] %v8880_v41 }
 0x208   : > { %v8882_v32 = vpop.f32.mrf.mxu0  ;;  %v8884_v39 = vpop.f32.mrf.mxu1 }
 0x209   : > { %9239 = vst [vmem:[#allocation43_spill] sm:$0xff] %v8882_v32  ;;  %9240 = vst [vmem:[#allocation44_spill] sm:$0xff] %v8884_v39  ;;  %v4116_v32 = vadd.f32 %v8767_v56, %v3722_v12  ;;  %v3724_v39 = vadd.f32 %v8778_v15, %v8684_v38  ;;  %v3726_v12 = vadd.f32 %v8786_v0, %v8690_v60 }
 0x20a   : > { %v8886_v5 = vpop.f32.mrf.mxu0  ;;  %v8888_v22 = vpop.f32.mrf.mxu1  ;;  %v4117_v60 = vadd.f32 %v8780_v46, %v3723_v3 }
 0x20b   : > { %9241 = vst [vmem:[#allocation45_spill] sm:$0xff] %v8886_v5  ;;  %9242 = vst [vmem:[#allocation46_spill] sm:$0xff] %v8888_v22  ;;  %v4118_v38 = vadd.f32 %v8776_v62, %v3724_v39  ;;  %v4120_v39 = vadd.f32 %v8784_v61, %v3726_v12  ;;  %v3728_v62 = vadd.f32 %v8794_v52, %v8696_v47 }
 0x20c   : > { %v8891_v8 = vpop.f32.mrf.mxu0  ;;  %v8893_v43 = vpop.f32.mrf.mxu1 }
 0x20d   : > { %9243 = vst [vmem:[#allocation47_spill] sm:$0xff] %v8891_v8  ;;  %9244 = vst [vmem:[#allocation48_spill] sm:$0xff] %v8893_v43  ;;  %v4115_v43 = vadd.f32 %v8772_v36, %v3721_v1  ;;  %v3725_v8 = vadd.f32 %v8790_v21, %v8693_v35 }
 0x20e   : > { %v8896_v59 = vpop.f32.mrf.mxu0  ;;  %v6585_v41 = vpop.f32.mrf.mxu1 }
 0x20f   : > { %9245 = vst [vmem:[#allocation49_spill] sm:$0xff] %v8896_v59  ;;  %v4119_v30 = vadd.f32 %v8788_v48, %v3725_v8  ;;  %v4122_v8 = vadd.f32 %v8792_v51, %v3728_v62 }
 0x210   : > { %v6529_v5 = vpop.f32.mrf.mxu0  ;;  %v4779_v58 = vpop.f32.mrf.mxu1 }
 0x211   : > { %v4510_v33 = vadd.f32 %v6529_v5, %v4116_v32 }
 0x212   : > { %v4350_v56 = vpop.f32.mrf.mxu0  ;;  %v6588_v22 = vpop.f32.mrf.mxu1 }
 0x213   : > { %v4509_v15 = vadd.f32 %v4350_v56, %v4115_v43  ;;  %v4549_v59 = vadd.f32 %v8905_v63, %v4510_v33 }
 0x214   : > { %v6532_v1 = vpop.f32.mrf.mxu0  ;;  %v4789_v5 = vpop.f32.mrf.mxu1 }
 0x215   : > { %v4939_v32 = vadd.f32 %v6585_v41, %v4549_v59  ;;  %v4512_v36 = vadd.f32 %v6532_v1, %v4118_v38  ;;  %v4548_v43 = vadd.f32 %v8905_v63, %v4509_v15  ;;  %v3727_v41 = vadd.f32 %v8798_v37, %v8699_v13 }
 0x216   : > { %v4360_v26 = vpop.f32.mrf.mxu0  ;;  %v6591_v35 = vpop.f32.mrf.mxu1  ;;  %v3730_v13 = vadd.f32 %v8802_v34, %v8702_v53  ;;  %v3729_v1 = vadd.f32 %v8806_v57, %v8705_v54 }
 0x217   : > { %v4978_v0 = vadd.f32 %v8921_v45, %v4939_v32  ;;  %v4938_v21 = vadd.f32 %v4779_v58, %v4548_v43  ;;  %v4511_v33 = vadd.f32 %v4360_v26, %v4117_v60  ;;  %v4551_v56 = vadd.f32 %v8905_v63, %v4512_v36 }
 0x218   : > { %v6535_v59 = vpop.f32.mrf.mxu0  ;;  %v4799_v46 = vpop.f32.mrf.mxu1  ;;  %v4121_v15 = vadd.f32 %v8796_v23, %v3727_v41  ;;  %v3732_v36 = vadd.f32 %v8810_v7, %v8708_v44  ;;  %v4123_v26 = vadd.f32 %v8804_v19, %v3729_v1  ;;  %v3734_v41 = vadd.f32 %v8818_v4, %v8714_v40 }
 0x219   : > { %5010 = vst.msk [vmem:[%s8933_s15 + $0x8] sm:$0xff] %vm905_vm0, %v4978_v0  ;;  %v4977_v47 = vadd.f32 %v8921_v45, %v4938_v21  ;;  %v4941_v61 = vadd.f32 %v6588_v22, %v4551_v56  ;;  %v4514_v52 = vadd.f32 %v6535_v59, %v4120_v39  ;;  %v4550_v58 = vadd.f32 %v8905_v63, %v4511_v33 }
 0x21a   : > { %v4370_v48 = vpop.f32.mrf.mxu0  ;;  %v6594_v37 = vpop.f32.mrf.mxu1  ;;  %v4126_v56 = vadd.f32 %v8808_v28, %v3732_v36 }
 0x21b   : > { %5009 = vst.msk [vmem:[%s8933_s15] sm:$0xff] %vm905_vm0, %v4977_v47  ;;  %v4980_v3 = vadd.f32 %v8921_v45, %v4941_v61  ;;  %v4940_v12 = vadd.f32 %v4789_v5, %v4550_v58  ;;  %v4513_v38 = vadd.f32 %v4370_v48, %v4119_v30  ;;  %v4553_v22 = vadd.f32 %v8905_v63, %v4514_v52 }
 0x21c   : > { %v6538_v51 = vpop.f32.mrf.mxu0  ;;  %v4809_v60 = vpop.f32.mrf.mxu1  ;;  %v4124_v30 = vadd.f32 %v8800_v20, %v3730_v13  ;;  %v3733_v52 = vadd.f32 %v8822_v6, %v8717_v42  ;;  %v4128_v48 = vadd.f32 %v8816_v50, %v3734_v41 }
 0x21d   : > { %5012 = vst.msk [vmem:[%s8933_s15 + $0x18] sm:$0xff] %vm905_vm0, %v4980_v3  ;;  %v4979_v53 = vadd.f32 %v8921_v45, %v4940_v12  ;;  %v4943_v34 = vadd.f32 %v6591_v35, %v4553_v22  ;;  %v4516_v32 = vadd.f32 %v6538_v51, %v4122_v8  ;;  %v4552_v5 = vadd.f32 %v8905_v63, %v4513_v38 }
 0x21e   : > { %v4380_v23 = vpop.f32.mrf.mxu0  ;;  %v6597_v43 = vpop.f32.mrf.mxu1  ;;  %v3731_v35 = vadd.f32 %v8814_v18, %v8711_v24  ;;  %v4127_v22 = vadd.f32 %v8820_v25, %v3733_v52  ;;  %v9252_v52 = vld [vmem:[#allocation9_spill] sm:$0xff] }
 0x21f   : > { %5011 = vst.msk [vmem:[%s8933_s15 + $0x10] sm:$0xff] %vm905_vm0, %v4979_v53  ;;  %v4982_v54 = vadd.f32 %v8921_v45, %v4943_v34  ;;  %v4942_v57 = vadd.f32 %v4799_v46, %v4552_v5  ;;  %v4515_v39 = vadd.f32 %v4380_v23, %v4121_v15  ;;  %v4555_v62 = vadd.f32 %v8905_v63, %v4516_v32 }
 0x220   : > { %v6541_v20 = vpop.f32.mrf.mxu0  ;;  %v4819_v0 = vpop.f32.mrf.mxu1  ;;  %v4125_v61 = vadd.f32 %v8812_v16, %v3731_v35  ;;  %v3735_v15 = vadd.f32 %v8830_v29, %v8723_v11  ;;  %v3738_v34 = vadd.f32 %v8834_v17, %v8726_v10  ;;  %v3737_v23 = vadd.f32 %v8838_v49, %v8729_v31 }
 0x221   : > { %5014 = vst.msk [vmem:[%s8933_s15 + $0x28] sm:$0xff] %vm905_vm0, %v4982_v54  ;;  %v4981_v44 = vadd.f32 %v8921_v45, %v4942_v57  ;;  %v4945_v7 = vadd.f32 %v6594_v37, %v4555_v62  ;;  %v4518_v21 = vadd.f32 %v6541_v20, %v4124_v30  ;;  %v4554_v33 = vadd.f32 %v8905_v63, %v4515_v39  ;;  %v9246_v62 = vld [vmem:[#allocation7_spill] sm:$0xff] }
 0x222   : > { %v4390_v19 = vpop.f32.mrf.mxu0  ;;  %v6600_v59 = vpop.f32.mrf.mxu1  ;;  %v3736_v37 = vadd.f32 %v8826_v9, %v8720_v27  ;;  %v4129_v36 = vadd.f32 %v8828_v2, %v3735_v15  ;;  %v4132_v39 = vadd.f32 %v8832_v14, %v3738_v34 }
 0x223   : > { %5013 = vst.msk [vmem:[%s8933_s15 + $0x20] sm:$0xff] %vm905_vm0, %v4981_v44  ;;  %v4984_v24 = vadd.f32 %v8921_v45, %v4945_v7  ;;  %v4944_v18 = vadd.f32 %v4809_v60, %v4554_v33  ;;  %v4517_v46 = vadd.f32 %v4390_v19, %v4123_v26  ;;  %v4557_v47 = vadd.f32 %v8905_v63, %v4518_v21  ;;  %v9247_v26 = vld [vmem:[#allocation23_spill] sm:$0xff]  ;;  %v9248_v7 = vld [vmem:[#allocation21_spill] sm:$0xff]  ;;  %v9249_v33 = vld [vmem:[#allocation8_spill] sm:$0xff] }
 0x224   : > { %v6544_v28 = vpop.f32.mrf.mxu0  ;;  %v4829_v58 = vpop.f32.mrf.mxu1  ;;  %v4130_v53 = vadd.f32 %v8824_v55, %v3736_v37  ;;  %v3740_v35 = vadd.f32 %v9247_v26, %v9246_v62  ;;  %v4131_v21 = vadd.f32 %v9248_v7, %v3737_v23 }
 0x225   : > { %5016 = vst.msk [vmem:[%s8933_s15 + $0x38] sm:$0xff] %vm905_vm0, %v4984_v24  ;;  %v4983_v40 = vadd.f32 %v8921_v45, %v4944_v18  ;;  %v4947_v4 = vadd.f32 %v6597_v43, %v4557_v47  ;;  %v4520_v8 = vadd.f32 %v6544_v28, %v4126_v56  ;;  %v4556_v13 = vadd.f32 %v8905_v63, %v4517_v46  ;;  %v9250_v56 = vld [vmem:[#allocation25_spill] sm:$0xff]  ;;  %v9251_v47 = vld [vmem:[#allocation22_spill] sm:$0xff]  ;;  %v9253_v28 = vld [vmem:[#allocation27_spill] sm:$0xff] }
 0x226   : > { %v4400_v16 = vpop.f32.mrf.mxu0  ;;  %v6603_v3 = vpop.f32.mrf.mxu1  ;;  %v3739_v41 = vadd.f32 %v9250_v56, %v9249_v33 }
 0x227   : > { %5015 = vst.msk [vmem:[%s8933_s15 + $0x30] sm:$0xff] %vm905_vm0, %v4983_v40  ;;  %v4986_v42 = vadd.f32 %v8921_v45, %v4947_v4  ;;  %v4946_v6 = vadd.f32 %v4819_v0, %v4556_v13  ;;  %v4519_v12 = vadd.f32 %v4400_v16, %v4125_v61  ;;  %v4559_v38 = vadd.f32 %v8905_v63, %v4520_v8  ;;  %v9254_v16 = vld [vmem:[#allocation24_spill] sm:$0xff] }
 0x228   : > { %v6547_v50 = vpop.f32.mrf.mxu0  ;;  %v4839_v1 = vpop.f32.mrf.mxu1  ;;  %v4134_v61 = vadd.f32 %v9251_v47, %v3740_v35  ;;  %v9263_v35 = vld [vmem:[#allocation30_spill] sm:$0xff] }
 0x229   : > { %5018 = vst.msk [vmem:[%s8933_s15 + $0x48] sm:$0xff] %vm905_vm0, %v4986_v42  ;;  %v4985_v27 = vadd.f32 %v8921_v45, %v4946_v6  ;;  %v4949_v9 = vadd.f32 %v6600_v59, %v4559_v38  ;;  %v4522_v51 = vadd.f32 %v6547_v50, %v4128_v48  ;;  %v4558_v60 = vadd.f32 %v8905_v63, %v4519_v12  ;;  %v9255_v42 = vld [vmem:[#allocation10_spill] sm:$0xff]  ;;  %v9256_v6 = vld [vmem:[#allocation29_spill] sm:$0xff] }
 0x22a   : > { %v4410_v25 = vpop.f32.mrf.mxu0  ;;  %v6606_v32 = vpop.f32.mrf.mxu1  ;;  %v3741_v12 = vadd.f32 %v9256_v6, %v9255_v42 }
 0x22b   : > { %5017 = vst.msk [vmem:[%s8933_s15 + $0x40] sm:$0xff] %vm905_vm0, %v4985_v27  ;;  %v4988_v11 = vadd.f32 %v8921_v45, %v4949_v9  ;;  %v4948_v29 = vadd.f32 %v4829_v58, %v4558_v60  ;;  %v4521_v5 = vadd.f32 %v4410_v25, %v4127_v22  ;;  %v4561_v30 = vadd.f32 %v8905_v63, %v4522_v51  ;;  %v9257_v9 = vld [vmem:[#allocation26_spill] sm:$0xff]  ;;  %v9258_v60 = vld [vmem:[#allocation11_spill] sm:$0xff] }
 0x22c   : > { %v6550_v55 = vpop.f32.mrf.mxu0  ;;  %v4849_v43 = vpop.f32.mrf.mxu1  ;;  %v3742_v58 = vadd.f32 %v9253_v28, %v9252_v52 }
 0x22d   : > { %5020 = vst.msk [vmem:[%s8933_s15 + $0x58] sm:$0xff] %vm905_vm0, %v4988_v11  ;;  %v4987_v10 = vadd.f32 %v8921_v45, %v4948_v29  ;;  %v4951_v17 = vadd.f32 %v6603_v3, %v4561_v30  ;;  %v4524_v54 = vadd.f32 %v6550_v55, %v4130_v53  ;;  %v4560_v57 = vadd.f32 %v8905_v63, %v4521_v5  ;;  %v9259_v53 = vld [vmem:[#allocation31_spill] sm:$0xff]  ;;  %v9261_v55 = vld [vmem:[#allocation12_spill] sm:$0xff] }
 0x22e   : > { %v4420_v2 = vpop.f32.mrf.mxu0  ;;  %v6609_v20 = vpop.f32.mrf.mxu1  ;;  %v4133_v3 = vadd.f32 %v9254_v16, %v3739_v41  ;;  %v4136_v51 = vadd.f32 %v9257_v9, %v3742_v58  ;;  %v3744_v34 = vadd.f32 %v9259_v53, %v9258_v60  ;;  %v9266_v41 = vld [vmem:[#allocation32_spill] sm:$0xff]  ;;  %v9269_v58 = vld [vmem:[#allocation34_spill] sm:$0xff] }
 0x22f   : > { %5019 = vst.msk [vmem:[%s8933_s15 + $0x50] sm:$0xff] %vm905_vm0, %v4987_v10  ;;  %v4990_v31 = vadd.f32 %v8921_v45, %v4951_v17  ;;  %v4950_v49 = vadd.f32 %v4839_v1, %v4560_v57  ;;  %v4523_v0 = vadd.f32 %v4420_v2, %v4129_v36  ;;  %v4563_v44 = vadd.f32 %v8905_v63, %v4524_v54  ;;  %v9260_v36 = vld [vmem:[#allocation28_spill] sm:$0xff] }
 0x230   : > { %v6553_v14 = vpop.f32.mrf.mxu0  ;;  %v4859_v19 = vpop.f32.mrf.mxu1  ;;  %v4135_v23 = vadd.f32 %v9260_v36, %v3741_v12  ;;  %v4138_v2 = vadd.f32 %v9263_v35, %v3744_v34  ;;  %v9272_v12 = vld [vmem:[#allocation36_spill] sm:$0xff]  ;;  %v9275_v34 = vld [vmem:[#allocation38_spill] sm:$0xff] }
 0x231   : > { %5022 = vst.msk [vmem:[%s8933_s15 + $0x68] sm:$0xff] %vm905_vm0, %v4990_v31  ;;  %v4989_v59 = vadd.f32 %v8921_v45, %v4950_v49  ;;  %v4953_v24 = vadd.f32 %v6606_v32, %v4563_v44  ;;  %v4526_v18 = vadd.f32 %v6553_v14, %v4132_v39  ;;  %v4562_v46 = vadd.f32 %v8905_v63, %v4523_v0  ;;  %v9265_v31 = vld [vmem:[#allocation35_spill] sm:$0xff] }
 0x232   : > { %v4430_v40 = vpop.f32.mrf.mxu0  ;;  %v6612_v4 = vpop.f32.mrf.mxu1 }
 0x233   : > { %5021 = vst.msk [vmem:[%s8933_s15 + $0x60] sm:$0xff] %vm905_vm0, %v4989_v59  ;;  %v4992_v8 = vadd.f32 %v8921_v45, %v4953_v24  ;;  %v4952_v13 = vadd.f32 %v4849_v43, %v4562_v46  ;;  %v4525_v48 = vadd.f32 %v4430_v40, %v4131_v21  ;;  %v4565_v37 = vadd.f32 %v8905_v63, %v4526_v18  ;;  %v9262_v43 = vld [vmem:[#allocation33_spill] sm:$0xff] }
 0x234   : > { %v6556_v38 = vpop.f32.mrf.mxu0  ;;  %v4869_v22 = vpop.f32.mrf.mxu1  ;;  %v3743_v10 = vadd.f32 %v9262_v43, %v9261_v55  ;;  %v9268_v59 = vld [vmem:[#allocation37_spill] sm:$0xff] }
 0x235   : > { %5024 = vst.msk [vmem:[%s8933_s15 + $0x78] sm:$0xff] %vm905_vm0, %v4992_v8  ;;  %v4991_v15 = vadd.f32 %v8921_v45, %v4952_v13  ;;  %v4955_v50 = vadd.f32 %v6609_v20, %v4565_v37  ;;  %v4528_v1 = vadd.f32 %v6556_v38, %v4134_v61  ;;  %v4564_v27 = vadd.f32 %v8905_v63, %v4525_v48  ;;  %v9264_v20 = vld [vmem:[#allocation13_spill] sm:$0xff]  ;;  %v9271_v8 = vld [vmem:[#allocation39_spill] sm:$0xff] }
 0x236   : > { %v4440_v25 = vpop.f32.mrf.mxu0  ;;  %v6615_v32 = vpop.f32.mrf.mxu1  ;;  %v3746_v49 = vadd.f32 %v9265_v31, %v9264_v20  ;;  %v4137_v14 = vadd.f32 %v9266_v41, %v3743_v10  ;;  %v9278_v10 = vld [vmem:[#allocation40_spill] sm:$0xff] }
 0x237   : > { %5023 = vst.msk [vmem:[%s8933_s15 + $0x70] sm:$0xff] %vm905_vm0, %v4991_v15  ;;  %v4994_v11 = vadd.f32 %v8921_v45, %v4955_v50  ;;  %v4954_v29 = vadd.f32 %v4859_v19, %v4564_v27  ;;  %v4527_v5 = vadd.f32 %v4440_v25, %v4133_v3  ;;  %v4567_v30 = vadd.f32 %v8905_v63, %v4528_v1  ;;  %v9267_v19 = vld [vmem:[#allocation14_spill] sm:$0xff]  ;;  %v9274_v15 = vld [vmem:[#allocation41_spill] sm:$0xff] }
 0x238   : > { %v6559_v17 = vpop.f32.mrf.mxu0  ;;  %v4879_v54 = vpop.f32.mrf.mxu1  ;;  %v3745_v24 = vadd.f32 %v9268_v59, %v9267_v19  ;;  %v4140_v40 = vadd.f32 %v9269_v58, %v3746_v49  ;;  %v9281_v49 = vld [vmem:[#allocation42_spill] sm:$0xff] }
 0x239   : > { %5026 = vst.msk [vmem:[%s8933_s15 + $0x88] sm:$0xff] %vm905_vm0, %v4994_v11  ;;  %v4993_v57 = vadd.f32 %v8921_v45, %v4954_v29  ;;  %v4957_v39 = vadd.f32 %v6612_v4, %v4567_v30  ;;  %v4530_v62 = vadd.f32 %v6559_v17, %v4136_v51  ;;  %v4566_v26 = vadd.f32 %v8905_v63, %v4527_v5  ;;  %v9270_v4 = vld [vmem:[#allocation15_spill] sm:$0xff] }
 0x23a   : > { %v4450_v0 = vpop.f32.mrf.mxu0  ;;  %v6618_v44 = vpop.f32.mrf.mxu1  ;;  %v3748_v13 = vadd.f32 %v9271_v8, %v9270_v4  ;;  %v4139_v38 = vadd.f32 %v9272_v12, %v3745_v24  ;;  %v9277_v11 = vld [vmem:[#allocation43_spill] sm:$0xff]  ;;  %v9284_v24 = vld [vmem:[#allocation44_spill] sm:$0xff]  ;;  %v9287_v8 = vld [vmem:[#allocation46_spill] sm:$0xff] }
 0x23b   : > { %5025 = vst.msk [vmem:[%s8933_s15 + $0x80] sm:$0xff] %vm905_vm0, %v4993_v57  ;;  %v4996_v7 = vadd.f32 %v8921_v45, %v4957_v39  ;;  %v4956_v21 = vadd.f32 %v4869_v22, %v4566_v26  ;;  %v4529_v33 = vadd.f32 %v4450_v0, %v4135_v23  ;;  %v4569_v56 = vadd.f32 %v8905_v63, %v4530_v62  ;;  %v9273_v22 = vld [vmem:[#allocation16_spill] sm:$0xff]  ;;  %v9280_v57 = vld [vmem:[#allocation45_spill] sm:$0xff] }
 0x23c   : > { %v6562_v18 = vpop.f32.mrf.mxu0  ;;  %v4889_v46 = vpop.f32.mrf.mxu1  ;;  %v3747_v50 = vadd.f32 %v9274_v15, %v9273_v22  ;;  %v4142_v25 = vadd.f32 %v9275_v34, %v3748_v13  ;;  %v9288_v12 = vld [vmem:[#allocation48_spill] sm:$0xff] }
 0x23d   : > { %5028 = vst.msk [vmem:[%s8933_s15 + $0x98] sm:$0xff] %vm905_vm0, %v4996_v7  ;;  %v4995_v47 = vadd.f32 %v8921_v45, %v4956_v21  ;;  %v4959_v61 = vadd.f32 %v6615_v32, %v4569_v56  ;;  %v4532_v52 = vadd.f32 %v6562_v18, %v4138_v2  ;;  %v4568_v28 = vadd.f32 %v8905_v63, %v4529_v33  ;;  %v9276_v32 = vld [vmem:[#allocation17_spill] sm:$0xff]  ;;  %v9283_v7 = vld [vmem:[#allocation47_spill] sm:$0xff] }
 0x23e   : > { %v4460_v48 = vpop.f32.mrf.mxu0  ;;  %v6621_v37 = vpop.f32.mrf.mxu1  ;;  %v3750_v29 = vadd.f32 %v9277_v11, %v9276_v32  ;;  %v4141_v17 = vadd.f32 %v9278_v10, %v3747_v50 }
 0x23f   : > { %5027 = vst.msk [vmem:[%s8933_s15 + $0x90] sm:$0xff] %vm905_vm0, %v4995_v47  ;;  %v4998_v16 = vadd.f32 %v8921_v45, %v4959_v61  ;;  %v4958_v3 = vadd.f32 %v4879_v54, %v4568_v28  ;;  %v4531_v42 = vadd.f32 %v4460_v48, %v4137_v14  ;;  %v4571_v6 = vadd.f32 %v8905_v63, %v4532_v52  ;;  %v9279_v54 = vld [vmem:[#allocation18_spill] sm:$0xff]  ;;  %v9286_v47 = vld [vmem:[#allocation49_spill] sm:$0xff] }
 0x240   : > { %v6565_v1 = vpop.f32.mrf.mxu0  ;;  %v4899_v27 = vpop.f32.mrf.mxu1  ;;  %v3749_v39 = vadd.f32 %v9280_v57, %v9279_v54  ;;  %v4144_v0 = vadd.f32 %v9281_v49, %v3750_v29 }
 0x241   : > { %5030 = vst.msk [vmem:[%s8933_s15 + $0xa8] sm:$0xff] %vm905_vm0, %v4998_v16  ;;  %v4997_v9 = vadd.f32 %v8921_v45, %v4958_v3  ;;  %v4961_v51 = vadd.f32 %v6618_v44, %v4571_v6  ;;  %v4534_v60 = vadd.f32 %v6565_v1, %v4140_v40  ;;  %v4570_v53 = vadd.f32 %v8905_v63, %v4531_v42  ;;  %v9282_v44 = vld [vmem:[#allocation19_spill] sm:$0xff] }
 0x242   : > { %v4470_v5 = vpop.f32.mrf.mxu0  ;;  %v6624_v30 = vpop.f32.mrf.mxu1  ;;  %v3752_v21 = vadd.f32 %v9283_v7, %v9282_v44  ;;  %v4143_v18 = vadd.f32 %v9284_v24, %v3749_v39 }
 0x243   : > { %5029 = vst.msk [vmem:[%s8933_s15 + $0xa0] sm:$0xff] %vm905_vm0, %v4997_v9  ;;  %v5000_v36 = vadd.f32 %v8921_v45, %v4961_v51  ;;  %v4960_v23 = vadd.f32 %v4889_v46, %v4570_v53  ;;  %v4533_v55 = vadd.f32 %v4470_v5, %v4139_v38  ;;  %v4573_v43 = vadd.f32 %v8905_v63, %v4534_v60  ;;  %v9285_v46 = vld [vmem:[#allocation20_spill] sm:$0xff] }
 0x244   : > { %v6568_v62 = vpop.f32.mrf.mxu0  ;;  %v4909_v26 = vpop.f32.mrf.mxu1  ;;  %v3751_v61 = vadd.f32 %v9286_v47, %v9285_v46  ;;  %v4146_v13 = vadd.f32 %v9287_v8, %v3752_v21 }
 0x245   : > { %5032 = vst.msk [vmem:[%s8933_s15 + $0xb8] sm:$0xff] %vm905_vm0, %v5000_v36  ;;  %v4999_v35 = vadd.f32 %v8921_v45, %v4960_v23  ;;  %v4963_v2 = vadd.f32 %v6621_v37, %v4573_v43  ;;  %v4536_v20 = vadd.f32 %v6568_v62, %v4142_v25  ;;  %v4572_v31 = vadd.f32 %v8905_v63, %v4533_v55 }
 0x246   : > { %v4480_v33 = vpop.f32.mrf.mxu0  ;;  %v6627_v56 = vpop.f32.mrf.mxu1  ;;  %v4145_v38 = vadd.f32 %v9288_v12, %v3751_v61 }
 0x247   : > { %5031 = vst.msk [vmem:[%s8933_s15 + $0xb0] sm:$0xff] %vm905_vm0, %v4999_v35  ;;  %v5002_v41 = vadd.f32 %v8921_v45, %v4963_v2  ;;  %v4962_v14 = vadd.f32 %v4899_v27, %v4572_v31  ;;  %v4535_v19 = vadd.f32 %v4480_v33, %v4141_v17  ;;  %v4575_v59 = vadd.f32 %v8905_v63, %v4536_v20 }
 0x248   : > { %v6571_v52 = vpop.f32.mrf.mxu0  ;;  %v4919_v37 = vpop.f32.mrf.mxu1 }
 0x249   : > { %5034 = vst.msk [vmem:[%s8933_s15 + $0xc8] sm:$0xff] %vm905_vm0, %v5002_v41  ;;  %v5001_v28 = vadd.f32 %v8921_v45, %v4962_v14  ;;  %v4965_v58 = vadd.f32 %v6624_v30, %v4575_v59  ;;  %v4538_v40 = vadd.f32 %v6571_v52, %v4144_v0  ;;  %v4574_v4 = vadd.f32 %v8905_v63, %v4535_v19 }
 0x24a   : > { %v4490_v48 = vpop.f32.mrf.mxu0  ;;  %v6630_v51 = vpop.f32.mrf.mxu1 }
 0x24b   : > { %5033 = vst.msk [vmem:[%s8933_s15 + $0xc0] sm:$0xff] %vm905_vm0, %v5001_v28  ;;  %v5004_v16 = vadd.f32 %v8921_v45, %v4965_v58  ;;  %v4964_v3 = vadd.f32 %v4909_v26, %v4574_v4  ;;  %v4537_v42 = vadd.f32 %v4490_v48, %v4143_v18  ;;  %v4577_v6 = vadd.f32 %v8905_v63, %v4538_v40 }
 0x24c   : > { %v6574_v22 = vpop.f32.mrf.mxu0  ;;  %v4929_v5 = vpop.f32.mrf.mxu1 }
 0x24d   : > { %5036 = vst.msk [vmem:[%s8933_s15 + $0xd8] sm:$0xff] %vm905_vm0, %v5004_v16  ;;  %v5003_v15 = vadd.f32 %v8921_v45, %v4964_v3  ;;  %v4967_v50 = vadd.f32 %v6627_v56, %v4577_v6  ;;  %v4540_v1 = vadd.f32 %v6574_v22, %v4146_v13  ;;  %v4576_v27 = vadd.f32 %v8905_v63, %v4537_v42 }
 0x24e   : > { %v4500_v9 = vpop.f32.mrf.mxu0 }
 0x24f   : > { %5035 = vst.msk [vmem:[%s8933_s15 + $0xd0] sm:$0xff] %vm905_vm0, %v5003_v15  ;;  %v5006_v60 = vadd.f32 %v8921_v45, %v4967_v50  ;;  %v4966_v53 = vadd.f32 %v4919_v37, %v4576_v27  ;;  %v4539_v34 = vadd.f32 %v4500_v9, %v4145_v38  ;;  %v4579_v25 = vadd.f32 %v8905_v63, %v4540_v1 }
 0x251   : > { %5038 = vst.msk [vmem:[%s8933_s15 + $0xe8] sm:$0xff] %vm905_vm0, %v5006_v60  ;;  %v5005_v32 = vadd.f32 %v8921_v45, %v4966_v53  ;;  %v4969_v11 = vadd.f32 %v6630_v51, %v4579_v25  ;;  %v4578_v29 = vadd.f32 %v8905_v63, %v4539_v34 }
 0x253   : > { %5037 = vst.msk [vmem:[%s8933_s15 + $0xe0] sm:$0xff] %vm905_vm0, %v5005_v32  ;;  %v5008_v30 = vadd.f32 %v8921_v45, %v4969_v11  ;;  %v4968_v36 = vadd.f32 %v4929_v5, %v4578_v29 }
 0x255   : > { %5040 = vst.msk [vmem:[%s8933_s15 + $0xf8] sm:$0xff] %vm905_vm0, %v5008_v30  ;;  %v5007_v63 = vadd.f32 %v8921_v45, %v4968_v36 }
 0x257   : > { %5039 = vst.msk [vmem:[%s8933_s15 + $0xf0] sm:$0xff] %vm905_vm0, %v5007_v63 }
 0x258   : > { %6815 = shalt.err (!%p6812_p5)
}
 0x259   : > { %s6816_s24 = scalar_lea.hbm %s9133_s20, 4096  ;;  %s6820_s29 = scalar_lea.hbm %s9198_s9, 8192 }
 0x25a   : > { %p6817_p6 = scmp.ne.s32.totalorder %s9133_s20, %s6816_s24  ;;  %p6821_p10 = scmp.lt.s32.totalorder %s9133_s20, %s9198_s9 }
 0x25b   : > { %p6822_p11 = scmp.lt.s32.totalorder %s6820_s29, %s6816_s24 }
 0x25c   : > { %p6818_p7 = pnand %p6817_p6, %p6974_p4 }
 0x25d   : > { %p6823_p12 = por %p6822_p11, %p6821_p10 }
 0x25e   : > { %p6819_p9 = pneg %p6818_p7 }
 0x260   : > { %p6824_p13 = pnand %p6823_p12, %p6819_p9 }
 0x262   : > { %6827 = shalt.err (!%p6824_p13)
}
 0x263   : > { %s6882_s23 = smov 128   ;;  %s6883_s17 = smov 8  }
 0x264   : > { %6633 = dma.vmem_to_hbm [thread:$0]  (%p6974_p4), %s9135_s16, 4096, %s9133_s20, %s9144_s12, %s6882_s23, %s6882_s23, %s6883_s17  }
 0x265 PF: > { %p6640_p0 = scmp.ge.s32.totalorder %s6878_s14, 2  ;;  %s5072_s25 = sand.u32 1, %s6858_s30  }
 0x266   : > { %s5073_s28 = scalar_lea.sflag [#allocation4], %s5072_s25 }
 0x267   : > { %p6636_p1 = pnand %p6640_p0, %p6981_p8 }
 0x269   : > { %p6637_p2 = pneg %p6636_p1 }
 0x26b   : > { %6853 = dma.done.wait (%p6637_p2), %s5073_s28, 4096  }
 0x26c   : > { %6855 = vsyncadd (%p6637_p2), %s5073_s28, 4294963200  ;;  %s22_s14 = sadd.s32 1, %s6878_s14   ;;  %s9289_s19 = sld [smem:[#allocation6_spill]] }
 0x26d   : > { %p19_p3 = scmp.ge.s32.totalorder %s22_s14, 4   ;;  %s9290_s30 = smov %s6862_s10 }
 0x26e   : > { %s9291_s10 = smov %s6866_s11  ;;  %s9292_s11 = smov %s6987_s22 }
 0x26f   : > { %s9293_s12 = smov %s6874_s13  ;;  %21 = sbr.rel (!%p19_p3) target bundleno = 4 (0x4), region = 119 }
 0x272   : > { %s9294_s13 = smov %s9289_s19 }
 0x274   :  { %5078 = vsyncpa [#allocation4], 1 }
 0x275   :  { %5080 = vsyncpa [#allocation4 + $0x1], 1 }

</bundles_post_ra>
